<compile_context>
chip_gen: v6e
topology: v6e:2x2x1
jax: 0.10.0
libtpu: 0.0.40
codegen_flags: <defaults>
</compile_context>

<pallas_src>
import jax
import jax.numpy as jnp
import numpy as np
from jax.experimental import pallas as pl
from jax.experimental.pallas import tpu as pltpu


# ----------------------------------------------------------------------------
# In-kernel helpers
# ----------------------------------------------------------------------------
def _shift(y, o):
    """out[:, i] = y[:, i + o] along lanes, zero-filled at the edge.

    Only used for the conv taps, where the zero boundary is semantically
    required (padding of the 1-D convolution)."""
    r, w = y.shape
    z = jnp.zeros((r, abs(o)), y.dtype)
    if o > 0:
        return jnp.concatenate([y[:, o:], z], axis=1)
    return jnp.concatenate([z, y[:, :w + o]], axis=1)


def _win15_max(y):
    """Sliding max over the centered 15-wide window [j-7, j+7] along lanes.

    Pure XLU rotations (pltpu.roll) + VPU max.  The tree is symmetric in
    +/- shifts, so the result does not depend on the hardware rotate
    direction convention.  Wrapped-around lanes only ever reach columns that
    the (hoisted) selection matrix never picks, so the wrap cannot affect the
    output (the selected centers are 15k+7, whose dependency cone stays
    inside [15k, 15k+14] which is always in-bounds)."""
    n = y.shape[-1]

    def sym(v, s):
        return jnp.maximum(pltpu.roll(v, s, axis=1),
                           pltpu.roll(v, n - s, axis=1))

    a = jnp.maximum(y, sym(y, 1))       # radius 1  (window 3)
    b = jnp.maximum(a, sym(a, 3))       # radius 4  (window 9)
    return jnp.maximum(b, sym(b, 3))    # radius 7  (window 15)


# ----------------------------------------------------------------------------
# Fused Pallas kernel: convs -> pool -> cl -> pool -> fc head
# ----------------------------------------------------------------------------
def _mscnn_kernel(x_ref, wk_ref, bconv_ref, sel1_ref, arow_ref, brow_ref,
                  wclk_ref, bcl_ref, w1_ref, fb1_ref, w2_ref, fb2_ref,
                  w3_ref, fb3_ref, out_ref):
    x = x_ref[...]                                        # (R, Wpad)

    # 1) 5 zero-padded conv taps stacked on sublanes, rows ordered (tap, row).
    xs = jnp.concatenate(
        [_shift(x, -2), _shift(x, -1), x, _shift(x, 1), _shift(x, 2)], axis=0)

    # 2) conv1/conv2/conv3 (+ raw-x passthrough for the conv4 branch) for every
    #    row in one MXU pass; rows of `big` are (channel, row)-major.
    big = (jnp.dot(wk_ref[...], xs, preferred_element_type=jnp.float32)
           + bconv_ref[...])                              # (16*R, Wpad)

    # 3) first MaxPool(1,15): centered sliding max (XLU rolls) + hoisted 0/1
    #    column-selection matmul.  (ReLU and max-pool commute, so ReLU is
    #    deferred to the scale/bias step below.)
    pooled = jnp.dot(_win15_max(big), sel1_ref[...],
                     preferred_element_type=jnp.float32)  # (16*R, P1)

    # 4) deferred ReLU of conv1-3 plus conv4's pool -> 1x1 conv -> ReLU, fused
    #    as one per-row scale/bias/ReLU (rows are still (channel, row)-major).
    pooled = jnp.maximum(pooled * arow_ref[...] + brow_ref[...], 0.0)

    # 5) cl: 1x1 conv 16->32 as a row-blocked matmul (stays in the same
    #    (channel, row)-major layout, so no feature-matrix relayout is needed),
    #    then ReLU.
    cl = jnp.maximum(
        jnp.dot(wclk_ref[...], pooled, preferred_element_type=jnp.float32)
        + bcl_ref[...], 0.0)                              # (32*R, P1)

    # 6) second MaxPool(1,15): only two output positions per row, so just two
    #    masked lane-max reductions, stacked on sublanes.
    P1 = sel1_ref.shape[1]
    feat = jnp.concatenate(
        [jnp.max(cl[:, 15 * j:15 * (j + 1)], axis=1, keepdims=True)
         for j in range(P1 // 15)], axis=0)               # (P2*32*R, 1)

    # 7) classifier head.  The fc weights were re-laid-out (once, outside jit)
    #    to act directly on this (p2, cl-channel, row)-ordered column vector,
    #    blocked per trial, so no in-kernel transpose/reshape is required.
    h = jnp.maximum(
        jnp.dot(w1_ref[...], feat, preferred_element_type=jnp.float32)
        + fb1_ref[...], 0.0)
    # TODO(synk): nn.Dropout is identity in eval mode; no stochastic masking applied.
    h = jnp.maximum(
        jnp.dot(w2_ref[...], h, preferred_element_type=jnp.float32)
        + fb2_ref[...], 0.0)
    out_ref[...] = (jnp.dot(w3_ref[...], h, preferred_element_type=jnp.float32)
                    + fb3_ref[...])                       # (B*num_classes, 1)


# ----------------------------------------------------------------------------
# One-time parameter preparation (pure function of the weights; NOT per-call)
# ----------------------------------------------------------------------------
def prepare_params(p, *, B, F_, H, W):
    f32 = np.float32
    NCH, NCL = 16, 32
    R = B * F_ * H
    assert W % 225 == 0, "width must be divisible by 225 (two floor-mode pools)"
    P1, P2 = W // 15, W // 225
    Wpad = -(-W // 128) * 128
    hidden = int(np.shape(p['fw1'])[1])
    last = int(np.shape(p['fw2'])[1])
    ncls = int(np.shape(p['fw3'])[1])

    w1 = np.asarray(p['w1'], f32); b1 = np.asarray(p['b1'], f32)
    w2 = np.asarray(p['w2'], f32); b2 = np.asarray(p['b2'], f32)
    w3 = np.asarray(p['w3'], f32); b3 = np.asarray(p['b3'], f32)
    w4 = np.asarray(p['w4'], f32); b4 = np.asarray(p['b4'], f32)
    wcl = np.asarray(p['wcl'], f32); bcl = np.asarray(p['bcl'], f32)
    fw1 = np.asarray(p['fw1'], f32); fb1 = np.asarray(p['fb1'], f32).reshape(-1)
    fw2 = np.asarray(p['fw2'], f32); fb2 = np.asarray(p['fb2'], f32).reshape(-1)
    fw3 = np.asarray(p['fw3'], f32); fb3 = np.asarray(p['fb3'], f32).reshape(-1)

    # conv1 (k=5,p=2) / conv2 (k=3,p=1) / conv3 (1x1) / raw passthrough as taps.
    wall = np.zeros((NCH, 5), f32)
    wall[0:4, :] = w1
    wall[4:8, 1:4] = w2
    wall[8:12, 2] = w3
    wall[12:16, 2] = 1.0
    wk = np.kron(wall, np.eye(R, dtype=f32))                         # (16R, 5R)
    bconv = np.repeat(np.concatenate([b1, b2, b3, np.zeros(4, f32)]),
                      R).reshape(NCH * R, 1)
    # deferred ReLU (conv1-3) + conv4's 1x1 conv after its pool, per row.
    arow = np.repeat(np.concatenate([np.ones(12, f32), w4]), R).reshape(NCH * R, 1)
    brow = np.repeat(np.concatenate([np.zeros(12, f32), b4]), R).reshape(NCH * R, 1)

    # stride-15 selection (window centers 15k+7), hoisted out of the kernel.
    sel1 = np.zeros((Wpad, P1), f32)
    sel1[np.arange(P1) * 15 + 7, np.arange(P1)] = 1.0

    # cl: 1x1 conv 16->32 acting on (channel, row)-major rows.
    wclk = np.kron(wcl, np.eye(R, dtype=f32))                        # (32R, 16R)
    bclrow = np.repeat(bcl, R).reshape(NCL * R, 1)

    # fc1 re-laid-out to act on the kernel's (p2, cl-channel, row) column
    # vector, blocked per trial b (the row index r encodes the trial).
    fw1_5d = fw1.reshape(F_, NCL, H, P2, hidden)                     # [f,d,h,p2,k]
    w1cat = np.zeros((B * hidden, P2 * NCL * R), f32)
    for b in range(B):
        for f in range(F_):
            for h in range(H):
                r = (b * F_ + f) * H + h
                for p2 in range(P2):
                    cols = p2 * NCL * R + np.arange(NCL) * R + r
                    w1cat[b * hidden:(b + 1) * hidden, cols] = fw1_5d[f, :, h, p2, :].T
    fb1r = np.tile(fb1, B).reshape(B * hidden, 1)
    w2blk = np.kron(np.eye(B, dtype=f32), fw2.T)                     # (B*last, B*hidden)
    fb2r = np.tile(fb2, B).reshape(B * last, 1)
    w3blk = np.kron(np.eye(B, dtype=f32), fw3.T)                     # (B*ncls, B*last)
    fb3r = np.tile(fb3, B).reshape(B * ncls, 1)

    d = dict(wk=wk, bconv=bconv, sel1=sel1, arow=arow, brow=brow,
             wclk=wclk, bclrow=bclrow, w1=w1cat, fb1=fb1r,
             w2=w2blk, fb2=fb2r, w3=w3blk, fb3=fb3r)
    return {k: jnp.asarray(v) for k, v in d.items()}


# ----------------------------------------------------------------------------
# Per-call wrapper (only layout plumbing of the activations + the pallas_call)
# ----------------------------------------------------------------------------
@jax.jit
def mscnn_forward(img, c):
    """img: (trials, freband, 1, eeg_channels, width) float32."""
    B, F_, _, H, W = img.shape
    R = B * F_ * H
    Wpad = c['sel1'].shape[0]
    ncls = c['w3'].shape[0] // B
    x = jnp.pad(img.reshape(R, W).astype(jnp.float32), ((0, 0), (0, Wpad - W)))

    vmem = pl.BlockSpec(memory_space=pltpu.MemorySpace.VMEM)
    out = pl.pallas_call(
        _mscnn_kernel,
        out_shape=jax.ShapeDtypeStruct((B * ncls, 1), jnp.float32),
        in_specs=[vmem] * 14,
        out_specs=vmem,
    )(x, c['wk'], c['bconv'], c['sel1'], c['arow'], c['brow'],
      c['wclk'], c['bclrow'], c['w1'], c['fb1'], c['w2'], c['fb2'],
      c['w3'], c['fb3'])
    return out.reshape(B, ncls)


# ----------------------------------------------------------------------------
# Pure-JAX reference (same math, NCHW semantics of the PyTorch module)
# ----------------------------------------------------------------------------
def ref_forward(img, p):
    B, F_, _, H, W = img.shape

    def pool(y):
        L = y.shape[-1]
        return jnp.max(y.reshape(y.shape[:-1] + (L // 15, 15)), axis=-1)

    feats_all = []
    for f in range(F_):
        xi = img[:, f, 0]                                    # (B,H,W)
        xp = jnp.pad(xi, ((0, 0), (0, 0), (2, 2)))
        taps1 = jnp.stack([xp[..., j:j + W] for j in range(5)], axis=-1)
        y1 = jnp.einsum('bhwj,cj->bchw', taps1, p['w1']) + p['b1'][None, :, None, None]
        f1 = pool(jax.nn.relu(y1))
        taps2 = jnp.stack([xp[..., 1 + j:1 + j + W] for j in range(3)], axis=-1)
        y2 = jnp.einsum('bhwj,cj->bchw', taps2, p['w2']) + p['b2'][None, :, None, None]
        f2 = pool(jax.nn.relu(y2))
        y3 = p['w3'][None, :, None, None] * xi[:, None] + p['b3'][None, :, None, None]
        f3 = pool(jax.nn.relu(y3))
        xpool = pool(xi)
        y4 = p['w4'][None, :, None, None] * xpool[:, None] + p['b4'][None, :, None, None]
        f4 = jax.nn.relu(y4)
        feat = jnp.concatenate([f1, f2, f3, f4], axis=1)     # (B,16,H,W//15)
        z = jnp.einsum('bchp,dc->bdhp', feat, p['wcl']) + p['bcl'][None, :, None, None]
        feats_all.append(pool(jax.nn.relu(z)))               # (B,32,H,W//225)
    fc_in = jnp.concatenate(feats_all, axis=1).reshape(B, -1)
    h = jax.nn.relu(fc_in @ p['fw1'] + p['fb1'])
    h = jax.nn.relu(h @ p['fw2'] + p['fb2'])
    return h @ p['fw3'] + p['fb3']


# ----------------------------------------------------------------------------
if __name__ == "__main__":
    # config: len_freband=2, channels(EEG)=4, width=450 (->30 ->2 after pools),
    # hidden=32, last_hidden=16, num_classes=3
    B, F_, H, W = 2, 2, 4, 450
    hidden, last_hidden, num_classes = 32, 16, 3
    D = F_ * 32 * H * ((W // 15) // 15)   # == len_freband * 32 * channels * 2

    key = jax.random.PRNGKey(0)
    ks = jax.random.split(key, 20)

    def rnd(k, shape, scale):
        return (scale * jax.random.normal(k, shape)).astype(jnp.float32)

    params = dict(
        w1=rnd(ks[0], (4, 5), 0.3),  b1=rnd(ks[1], (4,), 0.1),
        w2=rnd(ks[2], (4, 3), 0.3),  b2=rnd(ks[3], (4,), 0.1),
        w3=rnd(ks[4], (4,), 0.3),    b3=rnd(ks[5], (4,), 0.1),
        w4=rnd(ks[6], (4,), 0.3),    b4=rnd(ks[7], (4,), 0.1),
        wcl=rnd(ks[8], (32, 16), 0.15), bcl=rnd(ks[9], (32,), 0.1),
        fw1=rnd(ks[10], (D, hidden), 0.05),          fb1=rnd(ks[11], (1, hidden), 0.05),
        fw2=rnd(ks[12], (hidden, last_hidden), 0.2), fb2=rnd(ks[13], (1, last_hidden), 0.05),
        fw3=rnd(ks[14], (last_hidden, num_classes), 0.3), fb3=rnd(ks[15], (1, num_classes), 0.05),
    )

    img = jax.random.normal(ks[16], (B, F_, 1, H, W), dtype=jnp.float32)

    consts = prepare_params(params, B=B, F_=F_, H=H, W=W)   # once, outside jit

    out = jax.block_until_ready(mscnn_forward(img, consts))
    ref = jax.block_until_ready(ref_forward(img, params))
    np.testing.assert_allclose(np.asarray(out), np.asarray(ref), rtol=1e-3, atol=1e-3)

    print("KERNEL_OK")
</pallas_src>

<mosaic_0001>
module attributes {stable_mosaic.version = 11 : i64} {
  func.func @_mscnn_kernel(%arg0: memref<16x512xf32, #tpu.memory_space<vmem>>, %arg1: memref<256x80xf32, #tpu.memory_space<vmem>>, %arg2: memref<256x1xf32, #tpu.memory_space<vmem>>, %arg3: memref<512x30xf32, #tpu.memory_space<vmem>>, %arg4: memref<256x1xf32, #tpu.memory_space<vmem>>, %arg5: memref<256x1xf32, #tpu.memory_space<vmem>>, %arg6: memref<512x256xf32, #tpu.memory_space<vmem>>, %arg7: memref<512x1xf32, #tpu.memory_space<vmem>>, %arg8: memref<64x1024xf32, #tpu.memory_space<vmem>>, %arg9: memref<64x1xf32, #tpu.memory_space<vmem>>, %arg10: memref<32x64xf32, #tpu.memory_space<vmem>>, %arg11: memref<32x1xf32, #tpu.memory_space<vmem>>, %arg12: memref<6x32xf32, #tpu.memory_space<vmem>>, %arg13: memref<6x1xf32, #tpu.memory_space<vmem>>, %arg14: memref<6x1xf32, #tpu.memory_space<vmem>>) attributes {dimension_semantics = [], scalar_prefetch = 0 : i64, scratch_operands = 0 : i64, tpu.core_type = #tpu.core_type<tc>} {
    %c0 = arith.constant 0 : index
    %c0_0 = arith.constant 0 : index
    %0 = vector.load %arg0[%c0, %c0_0] : memref<16x512xf32, #tpu.memory_space<vmem>>, vector<16x512xf32>
    %cst = arith.constant 0.000000e+00 : f32
    %1 = vector.broadcast %cst : f32 to vector<16x2xf32>
    %2 = vector.extract_strided_slice %0 {offsets = [0, 0], sizes = [16, 510], strides = [1, 1]} : vector<16x512xf32> to vector<16x510xf32>
    %3 = tpu.concatenate %1, %2 in 1 : vector<16x2xf32>, vector<16x510xf32> -> vector<16x512xf32>
    %cst_1 = arith.constant 0.000000e+00 : f32
    %4 = vector.broadcast %cst_1 : f32 to vector<16x1xf32>
    %5 = vector.extract_strided_slice %0 {offsets = [0, 0], sizes = [16, 511], strides = [1, 1]} : vector<16x512xf32> to vector<16x511xf32>
    %6 = tpu.concatenate %4, %5 in 1 : vector<16x1xf32>, vector<16x511xf32> -> vector<16x512xf32>
    %cst_2 = arith.constant 0.000000e+00 : f32
    %7 = vector.broadcast %cst_2 : f32 to vector<16x1xf32>
    %8 = vector.extract_strided_slice %0 {offsets = [0, 1], sizes = [16, 511], strides = [1, 1]} : vector<16x512xf32> to vector<16x511xf32>
    %9 = tpu.concatenate %8, %7 in 1 : vector<16x511xf32>, vector<16x1xf32> -> vector<16x512xf32>
    %cst_3 = arith.constant 0.000000e+00 : f32
    %10 = vector.broadcast %cst_3 : f32 to vector<16x2xf32>
    %11 = vector.extract_strided_slice %0 {offsets = [0, 2], sizes = [16, 510], strides = [1, 1]} : vector<16x512xf32> to vector<16x510xf32>
    %12 = tpu.concatenate %11, %10 in 1 : vector<16x510xf32>, vector<16x2xf32> -> vector<16x512xf32>
    %13 = tpu.concatenate %3, %6, %0, %9, %12 in 0 : vector<16x512xf32>, vector<16x512xf32>, vector<16x512xf32>, vector<16x512xf32>, vector<16x512xf32> -> vector<80x512xf32>
    %c0_4 = arith.constant 0 : index
    %c0_5 = arith.constant 0 : index
    %14 = vector.load %arg1[%c0_4, %c0_5] : memref<256x80xf32, #tpu.memory_space<vmem>>, vector<256x80xf32>
    %cst_6 = arith.constant dense<0.000000e+00> : vector<256x512xf32>
    %15 = tpu.matmul %14, %13, %cst_6 {dimension_numbers = #tpu.dot_dimension_numbers<[1], [0], [0], [1], [0, 0, 1, 1], [], []>} : vector<256x80xf32>, vector<80x512xf32>, vector<256x512xf32> -> vector<256x512xf32>
    %c0_7 = arith.constant 0 : index
    %c0_8 = arith.constant 0 : index
    %16 = vector.load %arg2[%c0_7, %c0_8] : memref<256x1xf32, #tpu.memory_space<vmem>>, vector<256x1xf32>
    %17 = vector.broadcast %16 : vector<256x1xf32> to vector<256x512xf32>
    %18 = arith.addf %15, %17 : vector<256x512xf32>
    %c1_i32 = arith.constant 1 : i32
    %19 = tpu.dynamic_rotate %18 by %c1_i32 dim 1 : vector<256x512xf32>, i32 -> vector<256x512xf32>
    %c511_i32 = arith.constant 511 : i32
    %20 = tpu.dynamic_rotate %18 by %c511_i32 dim 1 : vector<256x512xf32>, i32 -> vector<256x512xf32>
    %21 = arith.maximumf %19, %20 : vector<256x512xf32>
    %22 = arith.maximumf %18, %21 : vector<256x512xf32>
    %c3_i32 = arith.constant 3 : i32
    %23 = tpu.dynamic_rotate %22 by %c3_i32 dim 1 : vector<256x512xf32>, i32 -> vector<256x512xf32>
    %c509_i32 = arith.constant 509 : i32
    %24 = tpu.dynamic_rotate %22 by %c509_i32 dim 1 : vector<256x512xf32>, i32 -> vector<256x512xf32>
    %25 = arith.maximumf %23, %24 : vector<256x512xf32>
    %26 = arith.maximumf %22, %25 : vector<256x512xf32>
    %c3_i32_9 = arith.constant 3 : i32
    %27 = tpu.dynamic_rotate %26 by %c3_i32_9 dim 1 : vector<256x512xf32>, i32 -> vector<256x512xf32>
    %c509_i32_10 = arith.constant 509 : i32
    %28 = tpu.dynamic_rotate %26 by %c509_i32_10 dim 1 : vector<256x512xf32>, i32 -> vector<256x512xf32>
    %29 = arith.maximumf %27, %28 : vector<256x512xf32>
    %30 = arith.maximumf %26, %29 : vector<256x512xf32>
    %c0_11 = arith.constant 0 : index
    %c0_12 = arith.constant 0 : index
    %31 = vector.load %arg3[%c0_11, %c0_12] : memref<512x30xf32, #tpu.memory_space<vmem>>, vector<512x30xf32>
    %cst_13 = arith.constant dense<0.000000e+00> : vector<256x30xf32>
    %32 = tpu.matmul %30, %31, %cst_13 {dimension_numbers = #tpu.dot_dimension_numbers<[1], [0], [0], [1], [0, 0, 1, 1], [], []>} : vector<256x512xf32>, vector<512x30xf32>, vector<256x30xf32> -> vector<256x30xf32>
    %c0_14 = arith.constant 0 : index
    %c0_15 = arith.constant 0 : index
    %33 = vector.load %arg4[%c0_14, %c0_15] : memref<256x1xf32, #tpu.memory_space<vmem>>, vector<256x1xf32>
    %34 = vector.broadcast %33 : vector<256x1xf32> to vector<256x30xf32>
    %35 = arith.mulf %32, %34 : vector<256x30xf32>
    %c0_16 = arith.constant 0 : index
    %c0_17 = arith.constant 0 : index
    %36 = vector.load %arg5[%c0_16, %c0_17] : memref<256x1xf32, #tpu.memory_space<vmem>>, vector<256x1xf32>
    %37 = vector.broadcast %36 : vector<256x1xf32> to vector<256x30xf32>
    %38 = arith.addf %35, %37 : vector<256x30xf32>
    %cst_18 = arith.constant 0.000000e+00 : f32
    %39 = vector.broadcast %cst_18 : f32 to vector<256x30xf32>
    %40 = arith.maximumf %38, %39 : vector<256x30xf32>
    %c0_19 = arith.constant 0 : index
    %c0_20 = arith.constant 0 : index
    %41 = vector.load %arg6[%c0_19, %c0_20] : memref<512x256xf32, #tpu.memory_space<vmem>>, vector<512x256xf32>
    %cst_21 = arith.constant dense<0.000000e+00> : vector<512x30xf32>
    %42 = tpu.matmul %41, %40, %cst_21 {dimension_numbers = #tpu.dot_dimension_numbers<[1], [0], [0], [1], [0, 0, 1, 1], [], []>} : vector<512x256xf32>, vector<256x30xf32>, vector<512x30xf32> -> vector<512x30xf32>
    %c0_22 = arith.constant 0 : index
    %c0_23 = arith.constant 0 : index
    %43 = vector.load %arg7[%c0_22, %c0_23] : memref<512x1xf32, #tpu.memory_space<vmem>>, vector<512x1xf32>
    %44 = vector.broadcast %43 : vector<512x1xf32> to vector<512x30xf32>
    %45 = arith.addf %42, %44 : vector<512x30xf32>
    %cst_24 = arith.constant 0.000000e+00 : f32
    %46 = vector.broadcast %cst_24 : f32 to vector<512x30xf32>
    %47 = arith.maximumf %45, %46 : vector<512x30xf32>
    %48 = vector.extract_strided_slice %47 {offsets = [0, 0], sizes = [512, 15], strides = [1, 1]} : vector<512x30xf32> to vector<512x15xf32>
    %cst_25 = arith.constant dense<0xFF800000> : vector<512xf32>
    %49 = vector.multi_reduction <maximumf>, %48, %cst_25 [1] : vector<512x15xf32> to vector<512xf32>
    %50 = vector.shape_cast %49 : vector<512xf32> to vector<512x1xf32>
    %51 = vector.extract_strided_slice %47 {offsets = [0, 15], sizes = [512, 15], strides = [1, 1]} : vector<512x30xf32> to vector<512x15xf32>
    %cst_26 = arith.constant dense<0xFF800000> : vector<512xf32>
    %52 = vector.multi_reduction <maximumf>, %51, %cst_26 [1] : vector<512x15xf32> to vector<512xf32>
    %53 = vector.shape_cast %52 : vector<512xf32> to vector<512x1xf32>
    %54 = tpu.concatenate %50, %53 in 0 : vector<512x1xf32>, vector<512x1xf32> -> vector<1024x1xf32>
    %c0_27 = arith.constant 0 : index
    %c0_28 = arith.constant 0 : index
    %55 = vector.load %arg8[%c0_27, %c0_28] : memref<64x1024xf32, #tpu.memory_space<vmem>>, vector<64x1024xf32>
    %cst_29 = arith.constant dense<0.000000e+00> : vector<64x1xf32>
    %56 = tpu.matmul %55, %54, %cst_29 {dimension_numbers = #tpu.dot_dimension_numbers<[1], [0], [0], [1], [0, 0, 1, 1], [], []>} : vector<64x1024xf32>, vector<1024x1xf32>, vector<64x1xf32> -> vector<64x1xf32>
    %c0_30 = arith.constant 0 : index
    %c0_31 = arith.constant 0 : index
    %57 = vector.load %arg9[%c0_30, %c0_31] : memref<64x1xf32, #tpu.memory_space<vmem>>, vector<64x1xf32>
    %58 = arith.addf %56, %57 : vector<64x1xf32>
    %cst_32 = arith.constant 0.000000e+00 : f32
    %59 = vector.broadcast %cst_32 : f32 to vector<64x1xf32>
    %60 = arith.maximumf %58, %59 : vector<64x1xf32>
    %c0_33 = arith.constant 0 : index
    %c0_34 = arith.constant 0 : index
    %61 = vector.load %arg10[%c0_33, %c0_34] : memref<32x64xf32, #tpu.memory_space<vmem>>, vector<32x64xf32>
    %cst_35 = arith.constant dense<0.000000e+00> : vector<32x1xf32>
    %62 = tpu.matmul %61, %60, %cst_35 {dimension_numbers = #tpu.dot_dimension_numbers<[1], [0], [0], [1], [0, 0, 1, 1], [], []>} : vector<32x64xf32>, vector<64x1xf32>, vector<32x1xf32> -> vector<32x1xf32>
    %c0_36 = arith.constant 0 : index
    %c0_37 = arith.constant 0 : index
    %63 = vector.load %arg11[%c0_36, %c0_37] : memref<32x1xf32, #tpu.memory_space<vmem>>, vector<32x1xf32>
    %64 = arith.addf %62, %63 : vector<32x1xf32>
    %cst_38 = arith.constant 0.000000e+00 : f32
    %65 = vector.broadcast %cst_38 : f32 to vector<32x1xf32>
    %66 = arith.maximumf %64, %65 : vector<32x1xf32>
    %c0_39 = arith.constant 0 : index
    %c0_40 = arith.constant 0 : index
    %67 = vector.load %arg12[%c0_39, %c0_40] : memref<6x32xf32, #tpu.memory_space<vmem>>, vector<6x32xf32>
    %cst_41 = arith.constant dense<0.000000e+00> : vector<6x1xf32>
    %68 = tpu.matmul %67, %66, %cst_41 {dimension_numbers = #tpu.dot_dimension_numbers<[1], [0], [0], [1], [0, 0, 1, 1], [], []>} : vector<6x32xf32>, vector<32x1xf32>, vector<6x1xf32> -> vector<6x1xf32>
    %c0_42 = arith.constant 0 : index
    %c0_43 = arith.constant 0 : index
    %69 = vector.load %arg13[%c0_42, %c0_43] : memref<6x1xf32, #tpu.memory_space<vmem>>, vector<6x1xf32>
    %70 = arith.addf %68, %69 : vector<6x1xf32>
    %c0_44 = arith.constant 0 : index
    %c0_45 = arith.constant 0 : index
    %71 = vector.load %arg14[%c0_44, %c0_45] : memref<6x1xf32, #tpu.memory_space<vmem>>, vector<6x1xf32>
    tpu.vector_store %arg14[%c0_44, %c0_45], %70 {strides = array<i32>} : memref<6x1xf32, #tpu.memory_space<vmem>>, vector<6x1xf32>,
    return
  }
}

</mosaic_0001>

<bundles_post_ra>
// kernel: mscnn_forward.1
= control target key start
LH: loop header
LB: loop body
LE: loop exit
PB: predicated region body
PF: predicated region fallthrough
CT: control target
= control target key end

     0   :  { %s9447_s17 = smov 2   ;;  %s9448_s30 = smov 1   ;;  %v9451_v8 = vmov 0   ;;  %v19173_v13 = vmov 0.0   ;;  %vm178_vm0 = vcmask 1031168   ;;  %vm145_vm1 = vcmask 1039360   ;;  %s19158_s0 = inlined_call_operand.vmem [shape: f32[16,512], index: 0, kind: input, shape index: {}]   ;;  %s19159_s2 = inlined_call_operand.vmem [shape: f32[256,1], index: 2, kind: input, shape index: {}]   ;;  %s19160_s1 = inlined_call_operand.vmem [shape: f32[256,80], index: 1, kind: input, shape index: {}]   ;;  %s19161_s3 = inlined_call_operand.vmem [shape: f32[512,30], index: 3, kind: input, shape index: {}]   ;;  %s19162_s4 = inlined_call_operand.vmem [shape: f32[256,1], index: 4, kind: input, shape index: {}]   ;;  %s19163_s5 = inlined_call_operand.vmem [shape: f32[256,1], index: 5, kind: input, shape index: {}]   ;;  %s19164_s7 = inlined_call_operand.vmem [shape: f32[512,1], index: 7, kind: input, shape index: {}]   ;;  %s19165_s6 = inlined_call_operand.vmem [shape: f32[512,256], index: 6, kind: input, shape index: {}]   ;;  %s19166_s8 = inlined_call_operand.vmem [shape: f32[64,1024], index: 8, kind: input, shape index: {}]   ;;  %s19167_s10 = inlined_call_operand.vmem [shape: f32[32,64], index: 10, kind: input, shape index: {}]   ;;  %s19168_s9 = inlined_call_operand.vmem [shape: f32[64,1], index: 9, kind: input, shape index: {}]   ;;  %s19169_s11 = inlined_call_operand.vmem [shape: f32[32,1], index: 11, kind: input, shape index: {}]   ;;  %s19170_s12 = inlined_call_operand.vmem [shape: f32[6,32], index: 12, kind: input, shape index: {}]   ;;  %s19171_s13 = inlined_call_operand.vmem [shape: f32[6,1], index: 13, kind: input, shape index: {}]   ;;  %s19172_s14 = inlined_call_operand.vmem [shape: f32[6,1], index: 14, kind: output, shape index: {}]  }
   0x1   :  { %v9534_v0 = vld [vmem:[%s19158_s0 + $0x10] sm:$0xff]  ;;  %v9539_v1 = vld [vmem:[%s19158_s0] sm:$0xff]  ;;  %v9546_v2 = vld [vmem:[%s19158_s0 + $0x18] sm:$0xff]  ;;  %s9450_s15 = smov 126   ;;  %7526 = vset.pattern.permute.xlu1 %v9451_v8  ;;  %7525 = vset.pattern.permute.xlu0 %v9451_v8  ;;  %vm112_vm2 = vcmask 7168   ;;  %vm79_vm4 = vcmask 15360  }
   0x2   :  { %67 = vrot.lane.b32.xlu1 %v9534_v0, %s9447_s17  ;;  %63 = vrot.lane.b32.xlu0 %v9539_v1, %s9447_s17  ;;  %v9551_v3 = vld [vmem:[%s19158_s0 + $0x8] sm:$0xff]  ;;  %v9563_v5 = vld [vmem:[%s19158_s0 + $0x20] sm:$0xff]  ;;  %vm7141_vm3 = vmneg %vm112_vm2  ;;  %vm419_vm6 = vcmask 654336   ;;  %vm6063_vm11 = vcmask 121856   ;;  %vm6256_vm12 = vcmask 244856   ;;  %vm6957_vm13 = vcmask 523264  }
   0x3   :  { %v9558_v4 = vld [vmem:[%s19158_s0 + $0x28] sm:$0xff]  ;;  %v9570_v6 = vld [vmem:[%s19158_s0 + $0x38] sm:$0xff]  ;;  %v9575_v7 = vld [vmem:[%s19158_s0 + $0x30] sm:$0xff]  ;;  %s9449_s0 = smov 127   ;;  %580 = vmatprep.mubr.f32.mxu0 %v19173_v13  ;;  %688 = vmatprep.mubr.f32.mxu1 %v19173_v13  ;;  %vm9455_vm14 = vmmov 0   ;;  %vm7061_vm15 = vcmask 261120  }
   0x4   :  { %v228_v9 = vld [vmem:[%s19159_s2 + $0x8] sm:$0xff]  ;;  %v227_v10 = vld [vmem:[%s19159_s2] sm:$0xff]  ;;  %v229_v11 = vld [vmem:[%s19159_s2 + $0x10] sm:$0xff] }
   0x5   :  { %v230_v12 = vld [vmem:[%s19159_s2 + $0x18] sm:$0xff]  ;;  %v231_v14 = vld [vmem:[%s19159_s2 + $0x20] sm:$0xff]  ;;  %v232_v15 = vld [vmem:[%s19159_s2 + $0x28] sm:$0xff] }
   0x6   :  { %69 = vrot.lane.b32.xlu1 %v9546_v2, %s9447_s17  ;;  %65 = vrot.lane.b32.xlu0 %v9551_v3, %s9447_s17  ;;  %v233_v16 = vld [vmem:[%s19159_s2 + $0x30] sm:$0xff]  ;;  %v234_v17 = vld [vmem:[%s19159_s2 + $0x38] sm:$0xff]  ;;  %vm9788_vm5 = vmneg %vm79_vm4 }
   0x7   :  { %v235_v18 = vld [vmem:[%s19159_s2 + $0x40] sm:$0xff]  ;;  %v236_v19 = vld [vmem:[%s19159_s2 + $0x48] sm:$0xff]  ;;  %v237_v20 = vld [vmem:[%s19159_s2 + $0x50] sm:$0xff] }
   0x8   :  { %v238_v21 = vld [vmem:[%s19159_s2 + $0x58] sm:$0xff]  ;;  %v239_v22 = vld [vmem:[%s19159_s2 + $0x60] sm:$0xff]  ;;  %v240_v23 = vld [vmem:[%s19159_s2 + $0x68] sm:$0xff] }
   0x9   :  { %v241_v24 = vld [vmem:[%s19159_s2 + $0x70] sm:$0xff]  ;;  %v242_v25 = vld [vmem:[%s19159_s2 + $0x78] sm:$0xff]  ;;  %v243_v26 = vld [vmem:[%s19159_s2 + $0x80] sm:$0xff] }
   0xa   :  { %73 = vrot.lane.b32.xlu1 %v9558_v4, %s9447_s17  ;;  %71 = vrot.lane.b32.xlu0 %v9563_v5, %s9447_s17  ;;  %v244_v27 = vld [vmem:[%s19159_s2 + $0x88] sm:$0xff]  ;;  %v245_v28 = vld [vmem:[%s19159_s2 + $0x90] sm:$0xff] }
   0xb   :  { %v246_v29 = vld [vmem:[%s19159_s2 + $0x98] sm:$0xff]  ;;  %v247_v30 = vld [vmem:[%s19159_s2 + $0xa0] sm:$0xff]  ;;  %v248_v31 = vld [vmem:[%s19159_s2 + $0xa8] sm:$0xff] }
   0xc   :  { %v249_v32 = vld [vmem:[%s19159_s2 + $0xb0] sm:$0xff]  ;;  %v250_v33 = vld [vmem:[%s19159_s2 + $0xb8] sm:$0xff]  ;;  %v251_v34 = vld [vmem:[%s19159_s2 + $0xc0] sm:$0xff] }
   0xd   :  { %v252_v35 = vld [vmem:[%s19159_s2 + $0xc8] sm:$0xff]  ;;  %v253_v36 = vld [vmem:[%s19159_s2 + $0xd0] sm:$0xff]  ;;  %v254_v37 = vld [vmem:[%s19159_s2 + $0xd8] sm:$0xff] }
   0xe   :  { %77 = vrot.lane.b32.xlu1 %v9570_v6, %s9447_s17  ;;  %75 = vrot.lane.b32.xlu0 %v9575_v7, %s9447_s17  ;;  %v255_v40 = vld [vmem:[%s19159_s2 + $0xe0] sm:$0xff]  ;;  %v256_v41 = vld [vmem:[%s19159_s2 + $0xe8] sm:$0xff] }
   0xf   :  { %v257_v44 = vld [vmem:[%s19159_s2 + $0xf0] sm:$0xff]  ;;  %v258_v45 = vld [vmem:[%s19159_s2 + $0xf8] sm:$0xff]  ;;  %s9454_s2 = smov 125  }
  0x12   :  { %98 = vrot.lane.b32.xlu1 %v9551_v3, %s9448_s30  ;;  %96 = vrot.lane.b32.xlu0 %v9539_v1, %s9448_s30 }
  0x16   :  { %102 = vrot.lane.b32.xlu1 %v9546_v2, %s9448_s30  ;;  %100 = vrot.lane.b32.xlu0 %v9534_v0, %s9448_s30 }
  0x1a   :  { %106 = vrot.lane.b32.xlu1 %v9558_v4, %s9448_s30  ;;  %104 = vrot.lane.b32.xlu0 %v9563_v5, %s9448_s30 }
  0x1e   :  { %110 = vrot.lane.b32.xlu1 %v9570_v6, %s9448_s30  ;;  %108 = vrot.lane.b32.xlu0 %v9575_v7, %s9448_s30 }
  0x22   :  { %131 = vrot.lane.b32.xlu1 %v9551_v3, %s9449_s0  ;;  %129 = vrot.lane.b32.xlu0 %v9539_v1, %s9449_s0 }
  0x26   :  { %135 = vrot.lane.b32.xlu1 %v9546_v2, %s9449_s0  ;;  %133 = vrot.lane.b32.xlu0 %v9534_v0, %s9449_s0 }
  0x2a   :  { %139 = vrot.lane.b32.xlu1 %v9558_v4, %s9449_s0  ;;  %137 = vrot.lane.b32.xlu0 %v9563_v5, %s9449_s0 }
  0x2e   :  { %143 = vrot.lane.b32.xlu1 %v9570_v6, %s9449_s0  ;;  %141 = vrot.lane.b32.xlu0 %v9575_v7, %s9449_s0 }
  0x32   :  { %164 = vrot.lane.b32.xlu1 %v9551_v3, %s9450_s15  ;;  %162 = vrot.lane.b32.xlu0 %v9539_v1, %s9450_s15 }
  0x36   :  { %168 = vrot.lane.b32.xlu1 %v9546_v2, %s9450_s15  ;;  %166 = vrot.lane.b32.xlu0 %v9534_v0, %s9450_s15 }
  0x3a   :  { %172 = vrot.lane.b32.xlu1 %v9558_v4, %s9450_s15  ;;  %170 = vrot.lane.b32.xlu0 %v9563_v5, %s9450_s15 }
  0x3e   :  { %176 = vrot.lane.b32.xlu1 %v9570_v6, %s9450_s15  ;;  %174 = vrot.lane.b32.xlu0 %v9575_v7, %s9450_s15 }
  0x42   :  { %266 = vperm.xlu1 %7526, %v228_v9   ;;  %261 = vperm.xlu0 %7525, %v227_v10  }
  0x46   :  { %271 = vperm.xlu1 %7526, %v229_v11   ;;  %276 = vperm.xlu0 %7525, %v230_v12  }
  0x4a   :  { %281 = vperm.xlu1 %7526, %v231_v14   ;;  %286 = vperm.xlu0 %7525, %v232_v15  }
  0x4e   :  { %291 = vperm.xlu1 %7526, %v233_v16   ;;  %296 = vperm.xlu0 %7525, %v234_v17  }
  0x52   :  { %301 = vperm.xlu1 %7526, %v235_v18   ;;  %306 = vperm.xlu0 %7525, %v236_v19  }
  0x56   :  { %311 = vperm.xlu1 %7526, %v237_v20   ;;  %316 = vperm.xlu0 %7525, %v238_v21  }
  0x5a   :  { %321 = vperm.xlu1 %7526, %v239_v22   ;;  %326 = vperm.xlu0 %7525, %v240_v23  }
  0x5e   :  { %331 = vperm.xlu1 %7526, %v241_v24   ;;  %336 = vperm.xlu0 %7525, %v242_v25  }
  0x62   :  { %341 = vperm.xlu1 %7526, %v243_v26   ;;  %346 = vperm.xlu0 %7525, %v244_v27   ;;  %v9809_v27 = vld [vmem:[%s19160_s1] sm:$0xff] }
  0x66   :  { %351 = vperm.xlu1 %7526, %v245_v28   ;;  %356 = vperm.xlu0 %7525, %v246_v29   ;;  %v9814_v28 = vld [vmem:[%s19160_s1 + $0x90] sm:$0xff] }
  0x6a   :  { %361 = vperm.xlu1 %7526, %v247_v30   ;;  %366 = vperm.xlu0 %7525, %v248_v31   ;;  %v9833_v31 = vld [vmem:[%s19160_s1 + $0x8] sm:$0xff] }
  0x6e   :  { %371 = vperm.xlu1 %7526, %v249_v32   ;;  %376 = vperm.xlu0 %7525, %v250_v33   ;;  %v9839_v32 = vld [vmem:[%s19160_s1 + $0x98] sm:$0xff] }
  0x72   :  { %381 = vperm.xlu1 %7526, %v251_v34   ;;  %386 = vperm.xlu0 %7525, %v252_v35   ;;  %v9859_v35 = vld [vmem:[%s19160_s1 + $0x10] sm:$0xff] }
  0x74   :  { %v9705_v38 = vpop.permute.xlu1 %67  ;;  %v9707_v39 = vpop.permute.xlu0 %63 }
  0x76   :  { %391 = vperm.xlu1 %7526, %v253_v36   ;;  %396 = vperm.xlu0 %7525, %v254_v37   ;;  %v9865_v36 = vld [vmem:[%s19160_s1 + $0xa0] sm:$0xff] }
  0x78   :  { %v9715_v42 = vpop.permute.xlu1 %69  ;;  %v9717_v43 = vpop.permute.xlu0 %65 }
  0x7a   :  { %401 = vperm.xlu1 %7526, %v255_v40   ;;  %406 = vperm.xlu0 %7525, %v256_v41   ;;  %v9888_v40 = vld [vmem:[%s19160_s1 + $0xa8] sm:$0xff]  ;;  %v9915_v41 = vld [vmem:[%s19160_s1 + $0xb0] sm:$0xff] }
  0x7c   :  { %v9725_v46 = vpop.permute.xlu1 %73  ;;  %v9727_v47 = vpop.permute.xlu0 %71 }
  0x7e   :  { %411 = vperm.xlu1 %7526, %v257_v44   ;;  %416 = vperm.xlu0 %7525, %v258_v45  }
  0x80   :  { %v9729_v48 = vpop.permute.xlu1 %77  ;;  %v9731_v49 = vpop.permute.xlu0 %75 }
  0x81   :  { %v85_v45 = vsel %vm79_vm4, %v9731_v49, %v9729_v48  ;;  %v9943_v48 = vld [vmem:[%s19160_s1 + $0xb8] sm:$0xff] }
  0x84   :  { %v9733_v50 = vpop.permute.xlu1 %98  ;;  %v9735_v51 = vpop.permute.xlu0 %96 }
  0x88   :  { %v9737_v52 = vpop.permute.xlu1 %102  ;;  %v9739_v53 = vpop.permute.xlu0 %100 }
  0x89   :  { %v114_v44 = vsel %vm112_vm2, %v9733_v50, %v9739_v53 }
  0x8c   :  { %v9741_v54 = vpop.permute.xlu1 %106  ;;  %v105_v55 = vpop.permute.xlu0 %104 }
  0x8d   :  { %v116_v26 = vsel %vm112_vm2, %v105_v55, %v9741_v54 }
  0x90   :  { %v9743_v56 = vpop.permute.xlu1 %110  ;;  %v9745_v57 = vpop.permute.xlu0 %108 }
  0x94   :  { %v132_v58 = vpop.permute.xlu1 %131  ;;  %v130_v59 = vpop.permute.xlu0 %129 }
  0x95   :  { %v146_v25 = vsel %vm145_vm1, %v130_v59, %v132_v58  ;;  %v10036_v59 = vld [vmem:[%s19160_s1 + $0xe8] sm:$0xff] }
  0x98   :  { %v9747_v60 = vpop.permute.xlu1 %135  ;;  %v9749_v61 = vpop.permute.xlu0 %133 }
  0x99   :  { %v147_v24 = vsel %vm145_vm1, %v132_v58, %v9749_v61  ;;  %v148_v37 = vsel %vm145_vm1, %v9749_v61, %v9747_v60  ;;  %v206_v58 = vld [vmem:[%s19160_s1 + $0x58] sm:$0xff]  ;;  %v10049_v61 = vld [vmem:[%s19160_s1 + $0xf0] sm:$0xff] }
  0x9c   :  { %v140_v62 = vpop.permute.xlu1 %139  ;;  %v138_v63 = vpop.permute.xlu0 %137 }
  0x9d   :  { %v149_v23 = vsel %vm145_vm1, %v138_v63, %v140_v62  ;;  %v10062_v63 = vld [vmem:[%s19160_s1 + $0xf8] sm:$0xff] }
  0xa0   :  { %v9751_v8 = vpop.permute.xlu1 %143  ;;  %v9753_v9 = vpop.permute.xlu0 %141 }
  0xa1   :  { %v150_v22 = vsel %vm145_vm1, %v140_v62, %v9753_v9  ;;  %v151_v34 = vsel %vm145_vm1, %v9753_v9, %v9751_v8  ;;  %v208_v62 = vld [vmem:[%s19160_s1 + $0x68] sm:$0xff]  ;;  %v210_v9 = vld [vmem:[%s19160_s1 + $0x78] sm:$0xff] }
  0xa4   :  { %v165_v10 = vpop.permute.xlu1 %164  ;;  %v163_v11 = vpop.permute.xlu0 %162 }
  0xa5   :  { %v179_v21 = vsel %vm178_vm0, %v163_v11, %v165_v10  ;;  %v212_v11 = vld [vmem:[%s19160_s1 + $0x88] sm:$0xff] }
  0xa8   :  { %v9755_v12 = vpop.permute.xlu0 %166  ;;  %v9757_v14 = vpop.permute.xlu1 %168 }
  0xa9   :  { %v180_v20 = vsel %vm178_vm0, %v165_v10, %v9755_v12  ;;  %v181_v33 = vsel %vm178_vm0, %v9755_v12, %v9757_v14  ;;  %v211_v10 = vld [vmem:[%s19160_s1 + $0x80] sm:$0xff] }
  0xac   :  { %v171_v15 = vpop.permute.xlu0 %170  ;;  %v173_v16 = vpop.permute.xlu1 %172 }
  0xad   :  { %v182_v19 = vsel %vm178_vm0, %v171_v15, %v173_v16 }
  0xb0   :  { %v9759_v17 = vpop.permute.xlu0 %174  ;;  %v177_v29 = vpop.permute.xlu1 %176 }
  0xb1   :  { %v183_v18 = vsel %vm178_vm0, %v173_v16, %v9759_v17  ;;  %v184_v30 = vsel %vm178_vm0, %v9759_v17, %v177_v29 }
  0xb2   :  { %528 = vmatprep.subr.mxu0 %v183_v18  ;;  %7496 = vmatprep.subr.mxu1 %v183_v18 }
  0xb3   :  { %529 = vmatpush1.msra.mxu0 %v182_v19  ;;  %7506 = vmatpush1.msra.mxu1 %v182_v19 }
  0xb4   :  { %530 = vmatprep.subr.mxu0 %v180_v20  ;;  %7497 = vmatprep.subr.mxu1 %v180_v20 }
  0xb5   :  { %531 = vmatpush1.msra.mxu0 %v179_v21  ;;  %7507 = vmatpush1.msra.mxu1 %v179_v21 }
  0xb6   :  { %532 = vmatprep.subr.mxu0 %v150_v22  ;;  %7498 = vmatprep.subr.mxu1 %v150_v22 }
  0xb7   :  { %533 = vmatpush1.msra.mxu0 %v149_v23  ;;  %7508 = vmatpush1.msra.mxu1 %v149_v23 }
  0xb8   :  { %534 = vmatprep.subr.mxu0 %v147_v24  ;;  %7499 = vmatprep.subr.mxu1 %v147_v24 }
  0xb9   :  { %535 = vmatpush1.msra.mxu0 %v146_v25  ;;  %7509 = vmatpush1.msra.mxu1 %v146_v25 }
  0xba   :  { %536 = vmatprep.subr.mxu0 %v9558_v4  ;;  %7500 = vmatprep.subr.mxu1 %v9558_v4  ;;  %v113_v4 = vsel %vm112_vm2, %v9735_v51, %v9733_v50  ;;  %v9934_v50 = vld [vmem:[%s19160_s1 + $0x28] sm:$0xff] }
  0xbb   :  { %537 = vmatpush1.msra.mxu0 %v9563_v5  ;;  %7510 = vmatpush1.msra.mxu1 %v9563_v5  ;;  %v80_v5 = vsel %vm79_vm4, %v9707_v39, %v9717_v43 }
  0xbc   :  { %538 = vmatprep.subr.mxu0 %v9551_v3  ;;  %7501 = vmatprep.subr.mxu1 %v9551_v3 }
  0xbd   :  { %539 = vmatpush1.msra.mxu0 %v9539_v1  ;;  %7511 = vmatpush1.msra.mxu1 %v9539_v1  ;;  %v83_v1 = vsel %vm79_vm4, %v9727_v47, %v9725_v46  ;;  %v10144_v12 = vpop.permute.xlu1 %266 }
  0xbe   :  { %540 = vmatprep.subr.mxu0 %v116_v26  ;;  %7502 = vmatprep.subr.mxu1 %v116_v26 }
  0xbf   :  { %7142 = vmatpush1.msk.msra.mxu0 %vm7141_vm3, %v105_v55  ;;  %7512 = vmatpush1.msk.msra.mxu1 %vm7141_vm3, %v105_v55  ;;  %v10010_v55 = vld [vmem:[%s19160_s1 + $0xd8] sm:$0xff] }
  0xc0   :  { %542 = vmatprep.subr.mxu0 %v113_v4  ;;  %7503 = vmatprep.subr.mxu1 %v113_v4 }
  0xc1   :  { %7144 = vmatpush1.msk.msra.mxu0 %vm7141_vm3, %v9735_v51  ;;  %7513 = vmatpush1.msk.msra.mxu1 %vm7141_vm3, %v9735_v51  ;;  %v82_v51 = vsel %vm79_vm4, %v9705_v38, %v9715_v42  ;;  %v9957_v42 = vld [vmem:[%s19160_s1 + $0x30] sm:$0xff]  ;;  %v10152_v15 = vpop.permute.xlu1 %271 }
  0xc2   :  { %544 = vmatprep.subr.mxu0 %v83_v1  ;;  %7504 = vmatprep.subr.mxu1 %v83_v1 }
  0xc3   :  { %7146 = vmatpush1.msk.msra.mxu0 %vm9788_vm5, %v9727_v47  ;;  %7514 = vmatpush1.msk.msra.mxu1 %vm9788_vm5, %v9727_v47  ;;  %v84_v47 = vsel %vm79_vm4, %v9725_v46, %v9731_v49  ;;  %v81_v46 = vsel %vm79_vm4, %v9717_v43, %v9705_v38  ;;  %v9963_v38 = vld [vmem:[%s19160_s1 + $0xc0] sm:$0xff]  ;;  %v9974_v43 = vld [vmem:[%s19160_s1 + $0x38] sm:$0xff]  ;;  %v9980_v49 = vld [vmem:[%s19160_s1 + $0xc8] sm:$0xff] }
  0xc4   :  { %546 = vmatprep.subr.mxu0 %v80_v5  ;;  %7505 = vmatprep.subr.mxu1 %v80_v5 }
  0xc5   :  { %7148 = vmatpush1.msk.msra.mxu0 %vm9788_vm5, %v9707_v39  ;;  %7515 = vmatpush1.msk.msra.mxu1 %vm9788_vm5, %v9707_v39  ;;  %v9881_v39 = vld [vmem:[%s19160_s1 + $0x18] sm:$0xff]  ;;  %v10161_v17 = vpop.permute.xlu1 %281 }
  0xc6   :  { %7149 = vmatmul.mubr.msk.f32.vlgmr.msra.gmra.mxu0 %vm419_vm6, %v9809_v27  ;;  %7167 = vmatmul.mubr.msk.f32.vlgmr.msra.gmra.mxu1 %vm419_vm6, %v9814_v28 }
  0xc7   :  { %7181 = vmatprep.subr.msk.mxu1 %vm178_vm0, %v177_v29  ;;  %586 = vmatprep.mubr.f32.mxu0 %v19173_v13 }
  0xc8   :  { %786 = vmatpush1.msra.mxu1 %v184_v30  ;;  %694 = vmatprep.mubr.f32.mxu1 %v19173_v13 }
  0xc9   :  { %7182 = vmatprep.subr.msk.mxu1 %vm178_vm0, %v9757_v14  ;;  %4172 = vmatprep.subr.mxu0 %v19173_v13  ;;  %v10147_v14 = vpop.permute.xlu0 %261  ;;  %v10169_v19 = vpop.permute.xlu1 %291  ;;  %vm7135_vm0 = vcmask 5120  }
  0xca   :  { %788 = vmatpush1.msra.mxu1 %v181_v33  ;;  %7150 = vmatmul.mubr.msk.f32.gmra.mxu0 %vm419_vm6, %v9833_v31 }
  0xcb   :  { %7168 = vmatmul.mubr.msk.f32.gmra.mxu1 %vm419_vm6, %v9839_v32  ;;  %7183 = vmatprep.subr.msk.mxu1 %vm145_vm1, %v9751_v8  ;;  %v209_v8 = vld [vmem:[%s19160_s1 + $0x70] sm:$0xff] }
  0xcc   :  { %790 = vmatpush1.msra.mxu1 %v151_v34  ;;  %592 = vmatprep.mubr.f32.mxu0 %v19173_v13 }
  0xcd   :  { %7184 = vmatprep.subr.msk.mxu1 %vm145_vm1, %v9747_v60  ;;  %700 = vmatprep.mubr.f32.mxu1 %v19173_v13  ;;  %v207_v60 = vld [vmem:[%s19160_s1 + $0x60] sm:$0xff]  ;;  %v10154_v16 = vpop.permute.xlu0 %276  ;;  %v10178_v21 = vpop.permute.xlu1 %301 }
  0xce   :  { %792 = vmatpush1.msra.mxu1 %v148_v37  ;;  %7151 = vmatmul.mubr.msk.f32.gmra.mxu0 %vm419_vm6, %v9859_v35 }
  0xcf   :  { %7169 = vmatmul.mubr.msk.f32.gmra.mxu1 %vm419_vm6, %v9865_v36  ;;  %793 = vmatprep.subr.mxu1 %v9570_v6  ;;  %v118_v6 = vsel %vm112_vm2, %v9745_v57, %v9743_v56  ;;  %v205_v56 = vld [vmem:[%s19160_s1 + $0x50] sm:$0xff] }
  0xd0   :  { %794 = vmatpush1.msra.mxu1 %v9575_v7  ;;  %598 = vmatprep.mubr.f32.mxu0 %v19173_v13  ;;  %v117_v7 = vsel %vm112_vm2, %v9741_v54, %v9745_v57  ;;  %v204_v54 = vld [vmem:[%s19160_s1 + $0x48] sm:$0xff]  ;;  %v10023_v57 = vld [vmem:[%s19160_s1 + $0xe0] sm:$0xff] }
  0xd1   :  { %795 = vmatprep.subr.mxu1 %v9546_v2  ;;  %706 = vmatprep.mubr.f32.mxu1 %v19173_v13  ;;  %v9906_v2 = vld [vmem:[%s19160_s1 + $0x20] sm:$0xff]  ;;  %v10164_v18 = vpop.permute.xlu0 %286  ;;  %v10186_v23 = vpop.permute.xlu1 %311 }
  0xd2   :  { %796 = vmatpush1.msra.mxu1 %v9534_v0  ;;  %7152 = vmatmul.mubr.msk.f32.gmra.mxu0 %vm419_vm6, %v9881_v39  ;;  %v115_v0 = vsel %vm112_vm2, %v9739_v53, %v9737_v52  ;;  %v9990_v52 = vld [vmem:[%s19160_s1 + $0x40] sm:$0xff]  ;;  %v9996_v53 = vld [vmem:[%s19160_s1 + $0xd0] sm:$0xff]  ;;  %s9453_s1 = smov 3  }
  0xd3   :  { %7170 = vmatmul.mubr.msk.f32.gmra.mxu1 %vm419_vm6, %v9888_v40  ;;  %797 = vmatprep.subr.mxu1 %v118_v6 }
  0xd4   :  { %798 = vmatpush1.msra.mxu1 %v117_v7  ;;  %604 = vmatprep.mubr.f32.mxu0 %v19173_v13 }
  0xd5   :  { %799 = vmatprep.subr.mxu1 %v115_v0  ;;  %712 = vmatprep.mubr.f32.mxu1 %v19173_v13  ;;  %v10171_v20 = vpop.permute.xlu0 %296  ;;  %v10195_v25 = vpop.permute.xlu1 %321 }
  0xd6   :  { %800 = vmatpush1.msra.mxu1 %v114_v44  ;;  %7153 = vmatmul.mubr.msk.f32.gmra.mxu0 %vm419_vm6, %v9906_v2 }
  0xd7   :  { %7171 = vmatmul.mubr.msk.f32.gmra.mxu1 %vm419_vm6, %v9915_v41  ;;  %801 = vmatprep.subr.mxu1 %v85_v45 }
  0xd8   :  { %802 = vmatpush1.msra.mxu1 %v84_v47  ;;  %610 = vmatprep.mubr.f32.mxu0 %v19173_v13 }
  0xd9   :  { %803 = vmatprep.subr.mxu1 %v82_v51  ;;  %718 = vmatprep.mubr.f32.mxu1 %v19173_v13  ;;  %v10181_v22 = vpop.permute.xlu0 %306  ;;  %v10202_v4 = vpop.permute.xlu1 %331 }
  0xda   :  { %804 = vmatpush1.msra.mxu1 %v81_v46  ;;  %7154 = vmatmul.mubr.msk.f32.gmra.mxu0 %vm419_vm6, %v9934_v50 }
  0xdb   :  { %7172 = vmatmul.mubr.msk.f32.gmra.mxu1 %vm419_vm6, %v9943_v48  ;;  %616 = vmatprep.mubr.f32.mxu0 %v19173_v13 }
  0xdc   :  { %724 = vmatprep.mubr.f32.mxu1 %v19173_v13  ;;  %4397 = vmatprep.subr.mxu1 %v19173_v13 }
  0xdd   :  { %v10188_v24 = vpop.permute.xlu0 %316  ;;  %v10206_v1 = vpop.permute.xlu1 %341 }
  0xde   :  { %7155 = vmatmul.mubr.msk.f32.gmra.mxu0 %vm419_vm6, %v9957_v42 }
  0xdf   :  { %7173 = vmatmul.mubr.msk.f32.gmra.mxu1 %vm419_vm6, %v9963_v38  ;;  %622 = vmatprep.mubr.f32.mxu0 %v19173_v13 }
  0xe0   :  { %730 = vmatprep.mubr.f32.mxu1 %v19173_v13 }
  0xe1   :  { %v10198_v26 = vpop.permute.xlu0 %326 }
  0xe2   :  { %7156 = vmatmul.mubr.msk.f32.gmra.mxu0 %vm419_vm6, %v9974_v43 }
  0xe3   :  { %7174 = vmatmul.mubr.msk.f32.gmra.mxu1 %vm419_vm6, %v9980_v49  ;;  %628 = vmatprep.mubr.f32.mxu0 %v19173_v13 }
  0xe4   :  { %736 = vmatprep.mubr.f32.mxu1 %v19173_v13 }
  0xe5   :  { %v10204_v3 = vpop.permute.xlu0 %336 }
  0xe6   :  { %7157 = vmatmul.mubr.msk.f32.gmra.mxu0 %vm419_vm6, %v9990_v52 }
  0xe7   :  { %7175 = vmatmul.mubr.msk.f32.gmra.mxu1 %vm419_vm6, %v9996_v53  ;;  %634 = vmatprep.mubr.f32.mxu0 %v19173_v13 }
  0xe8   :  { %742 = vmatprep.mubr.f32.mxu1 %v19173_v13 }
  0xe9   :  { %v10208_v5 = vpop.permute.xlu0 %346 }
  0xea   :  { %7158 = vmatmul.mubr.msk.f32.gmra.mxu0 %vm419_vm6, %v204_v54 }
  0xeb   :  { %7176 = vmatmul.mubr.msk.f32.gmra.mxu1 %vm419_vm6, %v10010_v55  ;;  %640 = vmatprep.mubr.f32.mxu0 %v19173_v13 }
  0xec   :  { %748 = vmatprep.mubr.f32.mxu1 %v19173_v13 }
  0xed   :  { %v10212_v33 = vpop.permute.xlu0 %356 }
  0xee   :  { %7159 = vmatmul.mubr.msk.f32.gmra.mxu0 %vm419_vm6, %v205_v56 }
  0xef   :  { %7177 = vmatmul.mubr.msk.f32.gmra.mxu1 %vm419_vm6, %v10023_v57  ;;  %646 = vmatprep.mubr.f32.mxu0 %v19173_v13 }
  0xf0   :  { %754 = vmatprep.mubr.f32.mxu1 %v19173_v13 }
  0xf2   :  { %7160 = vmatmul.mubr.msk.f32.gmra.mxu0 %vm419_vm6, %v206_v58 }
  0xf3   :  { %7178 = vmatmul.mubr.msk.f32.gmra.mxu1 %vm419_vm6, %v10036_v59  ;;  %652 = vmatprep.mubr.f32.mxu0 %v19173_v13 }
  0xf4   :  { %760 = vmatprep.mubr.f32.mxu1 %v19173_v13 }
  0xf6   :  { %7161 = vmatmul.mubr.msk.f32.gmra.mxu0 %vm419_vm6, %v207_v60 }
  0xf7   :  { %7179 = vmatmul.mubr.msk.f32.gmra.mxu1 %vm419_vm6, %v10049_v61  ;;  %658 = vmatprep.mubr.f32.mxu0 %v19173_v13 }
  0xf8   :  { %766 = vmatprep.mubr.f32.mxu1 %v19173_v13 }
  0xfa   :  { %7162 = vmatmul.mubr.msk.f32.gmra.mxu0 %vm419_vm6, %v208_v62 }
  0xfb   :  { %7180 = vmatmul.mubr.msk.f32.gmra.mxu1 %vm419_vm6, %v10062_v63  ;;  %664 = vmatprep.mubr.f32.mxu0 %v19173_v13 }
  0xfc   :  { %837 = vmatprep.mubr.f32.mxu1 %v19173_v13 }
  0xfe   :  { %7163 = vmatmul.mubr.msk.f32.gmra.mxu0 %vm419_vm6, %v209_v8 }
  0xff   :  { %7185 = vmatmul.mubr.msk.f32.vlgmr.msra.gmra.mxu1 %vm419_vm6, %v9809_v27  ;;  %670 = vmatprep.mubr.f32.mxu0 %v19173_v13 }
 0x100   :  { %843 = vmatprep.mubr.f32.mxu1 %v19173_v13 }
 0x102   :  { %7164 = vmatmul.mubr.msk.f32.gmra.mxu0 %vm419_vm6, %v210_v9 }
 0x103   :  { %7186 = vmatmul.mubr.msk.f32.gmra.mxu1 %vm419_vm6, %v9833_v31  ;;  %676 = vmatprep.mubr.f32.mxu0 %v19173_v13  ;;  %v10210_v31 = vpop.permute.xlu1 %351 }
 0x104   :  { %849 = vmatprep.mubr.f32.mxu1 %v19173_v13 }
 0x106   :  { %7165 = vmatmul.mubr.msk.f32.gmra.mxu0 %vm419_vm6, %v211_v10 }
 0x107   :  { %7187 = vmatmul.mubr.msk.f32.gmra.mxu1 %vm419_vm6, %v9859_v35  ;;  %682 = vmatprep.mubr.f32.mxu0 %v19173_v13 }
 0x108   :  { %855 = vmatprep.mubr.f32.mxu1 %v19173_v13 }
 0x10a   :  { %7166 = vmatmul.mubr.msk.f32.gmra.mxu0 %vm419_vm6, %v212_v11 }
 0x10b   :  { %7188 = vmatmul.mubr.msk.f32.gmra.mxu1 %vm419_vm6, %v9881_v39 }
 0x10c   :  { %861 = vmatprep.mubr.f32.mxu1 %v19173_v13 }
 0x10f   :  { %7189 = vmatmul.mubr.msk.f32.gmra.mxu1 %vm419_vm6, %v9906_v2 }
 0x110   :  { %867 = vmatprep.mubr.f32.mxu1 %v19173_v13 }
 0x113   :  { %7190 = vmatmul.mubr.msk.f32.gmra.mxu1 %vm419_vm6, %v9934_v50 }
 0x114   :  { %873 = vmatprep.mubr.f32.mxu1 %v19173_v13 }
 0x117   :  { %7191 = vmatmul.mubr.msk.f32.gmra.mxu1 %vm419_vm6, %v9957_v42 }
 0x118   :  { %879 = vmatprep.mubr.f32.mxu1 %v19173_v13 }
 0x11b   :  { %7192 = vmatmul.mubr.msk.f32.gmra.mxu1 %vm419_vm6, %v9974_v43 }
 0x11c   :  { %885 = vmatprep.mubr.f32.mxu1 %v19173_v13 }
 0x11f   :  { %7193 = vmatmul.mubr.msk.f32.gmra.mxu1 %vm419_vm6, %v9990_v52 }
 0x120   :  { %891 = vmatprep.mubr.f32.mxu1 %v19173_v13 }
 0x123   :  { %7194 = vmatmul.mubr.msk.f32.gmra.mxu1 %vm419_vm6, %v204_v54 }
 0x124   :  { %897 = vmatprep.mubr.f32.mxu1 %v19173_v13 }
 0x127   :  { %7195 = vmatmul.mubr.msk.f32.gmra.mxu1 %vm419_vm6, %v205_v56 }
 0x128   :  { %903 = vmatprep.mubr.f32.mxu1 %v19173_v13 }
 0x12b   :  { %7196 = vmatmul.mubr.msk.f32.gmra.mxu1 %vm419_vm6, %v206_v58 }
 0x12c   :  { %909 = vmatprep.mubr.f32.mxu1 %v19173_v13 }
 0x12f   :  { %7197 = vmatmul.mubr.msk.f32.gmra.mxu1 %vm419_vm6, %v207_v60 }
 0x130   :  { %915 = vmatprep.mubr.f32.mxu1 %v19173_v13 }
 0x133   :  { %7198 = vmatmul.mubr.msk.f32.gmra.mxu1 %vm419_vm6, %v208_v62 }
 0x134   :  { %921 = vmatprep.mubr.f32.mxu1 %v19173_v13 }
 0x137   :  { %7199 = vmatmul.mubr.msk.f32.gmra.mxu1 %vm419_vm6, %v209_v8 }
 0x138   :  { %927 = vmatprep.mubr.f32.mxu1 %v19173_v13 }
 0x13b   :  { %7200 = vmatmul.mubr.msk.f32.gmra.mxu1 %vm419_vm6, %v210_v9 }
 0x13c   :  { %933 = vmatprep.mubr.f32.mxu1 %v19173_v13 }
 0x13f   :  { %7201 = vmatmul.mubr.msk.f32.gmra.mxu1 %vm419_vm6, %v211_v10 }
 0x140   :  { %939 = vmatprep.mubr.f32.mxu1 %v19173_v13 }
 0x143   :  { %7202 = vmatmul.mubr.msk.f32.gmra.mxu1 %vm419_vm6, %v212_v11 }
 0x144   :  { %945 = vmatprep.mubr.f32.mxu1 %v19173_v13 }
 0x147   :  { %7203 = vmatmul.mubr.msk.f32.gmra.mxu1 %vm419_vm6, %v9814_v28 }
 0x148   :  { %951 = vmatprep.mubr.f32.mxu1 %v19173_v13 }
 0x14b   :  { %7204 = vmatmul.mubr.msk.f32.gmra.mxu1 %vm419_vm6, %v9839_v32 }
 0x14c   :  { %957 = vmatprep.mubr.f32.mxu1 %v19173_v13 }
 0x14f   :  { %7205 = vmatmul.mubr.msk.f32.gmra.mxu1 %vm419_vm6, %v9865_v36 }
 0x150   :  { %963 = vmatprep.mubr.f32.mxu1 %v19173_v13 }
 0x153   :  { %7206 = vmatmul.mubr.msk.f32.gmra.mxu1 %vm419_vm6, %v9888_v40 }
 0x154   :  { %969 = vmatprep.mubr.f32.mxu1 %v19173_v13 }
 0x157   :  { %7207 = vmatmul.mubr.msk.f32.gmra.mxu1 %vm419_vm6, %v9915_v41 }
 0x158   :  { %975 = vmatprep.mubr.f32.mxu1 %v19173_v13 }
 0x15b   :  { %7208 = vmatmul.mubr.msk.f32.gmra.mxu1 %vm419_vm6, %v9943_v48 }
 0x15c   :  { %981 = vmatprep.mubr.f32.mxu1 %v19173_v13 }
 0x15f   :  { %7209 = vmatmul.mubr.msk.f32.gmra.mxu1 %vm419_vm6, %v9963_v38 }
 0x160   :  { %987 = vmatprep.mubr.f32.mxu1 %v19173_v13 }
 0x163   :  { %7210 = vmatmul.mubr.msk.f32.gmra.mxu1 %vm419_vm6, %v9980_v49 }
 0x164   :  { %993 = vmatprep.mubr.f32.mxu1 %v19173_v13 }
 0x167   :  { %7211 = vmatmul.mubr.msk.f32.gmra.mxu1 %vm419_vm6, %v9996_v53  ;;  %v10251_v53 = vpop.permute.xlu0 %366 }
 0x168   :  { %999 = vmatprep.mubr.f32.mxu1 %v19173_v13 }
 0x16b   :  { %7212 = vmatmul.mubr.msk.f32.gmra.mxu1 %vm419_vm6, %v10010_v55 }
 0x16c   :  { %1005 = vmatprep.mubr.f32.mxu1 %v19173_v13 }
 0x16f   :  { %7213 = vmatmul.mubr.msk.f32.gmra.mxu1 %vm419_vm6, %v10023_v57  ;;  %v10257_v57 = vpop.permute.xlu1 %361 }
 0x170   :  { %1011 = vmatprep.mubr.f32.mxu1 %v19173_v13 }
 0x173   :  { %7214 = vmatmul.mubr.msk.f32.gmra.mxu1 %vm419_vm6, %v10036_v59 }
 0x174   :  { %1017 = vmatprep.mubr.f32.mxu1 %v19173_v13 }
 0x177   :  { %7215 = vmatmul.mubr.msk.f32.gmra.mxu1 %vm419_vm6, %v10049_v61 }
 0x178   :  { %1023 = vmatprep.mubr.f32.mxu1 %v19173_v13 }
 0x17b   :  { %7216 = vmatmul.mubr.msk.f32.gmra.mxu1 %vm419_vm6, %v10062_v63 }
 0x186   :  { %v582_v27 = vpop.f32.mrf.mxu0  ;;  %v690_v28 = vpop.f32.mrf.mxu1 }
 0x187   :  { %v10215_v34 = vadd.f32 %v582_v27, %v10147_v14  ;;  %v10221_v37 = vadd.f32 %v690_v28, %v10210_v31 }
 0x188   :  { %v584_v29 = vpop.f32.mrf.mxu0  ;;  %v692_v30 = vpop.f32.mrf.mxu1 }
 0x189   :  { %19824 = vst [vmem:[#allocation2_spill] sm:$0xff] %v10215_v34  ;;  %19826 = vst [vmem:[#allocation4_spill] sm:$0xff] %v10221_v37  ;;  %v10239_v51 = vadd.f32 %v584_v29, %v10147_v14  ;;  %v10243_v46 = vadd.f32 %v692_v30, %v10210_v31 }
 0x18a   :  { %v588_v32 = vpop.f32.mrf.mxu0 }
 0x18b   :  { %v10218_v35 = vadd.f32 %v588_v32, %v10144_v12  ;;  %v696_v36 = vpop.f32.mrf.mxu1  ;;  %19830 = vst [vmem:[#allocation8_spill] sm:$0xff] %v10239_v51  ;;  %19831 = vst [vmem:[#allocation9_spill] sm:$0xff] %v10243_v46 }
 0x18c   :  { %v10224_v39 = vadd.f32 %v696_v36, %v10212_v33  ;;  %v590_v40 = vpop.f32.mrf.mxu0 }
 0x18d   :  { %19825 = vst [vmem:[#allocation3_spill] sm:$0xff] %v10218_v35  ;;  %v698_v6 = vpop.f32.mrf.mxu1  ;;  %v7527_v7 = vpack.i.bf16 %v10218_v35, %v10215_v34  ;;  %v10233_v44 = vadd.f32 %v590_v40, %v10144_v12 }
 0x18e   :  { %19827 = vst [vmem:[#allocation5_spill] sm:$0xff] %v10224_v39  ;;  %v594_v2 = vpop.f32.mrf.mxu0  ;;  %v7532_v0 = vpack.i.bf16 %v10224_v39, %v10221_v37  ;;  %v10236_v50 = vadd.f32 %v698_v6, %v10212_v33 }
 0x18f   :  { %v702_v41 = vpop.f32.mrf.mxu1  ;;  %7528 = vrot.lane.b32.xlu1 %v7527_v7, %s9448_s30  ;;  %19828 = vst [vmem:[#allocation6_spill] sm:$0xff] %v10233_v44  ;;  %v7547_v43 = vpack.i.bf16 %v10233_v44, %v10239_v51  ;;  %v10267_v61 = vadd.f32 %v594_v2, %v10152_v15 }
 0x190   :  { %7533 = vrot.lane.b32.xlu0 %v7532_v0, %s9448_s30  ;;  %v596_v45 = vpop.f32.mrf.mxu0  ;;  %19829 = vst [vmem:[#allocation7_spill] sm:$0xff] %v10236_v50  ;;  %v7552_v49 = vpack.i.bf16 %v10236_v50, %v10243_v46  ;;  %v10263_v59 = vadd.f32 %v702_v41, %v10257_v57  ;;  %v10299_v41 = vpop.permute.xlu0 %376 }
 0x191   :  { %v704_v47 = vpop.f32.mrf.mxu1  ;;  %19835 = vst [vmem:[#allocation13_spill] sm:$0xff] %v10267_v61  ;;  %v10289_v36 = vadd.f32 %v596_v45, %v10152_v15 }
 0x192   :  { %v600_v42 = vpop.f32.mrf.mxu0  ;;  %19834 = vst [vmem:[#allocation12_spill] sm:$0xff] %v10263_v59  ;;  %v10285_v30 = vadd.f32 %v704_v47, %v10257_v57 }
 0x193   :  { %v708_v48 = vpop.f32.mrf.mxu1  ;;  %7538 = vrot.lane.b32.xlu1 %v7527_v7, %s9449_s0  ;;  %v10260_v58 = vadd.f32 %v600_v42, %v10154_v16  ;;  %19839 = vst [vmem:[#allocation17_spill] sm:$0xff] %v10289_v36 }
 0x194   :  { %7543 = vrot.lane.b32.xlu0 %v7532_v0, %s9449_s0  ;;  %v10255_v54 = vadd.f32 %v708_v48, %v10251_v53  ;;  %v602_v55 = vpop.f32.mrf.mxu0  ;;  %19838 = vst [vmem:[#allocation16_spill] sm:$0xff] %v10285_v30 }
 0x195   :  { %v710_v38 = vpop.f32.mrf.mxu1  ;;  %19833 = vst [vmem:[#allocation11_spill] sm:$0xff] %v10260_v58  ;;  %v7567_v9 = vpack.i.bf16 %v10260_v58, %v10267_v61  ;;  %v10282_v29 = vadd.f32 %v602_v55, %v10154_v16 }
 0x196   :  { %19832 = vst [vmem:[#allocation10_spill] sm:$0xff] %v10255_v54  ;;  %v606_v62 = vpop.f32.mrf.mxu0  ;;  %v7572_v8 = vpack.i.bf16 %v10255_v54, %v10263_v59  ;;  %v10277_v11 = vadd.f32 %v710_v38, %v10251_v53  ;;  %v10310_v38 = vpop.permute.xlu1 %371 }
 0x197   :  { %v714_v52 = vpop.f32.mrf.mxu1  ;;  %7548 = vrot.lane.b32.xlu1 %v7547_v43, %s9448_s30  ;;  %19837 = vst [vmem:[#allocation15_spill] sm:$0xff] %v10282_v29  ;;  %v7587_v2 = vpack.i.bf16 %v10282_v29, %v10289_v36  ;;  %19842 = vst [vmem:[#allocation20_spill] sm:$0xff] %v10310_v38 }
 0x198   :  { %7553 = vrot.lane.b32.xlu0 %v7552_v49, %s9448_s30  ;;  %19836 = vst [vmem:[#allocation14_spill] sm:$0xff] %v10277_v11  ;;  %v608_v27 = vpop.f32.mrf.mxu0  ;;  %v7592_v7 = vpack.i.bf16 %v10277_v11, %v10285_v30  ;;  %v10319_v55 = vadd.f32 %v714_v52, %v10310_v38  ;;  %v10359_v11 = vpop.permute.xlu0 %386 }
 0x199   :  { %v716_v56 = vpop.f32.mrf.mxu1  ;;  %v10341_v59 = vadd.f32 %v608_v27, %v10161_v17  ;;  %19849 = vst [vmem:[#allocation27_spill] sm:$0xff] %v10359_v11 }
 0x19a   :  { %v612_v40 = vpop.f32.mrf.mxu0  ;;  %19844 = vst [vmem:[#allocation22_spill] sm:$0xff] %v10319_v55  ;;  %v10367_v39 = vpop.permute.xlu1 %381 }
 0x19b   :  { %v720_v60 = vpop.f32.mrf.mxu1  ;;  %7558 = vrot.lane.b32.xlu1 %v7547_v43, %s9449_s0  ;;  %v10303_v45 = vadd.f32 %v612_v40, %v10164_v18  ;;  %v10313_v43 = vadd.f32 %v606_v62, %v10161_v17  ;;  %19847 = vst [vmem:[#allocation25_spill] sm:$0xff] %v10341_v59  ;;  %19851 = vst [vmem:[#allocation29_spill] sm:$0xff] %v10367_v39 }
 0x19c   :  { %7563 = vrot.lane.b32.xlu0 %v7552_v49, %s9449_s0  ;;  %v614_v47 = vpop.f32.mrf.mxu0  ;;  %v10308_v42 = vadd.f32 %v720_v60, %v10299_v41 }
 0x19d   :  { %v722_v63 = vpop.f32.mrf.mxu1  ;;  %19840 = vst [vmem:[#allocation18_spill] sm:$0xff] %v10303_v45  ;;  %19843 = vst [vmem:[#allocation21_spill] sm:$0xff] %v10313_v43  ;;  %v7607_v60 = vpack.i.bf16 %v10303_v45, %v10313_v43  ;;  %v10333_v52 = vadd.f32 %v614_v47, %v10164_v18 }
 0x19e   :  { %19841 = vst [vmem:[#allocation19_spill] sm:$0xff] %v10308_v42  ;;  %v7612_v40 = vpack.i.bf16 %v10308_v42, %v10319_v55  ;;  %v10338_v13 = vadd.f32 %v722_v63, %v10299_v41  ;;  %v10347_v55 = vadd.f32 %v716_v56, %v10310_v38 }
 0x19f   :  { %v726_v10 = vpop.f32.mrf.mxu1  ;;  %7573 = vrot.lane.b32.xlu1 %v7572_v8, %s9448_s30  ;;  %19845 = vst [vmem:[#allocation23_spill] sm:$0xff] %v10333_v52  ;;  %v7627_v30 = vpack.i.bf16 %v10333_v52, %v10341_v59  ;;  %v10420_v52 = vpop.permute.xlu0 %396 }
 0x1a0   :  { %7568 = vrot.lane.b32.xlu0 %v7567_v9, %s9448_s30  ;;  %19846 = vst [vmem:[#allocation24_spill] sm:$0xff] %v10338_v13  ;;  %19848 = vst [vmem:[#allocation26_spill] sm:$0xff] %v10347_v55  ;;  %v7632_v63 = vpack.i.bf16 %v10338_v13, %v10347_v55  ;;  %v10373_v13 = vadd.f32 %v726_v10, %v10367_v39 }
 0x1a1   :  { %v10279_v28 = vpop.f32.mrf.mxu1  ;;  %19859 = vst [vmem:[#allocation37_spill] sm:$0xff] %v10420_v52 }
 0x1a2   :  { %19853 = vst [vmem:[#allocation31_spill] sm:$0xff] %v10373_v13 }
 0x1a3   :  { %v732_v32 = vpop.f32.mrf.mxu1  ;;  %7583 = vrot.lane.b32.xlu1 %v7572_v8, %s9449_s0  ;;  %v618_v8 = vpop.f32.mrf.mxu0 }
 0x1a4   :  { %7578 = vrot.lane.b32.xlu0 %v7567_v9, %s9449_s0  ;;  %v10363_v56 = vadd.f32 %v732_v32, %v10359_v11  ;;  %v10379_v50 = vadd.f32 %v618_v8, %v10169_v19 }
 0x1a5   :  { %v734_v6 = vpop.f32.mrf.mxu1 }
 0x1a6   :  { %19850 = vst [vmem:[#allocation28_spill] sm:$0xff] %v10363_v56  ;;  %19854 = vst [vmem:[#allocation32_spill] sm:$0xff] %v10379_v50  ;;  %v7652_v59 = vpack.i.bf16 %v10363_v56, %v10373_v13  ;;  %v10402_v13 = vadd.f32 %v10279_v28, %v10367_v39 }
 0x1a7   :  { %v10296_v0 = vpop.f32.mrf.mxu1  ;;  %7593 = vrot.lane.b32.xlu1 %v7592_v7, %s9448_s30 }
 0x1a8   :  { %7588 = vrot.lane.b32.xlu0 %v7587_v2, %s9448_s30  ;;  %19857 = vst [vmem:[#allocation35_spill] sm:$0xff] %v10402_v13 }
 0x1a9   :  { %v10305_v48 = vpop.f32.mrf.mxu1 }
 0x1ab   :  { %v10315_v49 = vpop.f32.mrf.mxu1  ;;  %7603 = vrot.lane.b32.xlu1 %v7592_v7, %s9449_s0  ;;  %v620_v7 = vpop.f32.mrf.mxu0 }
 0x1ac   :  { %7598 = vrot.lane.b32.xlu0 %v7587_v2, %s9449_s0 }
 0x1ad   :  { %v10322_v9 = vpop.f32.mrf.mxu1  ;;  %v624_v47 = vpop.f32.mrf.mxu0 }
 0x1ae   :  { %v10370_v37 = vadd.f32 %v624_v47, %v10171_v20  ;;  %v10462_v36 = vadd.f32 %v10322_v9, %v10420_v52 }
 0x1af   :  { %v10328_v62 = vpop.f32.mrf.mxu1  ;;  %7608 = vrot.lane.b32.xlu1 %v7607_v60, %s9448_s30 }
 0x1b0   :  { %7613 = vrot.lane.b32.xlu0 %v7612_v40, %s9448_s30  ;;  %19852 = vst [vmem:[#allocation30_spill] sm:$0xff] %v10370_v37  ;;  %v7647_v47 = vpack.i.bf16 %v10370_v37, %v10379_v50  ;;  %v10408_v37 = vadd.f32 %v620_v7, %v10169_v19  ;;  %19866 = vst [vmem:[#allocation44_spill] sm:$0xff] %v10462_v36 }
 0x1b1   :  { %v10335_v2 = vpop.f32.mrf.mxu1 }
 0x1b2   :  { %19858 = vst [vmem:[#allocation36_spill] sm:$0xff] %v10408_v37 }
 0x1b3   :  { %v10343_v54 = vpop.f32.mrf.mxu1  ;;  %7618 = vrot.lane.b32.xlu1 %v7607_v60, %s9449_s0  ;;  %v626_v60 = vpop.f32.mrf.mxu0 }
 0x1b4   :  { %7623 = vrot.lane.b32.xlu0 %v7612_v40, %s9449_s0  ;;  %v10398_v43 = vadd.f32 %v626_v60, %v10171_v20 }
 0x1b5   :  { %v10350_v42 = vpop.f32.mrf.mxu1  ;;  %v630_v32 = vpop.f32.mrf.mxu0 }
 0x1b6   :  { %19856 = vst [vmem:[#allocation34_spill] sm:$0xff] %v10398_v43  ;;  %v7667_v45 = vpack.i.bf16 %v10398_v43, %v10408_v37  ;;  %v10435_v43 = vadd.f32 %v630_v32, %v10178_v21 }
 0x1b7   :  { %v10356_v27 = vpop.f32.mrf.mxu1  ;;  %7628 = vrot.lane.b32.xlu1 %v7627_v30, %s9448_s30  ;;  %v632_v8 = vpop.f32.mrf.mxu0 }
 0x1b8   :  { %7633 = vrot.lane.b32.xlu0 %v7632_v63, %s9448_s30  ;;  %19863 = vst [vmem:[#allocation41_spill] sm:$0xff] %v10435_v43 }
 0x1b9   :  { %v10365_v40 = vpop.f32.mrf.mxu1 }
 0x1bb   :  { %v10375_v55 = vpop.f32.mrf.mxu1  ;;  %7638 = vrot.lane.b32.xlu1 %v7627_v30, %s9449_s0  ;;  %v10393_v30 = vadd.f32 %v734_v6, %v10359_v11  ;;  %v636_v6 = vpop.f32.mrf.mxu0 }
 0x1bc   :  { %7643 = vrot.lane.b32.xlu0 %v7632_v63, %s9449_s0 }
 0x1bd   :  { %v10382_v46 = vpop.f32.mrf.mxu1  ;;  %19855 = vst [vmem:[#allocation33_spill] sm:$0xff] %v10393_v30  ;;  %v7672_v60 = vpack.i.bf16 %v10393_v30, %v10402_v13  ;;  %v638_v7 = vpop.f32.mrf.mxu0  ;;  %v10430_v13 = vadd.f32 %v10315_v49, %v10420_v52 }
 0x1be   :  { %v10432_v30 = vpop.permute.xlu1 %391 }
 0x1bf   :  { %v10388_v10 = vpop.f32.mrf.mxu1  ;;  %7653 = vrot.lane.b32.xlu1 %v7652_v59, %s9448_s30  ;;  %19861 = vst [vmem:[#allocation39_spill] sm:$0xff] %v10430_v13  ;;  %19862 = vst [vmem:[#allocation40_spill] sm:$0xff] %v10432_v30  ;;  %v642_v58 = vpop.f32.mrf.mxu0 }
 0x1c0   :  { %7648 = vrot.lane.b32.xlu0 %v7647_v47, %s9448_s30  ;;  %v10506_v34 = vadd.f32 %v642_v58, %v10186_v23 }
 0x1c1   :  { %v10395_v63 = vpop.f32.mrf.mxu1 }
 0x1c2   :  { %19874 = vst [vmem:[#allocation52_spill] sm:$0xff] %v10506_v34 }
 0x1c3   :  { %v10404_v56 = vpop.f32.mrf.mxu1  ;;  %7663 = vrot.lane.b32.xlu1 %v7652_v59, %s9449_s0  ;;  %v10424_v59 = vadd.f32 %v636_v6, %v10181_v22  ;;  %v10442_v6 = vadd.f32 %v10296_v0, %v10432_v30  ;;  %v10456_v0 = vadd.f32 %v638_v7, %v10181_v22 }
 0x1c4   :  { %7658 = vrot.lane.b32.xlu0 %v7647_v47, %s9449_s0 }
 0x1c5   :  { %v10411_v50 = vpop.f32.mrf.mxu1  ;;  %19860 = vst [vmem:[#allocation38_spill] sm:$0xff] %v10424_v59  ;;  %19864 = vst [vmem:[#allocation42_spill] sm:$0xff] %v10442_v6  ;;  %v7687_v49 = vpack.i.bf16 %v10424_v59, %v10435_v43  ;;  %v7692_v32 = vpack.i.bf16 %v10430_v13, %v10442_v6  ;;  %v10465_v43 = vadd.f32 %v632_v8, %v10178_v21 }
 0x1c6   :  { %19865 = vst [vmem:[#allocation43_spill] sm:$0xff] %v10456_v0  ;;  %v10472_v13 = vadd.f32 %v10305_v48, %v10432_v30 }
 0x1c7   :  { %v10417_v28 = vpop.f32.mrf.mxu1  ;;  %7673 = vrot.lane.b32.xlu1 %v7672_v60, %s9448_s30  ;;  %19867 = vst [vmem:[#allocation45_spill] sm:$0xff] %v10465_v43  ;;  %v7707_v7 = vpack.i.bf16 %v10456_v0, %v10465_v43  ;;  %v10493_v0 = vpop.permute.xlu1 %401 }
 0x1c8   :  { %7668 = vrot.lane.b32.xlu0 %v7667_v45, %s9448_s30  ;;  %19868 = vst [vmem:[#allocation46_spill] sm:$0xff] %v10472_v13  ;;  %v7712_v9 = vpack.i.bf16 %v10462_v36, %v10472_v13  ;;  %19871 = vst [vmem:[#allocation49_spill] sm:$0xff] %v10493_v0  ;;  %v10500_v36 = vadd.f32 %v10328_v62, %v10493_v0 }
 0x1c9   :  { %v10426_v47 = vpop.f32.mrf.mxu1 }
 0x1ca   :  { %19873 = vst [vmem:[#allocation51_spill] sm:$0xff] %v10500_v36 }
 0x1cb   :  { %v10437_v37 = vpop.f32.mrf.mxu1  ;;  %7683 = vrot.lane.b32.xlu1 %v7672_v60, %s9449_s0  ;;  %v644_v60 = vpop.f32.mrf.mxu0 }
 0x1cc   :  { %7678 = vrot.lane.b32.xlu0 %v7667_v45, %s9449_s0 }
 0x1cd   :  { %v10445_v29 = vpop.f32.mrf.mxu1  ;;  %v648_v59 = vpop.f32.mrf.mxu0 }
 0x1ce   :  { %v10496_v44 = vadd.f32 %v648_v59, %v10188_v24 }
 0x1cf   :  { %v10451_v61 = vpop.f32.mrf.mxu1  ;;  %7688 = vrot.lane.b32.xlu1 %v7687_v49, %s9448_s30 }
 0x1d0   :  { %7693 = vrot.lane.b32.xlu0 %v7692_v32, %s9448_s30  ;;  %19872 = vst [vmem:[#allocation50_spill] sm:$0xff] %v10496_v44  ;;  %v7727_v59 = vpack.i.bf16 %v10496_v44, %v10506_v34  ;;  %v10536_v34 = vadd.f32 %v644_v60, %v10186_v23 }
 0x1d1   :  { %v10458_v45 = vpop.f32.mrf.mxu1 }
 0x1d2   :  { %19878 = vst [vmem:[#allocation56_spill] sm:$0xff] %v10536_v34 }
 0x1d3   :  { %v10467_v6 = vpop.f32.mrf.mxu1  ;;  %7698 = vrot.lane.b32.xlu1 %v7687_v49, %s9449_s0  ;;  %v10484_v49 = vpop.permute.xlu0 %406 }
 0x1d4   :  { %7703 = vrot.lane.b32.xlu0 %v7692_v32, %s9449_s0  ;;  %19869 = vst [vmem:[#allocation47_spill] sm:$0xff] %v10484_v49  ;;  %v10489_v48 = vadd.f32 %v10343_v54, %v10484_v49  ;;  %v650_v32 = vpop.f32.mrf.mxu0  ;;  %v10521_v58 = vadd.f32 %v10350_v42, %v10484_v49 }
 0x1d5   :  { %v10477_v35 = vpop.f32.mrf.mxu1 }
 0x1d6   :  { %19870 = vst [vmem:[#allocation48_spill] sm:$0xff] %v10489_v48  ;;  %v7732_v54 = vpack.i.bf16 %v10489_v48, %v10500_v36  ;;  %v654_v51 = vpop.f32.mrf.mxu0  ;;  %19875 = vst [vmem:[#allocation53_spill] sm:$0xff] %v10521_v58  ;;  %v10526_v36 = vadd.f32 %v650_v32, %v10188_v24  ;;  %v10530_v48 = vadd.f32 %v10335_v2, %v10493_v0 }
 0x1d7   :  { %v10481_v8 = vpop.f32.mrf.mxu1  ;;  %7708 = vrot.lane.b32.xlu1 %v7707_v7, %s9448_s30  ;;  %v10548_v0 = vpop.permute.xlu0 %416 }
 0x1d8   :  { %7713 = vrot.lane.b32.xlu0 %v7712_v9, %s9448_s30  ;;  %19876 = vst [vmem:[#allocation54_spill] sm:$0xff] %v10526_v36  ;;  %19877 = vst [vmem:[#allocation55_spill] sm:$0xff] %v10530_v48  ;;  %v7752_v42 = vpack.i.bf16 %v10521_v58, %v10530_v48  ;;  %v7747_v32 = vpack.i.bf16 %v10526_v36, %v10536_v34  ;;  %v10558_v48 = vadd.f32 %v10375_v55, %v10548_v0  ;;  %v10560_v58 = vpop.permute.xlu1 %411 }
 0x1d9   :  { %v10491_v43 = vpop.f32.mrf.mxu1  ;;  %19879 = vst [vmem:[#allocation57_spill] sm:$0xff] %v10548_v0  ;;  %19882 = vst [vmem:[#allocation60_spill] sm:$0xff] %v10560_v58  ;;  %v10563_v36 = vadd.f32 %v654_v51, %v10195_v25 }
 0x1da   :  { %19881 = vst [vmem:[#allocation59_spill] sm:$0xff] %v10558_v48 }
 0x1db   :  { %v10502_v13 = vpop.f32.mrf.mxu1  ;;  %7718 = vrot.lane.b32.xlu1 %v7707_v7, %s9449_s0  ;;  %v656_v7 = vpop.f32.mrf.mxu0  ;;  %19883 = vst [vmem:[#allocation61_spill] sm:$0xff] %v10563_v36 }
 0x1dc   :  { %7723 = vrot.lane.b32.xlu0 %v7712_v9, %s9449_s0 }
 0x1dd   :  { %v10511_v30 = vpop.f32.mrf.mxu1  ;;  %v660_v49 = vpop.f32.mrf.mxu0 }
 0x1de   :  { %v10552_v60 = vadd.f32 %v660_v49, %v10198_v26  ;;  %v10570_v49 = vadd.f32 %v10356_v27, %v10560_v58 }
 0x1df   :  { %v10515_v62 = vpop.f32.mrf.mxu1  ;;  %7733 = vrot.lane.b32.xlu1 %v7732_v54, %s9448_s30 }
 0x1e0   :  { %7728 = vrot.lane.b32.xlu0 %v7727_v59, %s9448_s30  ;;  %19880 = vst [vmem:[#allocation58_spill] sm:$0xff] %v10552_v60  ;;  %19884 = vst [vmem:[#allocation62_spill] sm:$0xff] %v10570_v49  ;;  %v7767_v52 = vpack.i.bf16 %v10552_v60, %v10563_v36  ;;  %v7772_v51 = vpack.i.bf16 %v10558_v48, %v10570_v49  ;;  %v10593_v36 = vadd.f32 %v656_v7, %v10195_v25 }
 0x1e1   :  { %v10523_v9 = vpop.f32.mrf.mxu1  ;;  %v10598_v48 = vadd.f32 %v10365_v40, %v10560_v58 }
 0x1e2   :  { %19887 = vst [vmem:[#allocation65_spill] sm:$0xff] %v10593_v36 }
 0x1e3   :  { %v10532_v44 = vpop.f32.mrf.mxu1  ;;  %7743 = vrot.lane.b32.xlu1 %v7732_v54, %s9449_s0  ;;  %v662_v54 = vpop.f32.mrf.mxu0  ;;  %19888 = vst [vmem:[#allocation66_spill] sm:$0xff] %v10598_v48 }
 0x1e4   :  { %7738 = vrot.lane.b32.xlu0 %v7727_v59, %s9449_s0  ;;  %v10584_v27 = vadd.f32 %v662_v54, %v10198_v26 }
 0x1e5   :  { %v10541_v39 = vpop.f32.mrf.mxu1  ;;  %v666_v55 = vpop.f32.mrf.mxu0 }
 0x1e6   :  { %19885 = vst [vmem:[#allocation63_spill] sm:$0xff] %v10584_v27  ;;  %v7787_v54 = vpack.i.bf16 %v10584_v27, %v10593_v36  ;;  %v10620_v27 = vadd.f32 %v10388_v10, %v10147_v14  ;;  %v10637_v10 = vadd.f32 %v10411_v50, %v10144_v12 }
 0x1e7   :  { %v10545_v2 = vpop.f32.mrf.mxu1  ;;  %7753 = vrot.lane.b32.xlu1 %v7752_v42, %s9448_s30 }
 0x1e8   :  { %7748 = vrot.lane.b32.xlu0 %v7747_v32, %s9448_s30  ;;  %19891 = vst [vmem:[#allocation69_spill] sm:$0xff] %v10620_v27  ;;  %19893 = vst [vmem:[#allocation71_spill] sm:$0xff] %v10637_v10 }
 0x1e9   :  { %v10554_v59 = vpop.f32.mrf.mxu1 }
 0x1eb   :  { %v10565_v34 = vpop.f32.mrf.mxu1  ;;  %7763 = vrot.lane.b32.xlu1 %v7752_v42, %s9449_s0  ;;  %v668_v42 = vpop.f32.mrf.mxu0 }
 0x1ec   :  { %7758 = vrot.lane.b32.xlu0 %v7747_v32, %s9449_s0  ;;  %v10588_v32 = vadd.f32 %v10382_v46, %v10548_v0 }
 0x1ed   :  { %v10575_v11 = vpop.f32.mrf.mxu1  ;;  %v672_v49 = vpop.f32.mrf.mxu0 }
 0x1ee   :  { %19886 = vst [vmem:[#allocation64_spill] sm:$0xff] %v10588_v32  ;;  %v7792_v46 = vpack.i.bf16 %v10588_v32, %v10598_v48  ;;  %v10614_v7 = vadd.f32 %v672_v49, %v10204_v3  ;;  %v10624_v48 = vadd.f32 %v666_v55, %v10202_v4 }
 0x1ef   :  { %v10579_v38 = vpop.f32.mrf.mxu1  ;;  %7768 = vrot.lane.b32.xlu1 %v7767_v52, %s9448_s30  ;;  %v674_v40 = vpop.f32.mrf.mxu0 }
 0x1f0   :  { %7773 = vrot.lane.b32.xlu0 %v7772_v51, %s9448_s30  ;;  %19890 = vst [vmem:[#allocation68_spill] sm:$0xff] %v10614_v7  ;;  %19892 = vst [vmem:[#allocation70_spill] sm:$0xff] %v10624_v48  ;;  %v7807_v49 = vpack.i.bf16 %v10614_v7, %v10624_v48  ;;  %v10650_v7 = vadd.f32 %v10395_v63, %v10147_v14  ;;  %v10654_v48 = vadd.f32 %v668_v42, %v10202_v4 }
 0x1f1   :  { %v10590_v60 = vpop.f32.mrf.mxu1  ;;  %v678_v32 = vpop.f32.mrf.mxu0 }
 0x1f2   :  { %19896 = vst [vmem:[#allocation74_spill] sm:$0xff] %v10650_v7  ;;  %19897 = vst [vmem:[#allocation75_spill] sm:$0xff] %v10654_v48 }
 0x1f3   :  { %7778 = vrot.lane.b32.xlu1 %v7767_v52, %s9449_s0  ;;  %v10605_v0 = vpop.f32.mrf.mxu1  ;;  %v10611_v52 = vadd.f32 %v10404_v56, %v10144_v12  ;;  %v680_v55 = vpop.f32.mrf.mxu0  ;;  %v7832_v12 = vpack.i.bf16 %v10637_v10, %v10650_v7  ;;  %v10688_v10 = vadd.f32 %v10417_v28, %v10152_v15 }
 0x1f4   :  { %7783 = vrot.lane.b32.xlu0 %v7772_v51, %s9449_s0 }
 0x1f5   :  { %19889 = vst [vmem:[#allocation67_spill] sm:$0xff] %v10611_v52  ;;  %v10616_v51 = vpop.f32.mrf.mxu1  ;;  %v7812_v56 = vpack.i.bf16 %v10611_v52, %v10620_v27  ;;  %v684_v50 = vpop.f32.mrf.mxu0  ;;  %19903 = vst [vmem:[#allocation81_spill] sm:$0xff] %v10688_v10 }
 0x1f6   :  { %v10670_v63 = vadd.f32 %v684_v50, %v10208_v5 }
 0x1f7   :  { %7788 = vrot.lane.b32.xlu1 %v7787_v54, %s9448_s30  ;;  %v10631_v36 = vpop.f32.mrf.mxu1 }
 0x1f8   :  { %7793 = vrot.lane.b32.xlu0 %v7792_v46, %s9448_s30  ;;  %19899 = vst [vmem:[#allocation77_spill] sm:$0xff] %v10670_v63 }
 0x1f9   :  { %v10644_v52 = vpop.f32.mrf.mxu1 }
 0x1fb   :  { %7798 = vrot.lane.b32.xlu1 %v7787_v54, %s9449_s0 }
 0x1fc   :  { %7803 = vrot.lane.b32.xlu0 %v7792_v46, %s9449_s0  ;;  %v10642_v46 = vadd.f32 %v674_v40, %v10204_v3 }
 0x1fe   :  { %19894 = vst [vmem:[#allocation72_spill] sm:$0xff] %v10642_v46  ;;  %v7827_v27 = vpack.i.bf16 %v10642_v46, %v10654_v48  ;;  %v10683_v48 = vadd.f32 %v678_v32, %v10206_v1 }
 0x1ff   :  { %7813 = vrot.lane.b32.xlu1 %v7812_v56, %s9448_s30 }
 0x200   :  { %7808 = vrot.lane.b32.xlu0 %v7807_v49, %s9448_s30  ;;  %19902 = vst [vmem:[#allocation80_spill] sm:$0xff] %v10683_v48  ;;  %v7847_v50 = vpack.i.bf16 %v10670_v63, %v10683_v48 }
 0x201   :  { %v10639_v54 = vpop.permute.xlu1 %7528 }
 0x202   :  { %v10646_v58 = vpop.permute.xlu0 %7533 }
 0x203   :  { %19895 = vst [vmem:[#allocation73_spill] sm:$0xff] %v10646_v58  ;;  %7823 = vrot.lane.b32.xlu1 %v7812_v56, %s9449_s0  ;;  %v10663_v58 = vpop.f32.mrf.mxu1  ;;  %v10676_v56 = vadd.f32 %v10437_v37, %v10154_v16  ;;  %v686_v37 = vpop.f32.mrf.mxu0 }
 0x204   :  { %7818 = vrot.lane.b32.xlu0 %v7807_v49, %s9449_s0  ;;  %v10704_v28 = vadd.f32 %v686_v37, %v10208_v5 }
 0x205   :  { %v10659_v40 = vpop.permute.xlu1 %7538  ;;  %19900 = vst [vmem:[#allocation78_spill] sm:$0xff] %v10676_v56  ;;  %v10678_v49 = vpop.f32.mrf.mxu1 }
 0x206   :  { %v10665_v14 = vpop.permute.xlu0 %7543  ;;  %19905 = vst [vmem:[#allocation83_spill] sm:$0xff] %v10704_v28 }
 0x207   :  { %19898 = vst [vmem:[#allocation76_spill] sm:$0xff] %v10665_v14  ;;  %7833 = vrot.lane.b32.xlu1 %v7832_v12, %s9448_s30  ;;  %v7852_v14 = vpack.i.bf16 %v10676_v56, %v10688_v10  ;;  %v10717_v56 = vadd.f32 %v680_v55, %v10206_v1  ;;  %v10722_v10 = vadd.f32 %v10426_v47, %v10152_v15 }
 0x208   :  { %7828 = vrot.lane.b32.xlu0 %v7827_v27, %s9448_s30  ;;  %v10739_v15 = vadd.f32 %v10467_v6, %v10164_v18  ;;  %v10758_v6 = vadd.f32 %v10481_v8, %v10169_v19  ;;  %v10775_v8 = vadd.f32 %v10477_v35, %v10164_v18  ;;  %v10794_v18 = vadd.f32 %v10491_v43, %v10169_v19 }
 0x209   :  { %v10672_v42 = vpop.permute.xlu1 %7548  ;;  %19909 = vst [vmem:[#allocation87_spill] sm:$0xff] %v10717_v56  ;;  %19910 = vst [vmem:[#allocation88_spill] sm:$0xff] %v10722_v10  ;;  %v7867_v37 = vpack.i.bf16 %v10704_v28, %v10717_v56  ;;  %v10753_v56 = vadd.f32 %v10451_v61, %v10161_v17  ;;  %v10811_v19 = vadd.f32 %v10532_v44, %v10181_v22 }
 0x20a   :  { %v10680_v46 = vpop.permute.xlu0 %7553  ;;  %19912 = vst [vmem:[#allocation90_spill] sm:$0xff] %v10739_v15  ;;  %19917 = vst [vmem:[#allocation95_spill] sm:$0xff] %v10758_v6  ;;  %v10830_v44 = vadd.f32 %v10545_v2, %v10186_v23  ;;  %v10847_v2 = vadd.f32 %v10541_v39, %v10181_v22  ;;  %v10866_v22 = vadd.f32 %v10554_v59, %v10186_v23 }
 0x20b   :  { %19901 = vst [vmem:[#allocation79_spill] sm:$0xff] %v10680_v46  ;;  %7843 = vrot.lane.b32.xlu1 %v7832_v12, %s9449_s0  ;;  %v10697_v46 = vpop.f32.mrf.mxu1  ;;  %v10710_v12 = vadd.f32 %v10445_v29, %v10154_v16  ;;  %19916 = vst [vmem:[#allocation94_spill] sm:$0xff] %v10753_v56  ;;  %v10883_v23 = vadd.f32 %v10605_v0, %v10198_v26  ;;  %v10889_v59 = vadd.f32 %v10663_v58, %v10204_v3 }
 0x20c   :  { %7838 = vrot.lane.b32.xlu0 %v7827_v27, %s9449_s0  ;;  %19919 = vst [vmem:[#allocation97_spill] sm:$0xff] %v10775_v8  ;;  %19923 = vst [vmem:[#allocation101_spill] sm:$0xff] %v10794_v18  ;;  %v10902_v0 = vadd.f32 %v10631_v36, %v10202_v4  ;;  %v10917_v36 = vadd.f32 %v10616_v51, %v10198_v26  ;;  %v10936_v26 = vadd.f32 %v10644_v52, %v10202_v4 }
 0x20d   :  { %v10693_v7 = vpop.permute.xlu1 %7558  ;;  %19907 = vst [vmem:[#allocation85_spill] sm:$0xff] %v10710_v12  ;;  %v10712_v63 = vpop.f32.mrf.mxu1  ;;  %v7872_v29 = vpack.i.bf16 %v10710_v12, %v10722_v10  ;;  %19925 = vst [vmem:[#allocation103_spill] sm:$0xff] %v10811_v19 }
 0x20e   :  { %v10699_v32 = vpop.permute.xlu0 %7563  ;;  %19929 = vst [vmem:[#allocation107_spill] sm:$0xff] %v10830_v44  ;;  %19931 = vst [vmem:[#allocation109_spill] sm:$0xff] %v10847_v2 }
 0x20f   :  { %19904 = vst [vmem:[#allocation82_spill] sm:$0xff] %v10699_v32  ;;  %7848 = vrot.lane.b32.xlu1 %v7847_v50, %s9448_s30  ;;  %19935 = vst [vmem:[#allocation113_spill] sm:$0xff] %v10866_v22 }
 0x210   :  { %7853 = vrot.lane.b32.xlu0 %v7852_v14, %s9448_s30  ;;  %19938 = vst [vmem:[#allocation116_spill] sm:$0xff] %v10883_v23  ;;  %19940 = vst [vmem:[#allocation118_spill] sm:$0xff] %v10889_v59 }
 0x211   :  { %v10706_v27 = vpop.permute.xlu1 %7573  ;;  %19942 = vst [vmem:[#allocation120_spill] sm:$0xff] %v10902_v0  ;;  %19944 = vst [vmem:[#allocation122_spill] sm:$0xff] %v10917_v36 }
 0x212   :  { %19906 = vst [vmem:[#allocation84_spill] sm:$0xff] %v10706_v27  ;;  %v10714_v48 = vpop.permute.xlu0 %7568  ;;  %19949 = vst [vmem:[#allocation127_spill] sm:$0xff] %v10936_v26 }
 0x213   :  { %19908 = vst [vmem:[#allocation86_spill] sm:$0xff] %v10714_v48  ;;  %7858 = vrot.lane.b32.xlu1 %v7847_v50, %s9449_s0  ;;  %v10731_v48 = vpop.f32.mrf.mxu1 }
 0x214   :  { %7863 = vrot.lane.b32.xlu0 %v7852_v14, %s9449_s0  ;;  %v10745_v14 = vadd.f32 %v10502_v13, %v10171_v20  ;;  %v7887_v13 = vpack.i.bf16 %v10739_v15, %v10753_v56 }
 0x215   :  { %v10727_v16 = vpop.permute.xlu1 %7583  ;;  %v10747_v50 = vpop.f32.mrf.mxu1 }
 0x216   :  { %19911 = vst [vmem:[#allocation89_spill] sm:$0xff] %v10727_v16  ;;  %v10733_v55 = vpop.permute.xlu0 %7578  ;;  %19914 = vst [vmem:[#allocation92_spill] sm:$0xff] %v10745_v14  ;;  %v7907_v10 = vpack.i.bf16 %v10745_v14, %v10758_v6  ;;  %v10789_v6 = vadd.f32 %v10458_v45, %v10161_v17  ;;  %v10817_v45 = vadd.f32 %v10565_v34, %v10188_v24 }
 0x217   :  { %7868 = vrot.lane.b32.xlu1 %v7867_v37, %s9448_s30 }
 0x218   :  { %7873 = vrot.lane.b32.xlu0 %v7872_v29, %s9448_s30  ;;  %19922 = vst [vmem:[#allocation100_spill] sm:$0xff] %v10789_v6  ;;  %19926 = vst [vmem:[#allocation104_spill] sm:$0xff] %v10817_v45 }
 0x219   :  { %v10741_v47 = vpop.permute.xlu1 %7593 }
 0x21a   :  { %19913 = vst [vmem:[#allocation91_spill] sm:$0xff] %v10741_v47  ;;  %v10749_v28 = vpop.permute.xlu0 %7588 }
 0x21b   :  { %19915 = vst [vmem:[#allocation93_spill] sm:$0xff] %v10749_v28  ;;  %7878 = vrot.lane.b32.xlu1 %v7867_v37, %s9449_s0  ;;  %v10767_v28 = vpop.f32.mrf.mxu1 }
 0x21c   :  { %7883 = vrot.lane.b32.xlu0 %v7872_v29, %s9449_s0  ;;  %v10781_v29 = vadd.f32 %v10511_v30, %v10171_v20  ;;  %v7897_v20 = vpack.i.bf16 %v10775_v8, %v10789_v6  ;;  %v7947_v8 = vpack.i.bf16 %v10817_v45, %v10830_v44  ;;  %v10861_v44 = vadd.f32 %v10523_v9, %v10178_v21 }
 0x21d   :  { %v10763_v12 = vpop.permute.xlu1 %7603  ;;  %v10783_v15 = vpop.f32.mrf.mxu1 }
 0x21e   :  { %19918 = vst [vmem:[#allocation96_spill] sm:$0xff] %v10763_v12  ;;  %v10769_v61 = vpop.permute.xlu0 %7598  ;;  %19920 = vst [vmem:[#allocation98_spill] sm:$0xff] %v10781_v29  ;;  %v7917_v30 = vpack.i.bf16 %v10781_v29, %v10794_v18  ;;  %v10825_v29 = vadd.f32 %v10515_v62, %v10178_v21 }
 0x21f   :  { %7888 = vrot.lane.b32.xlu1 %v7887_v13, %s9448_s30  ;;  %v10803_v56 = vpop.f32.mrf.mxu1  ;;  %19934 = vst [vmem:[#allocation112_spill] sm:$0xff] %v10861_v44 }
 0x220   :  { %7908 = vrot.lane.b32.xlu0 %v7907_v10, %s9448_s30  ;;  %19928 = vst [vmem:[#allocation106_spill] sm:$0xff] %v10825_v29  ;;  %v7927_v34 = vpack.i.bf16 %v10811_v19, %v10825_v29 }
 0x221   :  { %v10777_v37 = vpop.permute.xlu1 %7608 }
 0x222   :  { %v10785_v14 = vpop.permute.xlu0 %7613 }
 0x223   :  { %19921 = vst [vmem:[#allocation99_spill] sm:$0xff] %v10785_v14  ;;  %7893 = vrot.lane.b32.xlu1 %v7887_v13, %s9449_s0 }
 0x224   :  { %7913 = vrot.lane.b32.xlu0 %v7907_v10, %s9449_s0  ;;  %v10819_v10 = vpop.f32.mrf.mxu1 }
 0x225   :  { %v10799_v35 = vpop.permute.xlu1 %7618 }
 0x226   :  { %v10805_v17 = vpop.permute.xlu0 %7623  ;;  %v10839_v6 = vpop.f32.mrf.mxu1 }
 0x227   :  { %19924 = vst [vmem:[#allocation102_spill] sm:$0xff] %v10805_v17  ;;  %7898 = vrot.lane.b32.xlu1 %v7897_v20, %s9448_s30 }
 0x228   :  { %7918 = vrot.lane.b32.xlu0 %v7917_v30, %s9448_s30  ;;  %v10855_v19 = vpop.f32.mrf.mxu1 }
 0x229   :  { %v10813_v43 = vpop.permute.xlu1 %7628 }
 0x22a   :  { %v10821_v13 = vpop.permute.xlu0 %7633  ;;  %v10875_v29 = vpop.f32.mrf.mxu1 }
 0x22b   :  { %19927 = vst [vmem:[#allocation105_spill] sm:$0xff] %v10821_v13  ;;  %7903 = vrot.lane.b32.xlu1 %v7897_v20, %s9449_s0 }
 0x22c   :  { %7923 = vrot.lane.b32.xlu0 %v7917_v30, %s9449_s0  ;;  %v10853_v30 = vadd.f32 %v10575_v11, %v10188_v24  ;;  %v7937_v24 = vpack.i.bf16 %v10847_v2, %v10861_v44  ;;  %v7987_v2 = vpack.i.bf16 %v10889_v59, %v10902_v0  ;;  %v10931_v0 = vadd.f32 %v10590_v60, %v10195_v25 }
 0x22d   :  { %v10835_v18 = vpop.permute.xlu1 %7638  ;;  %v10957_v60 = vadd.f32 %v10803_v56, %v10212_v33 }
 0x22e   :  { %v10841_v62 = vpop.permute.xlu0 %7643  ;;  %19933 = vst [vmem:[#allocation111_spill] sm:$0xff] %v10853_v30  ;;  %v7957_v11 = vpack.i.bf16 %v10853_v30, %v10866_v22  ;;  %v10897_v30 = vadd.f32 %v10579_v38, %v10195_v25  ;;  %19948 = vst [vmem:[#allocation126_spill] sm:$0xff] %v10931_v0  ;;  %v10951_v25 = vadd.f32 %v10731_v48, %v10208_v5 }
 0x22f   :  { %19930 = vst [vmem:[#allocation108_spill] sm:$0xff] %v10841_v62  ;;  %7928 = vrot.lane.b32.xlu1 %v7927_v34, %s9448_s30  ;;  %19952 = vst [vmem:[#allocation130_spill] sm:$0xff] %v10957_v60 }
 0x230   :  { %7948 = vrot.lane.b32.xlu0 %v7947_v8, %s9448_s30  ;;  %19941 = vst [vmem:[#allocation119_spill] sm:$0xff] %v10897_v30  ;;  %v7967_v58 = vpack.i.bf16 %v10883_v23, %v10897_v30  ;;  %19951 = vst [vmem:[#allocation129_spill] sm:$0xff] %v10951_v25 }
 0x231   :  { %v10849_v20 = vpop.permute.xlu1 %7653 }
 0x232   :  { %19932 = vst [vmem:[#allocation110_spill] sm:$0xff] %v10849_v20  ;;  %v10857_v45 = vpop.permute.xlu0 %7648 }
 0x233   :  { %7933 = vrot.lane.b32.xlu1 %v7927_v34, %s9449_s0 }
 0x234   :  { %7953 = vrot.lane.b32.xlu0 %v7947_v8, %s9449_s0  ;;  %v10891_v8 = vpop.f32.mrf.mxu1 }
 0x235   :  { %v10871_v39 = vpop.permute.xlu1 %7663 }
 0x236   :  { %19936 = vst [vmem:[#allocation114_spill] sm:$0xff] %v10871_v39  ;;  %v10877_v21 = vpop.permute.xlu0 %7658  ;;  %v971_v44 = vpop.f32.mrf.mxu1 }
 0x237   :  { %19937 = vst [vmem:[#allocation115_spill] sm:$0xff] %v10877_v21  ;;  %7938 = vrot.lane.b32.xlu1 %v7937_v24, %s9448_s30 }
 0x238   :  { %7958 = vrot.lane.b32.xlu0 %v7957_v11, %s9448_s30 }
 0x239   :  { %v10885_v9 = vpop.permute.xlu1 %7673 }
 0x23a   :  { %19939 = vst [vmem:[#allocation117_spill] sm:$0xff] %v10885_v9  ;;  %v10893_v34 = vpop.permute.xlu0 %7668 }
 0x23b   :  { %7943 = vrot.lane.b32.xlu1 %v7937_v24, %s9449_s0  ;;  %v10923_v24 = vadd.f32 %v10678_v49, %v10204_v3  ;;  %v7977_v3 = vpack.i.bf16 %v10917_v36, %v10931_v0 }
 0x23c   :  { %7963 = vrot.lane.b32.xlu0 %v7957_v11, %s9449_s0  ;;  %v10925_v11 = vpop.f32.mrf.mxu1 }
 0x23d   :  { %v10907_v22 = vpop.permute.xlu1 %7683  ;;  %19946 = vst [vmem:[#allocation124_spill] sm:$0xff] %v10923_v24  ;;  %v7997_v49 = vpack.i.bf16 %v10923_v24, %v10936_v26  ;;  %v10968_v24 = vadd.f32 %v10767_v28, %v10210_v31 }
 0x23e   :  { %19943 = vst [vmem:[#allocation121_spill] sm:$0xff] %v10907_v22  ;;  %v10911_v21 = vpop.permute.xlu0 %7678  ;;  %v977_v30 = vpop.f32.mrf.mxu1 }
 0x23f   :  { %7968 = vrot.lane.b32.xlu1 %v7967_v58, %s9448_s30  ;;  %19955 = vst [vmem:[#allocation133_spill] sm:$0xff] %v10968_v24  ;;  %v8027_v26 = vpack.i.bf16 %v10957_v60, %v10968_v24  ;;  %v10997_v24 = vadd.f32 %v10712_v63, %v10206_v1  ;;  %v11022_v63 = vadd.f32 %v977_v30, %v10299_v41 }
 0x240   :  { %7988 = vrot.lane.b32.xlu0 %v7987_v2, %s9448_s30  ;;  %v979_v52 = vpop.f32.mrf.mxu1 }
 0x241   :  { %v10919_v38 = vpop.permute.xlu1 %7688  ;;  %19962 = vst [vmem:[#allocation140_spill] sm:$0xff] %v10997_v24  ;;  %19968 = vst [vmem:[#allocation146_spill] sm:$0xff] %v11022_v63 }
 0x242   :  { %19945 = vst [vmem:[#allocation123_spill] sm:$0xff] %v10919_v38  ;;  %v10927_v59 = vpop.permute.xlu0 %7693  ;;  %v983_v0 = vpop.f32.mrf.mxu1 }
 0x243   :  { %19947 = vst [vmem:[#allocation125_spill] sm:$0xff] %v10927_v59  ;;  %7973 = vrot.lane.b32.xlu1 %v7967_v58, %s9449_s0  ;;  %v10963_v58 = vadd.f32 %v10697_v46, %v10206_v1  ;;  %v10983_v46 = vadd.f32 %v10747_v50, %v10208_v5  ;;  %v11002_v5 = vadd.f32 %v10783_v15, %v10210_v31 }
 0x244   :  { %7993 = vrot.lane.b32.xlu0 %v7987_v2, %s9449_s0  ;;  %v11017_v1 = vadd.f32 %v10875_v29, %v10251_v53 }
 0x245   :  { %v10941_v51 = vpop.permute.xlu1 %7698  ;;  %19954 = vst [vmem:[#allocation132_spill] sm:$0xff] %v10963_v58  ;;  %v8007_v48 = vpack.i.bf16 %v10951_v25, %v10963_v58  ;;  %19958 = vst [vmem:[#allocation136_spill] sm:$0xff] %v10983_v46 }
 0x246   :  { %v10945_v23 = vpop.permute.xlu0 %7703  ;;  %19963 = vst [vmem:[#allocation141_spill] sm:$0xff] %v11002_v5  ;;  %19966 = vst [vmem:[#allocation144_spill] sm:$0xff] %v11017_v1 }
 0x247   :  { %19950 = vst [vmem:[#allocation128_spill] sm:$0xff] %v10945_v23  ;;  %7978 = vrot.lane.b32.xlu1 %v7977_v3, %s9448_s30  ;;  %v20017_v23 = vld [vmem:[#allocation49_spill] sm:$0xff] }
 0x248   :  { %7998 = vrot.lane.b32.xlu0 %v7997_v49, %s9448_s30 }
 0x249   :  { %v10953_v4 = vpop.permute.xlu1 %7708 }
 0x24a   :  { %v10959_v2 = vpop.permute.xlu0 %7713 }
 0x24b   :  { %19953 = vst [vmem:[#allocation131_spill] sm:$0xff] %v10959_v2  ;;  %7983 = vrot.lane.b32.xlu1 %v7977_v3, %s9449_s0  ;;  %v10989_v3 = vadd.f32 %v10819_v10, %v10212_v33  ;;  %v8017_v33 = vpack.i.bf16 %v10983_v46, %v10997_v24 }
 0x24c   :  { %8003 = vrot.lane.b32.xlu0 %v7997_v49, %s9449_s0  ;;  %v10991_v49 = vpop.f32.mrf.mxu1 }
 0x24d   :  { %v10973_v56 = vpop.permute.xlu1 %7718  ;;  %19960 = vst [vmem:[#allocation138_spill] sm:$0xff] %v10989_v3  ;;  %v8037_v10 = vpack.i.bf16 %v10989_v3, %v11002_v5  ;;  %v19971_v3 = vld [vmem:[#allocation20_spill] sm:$0xff] }
 0x24e   :  { %19956 = vst [vmem:[#allocation134_spill] sm:$0xff] %v10973_v56  ;;  %v10977_v36 = vpop.permute.xlu0 %7723  ;;  %v989_v58 = vpop.f32.mrf.mxu1  ;;  %v11032_v5 = vadd.f32 %v971_v44, %v19971_v3 }
 0x24f   :  { %19957 = vst [vmem:[#allocation135_spill] sm:$0xff] %v10977_v36  ;;  %8008 = vrot.lane.b32.xlu1 %v8007_v48, %s9448_s30 }
 0x250   :  { %8028 = vrot.lane.b32.xlu0 %v8027_v26, %s9448_s30  ;;  %v991_v15 = vpop.f32.mrf.mxu1  ;;  %19972 = vst [vmem:[#allocation20_spill] sm:$0xff] %v11032_v5  ;;  %v8067_v30 = vpack.i.bf16 %v11022_v63, %v11032_v5  ;;  %v11058_v63 = vadd.f32 %v10855_v19, %v10257_v57  ;;  %v11063_v5 = vadd.f32 %v10925_v11, %v19971_v3  ;;  %v19986_v3 = vld [vmem:[#allocation37_spill] sm:$0xff] }
 0x251   :  { %v10985_v28 = vpop.permute.xlu1 %7733 }
 0x252   :  { %19959 = vst [vmem:[#allocation137_spill] sm:$0xff] %v10985_v28  ;;  %v10993_v60 = vpop.permute.xlu0 %7728  ;;  %v995_v46 = vpop.f32.mrf.mxu1  ;;  %19979 = vst [vmem:[#allocation155_spill] sm:$0xff] %v11058_v63 }
 0x253   :  { %19961 = vst [vmem:[#allocation139_spill] sm:$0xff] %v10993_v60  ;;  %8013 = vrot.lane.b32.xlu1 %v8007_v48, %s9449_s0  ;;  %v11028_v48 = vadd.f32 %v10839_v6, %v10257_v57  ;;  %v11047_v6 = vadd.f32 %v10891_v8, %v10251_v53  ;;  %19980 = vst [vmem:[#allocation156_spill] sm:$0xff] %v11063_v5  ;;  %v19983_v57 = vld [vmem:[#allocation27_spill] sm:$0xff] }
 0x254   :  { %8033 = vrot.lane.b32.xlu0 %v8027_v26, %s9449_s0  ;;  %v11077_v19 = vadd.f32 %v989_v58, %v19983_v57 }
 0x255   :  { %v11007_v50 = vpop.permute.xlu1 %7743  ;;  %19970 = vst [vmem:[#allocation148_spill] sm:$0xff] %v11028_v48  ;;  %v8047_v29 = vpack.i.bf16 %v11017_v1, %v11028_v48  ;;  %19975 = vst [vmem:[#allocation151_spill] sm:$0xff] %v11047_v6  ;;  %v8057_v53 = vpack.i.bf16 %v11047_v6, %v11058_v63  ;;  %v19989_v6 = vld [vmem:[#allocation29_spill] sm:$0xff] }
 0x256   :  { %19964 = vst [vmem:[#allocation142_spill] sm:$0xff] %v11007_v50  ;;  %v11011_v25 = vpop.permute.xlu0 %7738  ;;  %19984 = vst [vmem:[#allocation27_spill] sm:$0xff] %v11077_v19 }
 0x257   :  { %19965 = vst [vmem:[#allocation143_spill] sm:$0xff] %v11011_v25  ;;  %8018 = vrot.lane.b32.xlu1 %v8017_v33, %s9448_s30 }
 0x258   :  { %8038 = vrot.lane.b32.xlu0 %v8037_v10, %s9448_s30 }
 0x259   :  { %v11019_v31 = vpop.permute.xlu1 %7753 }
 0x25a   :  { %19967 = vst [vmem:[#allocation145_spill] sm:$0xff] %v11019_v31  ;;  %v11024_v26 = vpop.permute.xlu0 %7748 }
 0x25b   :  { %19969 = vst [vmem:[#allocation147_spill] sm:$0xff] %v11024_v26  ;;  %8023 = vrot.lane.b32.xlu1 %v8017_v33, %s9449_s0  ;;  %v11052_v33 = vadd.f32 %v979_v52, %v10299_v41 }
 0x25c   :  { %8043 = vrot.lane.b32.xlu0 %v8037_v10, %s9449_s0  ;;  %v997_v10 = vpop.f32.mrf.mxu1 }
 0x25d   :  { %v11037_v24 = vpop.permute.xlu1 %7763  ;;  %19977 = vst [vmem:[#allocation153_spill] sm:$0xff] %v11052_v33  ;;  %v8077_v8 = vpack.i.bf16 %v11052_v33, %v11063_v5  ;;  %v11087_v33 = vadd.f32 %v983_v0, %v19989_v6  ;;  %v1286_v5 = vlaneseq }
 0x25e   :  { %19973 = vst [vmem:[#allocation149_spill] sm:$0xff] %v11037_v24  ;;  %v11041_v26 = vpop.permute.xlu0 %7758  ;;  %v1001_v52 = vpop.f32.mrf.mxu1 }
 0x25f   :  { %19974 = vst [vmem:[#allocation150_spill] sm:$0xff] %v11041_v26  ;;  %8048 = vrot.lane.b32.xlu1 %v8047_v29, %s9448_s30  ;;  %19990 = vst [vmem:[#allocation29_spill] sm:$0xff] %v11087_v33  ;;  %v8087_v58 = vpack.i.bf16 %v11077_v19, %v11087_v33  ;;  %v11103_v0 = vand.u32 127, %v1286_v5  ;;  %v20003_v5 = vld [vmem:[#allocation76_spill] sm:$0xff]  ;;  %v20006_v26 = vunpack.i.h.bf16 %v10672_v42 }
 0x260   :  { %8068 = vrot.lane.b32.xlu0 %v8067_v30, %s9448_s30 }
 0x261   :  { %v11049_v44 = vpop.permute.xlu1 %7768  ;;  %vm1288_vm7 = vcmp.lt.s32.totalorder %v11103_v0, 1  ;;  %vm1673_vm8 = vcmp.lt.s32.totalorder %v11103_v0, 127  ;;  %vm2314_vm9 = vcmp.lt.s32.totalorder %v11103_v0, 3  ;;  %vm2699_vm10 = vcmp.lt.s32.totalorder %v11103_v0, 125 }
 0x262   :  { %19976 = vst [vmem:[#allocation152_spill] sm:$0xff] %v11049_v44  ;;  %v11054_v1 = vpop.permute.xlu0 %7773  ;;  %v20007_v44 = vunpack.i.h.bf16 %v10639_v54 }
 0x263   :  { %19978 = vst [vmem:[#allocation154_spill] sm:$0xff] %v11054_v1  ;;  %8053 = vrot.lane.b32.xlu1 %v8047_v29, %s9449_s0  ;;  %v11082_v29 = vadd.f32 %v1001_v52, %v19986_v3 }
 0x264   :  { %8073 = vrot.lane.b32.xlu0 %v8067_v30, %s9449_s0  ;;  %v1003_v30 = vpop.f32.mrf.mxu1  ;;  %v11169_v24 = vsel %vm1288_vm7, %v20007_v44, %v20006_v26  ;;  %v20015_v44 = vunpack.i.h.bf16 %v10693_v7 }
 0x265   :  { %v11068_v41 = vpop.permute.xlu1 %7778  ;;  %19987 = vst [vmem:[#allocation37_spill] sm:$0xff] %v11082_v29 }
 0x266   :  { %19981 = vst [vmem:[#allocation157_spill] sm:$0xff] %v11068_v41  ;;  %v11072_v48 = vpop.permute.xlu0 %7783 }
 0x267   :  { %19982 = vst [vmem:[#allocation158_spill] sm:$0xff] %v11072_v48  ;;  %8058 = vrot.lane.b32.xlu1 %v8057_v53, %s9448_s30  ;;  %v19991_v48 = vld [vmem:[#allocation40_spill] sm:$0xff] }
 0x268   :  { %8078 = vrot.lane.b32.xlu0 %v8077_v8, %s9448_s30  ;;  %v11091_v41 = vadd.f32 %v995_v46, %v19991_v48  ;;  %v11107_v46 = vadd.f32 %v991_v15, %v19983_v57  ;;  %v11127_v15 = vadd.f32 %v997_v10, %v19991_v48  ;;  %v7530_v57 = vunpack.i.l.bf16 %v10639_v54 }
 0x269   :  { %v11079_v11 = vpop.permute.xlu1 %7788  ;;  %v7550_v48 = vunpack.i.l.bf16 %v10672_v42 }
 0x26a   :  { %19985 = vst [vmem:[#allocation159_spill] sm:$0xff] %v11079_v11  ;;  %v11084_v63 = vpop.permute.xlu0 %7793  ;;  %19992 = vst [vmem:[#allocation40_spill] sm:$0xff] %v11091_v41  ;;  %v8107_v52 = vpack.i.bf16 %v11082_v29, %v11091_v41  ;;  %v11120_v41 = vadd.f32 %v10991_v49, %v19989_v6  ;;  %v20002_v49 = vld [vmem:[#allocation79_spill] sm:$0xff] }
 0x26b   :  { %19988 = vst [vmem:[#allocation160_spill] sm:$0xff] %v11084_v63  ;;  %8063 = vrot.lane.b32.xlu1 %v8057_v53, %s9449_s0  ;;  %v1007_v63 = vpop.f32.mrf.mxu1  ;;  %19995 = vst [vmem:[#allocation163_spill] sm:$0xff] %v11107_v46  ;;  %v1353_v19 = vsel %vm1288_vm7, %v7530_v57, %v7550_v48  ;;  %v20012_v60 = vunpack.i.h.bf16 %v20002_v49 }
 0x26c   :  { %8083 = vrot.lane.b32.xlu0 %v8077_v8, %s9449_s0  ;;  %v11112_v8 = vadd.f32 %v1003_v30, %v19986_v3  ;;  %19998 = vst [vmem:[#allocation166_spill] sm:$0xff] %v11120_v41  ;;  %19999 = vst [vmem:[#allocation167_spill] sm:$0xff] %v11127_v15  ;;  %v20000_v3 = vld [vmem:[#allocation73_spill] sm:$0xff]  ;;  %v8097_v6 = vpack.i.bf16 %v11107_v46, %v11120_v41  ;;  %v7540_v30 = vunpack.i.l.bf16 %v10659_v40 }
 0x26d   :  { %v11096_v11 = vpop.permute.xlu1 %7798  ;;  %v11114_v33 = vpop.f32.mrf.mxu1  ;;  %v20010_v31 = vunpack.i.l.bf16 %v20000_v3  ;;  %v20013_v28 = vunpack.i.h.bf16 %v20000_v3  ;;  %v11199_v56 = vadd.f32 %v1007_v63, %v20017_v23  ;;  %v20022_v63 = vunpack.i.h.bf16 %v10699_v32 }
 0x26e   :  { %19993 = vst [vmem:[#allocation161_spill] sm:$0xff] %v11096_v11  ;;  %v11100_v1 = vpop.permute.xlu0 %7803  ;;  %19996 = vst [vmem:[#allocation164_spill] sm:$0xff] %v11112_v8  ;;  %v8117_v10 = vpack.i.bf16 %v11112_v8, %v11127_v15  ;;  %v7560_v11 = vunpack.i.l.bf16 %v10693_v7 }
 0x26f   :  { %19994 = vst [vmem:[#allocation162_spill] sm:$0xff] %v11100_v1  ;;  %8088 = vrot.lane.b32.xlu1 %v8087_v58, %s9448_s30  ;;  %v11188_v26 = vsel %vm1288_vm7, %v20013_v28, %v20012_v60  ;;  %20018 = vst [vmem:[#allocation49_spill] sm:$0xff] %v11199_v56  ;;  %v20020_v60 = vunpack.i.l.bf16 %v20003_v5 }
 0x270   :  { %8108 = vrot.lane.b32.xlu0 %v8107_v52, %s9448_s30  ;;  %20014 = vst [vmem:[#allocation171_spill] sm:$0xff] %v11188_v26 }
 0x271   :  { %v11109_v53 = vpop.permute.xlu1 %7813 }
 0x272   :  { %v11116_v29 = vpop.permute.xlu0 %7808  ;;  %v7815_v3 = vunpack.i.l.bf16 %v11109_v53 }
 0x273   :  { %19997 = vst [vmem:[#allocation165_spill] sm:$0xff] %v11116_v29  ;;  %8093 = vrot.lane.b32.xlu1 %v8087_v58, %s9449_s0 }
 0x274   :  { %8113 = vrot.lane.b32.xlu0 %v8107_v52, %s9449_s0  ;;  %v1013_v52 = vpop.f32.mrf.mxu1 }
 0x275   :  { %v11135_v58 = vpop.permute.xlu1 %7823 }
 0x276   :  { %v11142_v29 = vpop.permute.xlu0 %7818  ;;  %v7825_v8 = vunpack.i.l.bf16 %v11135_v58  ;;  %v1015_v25 = vpop.f32.mrf.mxu1 }
 0x277   :  { %20001 = vst [vmem:[#allocation168_spill] sm:$0xff] %v11142_v29  ;;  %8098 = vrot.lane.b32.xlu1 %v8097_v6, %s9448_s30  ;;  %v20004_v29 = vld [vmem:[#allocation47_spill] sm:$0xff] }
 0x278   :  { %8118 = vrot.lane.b32.xlu0 %v8117_v10, %s9448_s30  ;;  %v11157_v41 = vadd.f32 %v1013_v52, %v20004_v29  ;;  %v20009_v52 = vunpack.i.l.bf16 %v20002_v49  ;;  %v19353_v49 = vunpack.i.h.bf16 %v10763_v12 }
 0x279   :  { %v11159_v46 = vpop.permute.xlu1 %7833 }
 0x27a   :  { %20005 = vst [vmem:[#allocation47_spill] sm:$0xff] %v11157_v41  ;;  %v7835_v15 = vunpack.i.l.bf16 %v11159_v46  ;;  %v11172_v1 = vpop.permute.xlu0 %7828  ;;  %v11180_v50 = vsel %vm1288_vm7, %v20010_v31, %v20009_v52  ;;  %v1738_v31 = vsel %vm1673_vm8, %v7540_v30, %v7560_v11  ;;  %v20019_v52 = vunpack.i.l.bf16 %v10699_v32 }
 0x27b   :  { %20008 = vst [vmem:[#allocation169_spill] sm:$0xff] %v11172_v1  ;;  %20011 = vst [vmem:[#allocation170_spill] sm:$0xff] %v11180_v50  ;;  %v20016_v1 = vunpack.i.h.bf16 %v10659_v40  ;;  %8103 = vrot.lane.b32.xlu1 %v8097_v6, %s9449_s0  ;;  %v20023_v6 = vunpack.i.h.bf16 %v20003_v5  ;;  %v11232_v50 = vpop.f32.mrf.mxu1  ;;  %v11250_v32 = vadd.f32 %v1015_v25, %v20004_v29  ;;  %v11266_v29 = vadd.f32 %v11114_v33, %v20017_v23  ;;  %v20035_v33 = vld [vmem:[#allocation2_spill] sm:$0xff] }
 0x27c   :  { %v11210_v28 = vsel %vm1673_vm8, %v20020_v60, %v20019_v52  ;;  %8123 = vrot.lane.b32.xlu0 %v8117_v10, %s9449_s0  ;;  %v8127_v60 = vpack.i.bf16 %v11157_v41, %v11199_v56  ;;  %v1385_v5 = vsel %vm1288_vm7, %v7835_v15, %v7530_v57  ;;  %v1321_v57 = vsel %vm1288_vm7, %v7550_v48, %v7815_v3 }
 0x27d   :  { %v11196_v36 = vsel %vm1673_vm8, %v20016_v1, %v20015_v44  ;;  %20021 = vst [vmem:[#allocation172_spill] sm:$0xff] %v11210_v28  ;;  %v1706_v1 = vsel %vm1673_vm8, %v7560_v11, %v7825_v8  ;;  %v11222_v44 = vsel %vm1673_vm8, %v20023_v6, %v20022_v63  ;;  %v11228_v28 = vpop.permute.xlu1 %7843  ;;  %v20025_v11 = vld [vmem:[#allocation86_spill] sm:$0xff]  ;;  %20027 = vst [vmem:[#allocation174_spill] sm:$0xff] %v11250_v32  ;;  %v11257_v10 = vpop.f32.mrf.mxu1 }
 0x27e   :  { %20024 = vst [vmem:[#allocation173_spill] sm:$0xff] %v11222_v44  ;;  %v7845_v63 = vunpack.i.l.bf16 %v11228_v28  ;;  %v11237_v6 = vpop.permute.xlu0 %7838  ;;  %v1803_v56 = vmax.f32 %v1353_v19, %v1706_v1  ;;  %v1802_v26 = vmax.f32 %v1385_v5, %v1738_v31  ;;  %v20029_v19 = vld [vmem:[#allocation93_spill] sm:$0xff]  ;;  %v1289_v25 = vsel %vm1288_vm7, %v7815_v3, %v7835_v15 }
 0x27f   :  { %20026 = vst [vmem:[#allocation86_spill] sm:$0xff] %v11237_v6  ;;  %8128 = vrot.lane.b32.xlu1 %v8127_v60, %s9448_s30  ;;  %v19351_v1 = vunpack.i.h.bf16 %v20029_v19  ;;  %v19350_v41 = vunpack.i.l.bf16 %v20029_v19  ;;  %20030 = vst [vmem:[#allocation93_spill] sm:$0xff] %v11266_v29  ;;  %v20033_v31 = vld [vmem:[#allocation69_spill] sm:$0xff]  ;;  %v8137_v23 = vpack.i.bf16 %v11250_v32, %v11266_v29  ;;  %v20041_v3 = vunpack.i.h.bf16 %v10741_v47 }
 0x280   :  { %v1674_v44 = vsel %vm1673_vm8, %v7825_v8, %v7845_v63  ;;  %v1770_v48 = vsel %vm1673_vm8, %v7845_v63, %v7540_v30  ;;  %v20031_v8 = vld [vmem:[#allocation8_spill] sm:$0xff]  ;;  %v20039_v63 = vunpack.i.l.bf16 %v10706_v27  ;;  %v20044_v30 = vunpack.i.l.bf16 %v20025_v11 }
 0x281   :  { %v1804_v52 = vmax.f32 %v1321_v57, %v1674_v44  ;;  %v11252_v6 = vpop.permute.xlu1 %7848  ;;  %v11269_v5 = vmax.f32 %v20031_v8, %v1803_v56  ;;  %v11283_v56 = vmax.f32 %v20035_v33, %v1802_v26  ;;  %v1805_v8 = vmax.f32 %v1289_v25, %v1770_v48  ;;  %v1025_v25 = vpop.f32.mrf.mxu1 }
 0x282   :  { %20028 = vst [vmem:[#allocation175_spill] sm:$0xff] %v11252_v6  ;;  %v11261_v2 = vpop.permute.xlu0 %7853  ;;  %v20038_v57 = vunpack.i.l.bf16 %v10741_v47  ;;  %v20042_v26 = vunpack.i.h.bf16 %v10706_v27  ;;  %v20052_v32 = vunpack.i.l.bf16 %v10733_v55  ;;  %v20061_v27 = vunpack.i.h.bf16 %v10639_v54 }
 0x283   :  { %20032 = vst [vmem:[#allocation8_spill] sm:$0xff] %v11269_v5  ;;  %v11272_v44 = vmax.f32 %v20033_v31, %v1804_v52  ;;  %8133 = vrot.lane.b32.xlu1 %v8127_v60, %s9449_s0  ;;  %20036 = vst [vmem:[#allocation2_spill] sm:$0xff] %v11283_v56  ;;  %v7855_v54 = vunpack.i.l.bf16 %v11261_v2 }
 0x284   :  { %v11296_v15 = vsel %vm1288_vm7, %v20039_v63, %v20038_v57  ;;  %v11304_v48 = vsel %vm1288_vm7, %v20042_v26, %v20041_v3  ;;  %v11315_v57 = vsel %vm1288_vm7, %v20044_v30, %v19350_v41  ;;  %v20045_v63 = vunpack.i.h.bf16 %v20025_v11 }
 0x285   :  { %20034 = vst [vmem:[#allocation69_spill] sm:$0xff] %v11272_v44  ;;  %v11285_v52 = vpop.permute.xlu1 %7858  ;;  %v8147_v60 = vpack.i.bf16 %v11272_v44, %v11269_v5  ;;  %20040 = vst [vmem:[#allocation177_spill] sm:$0xff] %v11296_v15  ;;  %v20046_v26 = vunpack.i.h.bf16 %v10727_v16  ;;  %v20048_v30 = vunpack.i.l.bf16 %v10763_v12  ;;  %v20049_v41 = vunpack.i.l.bf16 %v10727_v16 }
 0x286   :  { %20037 = vst [vmem:[#allocation176_spill] sm:$0xff] %v11285_v52  ;;  %20043 = vst [vmem:[#allocation178_spill] sm:$0xff] %v11304_v48  ;;  %v11307_v31 = vpop.permute.xlu0 %7863  ;;  %v11323_v3 = vsel %vm1288_vm7, %v20045_v63, %v19351_v1  ;;  %v20051_v1 = vunpack.i.l.bf16 %v10769_v61  ;;  %v20055_v16 = vunpack.i.h.bf16 %v11135_v58  ;;  %v8152_v48 = vpack.i.bf16 %v11269_v5, %v11283_v56  ;;  %v20063_v5 = vld [vmem:[#allocation60_spill] sm:$0xff] }
 0x287   :  { %v11331_v33 = vsel %vm1673_vm8, %v20046_v26, %v19353_v49  ;;  %8138 = vrot.lane.b32.xlu1 %v8137_v23, %s9448_s30  ;;  %8148 = vrot.lane.b32.xlu0 %v8147_v60, %s9453_s1  ;;  %v11341_v63 = vsel %vm1673_vm8, %v20049_v41, %v20048_v30  ;;  %v20053_v49 = vunpack.i.h.bf16 %v10769_v61  ;;  %v20054_v60 = vunpack.i.h.bf16 %v10733_v55 }
 0x288   :  { %20047 = vst [vmem:[#allocation179_spill] sm:$0xff] %v11331_v33  ;;  %20050 = vst [vmem:[#allocation180_spill] sm:$0xff] %v11341_v63  ;;  %v11349_v26 = vsel %vm1673_vm8, %v20052_v32, %v20051_v1  ;;  %v20056_v41 = vunpack.i.h.bf16 %v10693_v7  ;;  %v20057_v63 = vld [vmem:[#allocation57_spill] sm:$0xff]  ;;  %v20059_v32 = vld [vmem:[#allocation74_spill] sm:$0xff] }
 0x289   :  { %v11357_v29 = vsel %vm1673_vm8, %v20054_v60, %v20053_v49  ;;  %v11366_v33 = vadd.f32 %v1025_v25, %v20057_v63  ;;  %v11369_v1 = vmax.f32 %v20059_v32, %v1805_v8  ;;  %v11371_v15 = vpop.permute.xlu1 %7868  ;;  %v11390_v49 = vadd.f32 %v11232_v50, %v20063_v5  ;;  %v1027_v50 = vpop.f32.mrf.mxu1 }
 0x28a   :  { %v1707_v30 = vsel %vm1673_vm8, %v20056_v41, %v20055_v16  ;;  %v20062_v16 = vunpack.i.h.bf16 %v11159_v46  ;;  %v11384_v8 = vpop.permute.xlu0 %7873 }
 0x28b   :  { %20058 = vst [vmem:[#allocation57_spill] sm:$0xff] %v11366_v33  ;;  %20060 = vst [vmem:[#allocation74_spill] sm:$0xff] %v11369_v1  ;;  %v1807_v60 = vmax.f32 %v11169_v24, %v1707_v30  ;;  %8143 = vrot.lane.b32.xlu1 %v8137_v23, %s9449_s0  ;;  %8153 = vrot.lane.b32.xlu0 %v8152_v48, %s9454_s2  ;;  %v8162_v32 = vpack.i.bf16 %v11366_v33, %v11390_v49  ;;  %v7846_v24 = vunpack.i.h.bf16 %v11228_v28 }
 0x28c   :  { %v1386_v25 = vsel %vm1288_vm7, %v20062_v16, %v20061_v27  ;;  %20064 = vst [vmem:[#allocation60_spill] sm:$0xff] %v11390_v49  ;;  %v8157_v48 = vpack.i.bf16 %v11369_v1, %v11272_v44  ;;  %v20066_v27 = vunpack.i.l.bf16 %v10813_v43  ;;  %v20067_v16 = vunpack.i.l.bf16 %v10777_v37  ;;  %v20070_v44 = vld [vmem:[#allocation6_spill] sm:$0xff] }
 0x28d   :  { %v1806_v7 = vmax.f32 %v1386_v25, %v11196_v36  ;;  %v11403_v23 = vpop.permute.xlu1 %7878  ;;  %v20068_v25 = vunpack.i.h.bf16 %v10813_v43  ;;  %v20069_v49 = vunpack.i.h.bf16 %v10777_v37  ;;  %v7816_v33 = vunpack.i.h.bf16 %v11109_v53 }
 0x28e   :  { %20065 = vst [vmem:[#allocation181_spill] sm:$0xff] %v11403_v23  ;;  %v11414_v41 = vsel %vm1288_vm7, %v20067_v16, %v20066_v27  ;;  %v11418_v28 = vpop.permute.xlu0 %7883  ;;  %v11430_v47 = vmax.f32 %v20070_v44, %v1807_v60  ;;  %v11436_v16 = vadd.f32 %v1027_v50, %v20057_v63  ;;  %v7865_v36 = vunpack.i.l.bf16 %v11307_v31 }
 0x28f   :  { %v11426_v30 = vsel %vm1288_vm7, %v20069_v49, %v20068_v25  ;;  %v7885_v27 = vunpack.i.l.bf16 %v11418_v28  ;;  %8158 = vrot.lane.b32.xlu1 %v8157_v48, %s9454_s2  ;;  %8163 = vrot.lane.b32.xlu0 %v8162_v32, %s9448_s30  ;;  %v20073_v49 = vld [vmem:[#allocation3_spill] sm:$0xff]  ;;  %v20075_v53 = vunpack.i.h.bf16 %v10659_v40  ;;  %v20076_v60 = vunpack.i.h.bf16 %v11135_v58 }
 0x290   :  { %20071 = vst [vmem:[#allocation6_spill] sm:$0xff] %v11430_v47  ;;  %20072 = vst [vmem:[#allocation182_spill] sm:$0xff] %v11436_v16  ;;  %v11441_v25 = vmax.f32 %v20073_v49, %v1806_v7  ;;  %v8172_v63 = vpack.i.bf16 %v11430_v47, %v11369_v1  ;;  %v11464_v58 = vadd.f32 %v11257_v10, %v20063_v5  ;;  %v20079_v50 = vunpack.i.h.bf16 %v11159_v46 }
 0x291   :  { %v1771_v44 = vsel %vm1673_vm8, %v7846_v24, %v20075_v53  ;;  %v1675_v48 = vsel %vm1673_vm8, %v20076_v60, %v7846_v24  ;;  %v11451_v12 = vpop.permute.xlu1 %7888  ;;  %v1676_v40 = vsel %vm1673_vm8, %v7865_v36, %v7885_v27  ;;  %v20078_v24 = vunpack.i.h.bf16 %v10672_v42 }
 0x292   :  { %20074 = vst [vmem:[#allocation3_spill] sm:$0xff] %v11441_v25  ;;  %v11460_v53 = vpop.permute.xlu0 %7908  ;;  %20077 = vst [vmem:[#allocation183_spill] sm:$0xff] %v11464_v58  ;;  %v1290_v7 = vsel %vm1288_vm7, %v7816_v33, %v20079_v50  ;;  %v7875_v49 = vunpack.i.l.bf16 %v11384_v8  ;;  %v20080_v10 = vunpack.i.l.bf16 %v20029_v19  ;;  %v20081_v5 = vunpack.i.l.bf16 %v10769_v61 }
 0x293   :  { %v1322_v60 = vsel %vm1288_vm7, %v20078_v24, %v7816_v33  ;;  %8173 = vrot.lane.b32.xlu1 %v8172_v63, %s9453_s1  ;;  %8168 = vrot.lane.b32.xlu0 %v8162_v32, %s9449_s0  ;;  %v1809_v23 = vmax.f32 %v1290_v7, %v1771_v44  ;;  %v20082_v33 = vunpack.i.l.bf16 %v10821_v13  ;;  %v20083_v50 = vunpack.i.l.bf16 %v10785_v14 }
 0x294   :  { %v1808_v1 = vmax.f32 %v1322_v60, %v1675_v48  ;;  %v1323_v42 = vsel %vm1288_vm7, %v20080_v10, %v7855_v54  ;;  %v1708_v46 = vsel %vm1673_vm8, %v20081_v5, %v7865_v36  ;;  %v8177_v32 = vpack.i.bf16 %v11436_v16, %v11464_v58  ;;  %v20096_v58 = vld [vmem:[#allocation67_spill] sm:$0xff] }
 0x295   :  { %v11491_v63 = vsel %vm1288_vm7, %v20083_v50, %v20082_v33  ;;  %v1812_v44 = vmax.f32 %v1323_v42, %v1676_v40  ;;  %v11495_v48 = vpop.permute.xlu1 %7893  ;;  %v8187_v7 = vpack.i.bf16 %v11441_v25, %v11283_v56  ;;  %v20085_v24 = vunpack.i.h.bf16 %v10821_v13 }
 0x296   :  { %20084 = vst [vmem:[#allocation184_spill] sm:$0xff] %v11491_v63  ;;  %v20086_v36 = vunpack.i.h.bf16 %v10785_v14  ;;  %v20088_v10 = vunpack.i.l.bf16 %v10835_v18  ;;  %v20089_v5 = vunpack.i.l.bf16 %v10799_v35  ;;  %v20090_v42 = vunpack.i.h.bf16 %v10835_v18 }
 0x297   :  { %v20091_v33 = vunpack.i.h.bf16 %v10799_v35  ;;  %v20093_v16 = vunpack.i.l.bf16 %v10805_v17  ;;  %v20095_v56 = vunpack.i.l.bf16 %v20025_v11  ;;  %8188 = vrot.lane.b32.xlu1 %v8187_v7, %s9453_s1  ;;  %8178 = vrot.lane.b32.xlu0 %v8177_v32, %s9448_s30  ;;  %v11543_v14 = vmax.f32 %v20096_v58, %v1808_v1 }
 0x298   :  { %v11505_v60 = vsel %vm1288_vm7, %v20086_v36, %v20085_v24  ;;  %v11513_v40 = vsel %vm1673_vm8, %v20089_v5, %v20088_v10  ;;  %v11524_v24 = vpop.permute.xlu0 %7913  ;;  %v20092_v36 = vunpack.i.l.bf16 %v10841_v62  ;;  %v1811_v5 = vmax.f32 %v11315_v57, %v1708_v46  ;;  %v20117_v46 = vld [vmem:[#allocation78_spill] sm:$0xff] }
 0x299   :  { %20087 = vst [vmem:[#allocation185_spill] sm:$0xff] %v11505_v60  ;;  %v11521_v50 = vsel %vm1673_vm8, %v20091_v33, %v20090_v42  ;;  %v1387_v42 = vsel %vm1288_vm7, %v7875_v49, %v20095_v56  ;;  %v7886_v33 = vunpack.i.h.bf16 %v11418_v28  ;;  %20097 = vst [vmem:[#allocation67_spill] sm:$0xff] %v11543_v14  ;;  %v20098_v60 = vld [vmem:[#allocation71_spill] sm:$0xff]  ;;  %v7866_v57 = vunpack.i.h.bf16 %v11307_v31  ;;  %v11554_v28 = vpop.permute.xlu1 %7898 }
 0x29a   :  { %v11532_v10 = vsel %vm1673_vm8, %v20093_v16, %v20092_v36  ;;  %v11546_v63 = vmax.f32 %v20098_v60, %v1809_v23  ;;  %v7856_v16 = vunpack.i.h.bf16 %v11261_v2  ;;  %v20100_v36 = vld [vmem:[#allocation81_spill] sm:$0xff]  ;;  %v8197_v7 = vpack.i.bf16 %v11430_v47, %v11441_v25 }
 0x29b   :  { %20094 = vst [vmem:[#allocation186_spill] sm:$0xff] %v11532_v10  ;;  %v11552_v56 = vmax.f32 %v20100_v36, %v1812_v44  ;;  %v20102_v1 = vunpack.i.h.bf16 %v10841_v62  ;;  %v20103_v58 = vunpack.i.h.bf16 %v10805_v17  ;;  %v1810_v31 = vmax.f32 %v1387_v42, %v11349_v26  ;;  %v20106_v47 = vld [vmem:[#allocation17_spill] sm:$0xff]  ;;  %8183 = vrot.lane.b32.xlu0 %v8177_v32, %s9449_s0 }
 0x29c   :  { %20099 = vst [vmem:[#allocation71_spill] sm:$0xff] %v11546_v63  ;;  %v20105_v44 = vunpack.i.l.bf16 %v10733_v55  ;;  %v11572_v36 = vpop.permute.xlu0 %7918  ;;  %v11576_v25 = vmax.f32 %v20106_v47, %v1811_v5  ;;  %8198 = vrot.lane.b32.xlu1 %v8197_v7, %s9454_s2  ;;  %v1291_v5 = vsel %vm1288_vm7, %v7855_v54, %v7875_v49  ;;  %v8192_v32 = vpack.i.bf16 %v11546_v63, %v11543_v14  ;;  %v20144_v14 = vld [vmem:[#allocation131_spill] sm:$0xff] }
 0x29d   :  { %20101 = vst [vmem:[#allocation81_spill] sm:$0xff] %v11552_v56  ;;  %v11564_v23 = vsel %vm1673_vm8, %v20103_v58, %v20102_v1  ;;  %v1677_v1 = vsel %vm1673_vm8, %v7866_v57, %v7886_v33  ;;  %v20108_v58 = vunpack.i.h.bf16 %v10733_v55  ;;  %v20110_v55 = vunpack.i.h.bf16 %v11384_v8 }
 0x29e   :  { %20104 = vst [vmem:[#allocation187_spill] sm:$0xff] %v11564_v23  ;;  %v1772_v60 = vsel %vm1673_vm8, %v7885_v27, %v20105_v44  ;;  %20107 = vst [vmem:[#allocation17_spill] sm:$0xff] %v11576_v25  ;;  %v20109_v44 = vunpack.i.h.bf16 %v20029_v19  ;;  %v8207_v19 = vpack.i.bf16 %v11552_v56, %v11576_v25  ;;  %v20155_v17 = vunpack.i.l.bf16 %v20144_v14 }
 0x29f   :  { %v1773_v26 = vsel %vm1673_vm8, %v7886_v33, %v20108_v58  ;;  %v1292_v33 = vsel %vm1288_vm7, %v7856_v16, %v20110_v55  ;;  %v1813_v7 = vmax.f32 %v1291_v5, %v1772_v60  ;;  %v11598_v58 = vpop.permute.xlu1 %7903  ;;  %8193 = vrot.lane.b32.xlu0 %v8192_v32, %s9453_s1  ;;  %v20158_v10 = vunpack.i.h.bf16 %v20144_v14  ;;  %v20176_v14 = vld [vmem:[#allocation137_spill] sm:$0xff] }
 0x2a0   :  { %v1324_v47 = vsel %vm1288_vm7, %v20109_v44, %v7856_v16  ;;  %v20111_v44 = vld [vmem:[#allocation13_spill] sm:$0xff]  ;;  %v1817_v49 = vmax.f32 %v1292_v33, %v1773_v26  ;;  %v11608_v2 = vpop.permute.xlu0 %7923  ;;  %8208 = vrot.lane.b32.xlu1 %v8207_v19, %s9453_s1  ;;  %v20113_v26 = vunpack.i.h.bf16 %v10769_v61  ;;  %v20114_v16 = vld [vmem:[#allocation88_spill] sm:$0xff]  ;;  %v20116_v19 = vld [vmem:[#allocation115_spill] sm:$0xff]  ;;  %v20128_v33 = vunpack.i.l.bf16 %v10893_v34 }
 0x2a1   :  { %v11606_v42 = vmax.f32 %v20111_v44, %v1810_v31  ;;  %v1816_v54 = vmax.f32 %v1324_v47, %v1677_v1  ;;  %v11626_v55 = vmax.f32 %v20114_v16, %v1813_v7  ;;  %v20119_v1 = vld [vmem:[#allocation85_spill] sm:$0xff]  ;;  %v20122_v7 = vunpack.i.l.bf16 %v10885_v9 }
 0x2a2   :  { %v1709_v47 = vsel %vm1673_vm8, %v20113_v26, %v7866_v57  ;;  %v11635_v5 = vmax.f32 %v20119_v1, %v1817_v49  ;;  %v20123_v16 = vunpack.i.l.bf16 %v10849_v20  ;;  %v20129_v26 = vunpack.i.l.bf16 %v10857_v45 }
 0x2a3   :  { %20112 = vst [vmem:[#allocation13_spill] sm:$0xff] %v11606_v42  ;;  %20115 = vst [vmem:[#allocation88_spill] sm:$0xff] %v11626_v55  ;;  %v11628_v60 = vpop.permute.xlu1 %7928  ;;  %v11632_v31 = vmax.f32 %v20117_v46, %v1816_v54  ;;  %v8212_v57 = vpack.i.bf16 %v11576_v25, %v11606_v42  ;;  %v20125_v46 = vunpack.i.h.bf16 %v10885_v9  ;;  %v20126_v54 = vunpack.i.h.bf16 %v10849_v20  ;;  %8203 = vrot.lane.b32.xlu0 %v8192_v32, %s9454_s2 }
 0x2a4   :  { %20120 = vst [vmem:[#allocation78_spill] sm:$0xff] %v11635_v5  ;;  %v11637_v61 = vpop.permute.xlu0 %7948  ;;  %v11648_v27 = vsel %vm1288_vm7, %v20123_v16, %v20122_v7  ;;  %v1815_v1 = vmax.f32 %v11323_v3, %v1709_v47  ;;  %v11666_v7 = vsel %vm1288_vm7, %v20129_v26, %v20128_v33  ;;  %v20130_v16 = vunpack.i.h.bf16 %v10893_v34 }
 0x2a5   :  { %20118 = vst [vmem:[#allocation115_spill] sm:$0xff] %v11632_v31  ;;  %20121 = vst [vmem:[#allocation85_spill] sm:$0xff] %v11637_v61  ;;  %v11656_v49 = vsel %vm1288_vm7, %v20126_v54, %v20125_v46  ;;  %v20131_v44 = vunpack.i.h.bf16 %v10857_v45  ;;  %v20132_v3 = vunpack.i.l.bf16 %v10907_v22  ;;  %v20133_v32 = vunpack.i.l.bf16 %v10871_v39  ;;  %8213 = vrot.lane.b32.xlu1 %v8212_v57, %s9454_s2 }
 0x2a6   :  { %20124 = vst [vmem:[#allocation188_spill] sm:$0xff] %v11648_v27  ;;  %20127 = vst [vmem:[#allocation189_spill] sm:$0xff] %v11656_v49  ;;  %v20135_v54 = vunpack.i.h.bf16 %v10907_v22  ;;  %v20136_v33 = vunpack.i.h.bf16 %v10871_v39  ;;  %v8217_v57 = vpack.i.bf16 %v11626_v55, %v11552_v56  ;;  %v20145_v27 = vld [vmem:[#allocation134_spill] sm:$0xff]  ;;  %v7890_v9 = vunpack.i.l.bf16 %v11451_v12 }
 0x2a7   :  { %v11674_v46 = vsel %vm1288_vm7, %v20131_v44, %v20130_v16  ;;  %v11682_v47 = vsel %vm1673_vm8, %v20133_v32, %v20132_v3  ;;  %v20138_v44 = vunpack.i.l.bf16 %v10911_v21  ;;  %v20139_v16 = vunpack.i.l.bf16 %v20116_v19 }
 0x2a8   :  { %20134 = vst [vmem:[#allocation190_spill] sm:$0xff] %v11682_v47  ;;  %v11690_v26 = vsel %vm1673_vm8, %v20136_v33, %v20135_v54  ;;  %v20140_v3 = vunpack.i.h.bf16 %v10911_v21  ;;  %v20141_v32 = vunpack.i.h.bf16 %v20116_v19  ;;  %v11710_v33 = vpop.permute.xlu1 %7933  ;;  %v11717_v39 = vpop.permute.xlu0 %7953  ;;  %v8232_v47 = vpack.i.bf16 %v11635_v5, %v11632_v31  ;;  %8218 = vrot.lane.b32.xlu0 %v8217_v57, %s9454_s2 }
 0x2a9   :  { %20137 = vst [vmem:[#allocation191_spill] sm:$0xff] %v11690_v26  ;;  %v11699_v25 = vsel %vm1673_vm8, %v20139_v16, %v20138_v44  ;;  %v20142_v26 = vld [vmem:[#allocation15_spill] sm:$0xff]  ;;  %v7905_v54 = vunpack.i.l.bf16 %v11598_v58  ;;  %v20149_v31 = vunpack.i.l.bf16 %v10953_v4  ;;  %v20150_v5 = vunpack.i.l.bf16 %v10919_v38 }
 0x2aa   :  { %v11707_v63 = vsel %vm1673_vm8, %v20141_v32, %v20140_v3  ;;  %v11725_v20 = vmax.f32 %v20142_v26, %v1815_v1  ;;  %8233 = vrot.lane.b32.xlu1 %v8232_v47, %s9453_s1  ;;  %v20146_v3 = vld [vmem:[#allocation128_spill] sm:$0xff]  ;;  %v20147_v16 = vld [vmem:[#allocation135_spill] sm:$0xff]  ;;  %v7900_v57 = vunpack.i.l.bf16 %v11554_v28  ;;  %v20152_v44 = vunpack.i.h.bf16 %v10953_v4 }
 0x2ab   :  { %v11751_v32 = vsel %vm1288_vm7, %v20150_v5, %v20149_v31  ;;  %v20153_v56 = vunpack.i.h.bf16 %v10919_v38  ;;  %v20156_v5 = vunpack.i.l.bf16 %v10927_v59  ;;  %v20161_v13 = vunpack.i.l.bf16 %v20145_v27 }
 0x2ac   :  { %20143 = vst [vmem:[#allocation15_spill] sm:$0xff] %v11725_v20  ;;  %v11736_v1 = vpop.permute.xlu1 %7938  ;;  %v8222_v26 = vpack.i.bf16 %v11725_v20, %v11626_v55  ;;  %v11743_v49 = vpop.permute.xlu0 %7958  ;;  %20151 = vst [vmem:[#allocation192_spill] sm:$0xff] %v11751_v32  ;;  %v7895_v55 = vunpack.i.l.bf16 %v11495_v48  ;;  %v20179_v32 = vunpack.i.l.bf16 %v10813_v43 }
 0x2ad   :  { %20148 = vst [vmem:[#allocation134_spill] sm:$0xff] %v11743_v49  ;;  %v11763_v22 = vsel %vm1288_vm7, %v20153_v56, %v20152_v44  ;;  %v11771_v31 = vsel %vm1288_vm7, %v20156_v5, %v20155_v17  ;;  %v20162_v56 = vunpack.i.l.bf16 %v10941_v51  ;;  %v20164_v17 = vunpack.i.h.bf16 %v20145_v27 }
 0x2ae   :  { %8223 = vrot.lane.b32.xlu0 %v8222_v26, %s9453_s1  ;;  %20154 = vst [vmem:[#allocation193_spill] sm:$0xff] %v11763_v22  ;;  %20157 = vst [vmem:[#allocation194_spill] sm:$0xff] %v11771_v31  ;;  %v20159_v26 = vunpack.i.h.bf16 %v10927_v59  ;;  %8243 = vrot.lane.b32.xlu1 %v8232_v47, %s9454_s2  ;;  %v20165_v5 = vunpack.i.h.bf16 %v10941_v51  ;;  %v20169_v47 = vunpack.i.l.bf16 %v10799_v35  ;;  %v20184_v22 = vld [vmem:[#allocation147_spill] sm:$0xff]  ;;  %v20189_v49 = vunpack.i.h.bf16 %v10835_v18 }
 0x2af   :  { %v11787_v44 = vsel %vm1673_vm8, %v20162_v56, %v20161_v13  ;;  %v1678_v13 = vsel %vm1673_vm8, %v7895_v55, %v7905_v54 }
 0x2b0   :  { %v11779_v23 = vsel %vm1288_vm7, %v20159_v26, %v20158_v10  ;;  %20163 = vst [vmem:[#allocation196_spill] sm:$0xff] %v11787_v44  ;;  %v11796_v59 = vsel %vm1673_vm8, %v20165_v5, %v20164_v17  ;;  %v20167_v10 = vunpack.i.h.bf16 %v20025_v11  ;;  %v20168_v26 = vunpack.i.h.bf16 %v11384_v8  ;;  %v11810_v31 = vpop.permute.xlu1 %7943  ;;  %v11830_v62 = vpop.permute.xlu0 %7963  ;;  %v20178_v44 = vld [vmem:[#allocation139_spill] sm:$0xff] }
 0x2b1   :  { %20160 = vst [vmem:[#allocation195_spill] sm:$0xff] %v11779_v23  ;;  %20166 = vst [vmem:[#allocation197_spill] sm:$0xff] %v11796_v59  ;;  %v1774_v56 = vsel %vm1673_vm8, %v7905_v54, %v20169_v47  ;;  %v20170_v17 = vunpack.i.l.bf16 %v20147_v16  ;;  %v20171_v5 = vunpack.i.l.bf16 %v20146_v3  ;;  %v20173_v8 = vunpack.i.h.bf16 %v20147_v16  ;;  %v20187_v59 = vld [vmem:[#allocation150_spill] sm:$0xff]  ;;  %v20196_v16 = vld [vmem:[#allocation100_spill] sm:$0xff] }
 0x2b2   :  { %v1388_v23 = vsel %vm1288_vm7, %v20168_v26, %v20167_v10  ;;  %v20174_v10 = vunpack.i.h.bf16 %v20146_v3  ;;  %20177 = vst [vmem:[#allocation200_spill] sm:$0xff] %v11830_v62  ;;  %v1293_v3 = vsel %vm1288_vm7, %v7890_v9, %v7900_v57  ;;  %v20181_v62 = vld [vmem:[#allocation145_spill] sm:$0xff] }
 0x2b3   :  { %v11818_v11 = vsel %vm1673_vm8, %v20171_v5, %v20170_v17  ;;  %v1325_v17 = vsel %vm1288_vm7, %v20179_v32, %v7890_v9  ;;  %v1821_v47 = vmax.f32 %v1293_v3, %v1774_v56  ;;  %v20183_v5 = vld [vmem:[#allocation143_spill] sm:$0xff]  ;;  %v20186_v3 = vld [vmem:[#allocation149_spill] sm:$0xff] }
 0x2b4   :  { %20172 = vst [vmem:[#allocation198_spill] sm:$0xff] %v11818_v11  ;;  %v11826_v26 = vsel %vm1673_vm8, %v20174_v10, %v20173_v8  ;;  %v1814_v8 = vmax.f32 %v1388_v23, %v11357_v29  ;;  %v1820_v54 = vmax.f32 %v1325_v17, %v1678_v13  ;;  %v20180_v11 = vld [vmem:[#allocation142_spill] sm:$0xff]  ;;  %v11846_v32 = vpop.permute.xlu1 %7968  ;;  %v11852_v13 = vpop.permute.xlu0 %7988  ;;  %v20190_v9 = vld [vmem:[#allocation11_spill] sm:$0xff]  ;;  %v20192_v29 = vunpack.i.h.bf16 %v10777_v37 }
 0x2b5   :  { %20175 = vst [vmem:[#allocation199_spill] sm:$0xff] %v11826_v26  ;;  %20182 = vst [vmem:[#allocation139_spill] sm:$0xff] %v11846_v32  ;;  %v20188_v26 = vunpack.i.h.bf16 %v11495_v48  ;;  %v20193_v23 = vunpack.i.h.bf16 %v11554_v28  ;;  %v20194_v17 = vld [vmem:[#allocation94_spill] sm:$0xff]  ;;  %v11876_v32 = vmax.f32 %v20196_v16, %v1821_v47  ;;  %v20203_v16 = vunpack.i.h.bf16 %v20181_v62 }
 0x2b6   :  { %20185 = vst [vmem:[#allocation143_spill] sm:$0xff] %v11852_v13  ;;  %v11864_v10 = vmax.f32 %v20190_v9, %v1814_v8  ;;  %v11873_v13 = vmax.f32 %v20194_v17, %v1820_v54  ;;  %v20204_v47 = vunpack.i.h.bf16 %v20176_v14 }
 0x2b7   :  { %v1711_v38 = vsel %vm1673_vm8, %v20189_v49, %v20188_v26  ;;  %v1390_v56 = vsel %vm1288_vm7, %v20193_v23, %v20192_v29  ;;  %20197 = vst [vmem:[#allocation11_spill] sm:$0xff] %v11876_v32  ;;  %v20198_v49 = vunpack.i.l.bf16 %v20181_v62  ;;  %v20199_v26 = vunpack.i.l.bf16 %v20176_v14  ;;  %v20226_v62 = vld [vmem:[#allocation23_spill] sm:$0xff] }
 0x2b8   :  { %20191 = vst [vmem:[#allocation147_spill] sm:$0xff] %v11864_v10  ;;  %20195 = vst [vmem:[#allocation150_spill] sm:$0xff] %v11873_v13  ;;  %v20201_v29 = vunpack.i.l.bf16 %v10777_v37  ;;  %v11892_v23 = vpop.permute.xlu1 %7973  ;;  %v11900_v17 = vsel %vm1288_vm7, %v20204_v47, %v20203_v16  ;;  %v1823_v61 = vmax.f32 %v11426_v30, %v1711_v38  ;;  %v11919_v16 = vpop.permute.xlu0 %7993  ;;  %v20211_v47 = vunpack.i.l.bf16 %v20186_v3 }
 0x2b9   :  { %v11885_v8 = vsel %vm1288_vm7, %v20199_v26, %v20198_v49  ;;  %20202 = vst [vmem:[#allocation100_spill] sm:$0xff] %v11892_v23  ;;  %20205 = vst [vmem:[#allocation201_spill] sm:$0xff] %v11900_v17  ;;  %v20206_v49 = vunpack.i.l.bf16 %v20184_v22  ;;  %v20207_v26 = vunpack.i.l.bf16 %v20178_v44  ;;  %v20215_v14 = vunpack.i.h.bf16 %v20180_v11 }
 0x2ba   :  { %20200 = vst [vmem:[#allocation94_spill] sm:$0xff] %v11885_v8  ;;  %v1389_v54 = vsel %vm1288_vm7, %v7900_v57, %v20201_v29  ;;  %v20208_v57 = vunpack.i.h.bf16 %v20184_v22  ;;  %v20209_v29 = vunpack.i.h.bf16 %v20178_v44  ;;  %20210 = vst [vmem:[#allocation202_spill] sm:$0xff] %v11919_v16  ;;  %v20212_v8 = vunpack.i.l.bf16 %v20180_v11  ;;  %v20232_v11 = vld [vmem:[#allocation21_spill] sm:$0xff] }
 0x2bb   :  { %v11908_v37 = vsel %vm1288_vm7, %v20207_v26, %v20206_v49  ;;  %v20214_v26 = vunpack.i.h.bf16 %v20186_v3  ;;  %v20217_v38 = vunpack.i.l.bf16 %v10835_v18  ;;  %v20218_v17 = vunpack.i.l.bf16 %v20187_v59 }
 0x2bc   :  { %v11916_v9 = vsel %vm1288_vm7, %v20209_v29, %v20208_v57  ;;  %v11927_v49 = vsel %vm1673_vm8, %v20212_v8, %v20211_v47  ;;  %v1822_v29 = vmax.f32 %v1390_v56, %v11521_v50  ;;  %v20219_v8 = vunpack.i.l.bf16 %v20183_v5 }
 0x2bd   :  { %20213 = vst [vmem:[#allocation203_spill] sm:$0xff] %v11927_v49  ;;  %v11935_v57 = vsel %vm1673_vm8, %v20215_v14, %v20214_v26  ;;  %v1710_v30 = vsel %vm1673_vm8, %v20217_v38, %v7895_v55  ;;  %v1818_v49 = vmax.f32 %v1389_v54, %v11513_v40  ;;  %v8227_v14 = vpack.i.bf16 %v11864_v10, %v11606_v42  ;;  %v20222_v26 = vld [vmem:[#allocation152_spill] sm:$0xff]  ;;  %v11966_v54 = vpop.permute.xlu1 %7978  ;;  %v20230_v42 = vld [vmem:[#allocation18_spill] sm:$0xff]  ;;  %v20236_v40 = vld [vmem:[#allocation25_spill] sm:$0xff] }
 0x2be   :  { %20216 = vst [vmem:[#allocation204_spill] sm:$0xff] %v11935_v57  ;;  %v11948_v47 = vsel %vm1673_vm8, %v20219_v8, %v20218_v17  ;;  %v8257_v18 = vpack.i.bf16 %v11876_v32, %v11873_v13  ;;  %v20220_v55 = vunpack.i.h.bf16 %v20187_v59  ;;  %v20221_v50 = vunpack.i.h.bf16 %v20183_v5  ;;  %v20223_v8 = vld [vmem:[#allocation154_spill] sm:$0xff]  ;;  %20224 = vst [vmem:[#allocation205_spill] sm:$0xff] %v11966_v54  ;;  %v20225_v57 = vld [vmem:[#allocation157_spill] sm:$0xff] }
 0x2bf   :  { %v11971_v3 = vmax.f32 %v20226_v62, %v1823_v61  ;;  %v1819_v16 = vmax.f32 %v11414_v41, %v1710_v30  ;;  %8228 = vrot.lane.b32.xlu0 %v8227_v14, %s9453_s1  ;;  %v20229_v17 = vld [vmem:[#allocation160_spill] sm:$0xff]  ;;  %v11982_v23 = vmax.f32 %v20230_v42, %v1822_v29  ;;  %v11985_v62 = vmax.f32 %v20232_v11, %v1818_v49 }
 0x2c0   :  { %v11961_v56 = vsel %vm1673_vm8, %v20221_v50, %v20220_v55  ;;  %8258 = vrot.lane.b32.xlu1 %v8257_v18, %s9454_s2  ;;  %v11976_v55 = vpop.permute.xlu0 %7998  ;;  %v20228_v50 = vld [vmem:[#allocation159_spill] sm:$0xff]  ;;  %v7906_v41 = vunpack.i.h.bf16 %v11598_v58  ;;  %v8237_v61 = vpack.i.bf16 %v11725_v20, %v11864_v10  ;;  %v20234_v18 = vld [vmem:[#allocation158_spill] sm:$0xff]  ;;  %v7925_v42 = vunpack.i.l.bf16 %v11608_v2 }
 0x2c1   :  { %20227 = vst [vmem:[#allocation157_spill] sm:$0xff] %v11971_v3  ;;  %20231 = vst [vmem:[#allocation23_spill] sm:$0xff] %v11982_v23  ;;  %v8262_v30 = vpack.i.bf16 %v11971_v3, %v11876_v32  ;;  %v11996_v29 = vpop.permute.xlu1 %7983  ;;  %v7891_v58 = vunpack.i.h.bf16 %v11451_v12  ;;  %v7910_v49 = vunpack.i.l.bf16 %v11460_v53  ;;  %v12002_v10 = vmax.f32 %v20236_v40, %v1819_v16 }
 0x2c2   :  { %20233 = vst [vmem:[#allocation18_spill] sm:$0xff] %v11985_v62  ;;  %20235 = vst [vmem:[#allocation21_spill] sm:$0xff] %v11996_v29  ;;  %v20239_v14 = vunpack.i.l.bf16 %v20228_v50  ;;  %v20240_v54 = vunpack.i.l.bf16 %v20222_v26  ;;  %v20242_v12 = vunpack.i.h.bf16 %v20228_v50  ;;  %v20243_v32 = vunpack.i.h.bf16 %v20222_v26 }
 0x2c3   :  { %20237 = vst [vmem:[#allocation25_spill] sm:$0xff] %v12002_v10  ;;  %8238 = vrot.lane.b32.xlu0 %v8237_v61, %s9454_s2  ;;  %v7915_v40 = vunpack.i.l.bf16 %v11524_v24  ;;  %v7920_v61 = vunpack.i.l.bf16 %v11572_v36  ;;  %v20246_v20 = vunpack.i.l.bf16 %v20223_v8  ;;  %v20249_v26 = vunpack.i.h.bf16 %v20229_v17 }
 0x2c4   :  { %8263 = vrot.lane.b32.xlu1 %v8262_v30, %s9453_s1  ;;  %v12006_v38 = vpop.permute.xlu0 %8003  ;;  %v12014_v11 = vsel %vm1288_vm7, %v20240_v54, %v20239_v14  ;;  %v12022_v16 = vsel %vm1288_vm7, %v20243_v32, %v20242_v12  ;;  %v20245_v30 = vunpack.i.l.bf16 %v20229_v17  ;;  %v20248_v14 = vunpack.i.h.bf16 %v11495_v48 }
 0x2c5   :  { %20238 = vst [vmem:[#allocation206_spill] sm:$0xff] %v12006_v38  ;;  %20241 = vst [vmem:[#allocation207_spill] sm:$0xff] %v12014_v11  ;;  %v8247_v32 = vpack.i.bf16 %v11873_v13, %v12002_v10  ;;  %v8267_v12 = vpack.i.bf16 %v11982_v23, %v11985_v62  ;;  %v20250_v29 = vunpack.i.h.bf16 %v20223_v8  ;;  %v20253_v48 = vunpack.i.h.bf16 %v10799_v35  ;;  %v20254_v11 = vld [vmem:[#allocation162_spill] sm:$0xff] }
 0x2c6   :  { %20244 = vst [vmem:[#allocation208_spill] sm:$0xff] %v12022_v16  ;;  %v12032_v54 = vsel %vm1288_vm7, %v20246_v20, %v20245_v30  ;;  %v1679_v38 = vsel %vm1673_vm8, %v20248_v14, %v7906_v41  ;;  %v20252_v20 = vld [vmem:[#allocation161_spill] sm:$0xff]  ;;  %v1680_v13 = vsel %vm1673_vm8, %v7915_v40, %v7925_v42  ;;  %v20255_v50 = vunpack.i.h.bf16 %v10813_v43 }
 0x2c7   :  { %20247 = vst [vmem:[#allocation209_spill] sm:$0xff] %v12032_v54  ;;  %v12048_v16 = vsel %vm1288_vm7, %v20250_v29, %v20249_v26  ;;  %v1775_v14 = vsel %vm1673_vm8, %v7906_v41, %v20253_v48  ;;  %v12057_v54 = vpop.permute.xlu1 %8008  ;;  %v20256_v29 = vunpack.i.l.bf16 %v10893_v34  ;;  %8248 = vrot.lane.b32.xlu0 %v8247_v32, %s9453_s1  ;;  %v20258_v48 = vunpack.i.l.bf16 %v10911_v21 }
 0x2c8   :  { %20251 = vst [vmem:[#allocation210_spill] sm:$0xff] %v12048_v16  ;;  %v1326_v26 = vsel %vm1288_vm7, %v20255_v50, %v7891_v58  ;;  %8268 = vrot.lane.b32.xlu1 %v8267_v12, %s9453_s1  ;;  %v12071_v41 = vpop.permute.xlu0 %8028  ;;  %v20259_v43 = vunpack.i.h.bf16 %v11554_v28  ;;  %v20260_v17 = vunpack.i.l.bf16 %v10857_v45  ;;  %v8252_v16 = vpack.i.bf16 %v12002_v10, %v11985_v62 }
 0x2c9   :  { %v1327_v35 = vsel %vm1288_vm7, %v20256_v29, %v7910_v49  ;;  %20257 = vst [vmem:[#allocation161_spill] sm:$0xff] %v12071_v41  ;;  %v1712_v8 = vsel %vm1673_vm8, %v20258_v48, %v7915_v40  ;;  %v1824_v32 = vmax.f32 %v1326_v26, %v1679_v38  ;;  %v8277_v41 = vpack.i.bf16 %v11971_v3, %v11982_v23  ;;  %v20265_v48 = vld [vmem:[#allocation90_spill] sm:$0xff] }
 0x2ca   :  { %v1294_v50 = vsel %vm1288_vm7, %v7891_v58, %v20259_v43  ;;  %v1391_v29 = vsel %vm1288_vm7, %v7920_v61, %v20260_v17  ;;  %v1828_v12 = vmax.f32 %v1327_v35, %v1680_v13  ;;  %v20261_v40 = vunpack.i.l.bf16 %v20252_v20  ;;  %v20263_v17 = vld [vmem:[#allocation165_spill] sm:$0xff]  ;;  %v20264_v35 = vld [vmem:[#allocation168_spill] sm:$0xff] }
 0x2cb   :  { %v1825_v30 = vmax.f32 %v1294_v50, %v1775_v14  ;;  %v20262_v28 = vunpack.i.l.bf16 %v20225_v57  ;;  %v7926_v13 = vunpack.i.h.bf16 %v11608_v2  ;;  %v12100_v14 = vpop.permute.xlu1 %8013  ;;  %v1827_v3 = vmax.f32 %v11666_v7, %v1712_v8  ;;  %8253 = vrot.lane.b32.xlu0 %v8252_v16, %s9454_s2  ;;  %v20267_v50 = vld [vmem:[#allocation97_spill] sm:$0xff]  ;;  %v20270_v16 = vld [vmem:[#allocation95_spill] sm:$0xff] }
 0x2cc   :  { %8278 = vrot.lane.b32.xlu1 %v8277_v41, %s9454_s2  ;;  %v7916_v2 = vunpack.i.h.bf16 %v11524_v24  ;;  %v7921_v38 = vunpack.i.h.bf16 %v11572_v36  ;;  %v1826_v26 = vmax.f32 %v1391_v29, %v11699_v25  ;;  %v12115_v43 = vmax.f32 %v20265_v48, %v1824_v32  ;;  %v20274_v48 = vld [vmem:[#allocation86_spill] sm:$0xff] }
 0x2cd   :  { %v12095_v58 = vsel %vm1673_vm8, %v20262_v28, %v20261_v40  ;;  %v12108_v40 = vpop.permute.xlu0 %8033  ;;  %v7911_v28 = vunpack.i.h.bf16 %v11460_v53  ;;  %v12118_v23 = vmax.f32 %v20267_v50, %v1825_v30  ;;  %v20269_v7 = vunpack.i.l.bf16 %v20116_v19  ;;  %v20272_v53 = vld [vmem:[#allocation169_spill] sm:$0xff] }
 0x2ce   :  { %20266 = vst [vmem:[#allocation165_spill] sm:$0xff] %v12115_v43  ;;  %v12125_v41 = vmax.f32 %v20270_v16, %v1828_v12  ;;  %v1681_v25 = vsel %vm1673_vm8, %v7916_v2, %v7926_v13  ;;  %v20273_v29 = vunpack.i.h.bf16 %v20116_v19  ;;  %v20275_v12 = vld [vmem:[#allocation36_spill] sm:$0xff]  ;;  %v1295_v16 = vsel %vm1288_vm7, %v7910_v49, %v7920_v61 }
 0x2cf   :  { %20268 = vst [vmem:[#allocation168_spill] sm:$0xff] %v12118_v23  ;;  %v1776_v8 = vsel %vm1673_vm8, %v7925_v42, %v20269_v7  ;;  %v12135_v32 = vpop.permute.xlu1 %8018  ;;  %v12140_v7 = vmax.f32 %v20275_v12, %v1827_v3  ;;  %v20278_v36 = vunpack.i.h.bf16 %v10893_v34  ;;  %v8272_v12 = vpack.i.bf16 %v12118_v23, %v12115_v43 }
 0x2d0   :  { %20271 = vst [vmem:[#allocation90_spill] sm:$0xff] %v12125_v41  ;;  %v1777_v30 = vsel %vm1673_vm8, %v7926_v13, %v20273_v29  ;;  %v1296_v13 = vsel %vm1288_vm7, %v7911_v28, %v7921_v38  ;;  %v20279_v29 = vld [vmem:[#allocation32_spill] sm:$0xff]  ;;  %v1829_v42 = vmax.f32 %v1295_v16, %v1776_v8  ;;  %v20281_v34 = vunpack.i.h.bf16 %v20252_v20 }
 0x2d1   :  { %20276 = vst [vmem:[#allocation97_spill] sm:$0xff] %v12140_v7  ;;  %v12144_v24 = vpop.permute.xlu0 %8038  ;;  %v1328_v19 = vsel %vm1288_vm7, %v20278_v36, %v7911_v28  ;;  %v12153_v50 = vmax.f32 %v20279_v29, %v1826_v26  ;;  %v1833_v3 = vmax.f32 %v1296_v13, %v1777_v30  ;;  %v8287_v49 = vpack.i.bf16 %v12125_v41, %v12140_v7 }
 0x2d2   :  { %20277 = vst [vmem:[#allocation95_spill] sm:$0xff] %v12144_v24  ;;  %v1832_v62 = vmax.f32 %v1328_v19, %v1681_v25  ;;  %v20282_v61 = vunpack.i.h.bf16 %v20225_v57  ;;  %v20283_v26 = vunpack.i.l.bf16 %v20254_v11  ;;  %v20284_v28 = vunpack.i.l.bf16 %v20234_v18  ;;  %8273 = vrot.lane.b32.xlu0 %v8272_v12, %s9453_s1 }
 0x2d3   :  { %20280 = vst [vmem:[#allocation169_spill] sm:$0xff] %v12153_v50  ;;  %v20286_v25 = vunpack.i.h.bf16 %v20254_v11  ;;  %v20287_v30 = vunpack.i.h.bf16 %v20234_v18  ;;  %v20289_v19 = vunpack.i.l.bf16 %v20272_v53  ;;  %v20290_v13 = vunpack.i.l.bf16 %v20263_v17  ;;  %8288 = vrot.lane.b32.xlu1 %v8287_v49, %s9453_s1  ;;  %v20304_v18 = vld [vmem:[#allocation98_spill] sm:$0xff] }
 0x2d4   :  { %v12165_v36 = vsel %vm1673_vm8, %v20282_v61, %v20281_v34  ;;  %v12173_v8 = vsel %vm1673_vm8, %v20284_v28, %v20283_v26  ;;  %v12191_v34 = vpop.permute.xlu1 %8023  ;;  %v20292_v61 = vunpack.i.h.bf16 %v20272_v53  ;;  %v20293_v26 = vunpack.i.h.bf16 %v20263_v17 }
 0x2d5   :  { %20285 = vst [vmem:[#allocation86_spill] sm:$0xff] %v12173_v8  ;;  %v12181_v16 = vsel %vm1673_vm8, %v20287_v30, %v20286_v25  ;;  %v12189_v29 = vsel %vm1288_vm7, %v20290_v13, %v20289_v19  ;;  %20291 = vst [vmem:[#allocation32_spill] sm:$0xff] %v12191_v34  ;;  %v20294_v25 = vunpack.i.l.bf16 %v20274_v48  ;;  %v20295_v30 = vunpack.i.l.bf16 %v20264_v35 }
 0x2d6   :  { %20288 = vst [vmem:[#allocation36_spill] sm:$0xff] %v12181_v16  ;;  %v12199_v28 = vsel %vm1288_vm7, %v20293_v26, %v20292_v61  ;;  %v20296_v19 = vunpack.i.h.bf16 %v20274_v48  ;;  %v20297_v13 = vunpack.i.h.bf16 %v20264_v35  ;;  %v12219_v61 = vpop.permute.xlu0 %8043  ;;  %v20300_v16 = vld [vmem:[#allocation101_spill] sm:$0xff]  ;;  %v12234_v11 = vmax.f32 %v20304_v18, %v1833_v3  ;;  %8283 = vrot.lane.b32.xlu0 %v8272_v12, %s9454_s2 }
 0x2d7   :  { %v12207_v23 = vsel %vm1673_vm8, %v20295_v30, %v20294_v25  ;;  %20298 = vst [vmem:[#allocation211_spill] sm:$0xff] %v12219_v61  ;;  %v20299_v25 = vunpack.i.h.bf16 %v10911_v21  ;;  %v12228_v8 = vmax.f32 %v20300_v16, %v1829_v42  ;;  %v8292_v49 = vpack.i.bf16 %v12140_v7, %v12153_v50  ;;  %v20307_v42 = vld [vmem:[#allocation181_spill] sm:$0xff]  ;;  %v20320_v7 = vld [vmem:[#allocation34_spill] sm:$0xff] }
 0x2d8   :  { %v12215_v43 = vsel %vm1673_vm8, %v20297_v13, %v20296_v19  ;;  %v20302_v19 = vld [vmem:[#allocation92_spill] sm:$0xff]  ;;  %20305 = vst [vmem:[#allocation98_spill] sm:$0xff] %v12234_v11  ;;  %v20308_v18 = vunpack.i.h.bf16 %v10857_v45  ;;  %v7936_v10 = vunpack.i.h.bf16 %v11710_v33  ;;  %v7935_v16 = vunpack.i.l.bf16 %v11710_v33 }
 0x2d9   :  { %v1713_v30 = vsel %vm1673_vm8, %v20299_v25, %v7916_v2  ;;  %20301 = vst [vmem:[#allocation101_spill] sm:$0xff] %v12228_v8  ;;  %v12231_v13 = vmax.f32 %v20302_v19, %v1832_v62  ;;  %v7945_v2 = vunpack.i.l.bf16 %v11810_v31  ;;  %v12242_v25 = vpop.permute.xlu1 %8048  ;;  %v7930_v19 = vunpack.i.l.bf16 %v11628_v60  ;;  %8293 = vrot.lane.b32.xlu1 %v8292_v49, %s9454_s2 }
 0x2da   :  { %20306 = vst [vmem:[#allocation212_spill] sm:$0xff] %v12242_v25  ;;  %v1831_v62 = vmax.f32 %v11674_v46, %v1713_v30  ;;  %v1392_v3 = vsel %vm1288_vm7, %v7921_v38, %v20308_v18  ;;  %v12253_v21 = vpop.permute.xlu0 %8068  ;;  %v7940_v46 = vunpack.i.l.bf16 %v11736_v1  ;;  %v20310_v45 = vunpack.i.l.bf16 %v11371_v15 }
 0x2db   :  { %20303 = vst [vmem:[#allocation92_spill] sm:$0xff] %v12231_v13  ;;  %20309 = vst [vmem:[#allocation181_spill] sm:$0xff] %v12253_v21  ;;  %v20311_v38 = vunpack.i.l.bf16 %v11252_v6  ;;  %v20312_v12 = vunpack.i.h.bf16 %v11371_v15  ;;  %v20313_v49 = vunpack.i.h.bf16 %v11252_v6  ;;  %v8297_v33 = vpack.i.bf16 %v12228_v8, %v12125_v41  ;;  %v20330_v6 = vld [vmem:[#allocation85_spill] sm:$0xff] }
 0x2dc   :  { %v8312_v26 = vpack.i.bf16 %v12234_v11, %v12231_v13  ;;  %v1830_v21 = vmax.f32 %v1392_v3, %v11707_v63  ;;  %v20318_v41 = vunpack.i.l.bf16 %v11285_v52  ;;  %v12298_v63 = vmax.f32 %v20320_v7, %v1831_v62 }
 0x2dd   :  { %v12265_v30 = vsel %vm1288_vm7, %v20311_v38, %v20310_v45  ;;  %v12273_v18 = vsel %vm1288_vm7, %v20313_v49, %v20312_v12  ;;  %v1682_v45 = vsel %vm1673_vm8, %v7935_v16, %v7945_v2  ;;  %v20315_v38 = vunpack.i.l.bf16 %v10941_v51  ;;  %v12287_v12 = vpop.permute.xlu1 %8053  ;;  %8298 = vrot.lane.b32.xlu0 %v8297_v33, %s9454_s2 }
 0x2de   :  { %20314 = vst [vmem:[#allocation213_spill] sm:$0xff] %v12273_v18  ;;  %20316 = vst [vmem:[#allocation214_spill] sm:$0xff] %v12287_v12  ;;  %v20317_v49 = vunpack.i.l.bf16 %v20307_v42  ;;  %v20322_v3 = vunpack.i.l.bf16 %v10953_v4  ;;  %8313 = vrot.lane.b32.xlu1 %v8312_v26, %s9453_s1  ;;  %v20324_v12 = vunpack.i.h.bf16 %v20145_v27  ;;  %v7941_v62 = vunpack.i.h.bf16 %v11736_v1  ;;  %v20348_v18 = vld [vmem:[#allocation192_spill] sm:$0xff] }
 0x2df   :  { %v1778_v25 = vsel %vm1673_vm8, %v7945_v2, %v20315_v38  ;;  %20321 = vst [vmem:[#allocation34_spill] sm:$0xff] %v12298_v63  ;;  %v7955_v2 = vunpack.i.l.bf16 %v11717_v39  ;;  %v12307_v38 = vpop.permute.xlu0 %8073  ;;  %v8302_v33 = vpack.i.bf16 %v12298_v63, %v12228_v8  ;;  %v7931_v1 = vunpack.i.h.bf16 %v11628_v60 }
 0x2e0   :  { %v12295_v11 = vsel %vm1673_vm8, %v20318_v41, %v20317_v49  ;;  %v1329_v13 = vsel %vm1288_vm7, %v20322_v3, %v7930_v19  ;;  %20323 = vst [vmem:[#allocation216_spill] sm:$0xff] %v12307_v38  ;;  %v1715_v41 = vsel %vm1673_vm8, %v20324_v12, %v7936_v10  ;;  %v1297_v49 = vsel %vm1288_vm7, %v7930_v19, %v7940_v46  ;;  %v20328_v12 = vld [vmem:[#allocation30_spill] sm:$0xff] }
 0x2e1   :  { %20319 = vst [vmem:[#allocation215_spill] sm:$0xff] %v12295_v11  ;;  %v1836_v3 = vmax.f32 %v1329_v13, %v1682_v45  ;;  %v1837_v61 = vmax.f32 %v1297_v49, %v1778_v25  ;;  %v20325_v11 = vunpack.i.h.bf16 %v20307_v42  ;;  %v20326_v38 = vunpack.i.h.bf16 %v11285_v52  ;;  %v12332_v13 = vpop.permute.xlu1 %8058  ;;  %v20332_v45 = vld [vmem:[#allocation193_spill] sm:$0xff]  ;;  %8303 = vrot.lane.b32.xlu0 %v8302_v33, %s9453_s1 }
 0x2e2   :  { %v12328_v7 = vmax.f32 %v20328_v12, %v1830_v21  ;;  %v7950_v19 = vunpack.i.l.bf16 %v20330_v6  ;;  %20331 = vst [vmem:[#allocation85_spill] sm:$0xff] %v12332_v13  ;;  %v7951_v25 = vunpack.i.h.bf16 %v20330_v6  ;;  %v1839_v49 = vmax.f32 %v20332_v45, %v1715_v41  ;;  %8323 = vrot.lane.b32.xlu1 %v8312_v26, %s9454_s2  ;;  %v20338_v41 = vld [vmem:[#allocation123_spill] sm:$0xff]  ;;  %v20340_v12 = vld [vmem:[#allocation134_spill] sm:$0xff] }
 0x2e3   :  { %v12325_v34 = vsel %vm1673_vm8, %v20326_v38, %v20325_v11  ;;  %v20333_v8 = vunpack.i.l.bf16 %v20145_v27  ;;  %v20334_v11 = vunpack.i.l.bf16 %v20187_v59  ;;  %v12346_v60 = vpop.permute.xlu0 %8078  ;;  %v20336_v6 = vunpack.i.h.bf16 %v11717_v39 }
 0x2e4   :  { %20327 = vst [vmem:[#allocation217_spill] sm:$0xff] %v12325_v34  ;;  %20329 = vst [vmem:[#allocation30_spill] sm:$0xff] %v12328_v7  ;;  %v20337_v38 = vunpack.i.h.bf16 %v20187_v59  ;;  %v7961_v45 = vunpack.i.h.bf16 %v20340_v12  ;;  %v7960_v33 = vunpack.i.l.bf16 %v20340_v12  ;;  %v20341_v26 = vunpack.i.l.bf16 %v20338_v41  ;;  %v20342_v59 = vld [vmem:[#allocation106_spill] sm:$0xff] }
 0x2e5   :  { %v1714_v52 = vsel %vm1673_vm8, %v20333_v8, %v7935_v16  ;;  %v1716_v21 = vsel %vm1673_vm8, %v20334_v11, %v7955_v2  ;;  %20335 = vst [vmem:[#allocation193_spill] sm:$0xff] %v12346_v60  ;;  %v20339_v8 = vunpack.i.h.bf16 %v20338_v41  ;;  %v7946_v60 = vunpack.i.h.bf16 %v11810_v31 }
 0x2e6   :  { %v1717_v27 = vsel %vm1673_vm8, %v20337_v38, %v20336_v6  ;;  %v1393_v11 = vsel %vm1288_vm7, %v7940_v46, %v20341_v26  ;;  %v12366_v13 = vmax.f32 %v20342_v59, %v1836_v3  ;;  %v20344_v6 = vld [vmem:[#allocation112_spill] sm:$0xff]  ;;  %v20346_v34 = vunpack.i.h.bf16 %v10953_v4  ;;  %v12381_v26 = vpop.permute.xlu1 %8063  ;;  %v20351_v4 = vld [vmem:[#allocation43_spill] sm:$0xff] }
 0x2e7   :  { %v1394_v16 = vsel %vm1288_vm7, %v7941_v62, %v20339_v8  ;;  %v12369_v38 = vmax.f32 %v20344_v6, %v1837_v61  ;;  %v20347_v12 = vunpack.i.l.bf16 %v20184_v22  ;;  %v1835_v46 = vmax.f32 %v20348_v18, %v1714_v52  ;;  %20349 = vst [vmem:[#allocation106_spill] sm:$0xff] %v12381_v26  ;;  %v20353_v6 = vld [vmem:[#allocation200_spill] sm:$0xff]  ;;  %v20354_v52 = vld [vmem:[#allocation197_spill] sm:$0xff] }
 0x2e8   :  { %20343 = vst [vmem:[#allocation123_spill] sm:$0xff] %v12366_v13  ;;  %v1330_v8 = vsel %vm1288_vm7, %v20346_v34, %v7931_v1  ;;  %v1843_v31 = vmax.f32 %v11908_v37, %v1716_v21  ;;  %v20350_v3 = vunpack.i.h.bf16 %v20184_v22  ;;  %v12390_v59 = vmax.f32 %v20351_v4, %v1839_v49  ;;  %v20355_v37 = vld [vmem:[#allocation196_spill] sm:$0xff] }
 0x2e9   :  { %20345 = vst [vmem:[#allocation134_spill] sm:$0xff] %v12369_v38  ;;  %v1331_v41 = vsel %vm1288_vm7, %v20347_v12, %v7950_v19  ;;  %v1847_v34 = vmax.f32 %v11916_v9, %v1717_v27  ;;  %v7965_v24 = vunpack.i.l.bf16 %v20353_v6  ;;  %v12394_v12 = vpop.permute.xlu0 %8083  ;;  %v1838_v18 = vmax.f32 %v1394_v16, %v20354_v52 }
 0x2ea   :  { %v12387_v61 = vsel %vm1288_vm7, %v20350_v3, %v7951_v25  ;;  %20352 = vst [vmem:[#allocation112_spill] sm:$0xff] %v12390_v59  ;;  %v1834_v21 = vmax.f32 %v1393_v11, %v20355_v37  ;;  %v20356_v26 = vunpack.i.l.bf16 %v20178_v44  ;;  %v20357_v3 = vunpack.i.h.bf16 %v20178_v44  ;;  %v20361_v44 = vld [vmem:[#allocation56_spill] sm:$0xff] }
 0x2eb   :  { %v20358_v9 = vunpack.i.h.bf16 %v10941_v51  ;;  %v1683_v16 = vsel %vm1673_vm8, %v7936_v10, %v7946_v60  ;;  %v8307_v11 = vpack.i.bf16 %v12328_v7, %v12153_v50  ;;  %v8337_v4 = vpack.i.bf16 %v12369_v38, %v12366_v13 }
 0x2ec   :  { %v1395_v22 = vsel %vm1288_vm7, %v7960_v33, %v20356_v26  ;;  %v1396_v49 = vsel %vm1288_vm7, %v7961_v45, %v20357_v3  ;;  %v20359_v26 = vld [vmem:[#allocation45_spill] sm:$0xff]  ;;  %v12420_v37 = vmax.f32 %v20361_v44, %v1843_v31  ;;  %v1298_v51 = vsel %vm1288_vm7, %v7931_v1, %v7941_v62 }
 0x2ed   :  { %v1779_v27 = vsel %vm1673_vm8, %v7946_v60, %v20358_v9  ;;  %v12417_v52 = vmax.f32 %v20359_v26, %v1835_v46  ;;  %v7966_v3 = vunpack.i.h.bf16 %v20353_v6  ;;  %v12425_v9 = vpop.permute.xlu1 %8088  ;;  %v1842_v10 = vmax.f32 %v1395_v22, %v11948_v47  ;;  %8308 = vrot.lane.b32.xlu0 %v8307_v11, %s9453_s1  ;;  %8338 = vrot.lane.b32.xlu1 %v8337_v4, %s9454_s2  ;;  %v12439_v47 = vpop.permute.xlu0 %8108  ;;  %v20365_v22 = vld [vmem:[#allocation38_spill] sm:$0xff]  ;;  %v20367_v26 = vld [vmem:[#allocation41_spill] sm:$0xff] }
 0x2ee   :  { %20362 = vst [vmem:[#allocation43_spill] sm:$0xff] %v12420_v37  ;;  %v1684_v60 = vsel %vm1673_vm8, %v7955_v2, %v7965_v24  ;;  %v20363_v50 = vunpack.i.l.bf16 %v20183_v5  ;;  %v1299_v62 = vsel %vm1288_vm7, %v7950_v19, %v7960_v33  ;;  %v1846_v1 = vmax.f32 %v1396_v49, %v11961_v56  ;;  %20364 = vst [vmem:[#allocation200_spill] sm:$0xff] %v12439_v47  ;;  %v20369_v11 = vld [vmem:[#allocation54_spill] sm:$0xff] }
 0x2ef   :  { %20360 = vst [vmem:[#allocation192_spill] sm:$0xff] %v12417_v52  ;;  %v1840_v31 = vmax.f32 %v1330_v8, %v1683_v16  ;;  %v1841_v6 = vmax.f32 %v1298_v51, %v1779_v27  ;;  %v12442_v2 = vmax.f32 %v20365_v22, %v1838_v18  ;;  %v12445_v44 = vmax.f32 %v20367_v26, %v1834_v21  ;;  %v20372_v27 = vld [vmem:[#allocation52_spill] sm:$0xff] }
 0x2f0   :  { %v1780_v46 = vsel %vm1673_vm8, %v7965_v24, %v20363_v50  ;;  %v8317_v24 = vpack.i.bf16 %v12298_v63, %v12328_v7  ;;  %v8342_v50 = vpack.i.bf16 %v12390_v59, %v12369_v38  ;;  %v12452_v19 = vmax.f32 %v20369_v11, %v1847_v34  ;;  %v20375_v51 = vld [vmem:[#allocation100_spill] sm:$0xff] }
 0x2f1   :  { %20366 = vst [vmem:[#allocation197_spill] sm:$0xff] %v12442_v2  ;;  %20368 = vst [vmem:[#allocation196_spill] sm:$0xff] %v12445_v44  ;;  %v20371_v56 = vunpack.i.h.bf16 %v11717_v39  ;;  %v1844_v8 = vmax.f32 %v1331_v41, %v1684_v60  ;;  %v1845_v18 = vmax.f32 %v1299_v62, %v1780_v46  ;;  %v12458_v49 = vpop.permute.xlu1 %8093  ;;  %v1300_v21 = vsel %vm1288_vm7, %v7951_v25, %v7961_v45  ;;  %v20376_v41 = vld [vmem:[#allocation50_spill] sm:$0xff]  ;;  %v20378_v46 = vld [vmem:[#allocation103_spill] sm:$0xff] }
 0x2f2   :  { %20370 = vst [vmem:[#allocation45_spill] sm:$0xff] %v12452_v19  ;;  %v12463_v16 = vmax.f32 %v20372_v27, %v1842_v10  ;;  %v20374_v4 = vunpack.i.h.bf16 %v20183_v5  ;;  %v19457_v39 = vunpack.i.l.bf16 %v20375_v51  ;;  %8318 = vrot.lane.b32.xlu0 %v8317_v24, %s9454_s2  ;;  %8343 = vrot.lane.b32.xlu1 %v8342_v50, %s9453_s1  ;;  %v12473_v60 = vmax.f32 %v20376_v41, %v1846_v1  ;;  %v20380_v25 = vld [vmem:[#allocation109_spill] sm:$0xff]  ;;  %v20383_v50 = vld [vmem:[#allocation107_spill] sm:$0xff] }
 0x2f3   :  { %v1685_v33 = vsel %vm1673_vm8, %v20371_v56, %v7966_v3  ;;  %v12476_v62 = vmax.f32 %v20378_v46, %v1840_v31  ;;  %v12479_v45 = vmax.f32 %v20380_v25, %v1841_v6  ;;  %v7976_v5 = vunpack.i.h.bf16 %v20375_v51  ;;  %v20385_v31 = vld [vmem:[#allocation113_spill] sm:$0xff]  ;;  %v20387_v6 = vld [vmem:[#allocation139_spill] sm:$0xff] }
 0x2f4   :  { %20373 = vst [vmem:[#allocation56_spill] sm:$0xff] %v12463_v16  ;;  %v1781_v34 = vsel %vm1673_vm8, %v7966_v3, %v20374_v4  ;;  %20377 = vst [vmem:[#allocation38_spill] sm:$0xff] %v12473_v60  ;;  %v1848_v10 = vmax.f32 %v12387_v61, %v1685_v33  ;;  %v20382_v3 = vld [vmem:[#allocation202_spill] sm:$0xff]  ;;  %v8327_v26 = vpack.i.bf16 %v12366_v13, %v12417_v52  ;;  %v7970_v27 = vunpack.i.l.bf16 %v20387_v6  ;;  %v12495_v4 = vpop.permute.xlu0 %8113  ;;  %v20389_v41 = vld [vmem:[#allocation143_spill] sm:$0xff] }
 0x2f5   :  { %20379 = vst [vmem:[#allocation41_spill] sm:$0xff] %v12476_v62  ;;  %20381 = vst [vmem:[#allocation54_spill] sm:$0xff] %v12479_v45  ;;  %v8347_v24 = vpack.i.bf16 %v12442_v2, %v12445_v44  ;;  %v1849_v1 = vmax.f32 %v1300_v21, %v1781_v34  ;;  %v12489_v11 = vmax.f32 %v20383_v50, %v1844_v8  ;;  %v12497_v61 = vpop.permute.xlu1 %8098  ;;  %v7971_v33 = vunpack.i.h.bf16 %v20387_v6  ;;  %v20399_v13 = vld [vmem:[#allocation159_spill] sm:$0xff] }
 0x2f6   :  { %v12492_v56 = vmax.f32 %v20385_v31, %v1845_v18  ;;  %20388 = vst [vmem:[#allocation50_spill] sm:$0xff] %v12497_v61  ;;  %v7991_v46 = vunpack.i.h.bf16 %v20389_v41  ;;  %v20390_v21 = vunpack.i.l.bf16 %v20252_v20  ;;  %8328 = vrot.lane.b32.xlu0 %v8327_v26, %s9453_s1  ;;  %v7990_v34 = vunpack.i.l.bf16 %v20389_v41  ;;  %v20392_v31 = vld [vmem:[#allocation205_spill] sm:$0xff]  ;;  %v20397_v18 = vld [vmem:[#allocation111_spill] sm:$0xff] }
 0x2f7   :  { %20384 = vst [vmem:[#allocation52_spill] sm:$0xff] %v12489_v11  ;;  %8348 = vrot.lane.b32.xlu1 %v8347_v24, %s9453_s1  ;;  %v20391_v25 = vunpack.i.h.bf16 %v20252_v20  ;;  %v7981_v6 = vunpack.i.h.bf16 %v20392_v31  ;;  %v7980_v22 = vunpack.i.l.bf16 %v20392_v31  ;;  %v20393_v38 = vunpack.i.l.bf16 %v20382_v3 }
 0x2f8   :  { %20386 = vst [vmem:[#allocation100_spill] sm:$0xff] %v12492_v56  ;;  %v1718_v8 = vsel %vm1673_vm8, %v20390_v21, %v19457_v39  ;;  %v20394_v21 = vunpack.i.l.bf16 %v20274_v48  ;;  %v8001_v24 = vunpack.i.h.bf16 %v11976_v55  ;;  %v8332_v41 = vpack.i.bf16 %v12417_v52, %v12445_v44  ;;  %v20403_v52 = vld [vmem:[#allocation208_spill] sm:$0xff] }
 0x2f9   :  { %v1719_v50 = vsel %vm1673_vm8, %v20391_v25, %v7976_v5  ;;  %v8357_v20 = vpack.i.bf16 %v12390_v59, %v12442_v2  ;;  %v20395_v25 = vld [vmem:[#allocation104_spill] sm:$0xff]  ;;  %v12532_v31 = vmax.f32 %v20397_v18, %v1849_v1  ;;  %v20400_v63 = vunpack.i.l.bf16 %v20399_v13  ;;  %v12541_v47 = vpop.permute.xlu1 %8103 }
 0x2fa   :  { %v1720_v26 = vsel %vm1673_vm8, %v20394_v21, %v20393_v38  ;;  %v12529_v39 = vmax.f32 %v20395_v25, %v1848_v10  ;;  %v20401_v38 = vld [vmem:[#allocation207_spill] sm:$0xff]  ;;  %20402 = vst [vmem:[#allocation202_spill] sm:$0xff] %v12541_v47  ;;  %v1855_v44 = vmax.f32 %v20403_v52, %v1719_v50  ;;  %v20404_v59 = vunpack.i.h.bf16 %v20382_v3  ;;  %v20406_v25 = vld [vmem:[#allocation21_spill] sm:$0xff]  ;;  %8333 = vrot.lane.b32.xlu0 %v8332_v41, %s9454_s2 }
 0x2fb   :  { %20398 = vst [vmem:[#allocation109_spill] sm:$0xff] %v12532_v31  ;;  %v12538_v7 = vsel %vm1288_vm7, %v20400_v63, %v7970_v27  ;;  %v1851_v21 = vmax.f32 %v20401_v38, %v1718_v8  ;;  %v20405_v10 = vunpack.i.h.bf16 %v20274_v48  ;;  %v8000_v18 = vunpack.i.l.bf16 %v11976_v55  ;;  %8358 = vrot.lane.b32.xlu1 %v8357_v20, %s9454_s2  ;;  %v20409_v55 = vld [vmem:[#allocation152_spill] sm:$0xff]  ;;  %v12569_v38 = vpop.permute.xlu0 %8118 }
 0x2fc   :  { %20396 = vst [vmem:[#allocation103_spill] sm:$0xff] %v12529_v39  ;;  %v7986_v2 = vunpack.i.h.bf16 %v20406_v25  ;;  %v20407_v63 = vunpack.i.h.bf16 %v20399_v13  ;;  %v20408_v8 = vunpack.i.l.bf16 %v20272_v53  ;;  %v20410_v50 = vunpack.i.l.bf16 %v20409_v55  ;;  %20411 = vst [vmem:[#allocation107_spill] sm:$0xff] %v12569_v38 }
 0x2fd   :  { %v1721_v1 = vsel %vm1673_vm8, %v20405_v10, %v20404_v59  ;;  %v1859_v59 = vmax.f32 %v12189_v29, %v1720_v26  ;;  %v20412_v13 = vunpack.i.h.bf16 %v20272_v53  ;;  %v20413_v10 = vunpack.i.h.bf16 %v20409_v55  ;;  %v12594_v38 = vpop.permute.xlu1 %8128 }
 0x2fe   :  { %v1334_v52 = vsel %vm1288_vm7, %v20407_v63, %v7971_v33  ;;  %v12562_v48 = vsel %vm1288_vm7, %v20408_v8, %v7990_v34  ;;  %v1397_v41 = vsel %vm1288_vm7, %v7980_v22, %v20410_v50  ;;  %v20414_v29 = vunpack.i.h.bf16 %v20263_v17  ;;  %v20415_v50 = vld [vmem:[#allocation65_spill] sm:$0xff]  ;;  %20417 = vst [vmem:[#allocation139_spill] sm:$0xff] %v12594_v38 }
 0x2ff   :  { %v12575_v20 = vsel %vm1288_vm7, %v20412_v13, %v7991_v46  ;;  %v1398_v63 = vsel %vm1288_vm7, %v7981_v6, %v20413_v10  ;;  %v7985_v8 = vunpack.i.l.bf16 %v20406_v25  ;;  %v12587_v47 = vmax.f32 %v20415_v50, %v1851_v21  ;;  %v20418_v10 = vld [vmem:[#allocation63_spill] sm:$0xff] }
 0x300   :  { %v1400_v26 = vsel %vm1288_vm7, %v8001_v24, %v20414_v29  ;;  %v1863_v53 = vmax.f32 %v12199_v28, %v1721_v1  ;;  %v1301_v13 = vsel %vm1288_vm7, %v7970_v27, %v7980_v22  ;;  %v1302_v55 = vsel %vm1288_vm7, %v7971_v33, %v7981_v6  ;;  %v20421_v1 = vld [vmem:[#allocation75_spill] sm:$0xff]  ;;  %v20423_v6 = vld [vmem:[#allocation206_spill] sm:$0xff] }
 0x301   :  { %20416 = vst [vmem:[#allocation113_spill] sm:$0xff] %v12587_v47  ;;  %v12597_v61 = vmax.f32 %v20418_v10, %v1855_v44  ;;  %v1850_v29 = vmax.f32 %v1397_v41, %v12095_v58  ;;  %v20420_v25 = vunpack.i.l.bf16 %v20263_v17  ;;  %v1687_v28 = vsel %vm1673_vm8, %v7976_v5, %v7986_v2  ;;  %v12630_v10 = vpop.permute.xlu0 %8123 }
 0x302   :  { %v12607_v22 = vmax.f32 %v20421_v1, %v1859_v59  ;;  %v1854_v27 = vmax.f32 %v1398_v63, %v12165_v36  ;;  %v1862_v33 = vmax.f32 %v1400_v26, %v12215_v43  ;;  %v8005_v44 = vunpack.i.l.bf16 %v20423_v6 }
 0x303   :  { %20419 = vst [vmem:[#allocation143_spill] sm:$0xff] %v12597_v61  ;;  %v1399_v21 = vsel %vm1288_vm7, %v8000_v18, %v20420_v25  ;;  %v20424_v50 = vunpack.i.l.bf16 %v20375_v51  ;;  %v20425_v17 = vunpack.i.h.bf16 %v20225_v57  ;;  %v8352_v5 = vpack.i.bf16 %v12479_v45, %v12476_v62  ;;  %v12632_v25 = vpop.permute.xlu1 %8133 }
 0x304   :  { %20422 = vst [vmem:[#allocation205_spill] sm:$0xff] %v12607_v22  ;;  %v8367_v36 = vpack.i.bf16 %v12489_v11, %v12420_v37  ;;  %v1858_v43 = vmax.f32 %v1399_v21, %v12207_v23  ;;  %v20426_v59 = vunpack.i.l.bf16 %v20225_v57  ;;  %v1856_v63 = vmax.f32 %v1334_v52, %v1687_v28  ;;  %20427 = vst [vmem:[#allocation104_spill] sm:$0xff] %v12632_v25  ;;  %v20432_v57 = vld [vmem:[#allocation58_spill] sm:$0xff] }
 0x305   :  { %v1686_v58 = vsel %vm1673_vm8, %v20424_v50, %v7985_v8  ;;  %v1783_v41 = vsel %vm1673_vm8, %v7986_v2, %v20425_v17  ;;  %v8006_v26 = vunpack.i.h.bf16 %v20423_v6  ;;  %v20428_v2 = vld [vmem:[#allocation72_spill] sm:$0xff]  ;;  %v20430_v50 = vld [vmem:[#allocation61_spill] sm:$0xff]  ;;  %v1304_v23 = vsel %vm1288_vm7, %v7991_v46, %v8001_v24  ;;  %8353 = vrot.lane.b32.xlu0 %v8352_v5, %s9453_s1  ;;  %v20435_v24 = vld [vmem:[#allocation70_spill] sm:$0xff] }
 0x306   :  { %v1782_v51 = vsel %vm1673_vm8, %v7985_v8, %v20426_v59  ;;  %v12635_v1 = vmax.f32 %v20428_v2, %v1863_v53  ;;  %v12638_v17 = vmax.f32 %v20430_v50, %v1850_v29  ;;  %8368 = vrot.lane.b32.xlu1 %v8367_v36, %s9453_s1  ;;  %v12645_v52 = vmax.f32 %v20432_v57, %v1854_v27  ;;  %v20437_v27 = vld [vmem:[#allocation68_spill] sm:$0xff]  ;;  %v20448_v50 = vld [vmem:[#allocation122_spill] sm:$0xff] }
 0x307   :  { %v1852_v8 = vmax.f32 %v12538_v7, %v1686_v58  ;;  %v1857_v21 = vmax.f32 %v1302_v55, %v1783_v41  ;;  %v20434_v28 = vunpack.i.l.bf16 %v20382_v3  ;;  %v1303_v29 = vsel %vm1288_vm7, %v7990_v34, %v8000_v18  ;;  %v20439_v7 = vld [vmem:[#allocation116_spill] sm:$0xff]  ;;  %v12669_v2 = vpop.permute.xlu1 %8138  ;;  %v12671_v34 = vpop.permute.xlu0 %8148 }
 0x308   :  { %20429 = vst [vmem:[#allocation111_spill] sm:$0xff] %v12635_v1  ;;  %20431 = vst [vmem:[#allocation159_spill] sm:$0xff] %v12638_v17  ;;  %v1853_v6 = vmax.f32 %v1301_v13, %v1782_v51  ;;  %v8372_v46 = vpack.i.bf16 %v12420_v37, %v12463_v16  ;;  %v12657_v36 = vmax.f32 %v20435_v24, %v1858_v43  ;;  %v20441_v58 = vunpack.i.h.bf16 %v20382_v3  ;;  %v20446_v3 = vld [vmem:[#allocation119_spill] sm:$0xff] }
 0x309   :  { %20433 = vst [vmem:[#allocation207_spill] sm:$0xff] %v12645_v52  ;;  %v1688_v53 = vsel %vm1673_vm8, %v20434_v28, %v8005_v44  ;;  %v12660_v59 = vmax.f32 %v20437_v27, %v1862_v33  ;;  %v12663_v55 = vmax.f32 %v20439_v7, %v1856_v63  ;;  %20442 = vst [vmem:[#allocation65_spill] sm:$0xff] %v12669_v2  ;;  %v20444_v18 = vunpack.i.l.bf16 %v20264_v35 }
 0x30a   :  { %20436 = vst [vmem:[#allocation208_spill] sm:$0xff] %v12657_v36  ;;  %v1689_v41 = vsel %vm1673_vm8, %v20441_v58, %v8006_v26  ;;  %20443 = vst [vmem:[#allocation63_spill] sm:$0xff] %v12671_v34  ;;  %v20445_v33 = vunpack.i.h.bf16 %v20264_v35  ;;  %v1860_v51 = vmax.f32 %v12562_v48, %v1688_v53  ;;  %8363 = vrot.lane.b32.xlu0 %v8352_v5, %s9454_s2  ;;  %8373 = vrot.lane.b32.xlu1 %v8372_v46, %s9454_s2  ;;  %v20450_v35 = vld [vmem:[#allocation126_spill] sm:$0xff]  ;;  %v20490_v34 = vld [vmem:[#allocation73_spill] sm:$0xff] }
 0x30b   :  { %20438 = vst [vmem:[#allocation21_spill] sm:$0xff] %v12660_v59  ;;  %20440 = vst [vmem:[#allocation152_spill] sm:$0xff] %v12663_v55  ;;  %v1784_v13 = vsel %vm1673_vm8, %v8005_v44, %v20444_v18  ;;  %v12685_v63 = vmax.f32 %v20446_v3, %v1852_v8  ;;  %v12688_v57 = vmax.f32 %v20448_v50, %v1857_v21  ;;  %v8016_v28 = vunpack.i.h.bf16 %v12100_v14  ;;  %v12702_v27 = vpop.permute.xlu1 %8143  ;;  %v12704_v7 = vpop.permute.xlu0 %8153 }
 0x30c   :  { %v1785_v43 = vsel %vm1673_vm8, %v8006_v26, %v20445_v33  ;;  %v19469_v44 = vunpack.i.l.bf16 %v12100_v14  ;;  %v12693_v24 = vmax.f32 %v20450_v35, %v1853_v6  ;;  %v19472_v26 = vunpack.i.l.bf16 %v12108_v40  ;;  %20452 = vst [vmem:[#allocation61_spill] sm:$0xff] %v12702_v27  ;;  %20453 = vst [vmem:[#allocation58_spill] sm:$0xff] %v12704_v7  ;;  %v20454_v6 = vld [vmem:[#allocation120_spill] sm:$0xff]  ;;  %v20456_v33 = vld [vmem:[#allocation161_spill] sm:$0xff] }
 0x30d   :  { %20447 = vst [vmem:[#allocation75_spill] sm:$0xff] %v12685_v63  ;;  %20449 = vst [vmem:[#allocation206_spill] sm:$0xff] %v12688_v57  ;;  %v8377_v48 = vpack.i.bf16 %v12492_v56, %v12489_v11  ;;  %v8392_v5 = vpack.i.bf16 %v12532_v31, %v12529_v39  ;;  %v1861_v8 = vmax.f32 %v1303_v29, %v1784_v13  ;;  %v8010_v46 = vunpack.i.l.bf16 %v12057_v54  ;;  %v20476_v11 = vld [vmem:[#allocation175_spill] sm:$0xff] }
 0x30e   :  { %20451 = vst [vmem:[#allocation72_spill] sm:$0xff] %v12693_v24  ;;  %v1864_v53 = vmax.f32 %v12575_v20, %v1689_v41  ;;  %v1865_v21 = vmax.f32 %v1304_v23, %v1785_v43  ;;  %v12707_v58 = vmax.f32 %v20454_v6, %v1860_v51  ;;  %v8011_v18 = vunpack.i.h.bf16 %v12057_v54  ;;  %v20459_v43 = vld [vmem:[#allocation82_spill] sm:$0xff] }
 0x30f   :  { %v8031_v3 = vunpack.i.h.bf16 %v20456_v33  ;;  %8378 = vrot.lane.b32.xlu0 %v8377_v48, %s9454_s2  ;;  %8393 = vrot.lane.b32.xlu1 %v8392_v5, %s9453_s1  ;;  %v20457_v23 = vunpack.i.l.bf16 %v20307_v42  ;;  %v20458_v41 = vunpack.i.h.bf16 %v20307_v42  ;;  %v8020_v13 = vunpack.i.l.bf16 %v12135_v32  ;;  %v20463_v42 = vld [vmem:[#allocation118_spill] sm:$0xff] }
 0x310   :  { %20455 = vst [vmem:[#allocation70_spill] sm:$0xff] %v12707_v58  ;;  %v20460_v51 = vunpack.i.l.bf16 %v20459_v43  ;;  %v8021_v48 = vunpack.i.h.bf16 %v12135_v32  ;;  %v8382_v6 = vpack.i.bf16 %v12452_v19, %v12492_v56  ;;  %v12739_v20 = vmax.f32 %v20463_v42, %v1864_v53  ;;  %v12752_v32 = vpop.permute.xlu0 %8163  ;;  %v20475_v56 = vld [vmem:[#allocation170_spill] sm:$0xff] }
 0x311   :  { %v1722_v29 = vsel %vm1673_vm8, %v20457_v23, %v19469_v44  ;;  %v1723_v54 = vsel %vm1673_vm8, %v20458_v41, %v8016_v28  ;;  %v20461_v23 = vld [vmem:[#allocation127_spill] sm:$0xff]  ;;  %v20465_v41 = vld [vmem:[#allocation124_spill] sm:$0xff]  ;;  %v20467_v31 = vunpack.i.l.bf16 %v11371_v15  ;;  %20469 = vst [vmem:[#allocation126_spill] sm:$0xff] %v12752_v32  ;;  %v20471_v53 = vunpack.i.h.bf16 %v20459_v43 }
 0x312   :  { %v1724_v35 = vsel %vm1673_vm8, %v20460_v51, %v19472_v26  ;;  %v12736_v44 = vmax.f32 %v20461_v23, %v1861_v8  ;;  %20464 = vst [vmem:[#allocation116_spill] sm:$0xff] %v12739_v20  ;;  %v12742_v50 = vmax.f32 %v20465_v41, %v1865_v21  ;;  %v12750_v51 = vpop.permute.xlu1 %8158  ;;  %v1867_v26 = vmax.f32 %v12265_v30, %v1722_v29  ;;  %v20472_v23 = vld [vmem:[#allocation95_spill] sm:$0xff]  ;;  %v20474_v29 = vld [vmem:[#allocation213_spill] sm:$0xff] }
 0x313   :  { %v12748_v37 = vsel %vm1288_vm7, %v20467_v31, %v8010_v46  ;;  %20468 = vst [vmem:[#allocation122_spill] sm:$0xff] %v12750_v51  ;;  %v20470_v8 = vunpack.i.h.bf16 %v12108_v40  ;;  %v8041_v42 = vunpack.i.h.bf16 %v20472_v23  ;;  %v8040_v41 = vunpack.i.l.bf16 %v20472_v23  ;;  %8383 = vrot.lane.b32.xlu0 %v8382_v6, %s9453_s1  ;;  %8403 = vrot.lane.b32.xlu1 %v8392_v5, %s9454_s2  ;;  %v20479_v23 = vld [vmem:[#allocation79_spill] sm:$0xff] }
 0x314   :  { %20462 = vst [vmem:[#allocation68_spill] sm:$0xff] %v12736_v44  ;;  %20466 = vst [vmem:[#allocation119_spill] sm:$0xff] %v12742_v50  ;;  %v20473_v31 = vunpack.i.h.bf16 %v11371_v15  ;;  %v1871_v39 = vmax.f32 %v20474_v29, %v1723_v54  ;;  %v1875_v43 = vmax.f32 %v20475_v56, %v1724_v35  ;;  %v20477_v62 = vunpack.i.l.bf16 %v20476_v11  ;;  %v20484_v29 = vld [vmem:[#allocation171_spill] sm:$0xff] }
 0x315   :  { %v1725_v21 = vsel %vm1673_vm8, %v20471_v53, %v20470_v8  ;;  %v20478_v53 = vunpack.i.l.bf16 %v20456_v33  ;;  %v20480_v6 = vunpack.i.l.bf16 %v20479_v23  ;;  %v20481_v15 = vunpack.i.h.bf16 %v20479_v23 }
 0x316   :  { %v1338_v30 = vsel %vm1288_vm7, %v20473_v31, %v8011_v18  ;;  %v1401_v8 = vsel %vm1288_vm7, %v8020_v13, %v20477_v62  ;;  %v20482_v56 = vunpack.i.h.bf16 %v20476_v11  ;;  %v20483_v62 = vld [vmem:[#allocation32_spill] sm:$0xff]  ;;  %v1879_v45 = vmax.f32 %v20484_v29, %v1725_v21  ;;  %v20487_v11 = vld [vmem:[#allocation87_spill] sm:$0xff] }
 0x317   :  { %v12781_v5 = vsel %vm1288_vm7, %v20480_v6, %v20478_v53  ;;  %v12787_v54 = vsel %vm1288_vm7, %v20481_v15, %v8031_v3  ;;  %v8026_v31 = vunpack.i.h.bf16 %v20483_v62  ;;  %v1305_v32 = vsel %vm1288_vm7, %v8010_v46, %v8020_v13  ;;  %v12800_v6 = vpop.permute.xlu1 %8173  ;;  %v12802_v15 = vpop.permute.xlu0 %8168  ;;  %v20493_v13 = vld [vmem:[#allocation83_spill] sm:$0xff] }
 0x318   :  { %v1402_v35 = vsel %vm1288_vm7, %v8021_v48, %v20482_v56  ;;  %v1306_v53 = vsel %vm1288_vm7, %v8011_v18, %v8021_v48  ;;  %v8025_v23 = vunpack.i.l.bf16 %v20483_v62  ;;  %20485 = vst [vmem:[#allocation120_spill] sm:$0xff] %v12800_v6  ;;  %20486 = vst [vmem:[#allocation161_spill] sm:$0xff] %v12802_v15  ;;  %v12805_v51 = vmax.f32 %v20487_v11, %v1867_v26  ;;  %v20489_v56 = vld [vmem:[#allocation215_spill] sm:$0xff]  ;;  %v20495_v62 = vld [vmem:[#allocation9_spill] sm:$0xff] }
 0x319   :  { %v1866_v7 = vmax.f32 %v1401_v8, %v20489_v56  ;;  %v20491_v27 = vunpack.i.l.bf16 %v20490_v34  ;;  %v20492_v46 = vunpack.i.h.bf16 %v20490_v34  ;;  %v12817_v48 = vmax.f32 %v20493_v13, %v1871_v39  ;;  %v20497_v26 = vld [vmem:[#allocation217_spill] sm:$0xff]  ;;  %v20498_v15 = vld [vmem:[#allocation211_spill] sm:$0xff]  ;;  %v20499_v6 = vld [vmem:[#allocation176_spill] sm:$0xff] }
 0x31a   :  { %20488 = vst [vmem:[#allocation82_spill] sm:$0xff] %v12805_v51  ;;  %v12820_v29 = vmax.f32 %v20495_v62, %v1875_v43  ;;  %v1870_v11 = vmax.f32 %v1402_v35, %v20497_v26  ;;  %v8045_v8 = vunpack.i.l.bf16 %v20498_v15  ;;  %v1691_v56 = vsel %vm1673_vm8, %v8016_v28, %v8026_v31  ;;  %v20501_v43 = vld [vmem:[#allocation7_spill] sm:$0xff]  ;;  %v20503_v35 = vld [vmem:[#allocation172_spill] sm:$0xff]  ;;  %v20504_v26 = vld [vmem:[#allocation173_spill] sm:$0xff] }
 0x31b   :  { %v1403_v21 = vsel %vm1288_vm7, %v8040_v41, %v20491_v27  ;;  %v1404_v18 = vsel %vm1288_vm7, %v8041_v42, %v20492_v46  ;;  %20494 = vst [vmem:[#allocation127_spill] sm:$0xff] %v12817_v48  ;;  %v20500_v27 = vunpack.i.h.bf16 %v20499_v6  ;;  %v8387_v46 = vpack.i.bf16 %v12473_v60, %v12463_v16  ;;  %v12843_v25 = vpop.permute.xlu1 %8188 }
 0x31c   :  { %20496 = vst [vmem:[#allocation118_spill] sm:$0xff] %v12820_v29  ;;  %v8417_v39 = vpack.i.bf16 %v12693_v24, %v12685_v63  ;;  %v12835_v13 = vmax.f32 %v20501_v43, %v1879_v45  ;;  %v1874_v62 = vmax.f32 %v1403_v21, %v20503_v35  ;;  %v1878_v2 = vmax.f32 %v1404_v18, %v20504_v26  ;;  %v20511_v18 = vld [vmem:[#allocation77_spill] sm:$0xff] }
 0x31d   :  { %v1787_v34 = vsel %vm1673_vm8, %v8026_v31, %v20500_v27  ;;  %v20505_v28 = vunpack.i.l.bf16 %v12100_v14  ;;  %20506 = vst [vmem:[#allocation95_spill] sm:$0xff] %v12843_v25  ;;  %v12845_v31 = vpop.permute.xlu0 %8178  ;;  %v20508_v27 = vld [vmem:[#allocation80_spill] sm:$0xff]  ;;  %v1308_v45 = vsel %vm1288_vm7, %v8031_v3, %v8041_v42  ;;  %v20510_v43 = vunpack.i.l.bf16 %v20499_v6  ;;  %8388 = vrot.lane.b32.xlu0 %v8387_v46, %s9453_s1  ;;  %v20572_v25 = vld [vmem:[#allocation99_spill] sm:$0xff] }
 0x31e   :  { %20502 = vst [vmem:[#allocation124_spill] sm:$0xff] %v12835_v13  ;;  %20507 = vst [vmem:[#allocation213_spill] sm:$0xff] %v12845_v31  ;;  %v12848_v16 = vmax.f32 %v20508_v27, %v1866_v7  ;;  %v8046_v14 = vunpack.i.h.bf16 %v20498_v15  ;;  %8418 = vrot.lane.b32.xlu1 %v8417_v39, %s9454_s2  ;;  %v12860_v35 = vmax.f32 %v20511_v18, %v1870_v11  ;;  %v20514_v6 = vld [vmem:[#allocation76_spill] sm:$0xff]  ;;  %v20574_v13 = vld [vmem:[#allocation106_spill] sm:$0xff] }
 0x31f   :  { %v1690_v38 = vsel %vm1673_vm8, %v20505_v28, %v8025_v23  ;;  %v1786_v21 = vsel %vm1673_vm8, %v8025_v23, %v20510_v43  ;;  %v1872_v26 = vmax.f32 %v1338_v30, %v1691_v56  ;;  %v1873_v7 = vmax.f32 %v1306_v53, %v1787_v34  ;;  %v20517_v56 = vld [vmem:[#allocation4_spill] sm:$0xff] }
 0x320   :  { %20509 = vst [vmem:[#allocation170_spill] sm:$0xff] %v12848_v16  ;;  %20512 = vst [vmem:[#allocation175_spill] sm:$0xff] %v12860_v35  ;;  %v20513_v28 = vunpack.i.l.bf16 %v12108_v40  ;;  %v1868_v42 = vmax.f32 %v12748_v37, %v1690_v38  ;;  %v20515_v23 = vunpack.i.l.bf16 %v20514_v6  ;;  %v8397_v46 = vpack.i.bf16 %v12452_v19, %v12473_v60  ;;  %v20519_v37 = vld [vmem:[#allocation5_spill] sm:$0xff] }
 0x321   :  { %v8422_v11 = vpack.i.bf16 %v12597_v61, %v12693_v24  ;;  %v20516_v30 = vunpack.i.l.bf16 %v20456_v33  ;;  %v12880_v34 = vmax.f32 %v20517_v56, %v1874_v62  ;;  %v12883_v38 = vmax.f32 %v20519_v37, %v1878_v2  ;;  %v12898_v2 = vpop.permute.xlu0 %8183  ;;  %v20527_v62 = vld [vmem:[#allocation136_spill] sm:$0xff]  ;;  %v20535_v37 = vld [vmem:[#allocation133_spill] sm:$0xff]  ;;  %v20551_v24 = vld [vmem:[#allocation91_spill] sm:$0xff] }
 0x322   :  { %v1692_v3 = vsel %vm1673_vm8, %v20513_v28, %v8045_v8  ;;  %v1788_v15 = vsel %vm1673_vm8, %v8045_v8, %v20515_v23  ;;  %v1869_v39 = vmax.f32 %v1305_v32, %v1786_v21  ;;  %v20521_v8 = vunpack.i.h.bf16 %v12108_v40  ;;  %8398 = vrot.lane.b32.xlu0 %v8397_v46, %s9454_s2  ;;  %20524 = vst [vmem:[#allocation87_spill] sm:$0xff] %v12898_v2  ;;  %v20525_v32 = vld [vmem:[#allocation129_spill] sm:$0xff] }
 0x323   :  { %v1307_v53 = vsel %vm1288_vm7, %v20516_v30, %v8040_v41  ;;  %20518 = vst [vmem:[#allocation79_spill] sm:$0xff] %v12880_v34  ;;  %20520 = vst [vmem:[#allocation32_spill] sm:$0xff] %v12883_v38  ;;  %v20522_v43 = vunpack.i.h.bf16 %v20514_v6  ;;  %v1876_v18 = vmax.f32 %v12781_v5, %v1692_v3  ;;  %8423 = vrot.lane.b32.xlu1 %v8422_v11, %s9453_s1  ;;  %v12896_v41 = vpop.permute.xlu1 %8198  ;;  %v20529_v6 = vld [vmem:[#allocation214_spill] sm:$0xff]  ;;  %v20532_v11 = vld [vmem:[#allocation140_spill] sm:$0xff]  ;;  %v8065_v38 = vunpack.i.l.bf16 %v20574_v13 }
 0x324   :  { %v1693_v27 = vsel %vm1673_vm8, %v20521_v8, %v8046_v14  ;;  %20523 = vst [vmem:[#allocation171_spill] sm:$0xff] %v12896_v41  ;;  %v12901_v40 = vmax.f32 %v20525_v32, %v1872_v26  ;;  %v12904_v21 = vmax.f32 %v20527_v62, %v1873_v7  ;;  %v1877_v28 = vmax.f32 %v1307_v53, %v1788_v15  ;;  %v20534_v15 = vld [vmem:[#allocation212_spill] sm:$0xff]  ;;  %v20538_v62 = vld [vmem:[#allocation85_spill] sm:$0xff]  ;;  %v20549_v32 = vld [vmem:[#allocation138_spill] sm:$0xff] }
 0x325   :  { %v1789_v33 = vsel %vm1673_vm8, %v8046_v14, %v20522_v43  ;;  %v19489_v23 = vunpack.i.h.bf16 %v20529_v6  ;;  %v20530_v14 = vld [vmem:[#allocation132_spill] sm:$0xff]  ;;  %v19491_v5 = vunpack.i.l.bf16 %v20529_v6  ;;  %v8407_v3 = vpack.i.bf16 %v12685_v63, %v12587_v47  ;;  %v20560_v19 = vld [vmem:[#allocation193_spill] sm:$0xff] }
 0x326   :  { %20526 = vst [vmem:[#allocation215_spill] sm:$0xff] %v12901_v40  ;;  %20528 = vst [vmem:[#allocation73_spill] sm:$0xff] %v12904_v21  ;;  %v12908_v30 = vmax.f32 %v20530_v14, %v1868_v42  ;;  %v8427_v46 = vpack.i.bf16 %v12645_v52, %v12638_v17  ;;  %v12916_v26 = vmax.f32 %v20532_v11, %v1869_v39  ;;  %v8051_v53 = vunpack.i.h.bf16 %v20534_v15  ;;  %v20537_v42 = vld [vmem:[#allocation216_spill] sm:$0xff]  ;;  %v20539_v39 = vld [vmem:[#allocation141_spill] sm:$0xff] }
 0x327   :  { %v1880_v7 = vmax.f32 %v12787_v54, %v1693_v27  ;;  %v1881_v56 = vmax.f32 %v1308_v45, %v1789_v33  ;;  %v12921_v8 = vmax.f32 %v20535_v37, %v1876_v18  ;;  %v8061_v14 = vunpack.i.h.bf16 %v20538_v62  ;;  %8408 = vrot.lane.b32.xlu0 %v8407_v3, %s9453_s1  ;;  %v20541_v45 = vld [vmem:[#allocation181_spill] sm:$0xff]  ;;  %v20542_v33 = vld [vmem:[#allocation96_spill] sm:$0xff]  ;;  %v12950_v27 = vpop.permute.xlu0 %8193  ;;  %v12952_v43 = vpop.permute.xlu1 %8208 }
 0x328   :  { %20531 = vst [vmem:[#allocation83_spill] sm:$0xff] %v12908_v30  ;;  %20533 = vst [vmem:[#allocation9_spill] sm:$0xff] %v12916_v26  ;;  %8428 = vrot.lane.b32.xlu1 %v8427_v46, %s9453_s1  ;;  %v12929_v11 = vmax.f32 %v20539_v39, %v1877_v28  ;;  %v8050_v54 = vunpack.i.l.bf16 %v20534_v15  ;;  %v20543_v18 = vunpack.i.h.bf16 %v20542_v33  ;;  %v20544_v3 = vunpack.i.l.bf16 %v20542_v33 }
 0x329   :  { %20536 = vst [vmem:[#allocation217_spill] sm:$0xff] %v12921_v8  ;;  %v8060_v28 = vunpack.i.l.bf16 %v20538_v62  ;;  %v8412_v15 = vpack.i.bf16 %v12587_v47, %v12638_v17  ;;  %v8437_v39 = vpack.i.bf16 %v12597_v61, %v12645_v52  ;;  %20545 = vst [vmem:[#allocation176_spill] sm:$0xff] %v12950_v27  ;;  %v12958_v33 = vmax.f32 %v20549_v32, %v1881_v56  ;;  %v20554_v52 = vld [vmem:[#allocation108_spill] sm:$0xff]  ;;  %v20566_v27 = vld [vmem:[#allocation177_spill] sm:$0xff] }
 0x32a   :  { %20540 = vst [vmem:[#allocation211_spill] sm:$0xff] %v12929_v11  ;;  %v1727_v37 = vsel %vm1673_vm8, %v20543_v18, %v19489_v23  ;;  %v1726_v46 = vsel %vm1673_vm8, %v20544_v3, %v19491_v5  ;;  %20546 = vst [vmem:[#allocation7_spill] sm:$0xff] %v12952_v43  ;;  %v20547_v18 = vld [vmem:[#allocation130_spill] sm:$0xff]  ;;  %v20552_v3 = vunpack.i.h.bf16 %v20551_v24  ;;  %v8071_v5 = vunpack.i.h.bf16 %v20541_v45 }
 0x32b   :  { %v12955_v23 = vmax.f32 %v20547_v18, %v1880_v7  ;;  %20550 = vst [vmem:[#allocation173_spill] sm:$0xff] %v12958_v33  ;;  %v20553_v61 = vunpack.i.l.bf16 %v20537_v42  ;;  %v20555_v47 = vunpack.i.l.bf16 %v20554_v52  ;;  %v20556_v7 = vunpack.i.h.bf16 %v20537_v42  ;;  %v20558_v18 = vld [vmem:[#allocation84_spill] sm:$0xff]  ;;  %8413 = vrot.lane.b32.xlu0 %v8412_v15, %s9454_s2 }
 0x32c   :  { %v12964_v62 = vsel %vm1288_vm7, %v20552_v3, %v8051_v53  ;;  %v20557_v56 = vunpack.i.h.bf16 %v20554_v52  ;;  %v20559_v63 = vunpack.i.h.bf16 %v20558_v18  ;;  %v8081_v60 = vunpack.i.h.bf16 %v20560_v19  ;;  %8438 = vrot.lane.b32.xlu1 %v8437_v39, %s9454_s2 }
 0x32d   :  { %20548 = vst [vmem:[#allocation172_spill] sm:$0xff] %v12955_v23  ;;  %v1728_v17 = vsel %vm1673_vm8, %v20555_v47, %v20553_v61  ;;  %v20561_v47 = vunpack.i.l.bf16 %v20551_v24  ;;  %v20562_v52 = vunpack.i.l.bf16 %v20541_v45  ;;  %v1883_v15 = vmax.f32 %v20566_v27, %v1726_v46  ;;  %v20569_v27 = vld [vmem:[#allocation184_spill] sm:$0xff] }
 0x32e   :  { %v1729_v32 = vsel %vm1673_vm8, %v20557_v56, %v20556_v7  ;;  %v1406_v3 = vsel %vm1288_vm7, %v8061_v14, %v20559_v63  ;;  %v20563_v7 = vld [vmem:[#allocation105_spill] sm:$0xff]  ;;  %v20565_v63 = vld [vmem:[#allocation178_spill] sm:$0xff]  ;;  %v20567_v39 = vunpack.i.l.bf16 %v20558_v18  ;;  %v8432_v2 = vpack.i.bf16 %v12688_v57, %v12663_v55 }
 0x32f   :  { %v12990_v61 = vsel %vm1288_vm7, %v20561_v47, %v8050_v54  ;;  %v20564_v56 = vunpack.i.l.bf16 %v20563_v7  ;;  %v1887_v41 = vmax.f32 %v20565_v63, %v1727_v37  ;;  %v8080_v47 = vunpack.i.l.bf16 %v20560_v19  ;;  %v20570_v18 = vld [vmem:[#allocation185_spill] sm:$0xff]  ;;  %v20571_v63 = vld [vmem:[#allocation179_spill] sm:$0xff] }
 0x330   :  { %v1405_v24 = vsel %vm1288_vm7, %v8060_v28, %v20567_v39  ;;  %v8447_v31 = vpack.i.bf16 %v12707_v58, %v12607_v22  ;;  %v1891_v46 = vmax.f32 %v20569_v27, %v1728_v17  ;;  %v1886_v39 = vmax.f32 %v1406_v3, %v20571_v63  ;;  %8433 = vrot.lane.b32.xlu0 %v8432_v2, %s9453_s1  ;;  %v13030_v17 = vpop.permute.xlu0 %8203  ;;  %v20577_v3 = vld [vmem:[#allocation14_spill] sm:$0xff]  ;;  %v20581_v27 = vld [vmem:[#allocation180_spill] sm:$0xff] }
 0x331   :  { %v12998_v43 = vsel %vm1288_vm7, %v20564_v56, %v20562_v52  ;;  %v20568_v52 = vunpack.i.h.bf16 %v20563_v7  ;;  %v1895_v56 = vmax.f32 %v20570_v18, %v1729_v32  ;;  %v1309_v19 = vsel %vm1288_vm7, %v8050_v54, %v8060_v28  ;;  %20575 = vst [vmem:[#allocation80_spill] sm:$0xff] %v13030_v17  ;;  %v13032_v32 = vpop.permute.xlu1 %8213  ;;  %v20579_v54 = vld [vmem:[#allocation16_spill] sm:$0xff]  ;;  %v20587_v17 = vld [vmem:[#allocation10_spill] sm:$0xff] }
 0x332   :  { %v20573_v57 = vunpack.i.h.bf16 %v20572_v25  ;;  %v8066_v7 = vunpack.i.h.bf16 %v20574_v13  ;;  %8448 = vrot.lane.b32.xlu1 %v8447_v31, %s9453_s1  ;;  %20576 = vst [vmem:[#allocation77_spill] sm:$0xff] %v13032_v32  ;;  %v13038_v28 = vmax.f32 %v20579_v54, %v1883_v15  ;;  %v1882_v18 = vmax.f32 %v1405_v24, %v20581_v27  ;;  %v20585_v15 = vld [vmem:[#allocation24_spill] sm:$0xff] }
 0x333   :  { %v13015_v37 = vsel %vm1288_vm7, %v20568_v52, %v8071_v5  ;;  %v13035_v52 = vmax.f32 %v20577_v3, %v1887_v41  ;;  %v20582_v13 = vunpack.i.l.bf16 %v20572_v25  ;;  %v8085_v63 = vunpack.i.l.bf16 %v12394_v12  ;;  %v20583_v41 = vld [vmem:[#allocation26_spill] sm:$0xff]  ;;  %v20590_v25 = vld [vmem:[#allocation89_spill] sm:$0xff] }
 0x334   :  { %v1408_v55 = vsel %vm1288_vm7, %v8081_v60, %v20573_v57  ;;  %20580 = vst [vmem:[#allocation4_spill] sm:$0xff] %v13038_v28  ;;  %v1310_v57 = vsel %vm1288_vm7, %v8051_v53, %v8061_v14  ;;  %v8452_v32 = vpack.i.bf16 %v12607_v22, %v12657_v36  ;;  %v13051_v3 = vmax.f32 %v20583_v41, %v1891_v46  ;;  %v20589_v14 = vld [vmem:[#allocation187_spill] sm:$0xff] }
 0x335   :  { %20578 = vst [vmem:[#allocation76_spill] sm:$0xff] %v13035_v52  ;;  %v1407_v31 = vsel %vm1288_vm7, %v8080_v47, %v20582_v13  ;;  %v13054_v54 = vmax.f32 %v20585_v15, %v1895_v56  ;;  %v13057_v53 = vmax.f32 %v20587_v17, %v1886_v39  ;;  %v1894_v24 = vmax.f32 %v1408_v55, %v20589_v14  ;;  %v20594_v55 = vld [vmem:[#allocation12_spill] sm:$0xff]  ;;  %v20596_v15 = vld [vmem:[#allocation186_spill] sm:$0xff] }
 0x336   :  { %20584 = vst [vmem:[#allocation5_spill] sm:$0xff] %v13051_v3  ;;  %v20591_v27 = vunpack.i.h.bf16 %v20590_v25  ;;  %v20592_v52 = vunpack.i.l.bf16 %v20529_v6  ;;  %v20593_v46 = vunpack.i.h.bf16 %v20529_v6  ;;  %v8086_v39 = vunpack.i.h.bf16 %v12394_v12  ;;  %8443 = vrot.lane.b32.xlu0 %v8432_v2, %s9454_s2  ;;  %8453 = vrot.lane.b32.xlu1 %v8452_v32, %s9454_s2  ;;  %v20599_v2 = vld [vmem:[#allocation102_spill] sm:$0xff] }
 0x337   :  { %20586 = vst [vmem:[#allocation129_spill] sm:$0xff] %v13054_v54  ;;  %20588 = vst [vmem:[#allocation136_spill] sm:$0xff] %v13057_v53  ;;  %v13076_v17 = vmax.f32 %v20594_v55, %v1882_v18  ;;  %v1312_v41 = vsel %vm1288_vm7, %v8071_v5, %v8081_v60  ;;  %v1890_v14 = vmax.f32 %v1407_v31, %v20596_v15  ;;  %v20600_v32 = vunpack.i.l.bf16 %v20599_v2  ;;  %v13097_v31 = vpop.permute.xlu0 %8218  ;;  %v20603_v15 = vld [vmem:[#allocation19_spill] sm:$0xff] }
 0x338   :  { %v1791_v13 = vsel %vm1673_vm8, %v8066_v7, %v20591_v27  ;;  %v1694_v22 = vsel %vm1673_vm8, %v20592_v52, %v8065_v38  ;;  %v1695_v56 = vsel %vm1673_vm8, %v20593_v46, %v8066_v7  ;;  %v20597_v52 = vunpack.i.l.bf16 %v20590_v25  ;;  %v13099_v25 = vpop.permute.xlu1 %8233  ;;  %v20650_v54 = vld [vmem:[#allocation195_spill] sm:$0xff] }
 0x339   :  { %20595 = vst [vmem:[#allocation214_spill] sm:$0xff] %v13076_v17  ;;  %v20598_v7 = vunpack.i.l.bf16 %v20537_v42  ;;  %v1792_v18 = vsel %vm1673_vm8, %v8085_v63, %v20600_v32  ;;  %v8457_v60 = vpack.i.bf16 %v12736_v44, %v12707_v58  ;;  %v8472_v5 = vpack.i.bf16 %v12742_v50, %v12739_v20  ;;  %20601 = vst [vmem:[#allocation132_spill] sm:$0xff] %v13099_v25  ;;  %v20639_v58 = vld [vmem:[#allocation107_spill] sm:$0xff] }
 0x33a   :  { %v1790_v6 = vsel %vm1673_vm8, %v8065_v38, %v20597_v52  ;;  %v20602_v38 = vunpack.i.l.bf16 %v20541_v45  ;;  %v1884_v46 = vmax.f32 %v12990_v61, %v1694_v22  ;;  %v1888_v55 = vmax.f32 %v12964_v62, %v1695_v56 }
 0x33b   :  { %v1696_v12 = vsel %vm1673_vm8, %v20598_v7, %v8085_v63  ;;  %v1889_v63 = vmax.f32 %v1310_v57, %v1791_v13  ;;  %v13108_v52 = vmax.f32 %v20603_v15, %v1894_v24  ;;  %v1885_v7 = vmax.f32 %v1309_v19, %v1790_v6  ;;  %8458 = vrot.lane.b32.xlu0 %v8457_v60, %s9454_s2  ;;  %v20607_v19 = vld [vmem:[#allocation22_spill] sm:$0xff]  ;;  %v20609_v13 = vld [vmem:[#allocation148_spill] sm:$0xff] }
 0x33c   :  { %v1311_v27 = vsel %vm1288_vm7, %v20602_v38, %v8080_v47  ;;  %v20605_v32 = vunpack.i.h.bf16 %v20537_v42  ;;  %8473 = vrot.lane.b32.xlu1 %v8472_v5, %s9453_s1  ;;  %v20606_v45 = vunpack.i.h.bf16 %v20599_v2  ;;  %v1892_v62 = vmax.f32 %v12998_v43, %v1696_v12  ;;  %v20611_v6 = vld [vmem:[#allocation144_spill] sm:$0xff]  ;;  %v20615_v12 = vld [vmem:[#allocation155_spill] sm:$0xff] }
 0x33d   :  { %20604 = vst [vmem:[#allocation140_spill] sm:$0xff] %v13108_v52  ;;  %v1893_v61 = vmax.f32 %v1311_v27, %v1792_v18  ;;  %v19515_v47 = vunpack.i.h.bf16 %v12458_v49  ;;  %v13123_v57 = vmax.f32 %v20607_v19, %v1890_v14  ;;  %v19514_v42 = vunpack.i.l.bf16 %v12458_v49 }
 0x33e   :  { %v1697_v50 = vsel %vm1673_vm8, %v20605_v32, %v8086_v39  ;;  %v1793_v22 = vsel %vm1673_vm8, %v8086_v39, %v20606_v45  ;;  %v8462_v24 = vpack.i.bf16 %v12635_v1, %v12736_v44  ;;  %v13129_v56 = vmax.f32 %v20609_v13, %v1884_v46  ;;  %v20613_v39 = vld [vmem:[#allocation151_spill] sm:$0xff]  ;;  %v13145_v46 = vpop.permute.xlu0 %8223  ;;  %v20626_v13 = vld [vmem:[#allocation146_spill] sm:$0xff] }
 0x33f   :  { %20608 = vst [vmem:[#allocation212_spill] sm:$0xff] %v13123_v57  ;;  %v13132_v2 = vmax.f32 %v20611_v6, %v1888_v55  ;;  %v13135_v60 = vmax.f32 %v20613_v39, %v1889_v63  ;;  %v1896_v43 = vmax.f32 %v13015_v37, %v1697_v50  ;;  %v13139_v18 = vmax.f32 %v20615_v12, %v1885_v7  ;;  %v13147_v55 = vpop.permute.xlu1 %8243  ;;  %v20618_v63 = vld [vmem:[#allocation20_spill] sm:$0xff]  ;;  %v20633_v45 = vld [vmem:[#allocation135_spill] sm:$0xff] }
 0x340   :  { %20610 = vst [vmem:[#allocation133_spill] sm:$0xff] %v13129_v56  ;;  %v1897_v14 = vmax.f32 %v1312_v41, %v1793_v22  ;;  %v8091_v38 = vunpack.i.h.bf16 %v12425_v9  ;;  %v19522_v27 = vunpack.i.l.bf16 %v12495_v4  ;;  %8463 = vrot.lane.b32.xlu0 %v8462_v24, %s9453_s1  ;;  %8483 = vrot.lane.b32.xlu1 %v8472_v5, %s9454_s2  ;;  %20617 = vst [vmem:[#allocation181_spill] sm:$0xff] %v13147_v55  ;;  %v20620_v50 = vld [vmem:[#allocation156_spill] sm:$0xff]  ;;  %v20622_v41 = vld [vmem:[#allocation121_spill] sm:$0xff]  ;;  %v8090_v39 = vunpack.i.l.bf16 %v12425_v9 }
 0x341   :  { %20612 = vst [vmem:[#allocation216_spill] sm:$0xff] %v13132_v2  ;;  %20614 = vst [vmem:[#allocation85_spill] sm:$0xff] %v13135_v60  ;;  %v13150_v15 = vmax.f32 %v20618_v63, %v1892_v62  ;;  %v13153_v37 = vmax.f32 %v20620_v50, %v1893_v61  ;;  %v20623_v7 = vunpack.i.h.bf16 %v20622_v41  ;;  %v20624_v5 = vunpack.i.l.bf16 %v20622_v41  ;;  %v20625_v62 = vld [vmem:[#allocation50_spill] sm:$0xff]  ;;  %v20628_v12 = vld [vmem:[#allocation200_spill] sm:$0xff] }
 0x342   :  { %20616 = vst [vmem:[#allocation141_spill] sm:$0xff] %v13139_v18  ;;  %v8101_v19 = vunpack.i.h.bf16 %v20625_v62  ;;  %v8467_v61 = vpack.i.bf16 %v12660_v59, %v12657_v36  ;;  %v8497_v24 = vpack.i.bf16 %v12916_v26, %v12908_v30  ;;  %v13174_v6 = vmax.f32 %v20626_v13, %v1896_v43  ;;  %v20629_v41 = vld [vmem:[#allocation153_spill] sm:$0xff]  ;;  %v20636_v50 = vld [vmem:[#allocation188_spill] sm:$0xff] }
 0x343   :  { %20619 = vst [vmem:[#allocation96_spill] sm:$0xff] %v13150_v15  ;;  %20621 = vst [vmem:[#allocation130_spill] sm:$0xff] %v13153_v37  ;;  %v1731_v32 = vsel %vm1673_vm8, %v20623_v7, %v19515_v47  ;;  %v1730_v22 = vsel %vm1673_vm8, %v20624_v5, %v19514_v42  ;;  %v8111_v63 = vunpack.i.h.bf16 %v20628_v12  ;;  %v13180_v7 = vmax.f32 %v20629_v41, %v1897_v14  ;;  %v20631_v5 = vld [vmem:[#allocation117_spill] sm:$0xff] }
 0x344   :  { %20627 = vst [vmem:[#allocation138_spill] sm:$0xff] %v13174_v6  ;;  %v20632_v42 = vunpack.i.h.bf16 %v20631_v5  ;;  %v20634_v43 = vunpack.i.l.bf16 %v20633_v45  ;;  %v8100_v13 = vunpack.i.l.bf16 %v20625_v62  ;;  %8468 = vrot.lane.b32.xlu0 %v8467_v61, %s9453_s1  ;;  %8498 = vrot.lane.b32.xlu1 %v8497_v24, %s9454_s2  ;;  %v20635_v14 = vld [vmem:[#allocation189_spill] sm:$0xff]  ;;  %v1899_v36 = vmax.f32 %v20636_v50, %v1730_v22  ;;  %v13215_v24 = vpop.permute.xlu0 %8228 }
 0x345   :  { %20630 = vst [vmem:[#allocation91_spill] sm:$0xff] %v13180_v7  ;;  %v1903_v41 = vmax.f32 %v20635_v14, %v1731_v32  ;;  %v20638_v20 = vunpack.i.h.bf16 %v20633_v45  ;;  %v8121_v26 = vunpack.i.h.bf16 %v20639_v58  ;;  %v8120_v61 = vunpack.i.l.bf16 %v20639_v58  ;;  %20642 = vst [vmem:[#allocation108_spill] sm:$0xff] %v13215_v24  ;;  %v13217_v45 = vpop.permute.xlu1 %8258  ;;  %v20646_v14 = vld [vmem:[#allocation131_spill] sm:$0xff] }
 0x346   :  { %v13186_v47 = vsel %vm1288_vm7, %v20632_v42, %v8091_v38  ;;  %v1732_v9 = vsel %vm1673_vm8, %v20634_v43, %v19522_v27  ;;  %v20637_v42 = vunpack.i.h.bf16 %v12495_v4  ;;  %v20640_v43 = vld [vmem:[#allocation110_spill] sm:$0xff]  ;;  %v8477_v32 = vpack.i.bf16 %v12635_v1, %v12660_v59  ;;  %20643 = vst [vmem:[#allocation84_spill] sm:$0xff] %v13217_v45 }
 0x347   :  { %v20641_v27 = vunpack.i.h.bf16 %v20640_v43  ;;  %v8502_v22 = vpack.i.bf16 %v12860_v35, %v12848_v16  ;;  %v20647_v58 = vunpack.i.l.bf16 %v20646_v14  ;;  %v20648_v1 = vunpack.i.h.bf16 %v20646_v14  ;;  %v20649_v45 = vld [vmem:[#allocation194_spill] sm:$0xff] }
 0x348   :  { %v1733_v44 = vsel %vm1673_vm8, %v20638_v20, %v20637_v42  ;;  %v20644_v20 = vunpack.i.l.bf16 %v20631_v5  ;;  %v1907_v5 = vmax.f32 %v20649_v45, %v1732_v9  ;;  %v20651_v55 = vunpack.i.l.bf16 %v20640_v43  ;;  %8478 = vrot.lane.b32.xlu0 %v8477_v32, %s9454_s2  ;;  %v20655_v9 = vld [vmem:[#allocation35_spill] sm:$0xff]  ;;  %v20658_v45 = vld [vmem:[#allocation125_spill] sm:$0xff] }
 0x349   :  { %v1410_v62 = vsel %vm1288_vm7, %v8101_v19, %v20641_v27  ;;  %v20645_v27 = vunpack.i.l.bf16 %v20628_v12  ;;  %v13237_v59 = vsel %vm1288_vm7, %v20648_v1, %v8111_v63  ;;  %v1911_v24 = vmax.f32 %v20650_v54, %v1733_v44  ;;  %8503 = vrot.lane.b32.xlu1 %v8502_v22, %s9453_s1  ;;  %v20653_v1 = vld [vmem:[#allocation33_spill] sm:$0xff]  ;;  %v20657_v54 = vld [vmem:[#allocation191_spill] sm:$0xff]  ;;  %v13272_v22 = vpop.permute.xlu0 %8238 }
 0x34a   :  { %v13223_v50 = vsel %vm1288_vm7, %v20644_v20, %v8090_v39  ;;  %v13243_v20 = vsel %vm1288_vm7, %v8090_v39, %v8100_v13  ;;  %v13253_v14 = vmax.f32 %v20653_v1, %v1903_v41  ;;  %v13256_v44 = vmax.f32 %v20655_v9, %v1899_v36  ;;  %v20661_v1 = vld [vmem:[#allocation46_spill] sm:$0xff] }
 0x34b   :  { %v13231_v42 = vsel %vm1288_vm7, %v20647_v58, %v20645_v27  ;;  %v1409_v27 = vsel %vm1288_vm7, %v8100_v13, %v20651_v55  ;;  %v20652_v58 = vld [vmem:[#allocation202_spill] sm:$0xff]  ;;  %v1902_v39 = vmax.f32 %v1410_v62, %v20657_v54  ;;  %v20659_v52 = vunpack.i.h.bf16 %v20658_v45  ;;  %v13274_v62 = vpop.permute.xlu1 %8263 }
 0x34c   :  { %v8106_v25 = vunpack.i.h.bf16 %v20652_v58  ;;  %20654 = vst [vmem:[#allocation193_spill] sm:$0xff] %v13253_v14  ;;  %20656 = vst [vmem:[#allocation105_spill] sm:$0xff] %v13256_v44  ;;  %v20660_v55 = vunpack.i.l.bf16 %v20658_v45  ;;  %v8105_v32 = vunpack.i.l.bf16 %v20652_v58  ;;  %v8487_v41 = vpack.i.bf16 %v12908_v30, %v12805_v51  ;;  %v20663_v54 = vld [vmem:[#allocation190_spill] sm:$0xff] }
 0x34d   :  { %v1412_v43 = vsel %vm1288_vm7, %v8121_v26, %v20659_v52  ;;  %v8512_v36 = vpack.i.bf16 %v12817_v48, %v12860_v35  ;;  %v13277_v9 = vmax.f32 %v20661_v1, %v1907_v5  ;;  %v1314_v52 = vsel %vm1288_vm7, %v8091_v38, %v8101_v19  ;;  %v20666_v30 = vld [vmem:[#allocation114_spill] sm:$0xff]  ;;  %v20669_v38 = vld [vmem:[#allocation28_spill] sm:$0xff] }
 0x34e   :  { %v1411_v13 = vsel %vm1288_vm7, %v8120_v61, %v20660_v55  ;;  %v1898_v45 = vmax.f32 %v1409_v27, %v20663_v54  ;;  %v8125_v58 = vunpack.i.l.bf16 %v12630_v10  ;;  %v20664_v55 = vld [vmem:[#allocation44_spill] sm:$0xff]  ;;  %v20667_v44 = vunpack.i.h.bf16 %v20666_v30  ;;  %8488 = vrot.lane.b32.xlu0 %v8487_v41, %s9453_s1  ;;  %v20671_v27 = vld [vmem:[#allocation198_spill] sm:$0xff] }
 0x34f   :  { %20662 = vst [vmem:[#allocation178_spill] sm:$0xff] %v13277_v9  ;;  %v13284_v14 = vmax.f32 %v20664_v55, %v1911_v24  ;;  %v20668_v48 = vunpack.i.h.bf16 %v12458_v49  ;;  %v8126_v1 = vunpack.i.h.bf16 %v12630_v10  ;;  %8513 = vrot.lane.b32.xlu1 %v8512_v36, %s9454_s2  ;;  %v13298_v19 = vmax.f32 %v20669_v38, %v1902_v39  ;;  %v20727_v9 = vld [vmem:[#allocation58_spill] sm:$0xff] }
 0x350   :  { %v1795_v35 = vsel %vm1673_vm8, %v8106_v25, %v20667_v44  ;;  %v1316_v24 = vsel %vm1288_vm7, %v8111_v63, %v8121_v26  ;;  %v1906_v54 = vmax.f32 %v1411_v13, %v20671_v27  ;;  %v20672_v44 = vld [vmem:[#allocation199_spill] sm:$0xff]  ;;  %v20674_v10 = vunpack.i.l.bf16 %v20666_v30  ;;  %v13316_v63 = vpop.permute.xlu0 %8248  ;;  %v13318_v13 = vpop.permute.xlu1 %8268  ;;  %v20679_v27 = vld [vmem:[#allocation128_spill] sm:$0xff] }
 0x351   :  { %20665 = vst [vmem:[#allocation177_spill] sm:$0xff] %v13284_v14  ;;  %v1699_v5 = vsel %vm1673_vm8, %v20668_v48, %v8106_v25  ;;  %20670 = vst [vmem:[#allocation184_spill] sm:$0xff] %v13298_v19  ;;  %v1910_v55 = vmax.f32 %v1412_v43, %v20672_v44  ;;  %v20673_v14 = vunpack.i.l.bf16 %v12458_v49  ;;  %v8492_v39 = vpack.i.bf16 %v12805_v51, %v12848_v16  ;;  %v20675_v43 = vld [vmem:[#allocation31_spill] sm:$0xff]  ;;  %v20704_v16 = vld [vmem:[#allocation37_spill] sm:$0xff] }
 0x352   :  { %v1794_v25 = vsel %vm1673_vm8, %v8105_v32, %v20674_v10  ;;  %v8522_v26 = vpack.i.bf16 %v12921_v8, %v12820_v29  ;;  %v13321_v49 = vmax.f32 %v20675_v43, %v1898_v45  ;;  %v1905_v41 = vmax.f32 %v1314_v52, %v1795_v35  ;;  %v20683_v52 = vld [vmem:[#allocation39_spill] sm:$0xff] }
 0x353   :  { %v1698_v48 = vsel %vm1673_vm8, %v20673_v14, %v8105_v32  ;;  %v1904_v14 = vmax.f32 %v13186_v47, %v1699_v5  ;;  %v20677_v30 = vunpack.i.l.bf16 %v12495_v4  ;;  %v20678_v36 = vunpack.i.h.bf16 %v12495_v4  ;;  %8493 = vrot.lane.b32.xlu0 %v8492_v39, %s9454_s2  ;;  %v20720_v51 = vld [vmem:[#allocation63_spill] sm:$0xff] }
 0x354   :  { %20676 = vst [vmem:[#allocation185_spill] sm:$0xff] %v13321_v49  ;;  %v20680_v44 = vunpack.i.l.bf16 %v20679_v27  ;;  %v20681_v45 = vunpack.i.h.bf16 %v20679_v27  ;;  %8523 = vrot.lane.b32.xlu1 %v8522_v26, %s9453_s1  ;;  %v20682_v47 = vunpack.i.l.bf16 %v20628_v12  ;;  %v13347_v5 = vmax.f32 %v20683_v52, %v1910_v55  ;;  %v13371_v52 = vpop.permute.xlu0 %8253 }
 0x355   :  { %v1700_v32 = vsel %vm1673_vm8, %v20677_v30, %v8125_v58  ;;  %v1701_v38 = vsel %vm1673_vm8, %v20678_v36, %v8126_v1  ;;  %v1900_v43 = vmax.f32 %v13223_v50, %v1698_v48  ;;  %v20685_v30 = vld [vmem:[#allocation42_spill] sm:$0xff]  ;;  %v8507_v39 = vpack.i.bf16 %v12904_v21, %v12901_v40  ;;  %v20688_v50 = vld [vmem:[#allocation27_spill] sm:$0xff] }
 0x356   :  { %v1796_v10 = vsel %vm1673_vm8, %v8125_v58, %v20680_v44  ;;  %v1797_v35 = vsel %vm1673_vm8, %v8126_v1, %v20681_v45  ;;  %v1315_v4 = vsel %vm1288_vm7, %v20682_v47, %v8120_v61  ;;  %20684 = vst [vmem:[#allocation179_spill] sm:$0xff] %v13347_v5  ;;  %v1901_v58 = vmax.f32 %v13243_v20, %v1794_v25  ;;  %v20687_v1 = vld [vmem:[#allocation104_spill] sm:$0xff]  ;;  %v20690_v20 = vld [vmem:[#allocation163_spill] sm:$0xff] }
 0x357   :  { %v13352_v36 = vmax.f32 %v20685_v30, %v1906_v54  ;;  %v19540_v27 = vunpack.i.h.bf16 %v20687_v1  ;;  %v8527_v12 = vpack.i.bf16 %v12820_v29, %v12880_v34  ;;  %v1908_v61 = vmax.f32 %v13231_v42, %v1700_v32  ;;  %v20692_v25 = vld [vmem:[#allocation139_spill] sm:$0xff]  ;;  %8508 = vrot.lane.b32.xlu0 %v8507_v39, %s9453_s1  ;;  %v13373_v42 = vpop.permute.xlu1 %8278  ;;  %v20698_v30 = vld [vmem:[#allocation149_spill] sm:$0xff] }
 0x358   :  { %v1909_v26 = vmax.f32 %v1315_v4, %v1796_v10  ;;  %v1912_v55 = vmax.f32 %v13237_v59, %v1701_v38  ;;  %v1913_v44 = vmax.f32 %v1316_v24, %v1797_v35  ;;  %v13362_v48 = vmax.f32 %v20688_v50, %v1904_v14  ;;  %v20693_v59 = vld [vmem:[#allocation29_spill] sm:$0xff]  ;;  %v20695_v14 = vld [vmem:[#allocation166_spill] sm:$0xff]  ;;  %v13454_v21 = vpop.permute.xlu0 %8273 }
 0x359   :  { %20686 = vst [vmem:[#allocation99_spill] sm:$0xff] %v13352_v36  ;;  %v13365_v54 = vmax.f32 %v20690_v20, %v1905_v41  ;;  %v8130_v45 = vunpack.i.l.bf16 %v20692_v25  ;;  %v8135_v47 = vunpack.i.l.bf16 %v20687_v1  ;;  %8528 = vrot.lane.b32.xlu1 %v8527_v12, %s9454_s2  ;;  %v13376_v24 = vmax.f32 %v20693_v59, %v1900_v43  ;;  %v20697_v38 = vld [vmem:[#allocation65_spill] sm:$0xff]  ;;  %v4122_v20 = vld [vmem:[%s19161_s3 + $0x70] sm:$0xff] }
 0x35a   :  { %20689 = vst [vmem:[#allocation106_spill] sm:$0xff] %v13362_v48  ;;  %v13379_v32 = vmax.f32 %v20695_v14, %v1901_v58  ;;  %v8131_v41 = vunpack.i.h.bf16 %v20692_v25  ;;  %v8141_v10 = vunpack.i.h.bf16 %v20697_v38  ;;  %v4123_v35 = vld [vmem:[%s19161_s3 + $0x78] sm:$0xff]  ;;  %v20699_v43 = vunpack.i.h.bf16 %v20698_v30  ;;  %v20700_v25 = vld [vmem:[#allocation40_spill] sm:$0xff]  ;;  %v20702_v14 = vld [vmem:[#allocation167_spill] sm:$0xff] }
 0x35b   :  { %20691 = vst [vmem:[#allocation14_spill] sm:$0xff] %v13365_v54  ;;  %20694 = vst [vmem:[#allocation16_spill] sm:$0xff] %v13376_v24  ;;  %v4155_v4 = vld [vmem:[%s19161_s3 + $0x178] sm:$0xff]  ;;  %v8140_v12 = vunpack.i.l.bf16 %v20697_v38  ;;  %v8542_v50 = vpack.i.bf16 %v12958_v33, %v12955_v23  ;;  %4173 = vmatpush1.msra.mxu0 %v4123_v35  ;;  %v13404_v59 = vmax.f32 %v20700_v25, %v1908_v61  ;;  %v20708_v29 = vmov 0.0   ;;  %v4154_v35 = vld [vmem:[%s19161_s3 + $0x170] sm:$0xff]  ;;  %8518 = vrot.lane.b32.xlu0 %v8507_v39, %s9454_s2 }
 0x35c   :  { %20696 = vst [vmem:[#allocation180_spill] sm:$0xff] %v13379_v32  ;;  %v13395_v58 = vsel %vm1673_vm8, %v20699_v43, %v19540_v27  ;;  %4398 = vmatpush1.msra.mxu1 %v4155_v4  ;;  %v13407_v40 = vmax.f32 %v20702_v14, %v1909_v26  ;;  %v13410_v43 = vmax.f32 %v20704_v16, %v1912_v55  ;;  %v20706_v27 = vld [vmem:[#allocation164_spill] sm:$0xff]  ;;  %v20709_v4 = vld [vmem:[#allocation145_spill] sm:$0xff]  ;;  %v20711_v26 = vunpack.i.l.bf16 %v20698_v30  ;;  %v20728_v54 = vld [vmem:[#allocation122_spill] sm:$0xff] }
 0x35d   :  { %20701 = vst [vmem:[#allocation26_spill] sm:$0xff] %v13404_v59  ;;  %v13413_v38 = vmax.f32 %v20706_v27, %v1913_v44  ;;  %4174 = vmatprep.subr.mxu0 %v20708_v29  ;;  %v20710_v23 = vunpack.i.l.bf16 %v20709_v4  ;;  %v20712_v55 = vld [vmem:[#allocation61_spill] sm:$0xff]  ;;  %8543 = vrot.lane.b32.xlu1 %v8542_v50, %s9453_s1  ;;  %v20713_v25 = vunpack.i.h.bf16 %v20709_v4  ;;  %v8161_v48 = vunpack.i.h.bf16 %v20728_v54 }
 0x35e   :  { %20703 = vst [vmem:[#allocation24_spill] sm:$0xff] %v13407_v40  ;;  %20705 = vst [vmem:[#allocation10_spill] sm:$0xff] %v13410_v43  ;;  %v1734_v16 = vsel %vm1673_vm8, %v20711_v26, %v8135_v47  ;;  %v8146_v27 = vunpack.i.h.bf16 %v20712_v55  ;;  %v8145_v44 = vunpack.i.l.bf16 %v20712_v55  ;;  %v20714_v30 = vld [vmem:[#allocation201_spill] sm:$0xff]  ;;  %4399 = vmatprep.subr.mxu1 %v20708_v29  ;;  %4175 = vmatpush1.msra.mxu0 %v4122_v20  ;;  %v4153_v20 = vld [vmem:[%s19161_s3 + $0x168] sm:$0xff]  ;;  %v20721_v40 = vunpack.i.h.bf16 %v20687_v1 }
 0x35f   :  { %20707 = vst [vmem:[#allocation187_spill] sm:$0xff] %v13413_v38  ;;  %v13423_v61 = vsel %vm1288_vm7, %v20710_v23, %v8130_v45  ;;  %v13438_v23 = vsel %vm1288_vm7, %v20713_v25, %v8131_v41  ;;  %v1919_v14 = vmax.f32 %v20714_v30, %v13395_v58  ;;  %v20715_v26 = vld [vmem:[#allocation137_spill] sm:$0xff]  ;;  %v8532_v25 = vpack.i.bf16 %v12929_v11, %v12921_v8  ;;  %v13456_v58 = vpop.permute.xlu1 %8288  ;;  %v20719_v30 = vld [vmem:[#allocation94_spill] sm:$0xff] }
 0x360   :  { %v20716_v33 = vunpack.i.h.bf16 %v20715_v26  ;;  %v20717_v39 = vunpack.i.l.bf16 %v20715_v26  ;;  %20718 = vst [vmem:[#allocation89_spill] sm:$0xff] %v13456_v58  ;;  %4400 = vmatpush1.msra.mxu1 %v4154_v35  ;;  %4176 = vmatprep.subr.mxu0 %v20708_v29  ;;  %v1915_v26 = vmax.f32 %v20719_v30, %v1734_v16  ;;  %v1318_v8 = vsel %vm1288_vm7, %v8131_v41, %v8141_v10  ;;  %v20722_v30 = vld [vmem:[#allocation142_spill] sm:$0xff]  ;;  %v20724_v41 = vld [vmem:[#allocation203_spill] sm:$0xff]  ;;  %v4151_v58 = vld [vmem:[%s19161_s3 + $0x158] sm:$0xff] }
 0x361   :  { %v8151_v35 = vunpack.i.h.bf16 %v20720_v51  ;;  %4401 = vmatprep.subr.mxu1 %v20708_v29  ;;  %v1702_v43 = vsel %vm1673_vm8, %v8135_v47, %v8145_v44  ;;  %v1703_v16 = vsel %vm1673_vm8, %v20721_v40, %v8146_v27  ;;  %v20723_v59 = vunpack.i.l.bf16 %v20722_v30  ;;  %8533 = vrot.lane.b32.xlu0 %v8532_v25, %s9454_s2  ;;  %v20750_v11 = vld [vmem:[#allocation174_spill] sm:$0xff] }
 0x362   :  { %v1414_v55 = vsel %vm1288_vm7, %v8141_v10, %v20716_v33  ;;  %v1413_v4 = vsel %vm1288_vm7, %v8140_v12, %v20717_v39  ;;  %v4121_v33 = vld [vmem:[%s19161_s3 + $0x68] sm:$0xff]  ;;  %v1317_v39 = vsel %vm1288_vm7, %v8130_v45, %v8140_v12  ;;  %8553 = vrot.lane.b32.xlu1 %v8542_v50, %s9454_s2  ;;  %v20725_v12 = vld [vmem:[#allocation204_spill] sm:$0xff]  ;;  %v20726_v47 = vunpack.i.h.bf16 %v20722_v30  ;;  %4402 = vmatpush1.msra.mxu1 %v4153_v20 }
 0x363   :  { %v1798_v45 = vsel %vm1673_vm8, %v8145_v44, %v20723_v59  ;;  %v1914_v10 = vmax.f32 %v1413_v4, %v20724_v41  ;;  %v1918_v38 = vmax.f32 %v1414_v55, %v20725_v12  ;;  %v8156_v40 = vunpack.i.h.bf16 %v20727_v9  ;;  %4177 = vmatpush1.msra.mxu0 %v4121_v33  ;;  %v20729_v44 = vld [vmem:[#allocation32_spill] sm:$0xff]  ;;  %v13498_v55 = vpop.permute.xlu0 %8283  ;;  %v13500_v25 = vpop.permute.xlu1 %8293  ;;  %4403 = vmatprep.subr.mxu1 %v20708_v29  ;;  %v20731_v12 = vld [vmem:[#allocation53_spill] sm:$0xff] }
 0x364   :  { %v1799_v1 = vsel %vm1673_vm8, %v8146_v27, %v20726_v47  ;;  %v8160_v59 = vunpack.i.l.bf16 %v20728_v54  ;;  %v8537_v50 = vpack.i.bf16 %v20729_v44, %v12880_v34  ;;  %v8567_v4 = vpack.i.bf16 %v13139_v18, %v13129_v56  ;;  %20730 = vst [vmem:[#allocation12_spill] sm:$0xff] %v13500_v25  ;;  %4178 = vmatprep.subr.mxu0 %v20708_v29  ;;  %v4120_v27 = vld [vmem:[%s19161_s3 + $0x60] sm:$0xff]  ;;  %v20733_v18 = vld [vmem:[#allocation120_spill] sm:$0xff]  ;;  %v20734_v25 = vld [vmem:[#allocation161_spill] sm:$0xff] }
 0x365   :  { %v4152_v54 = vld [vmem:[%s19161_s3 + $0x160] sm:$0xff]  ;;  %v1916_v33 = vmax.f32 %v13423_v61, %v1702_v43  ;;  %v1917_v20 = vmax.f32 %v1317_v39, %v1798_v45  ;;  %v1920_v30 = vmax.f32 %v13438_v23, %v1703_v16  ;;  %v8155_v41 = vunpack.i.l.bf16 %v20727_v9  ;;  %v20735_v43 = vld [vmem:[#allocation55_spill] sm:$0xff]  ;;  %v20737_v23 = vld [vmem:[#allocation48_spill] sm:$0xff]  ;;  %4179 = vmatpush1.msra.mxu0 %v4120_v27 }
 0x366   :  { %v13514_v47 = vmax.f32 %v20731_v12, %v1919_v14  ;;  %v1921_v34 = vmax.f32 %v1318_v8, %v1799_v1  ;;  %8538 = vrot.lane.b32.xlu0 %v8537_v50, %s9453_s1  ;;  %8568 = vrot.lane.b32.xlu1 %v8567_v4, %s9454_s2  ;;  %v13521_v61 = vmax.f32 %v20735_v43, %v1915_v26  ;;  %v20739_v9 = vunpack.i.l.bf16 %v20720_v51  ;;  %v20740_v16 = vld [vmem:[#allocation51_spill] sm:$0xff]  ;;  %v20742_v26 = vld [vmem:[#allocation124_spill] sm:$0xff]  ;;  %v20744_v27 = vld [vmem:[#allocation49_spill] sm:$0xff] }
 0x367   :  { %v13524_v39 = vmax.f32 %v20737_v23, %v1918_v38  ;;  %4404 = vmatpush1.msra.mxu1 %v4152_v54  ;;  %v13532_v45 = vmax.f32 %v20740_v16, %v1914_v10  ;;  %v2700_v1 = vsel %vm2699_vm10, %v8160_v59, %v8161_v48  ;;  %v8547_v50 = vpack.i.bf16 %v20742_v26, %v20729_v44  ;;  %v13540_v4 = vpop.permute.xlu0 %8298  ;;  %v13542_v12 = vpop.permute.xlu1 %8313  ;;  %v4119_v10 = vld [vmem:[%s19161_s3 + $0x58] sm:$0xff]  ;;  %v20777_v26 = vld [vmem:[#allocation64_spill] sm:$0xff] }
 0x368   :  { %20732 = vst [vmem:[#allocation186_spill] sm:$0xff] %v13514_v47  ;;  %20736 = vst [vmem:[#allocation102_spill] sm:$0xff] %v13521_v61  ;;  %v2347_v14 = vsel %vm2314_vm9, %v20739_v9, %v8151_v35  ;;  %v8572_v38 = vpack.i.bf16 %v13057_v53, %v13076_v17  ;;  %4180 = vmatprep.subr.mxu0 %v20708_v29  ;;  %v13549_v54 = vmax.f32 %v20744_v27, %v1916_v33  ;;  %v20746_v43 = vld [vmem:[#allocation93_spill] sm:$0xff]  ;;  %v20748_v9 = vld [vmem:[#allocation47_spill] sm:$0xff] }
 0x369   :  { %20738 = vst [vmem:[#allocation19_spill] sm:$0xff] %v13524_v39  ;;  %20741 = vst [vmem:[#allocation22_spill] sm:$0xff] %v13532_v45  ;;  %v13552_v23 = vmax.f32 %v20746_v43, %v1917_v20  ;;  %v13555_v16 = vmax.f32 %v20748_v9, %v1920_v30  ;;  %v13559_v8 = vsel %vm2699_vm10, %v8155_v41, %v8156_v40  ;;  %4405 = vmatprep.subr.mxu1 %v20708_v29  ;;  %v20752_v33 = vld [vmem:[#allocation126_spill] sm:$0xff]  ;;  %v20768_v61 = vld [vmem:[#allocation69_spill] sm:$0xff] }
 0x36a   :  { %20743 = vst [vmem:[#allocation148_spill] sm:$0xff] %v13542_v12  ;;  %20745 = vst [vmem:[#allocation144_spill] sm:$0xff] %v13549_v54  ;;  %v13566_v44 = vmax.f32 %v20750_v11, %v1921_v34  ;;  %v20753_v20 = vunpack.i.l.bf16 %v20733_v18  ;;  %v20754_v43 = vunpack.i.h.bf16 %v20734_v25  ;;  %v20755_v9 = vld [vmem:[#allocation162_spill] sm:$0xff]  ;;  %8548 = vrot.lane.b32.xlu0 %v8547_v50, %s9454_s2  ;;  %8573 = vrot.lane.b32.xlu1 %v8572_v38, %s9453_s1  ;;  %v8165_v11 = vunpack.i.l.bf16 %v20752_v33 }
 0x36b   :  { %20747 = vst [vmem:[#allocation151_spill] sm:$0xff] %v13552_v23  ;;  %20749 = vst [vmem:[#allocation155_spill] sm:$0xff] %v13555_v16  ;;  %v20756_v16 = vunpack.i.h.bf16 %v20755_v9  ;;  %v2830_v34 = vmax.f32 %v2347_v14, %v2700_v1  ;;  %v20757_v27 = vunpack.i.l.bf16 %v20734_v25  ;;  %4181 = vmatpush1.msra.mxu0 %v4119_v10  ;;  %v8557_v14 = vpack.i.bf16 %v13129_v56, %v13038_v28  ;;  %v20760_v1 = vld [vmem:[#allocation76_spill] sm:$0xff]  ;;  %v13625_v54 = vpop.permute.xlu1 %8323 }
 0x36c   :  { %20751 = vst [vmem:[#allocation20_spill] sm:$0xff] %v13566_v44  ;;  %v2315_v30 = vsel %vm2314_vm9, %v8151_v35, %v20753_v20  ;;  %v20758_v44 = vunpack.i.l.bf16 %v20755_v9  ;;  %v20759_v20 = vld [vmem:[#allocation95_spill] sm:$0xff]  ;;  %v8582_v38 = vpack.i.bf16 %v20760_v1, %v13057_v53  ;;  %4406 = vmatpush1.msra.mxu1 %v4151_v58  ;;  %4182 = vmatprep.subr.mxu0 %v20708_v29  ;;  %v4150_v58 = vld [vmem:[%s19161_s3 + $0x150] sm:$0xff]  ;;  %v20763_v50 = vunpack.i.h.bf16 %v20752_v33 }
 0x36d   :  { %v1737_v47 = vsel %vm1673_vm8, %v20756_v16, %v20754_v43  ;;  %v8190_v23 = vunpack.i.l.bf16 %v20759_v20  ;;  %v2796_v16 = vsel %vm2699_vm10, %v8161_v48, %v8155_v41  ;;  %v4118_v43 = vld [vmem:[%s19161_s3 + $0x50] sm:$0xff]  ;;  %v20762_v41 = vld [vmem:[#allocation213_spill] sm:$0xff]  ;;  %4407 = vmatprep.subr.mxu1 %v20708_v29  ;;  %20767 = vst [vmem:[#allocation156_spill] sm:$0xff] %v13625_v54  ;;  %v13628_v1 = vmax.f32 %v20768_v61, %v2830_v34 }
 0x36e   :  { %v1736_v35 = vsel %vm1673_vm8, %v20758_v44, %v20757_v27  ;;  %v13601_v44 = vsel %vm2699_vm10, %v8156_v40, %v8160_v59  ;;  %v2831_v10 = vmax.f32 %v2315_v30, %v2796_v16  ;;  %v20761_v27 = vld [vmem:[#allocation210_spill] sm:$0xff]  ;;  %v8180_v9 = vunpack.i.l.bf16 %v20762_v41  ;;  %v20764_v53 = vld [vmem:[#allocation160_spill] sm:$0xff]  ;;  %8558 = vrot.lane.b32.xlu0 %v8557_v14, %s9453_s1  ;;  %8583 = vrot.lane.b32.xlu1 %v8582_v38, %s9454_s2 }
 0x36f   :  { %v1927_v48 = vmax.f32 %v20761_v27, %v1737_v47  ;;  %v20765_v56 = vunpack.i.h.bf16 %v20764_v53  ;;  %v19571_v59 = vunpack.i.h.bf16 %v20733_v18  ;;  %v20766_v47 = vld [vmem:[#allocation209_spill] sm:$0xff]  ;;  %v8181_v16 = vunpack.i.h.bf16 %v20762_v41  ;;  %v13623_v27 = vpop.permute.xlu0 %8303  ;;  %20769 = vst [vmem:[#allocation121_spill] sm:$0xff] %v13628_v1  ;;  %v20772_v41 = vld [vmem:[#allocation87_spill] sm:$0xff]  ;;  %4183 = vmatpush1.msra.mxu0 %v4118_v43  ;;  %4408 = vmatpush1.msra.mxu1 %v4150_v58  ;;  %v20775_v43 = vld [vmem:[#allocation74_spill] sm:$0xff] }
 0x370   :  { %v1923_v30 = vmax.f32 %v20766_v47, %v1736_v35  ;;  %v20771_v35 = vunpack.i.l.bf16 %v20720_v51  ;;  %v8186_v38 = vunpack.i.h.bf16 %v20772_v41  ;;  %v20773_v47 = vunpack.i.h.bf16 %v20759_v20  ;;  %4184 = vmatprep.subr.mxu0 %v20708_v29  ;;  %v20781_v58 = vld [vmem:[#allocation66_spill] sm:$0xff]  ;;  %4409 = vmatprep.subr.mxu1 %v20708_v29 }
 0x371   :  { %v13616_v40 = vsel %vm1288_vm7, %v20765_v56, %v20763_v50  ;;  %v20770_v56 = vunpack.i.l.bf16 %v20764_v53  ;;  %v20774_v53 = vunpack.i.l.bf16 %v20733_v18  ;;  %v8562_v51 = vpack.i.bf16 %v13038_v28, %v13076_v17 }
 0x372   :  { %v2379_v14 = vsel %vm2314_vm9, %v8190_v23, %v20771_v35  ;;  %v13647_v61 = vsel %vm2314_vm9, %v20773_v47, %v19571_v59  ;;  %v13658_v35 = vmax.f32 %v20775_v43, %v2831_v10  ;;  %v13661_v12 = vmax.f32 %v20777_v26, %v1927_v48  ;;  %v20779_v47 = vld [vmem:[#allocation154_spill] sm:$0xff] }
 0x373   :  { %v13634_v50 = vsel %vm1288_vm7, %v20770_v56, %v8165_v11  ;;  %v2411_v34 = vsel %vm2314_vm9, %v20774_v53, %v8190_v23  ;;  %v8592_v56 = vpack.i.bf16 %v13150_v15, %v13051_v3  ;;  %v20780_v59 = vunpack.i.l.bf16 %v20779_v47  ;;  %v4117_v53 = vld [vmem:[%s19161_s3 + $0x48] sm:$0xff]  ;;  %8563 = vrot.lane.b32.xlu0 %v8562_v51, %s9454_s2  ;;  %v20785_v43 = vld [vmem:[#allocation158_spill] sm:$0xff] }
 0x374   :  { %20776 = vst [vmem:[#allocation50_spill] sm:$0xff] %v13658_v35  ;;  %20778 = vst [vmem:[#allocation146_spill] sm:$0xff] %v13661_v12  ;;  %v8185_v23 = vunpack.i.l.bf16 %v20772_v41  ;;  %v13673_v17 = vmax.f32 %v20781_v58, %v1923_v30  ;;  %v2829_v10 = vmax.f32 %v2379_v14, %v13601_v44  ;;  %v20783_v26 = vunpack.i.h.bf16 %v20779_v47  ;;  %4185 = vmatpush1.msra.mxu0 %v4117_v53  ;;  %v4116_v53 = vld [vmem:[%s19161_s3 + $0x40] sm:$0xff] }
 0x375   :  { %v1415_v54 = vsel %vm1288_vm7, %v8180_v9, %v20780_v59  ;;  %8593 = vrot.lane.b32.xlu1 %v8592_v56, %s9453_s1  ;;  %v4149_v59 = vld [vmem:[%s19161_s3 + $0x148] sm:$0xff]  ;;  %v2828_v41 = vmax.f32 %v2411_v34, %v13559_v8  ;;  %v13688_v30 = vsel %vm1288_vm7, %v8165_v11, %v8180_v9  ;;  %v20784_v44 = vunpack.i.h.bf16 %v20734_v25  ;;  %v20787_v56 = vld [vmem:[#allocation86_spill] sm:$0xff]  ;;  %v13705_v34 = vpop.permute.xlu0 %8308  ;;  %4186 = vmatprep.subr.mxu0 %v20708_v29 }
 0x376   :  { %20782 = vst [vmem:[#allocation200_spill] sm:$0xff] %v13673_v17  ;;  %v1416_v48 = vsel %vm1288_vm7, %v8181_v16, %v20783_v26  ;;  %v20786_v47 = vunpack.i.h.bf16 %v20785_v43  ;;  %v1922_v58 = vmax.f32 %v1415_v54, %v20787_v56  ;;  %v20788_v26 = vld [vmem:[#allocation176_spill] sm:$0xff]  ;;  %v8577_v11 = vpack.i.bf16 %v13135_v60, %v13132_v2  ;;  %v20791_v56 = vld [vmem:[#allocation171_spill] sm:$0xff]  ;;  %4410 = vmatpush1.msra.mxu1 %v4149_v59  ;;  %v20794_v59 = vld [vmem:[#allocation2_spill] sm:$0xff] }
 0x377   :  { %v1705_v14 = vsel %vm1673_vm8, %v20784_v44, %v8186_v38  ;;  %v8196_v8 = vunpack.i.h.bf16 %v20788_v26  ;;  %v8597_v9 = vpack.i.bf16 %v13051_v3, %v13123_v57  ;;  %v13707_v44 = vpop.permute.xlu1 %8338  ;;  %v20789_v28 = vunpack.i.h.bf16 %v20752_v33  ;;  %4411 = vmatprep.subr.mxu1 %v20708_v29  ;;  %4187 = vmatpush1.msra.mxu0 %v4116_v53  ;;  %v20804_v53 = vld [vmem:[#allocation57_spill] sm:$0xff] }
 0x378   :  { %v1801_v51 = vsel %vm1673_vm8, %v8186_v38, %v20786_v47  ;;  %v20790_v47 = vld [vmem:[#allocation36_spill] sm:$0xff]  ;;  %v8201_v12 = vunpack.i.h.bf16 %v20791_v56  ;;  %v20792_v17 = vunpack.i.l.bf16 %v20734_v25  ;;  %v8200_v33 = vunpack.i.l.bf16 %v20791_v56  ;;  %8578 = vrot.lane.b32.xlu0 %v8577_v11, %s9453_s1  ;;  %4188 = vmatprep.subr.mxu0 %v20708_v29 }
 0x379   :  { %v1320_v38 = vsel %vm1288_vm7, %v20789_v28, %v8181_v16  ;;  %v1926_v54 = vmax.f32 %v1416_v48, %v20790_v47  ;;  %v20793_v28 = vunpack.i.l.bf16 %v20785_v43  ;;  %v1928_v48 = vmax.f32 %v13616_v40, %v1705_v14  ;;  %8598 = vrot.lane.b32.xlu1 %v8597_v9, %s9454_s2  ;;  %v20796_v56 = vld [vmem:[#allocation8_spill] sm:$0xff]  ;;  %v20799_v40 = vld [vmem:[#allocation62_spill] sm:$0xff] }
 0x37a   :  { %v1704_v2 = vsel %vm1673_vm8, %v20792_v17, %v8185_v23  ;;  %v1929_v25 = vmax.f32 %v1320_v38, %v1801_v51  ;;  %v4148_v17 = vld [vmem:[%s19161_s3 + $0x140] sm:$0xff]  ;;  %v13735_v47 = vmax.f32 %v20794_v59, %v2828_v41  ;;  %v13738_v3 = vmax.f32 %v20796_v56, %v2829_v10  ;;  %v20798_v43 = vld [vmem:[#allocation80_spill] sm:$0xff]  ;;  %v13752_v38 = vpop.permute.xlu0 %8318 }
 0x37b   :  { %v1800_v16 = vsel %vm1673_vm8, %v8185_v23, %v20793_v28  ;;  %v8206_v60 = vunpack.i.h.bf16 %v20798_v43  ;;  %v8205_v23 = vunpack.i.l.bf16 %v20798_v43  ;;  %v13744_v14 = vmax.f32 %v20799_v40, %v1922_v58  ;;  %v13754_v10 = vpop.permute.xlu1 %8343  ;;  %v20802_v28 = vld [vmem:[#allocation59_spill] sm:$0xff]  ;;  %4412 = vmatpush1.msra.mxu1 %v4148_v17  ;;  %v4115_v43 = vld [vmem:[%s19161_s3 + $0x38] sm:$0xff] }
 0x37c   :  { %20795 = vst [vmem:[#allocation153_spill] sm:$0xff] %v13735_v47  ;;  %20797 = vst [vmem:[#allocation117_spill] sm:$0xff] %v13738_v3  ;;  %v20801_v51 = vunpack.i.h.bf16 %v20759_v20  ;;  %v8612_v41 = vpack.i.bf16 %v13180_v7, %v13174_v6  ;;  %v13757_v59 = vmax.f32 %v20802_v28, %v1926_v54  ;;  %v1924_v56 = vmax.f32 %v13634_v50, %v1704_v2  ;;  %v20806_v54 = vld [vmem:[#allocation182_spill] sm:$0xff]  ;;  %v20808_v2 = vld [vmem:[#allocation7_spill] sm:$0xff] }
 0x37d   :  { %20800 = vst [vmem:[#allocation135_spill] sm:$0xff] %v13744_v14  ;;  %v1925_v58 = vmax.f32 %v13688_v30, %v1800_v16  ;;  %v8195_v20 = vunpack.i.l.bf16 %v20788_v26  ;;  %v2765_v40 = vsel %vm2699_vm10, %v8200_v33, %v8201_v12  ;;  %v13772_v28 = vmax.f32 %v20806_v54, %v1929_v25  ;;  %8588 = vrot.lane.b32.xlu0 %v8577_v11, %s9454_s2  ;;  %v4147_v30 = vld [vmem:[%s19161_s3 + $0x138] sm:$0xff]  ;;  %v20811_v6 = vld [vmem:[#allocation183_spill] sm:$0xff] }
 0x37e   :  { %v2412_v9 = vsel %vm2314_vm9, %v8196_v8, %v20801_v51  ;;  %20803 = vst [vmem:[#allocation189_spill] sm:$0xff] %v13757_v59  ;;  %v13769_v51 = vmax.f32 %v20804_v53, %v1928_v48  ;;  %v8211_v50 = vunpack.i.h.bf16 %v20808_v2  ;;  %8613 = vrot.lane.b32.xlu1 %v8612_v41, %s9453_s1  ;;  %v2701_v48 = vsel %vm2699_vm10, %v8205_v23, %v8206_v60  ;;  %v13790_v54 = vpop.permute.xlu0 %8328  ;;  %v20823_v59 = vld [vmem:[#allocation6_spill] sm:$0xff] }
 0x37f   :  { %20807 = vst [vmem:[#allocation107_spill] sm:$0xff] %v13772_v28  ;;  %v2832_v26 = vmax.f32 %v2412_v9, %v2765_v40  ;;  %v2733_v25 = vsel %vm2699_vm10, %v8201_v12, %v8205_v23  ;;  %4413 = vmatprep.subr.mxu1 %v20708_v29  ;;  %v8221_v17 = vunpack.i.h.bf16 %v13097_v31  ;;  %v8220_v11 = vunpack.i.l.bf16 %v13097_v31  ;;  %v13792_v9 = vpop.permute.xlu1 %8348  ;;  %4189 = vmatpush1.msra.mxu0 %v4115_v43  ;;  %v20809_v40 = vld [vmem:[#allocation60_spill] sm:$0xff] }
 0x380   :  { %20805 = vst [vmem:[#allocation188_spill] sm:$0xff] %v13769_v51  ;;  %v8602_v53 = vpack.i.bf16 %v13153_v37, %v13150_v15  ;;  %v13795_v16 = vmax.f32 %v20809_v40, %v1924_v56  ;;  %v13798_v7 = vmax.f32 %v20811_v6, %v1925_v58  ;;  %v2316_v12 = vsel %vm2314_vm9, %v8195_v20, %v8196_v8  ;;  %v4114_v31 = vld [vmem:[%s19161_s3 + $0x30] sm:$0xff]  ;;  %v20814_v6 = vld [vmem:[#allocation77_spill] sm:$0xff] }
 0x381   :  { %4414 = vmatpush1.msra.mxu1 %v4147_v30  ;;  %4190 = vmatprep.subr.mxu0 %v20708_v29  ;;  %v20813_v23 = vunpack.i.h.bf16 %v20733_v18  ;;  %v2797_v56 = vsel %vm2699_vm10, %v8206_v60, %v8200_v33  ;;  %v8216_v58 = vunpack.i.h.bf16 %v20814_v6  ;;  %v8215_v40 = vunpack.i.l.bf16 %v20814_v6  ;;  %v4146_v8 = vld [vmem:[%s19161_s3 + $0x130] sm:$0xff]  ;;  %v20815_v30 = vld [vmem:[#allocation3_spill] sm:$0xff]  ;;  %v20827_v37 = vld [vmem:[#allocation129_spill] sm:$0xff] }
 0x382   :  { %20810 = vst [vmem:[#allocation110_spill] sm:$0xff] %v13795_v16  ;;  %20812 = vst [vmem:[#allocation131_spill] sm:$0xff] %v13798_v7  ;;  %8603 = vrot.lane.b32.xlu0 %v8602_v53, %s9454_s2  ;;  %8623 = vrot.lane.b32.xlu1 %v8612_v41, %s9454_s2  ;;  %v13820_v18 = vmax.f32 %v20815_v30, %v2832_v26  ;;  %v2833_v33 = vmax.f32 %v13647_v61, %v2733_v25  ;;  %v8225_v53 = vunpack.i.l.bf16 %v13145_v46  ;;  %v20818_v6 = vld [vmem:[#allocation140_spill] sm:$0xff]  ;;  %v4113_v25 = vld [vmem:[%s19161_s3 + $0x28] sm:$0xff] }
 0x383   :  { %v2348_v43 = vsel %vm2314_vm9, %v20813_v23, %v8195_v20  ;;  %v20817_v20 = vunpack.i.l.bf16 %v20808_v2  ;;  %4415 = vmatprep.subr.mxu1 %v20708_v29  ;;  %v2702_v41 = vsel %vm2699_vm10, %v8220_v11, %v8221_v17  ;;  %v8607_v15 = vpack.i.bf16 %v20818_v6, %v13123_v57  ;;  %4191 = vmatpush1.msra.mxu0 %v4114_v31  ;;  %v20819_v28 = vld [vmem:[#allocation132_spill] sm:$0xff]  ;;  %v20820_v57 = vld [vmem:[#allocation181_spill] sm:$0xff]  ;;  %v20825_v16 = vld [vmem:[#allocation67_spill] sm:$0xff] }
 0x384   :  { %20816 = vst [vmem:[#allocation194_spill] sm:$0xff] %v13820_v18  ;;  %v2834_v23 = vmax.f32 %v2348_v43, %v2701_v48  ;;  %v8637_v26 = vpack.i.bf16 %v13379_v32, %v13376_v24  ;;  %v2835_v30 = vmax.f32 %v2316_v12, %v2797_v56  ;;  %v8235_v61 = vunpack.i.l.bf16 %v20819_v28  ;;  %4416 = vmatpush1.msra.mxu1 %v4146_v8  ;;  %v20821_v56 = vld [vmem:[#allocation108_spill] sm:$0xff]  ;;  %v4145_v8 = vld [vmem:[%s19161_s3 + $0x128] sm:$0xff] }
 0x385   :  { %v2349_v60 = vsel %vm2314_vm9, %v20817_v20, %v8211_v50  ;;  %v8236_v20 = vunpack.i.h.bf16 %v20819_v28  ;;  %v8226_v48 = vunpack.i.h.bf16 %v13145_v46  ;;  %4192 = vmatprep.subr.mxu0 %v20708_v29  ;;  %v13844_v43 = vsel %vm2699_vm10, %v8215_v40, %v8216_v58  ;;  %v13851_v46 = vpop.permute.xlu0 %8333  ;;  %v13853_v28 = vpop.permute.xlu1 %8358  ;;  %4417 = vmatprep.subr.mxu1 %v20708_v29 }
 0x386   :  { %v8246_v31 = vunpack.i.h.bf16 %v20820_v57  ;;  %v8245_v12 = vunpack.i.l.bf16 %v20820_v57  ;;  %v8230_v51 = vunpack.i.l.bf16 %v20821_v56  ;;  %8608 = vrot.lane.b32.xlu0 %v8607_v15, %s9453_s1  ;;  %8638 = vrot.lane.b32.xlu1 %v8637_v26, %s9454_s2  ;;  %20822 = vst [vmem:[#allocation195_spill] sm:$0xff] %v13853_v28  ;;  %v13859_v7 = vmax.f32 %v20823_v59, %v2833_v33 }
 0x387   :  { %v13862_v14 = vmax.f32 %v20825_v16, %v2834_v23  ;;  %v2798_v57 = vsel %vm2699_vm10, %v8221_v17, %v8215_v40  ;;  %v2838_v15 = vmax.f32 %v2349_v60, %v2702_v41  ;;  %v2317_v26 = vsel %vm2314_vm9, %v8211_v50, %v8225_v53  ;;  %4193 = vmatpush1.msra.mxu0 %v4113_v25  ;;  %v20828_v16 = vld [vmem:[#allocation71_spill] sm:$0xff] }
 0x388   :  { %20824 = vst [vmem:[#allocation202_spill] sm:$0xff] %v13859_v7  ;;  %v8231_v32 = vunpack.i.h.bf16 %v20821_v56  ;;  %v8617_v28 = vpack.i.bf16 %v20827_v37, %v20818_v6  ;;  %v8642_v59 = vpack.i.bf16 %v13298_v19, %v13321_v49  ;;  %v13875_v33 = vmax.f32 %v20828_v16, %v2835_v30  ;;  %4418 = vmatpush1.msra.mxu1 %v4145_v8  ;;  %v20833_v8 = vld [vmem:[#allocation105_spill] sm:$0xff] }
 0x389   :  { %20826 = vst [vmem:[#allocation33_spill] sm:$0xff] %v13862_v14  ;;  %v2734_v17 = vsel %vm2699_vm10, %v8216_v58, %v8220_v11  ;;  %v13881_v40 = vsel %vm2314_vm9, %v8235_v61, %v8236_v20  ;;  %v2350_v50 = vsel %vm2314_vm9, %v8226_v48, %v8235_v61  ;;  %v2703_v60 = vsel %vm2699_vm10, %v8245_v12, %v8246_v31  ;;  %v4112_v11 = vld [vmem:[%s19161_s3 + $0x20] sm:$0xff]  ;;  %v20831_v61 = vld [vmem:[#allocation81_spill] sm:$0xff] }
 0x38a   :  { %20829 = vst [vmem:[#allocation35_spill] sm:$0xff] %v13875_v33  ;;  %v20830_v23 = vunpack.i.l.bf16 %v20808_v2  ;;  %v2413_v30 = vsel %vm2314_vm9, %v8225_v53, %v8230_v51  ;;  %8618 = vrot.lane.b32.xlu0 %v8617_v28, %s9454_s2  ;;  %8643 = vrot.lane.b32.xlu1 %v8642_v59, %s9453_s1  ;;  %v4144_v58 = vld [vmem:[%s19161_s3 + $0x120] sm:$0xff]  ;;  %v13902_v2 = vmax.f32 %v20831_v61, %v2838_v15  ;;  %v8241_v56 = vunpack.i.h.bf16 %v13272_v22  ;;  %v13919_v15 = vpop.permute.xlu0 %8353 }
 0x38b   :  { %v2839_v25 = vmax.f32 %v2317_v26, %v2798_v57  ;;  %4194 = vmatprep.subr.mxu0 %v20708_v29  ;;  %v13909_v53 = vsel %vm2314_vm9, %v8231_v32, %v8226_v48  ;;  %v13913_v28 = vsel %vm2314_vm9, %v8236_v20, %v8231_v32  ;;  %v8627_v59 = vpack.i.bf16 %v13376_v24, %v20833_v8  ;;  %v13921_v26 = vpop.permute.xlu1 %8368  ;;  %v20834_v32 = vld [vmem:[#allocation84_spill] sm:$0xff] }
 0x38c   :  { %v2381_v41 = vsel %vm2314_vm9, %v8230_v51, %v20830_v23  ;;  %20832 = vst [vmem:[#allocation191_spill] sm:$0xff] %v13902_v2  ;;  %v8240_v51 = vunpack.i.l.bf16 %v13272_v22  ;;  %v8652_v57 = vpack.i.bf16 %v13524_v39, %v13532_v45  ;;  %4419 = vmatprep.subr.mxu1 %v20708_v29  ;;  %v2842_v22 = vmax.f32 %v2350_v50, %v2703_v60  ;;  %v4111_v50 = vld [vmem:[%s19161_s3 + $0x18] sm:$0xff]  ;;  %v20862_v39 = vld [vmem:[#allocation156_spill] sm:$0xff] }
 0x38d   :  { %v2836_v48 = vmax.f32 %v2413_v30, %v13844_v43  ;;  %v2837_v16 = vmax.f32 %v2381_v41, %v2734_v17  ;;  %4195 = vmatpush1.msra.mxu0 %v4112_v11  ;;  %4420 = vmatpush1.msra.mxu1 %v4144_v58  ;;  %v8261_v20 = vunpack.i.h.bf16 %v20834_v32  ;;  %v8260_v23 = vunpack.i.l.bf16 %v20834_v32  ;;  %v4143_v43 = vld [vmem:[%s19161_s3 + $0x118] sm:$0xff]  ;;  %v20835_v17 = vld [vmem:[#allocation88_spill] sm:$0xff] }
 0x38e   :  { %v8251_v61 = vunpack.i.h.bf16 %v13316_v63  ;;  %v8250_v24 = vunpack.i.l.bf16 %v13316_v63  ;;  %8628 = vrot.lane.b32.xlu0 %v8627_v59, %s9453_s1  ;;  %8653 = vrot.lane.b32.xlu1 %v8652_v57, %s9453_s1  ;;  %v13938_v60 = vmax.f32 %v20835_v17, %v2839_v25  ;;  %v2735_v41 = vsel %vm2699_vm10, %v8241_v56, %v8245_v12  ;;  %v13953_v57 = vpop.permute.xlu0 %8363  ;;  %v20839_v17 = vld [vmem:[#allocation13_spill] sm:$0xff]  ;;  %v20864_v45 = vld [vmem:[#allocation12_spill] sm:$0xff] }
 0x38f   :  { %v2767_v63 = vsel %vm2699_vm10, %v8240_v51, %v8241_v56  ;;  %v8256_v30 = vunpack.i.h.bf16 %v13371_v52  ;;  %4196 = vmatprep.subr.mxu0 %v20708_v29  ;;  %v2799_v11 = vsel %vm2699_vm10, %v8246_v31, %v8240_v51  ;;  %v8255_v58 = vunpack.i.l.bf16 %v13371_v52  ;;  %v13955_v12 = vpop.permute.xlu1 %8373  ;;  %4421 = vmatprep.subr.mxu1 %v20708_v29  ;;  %v20837_v56 = vld [vmem:[#allocation115_spill] sm:$0xff]  ;;  %v20841_v31 = vld [vmem:[#allocation17_spill] sm:$0xff] }
 0x390   :  { %20836 = vst [vmem:[#allocation125_spill] sm:$0xff] %v13938_v60  ;;  %v8632_v59 = vpack.i.bf16 %v20833_v8, %v13321_v49  ;;  %v8662_v25 = vpack.i.bf16 %v13658_v35, %v13628_v1  ;;  %v13959_v32 = vmax.f32 %v20837_v56, %v2842_v22  ;;  %v13962_v6 = vmax.f32 %v20839_v17, %v2836_v48  ;;  %v4110_v48 = vld [vmem:[%s19161_s3 + $0x10] sm:$0xff] }
 0x391   :  { %v13965_v52 = vmax.f32 %v20841_v31, %v2837_v16  ;;  %v8270_v51 = vunpack.i.l.bf16 %v13318_v13  ;;  %4197 = vmatpush1.msra.mxu0 %v4111_v50  ;;  %4422 = vmatpush1.msra.mxu1 %v4143_v43  ;;  %v2704_v49 = vsel %vm2699_vm10, %v8260_v23, %v8261_v20  ;;  %v8265_v35 = vunpack.i.l.bf16 %v13274_v62  ;;  %v4142_v16 = vld [vmem:[%s19161_s3 + $0x110] sm:$0xff] }
 0x392   :  { %20838 = vst [vmem:[#allocation46_spill] sm:$0xff] %v13959_v32  ;;  %20840 = vst [vmem:[#allocation190_spill] sm:$0xff] %v13962_v6  ;;  %v2351_v22 = vsel %vm2314_vm9, %v8250_v24, %v8251_v61  ;;  %8633 = vrot.lane.b32.xlu0 %v8632_v59, %s9454_s2  ;;  %8663 = vrot.lane.b32.xlu1 %v8662_v25, %s9453_s1  ;;  %v2840_v50 = vmax.f32 %v13913_v28, %v2767_v63  ;;  %v13994_v1 = vpop.permute.xlu0 %8378  ;;  %v8310_v19 = vunpack.i.l.bf16 %v13705_v34 }
 0x393   :  { %20842 = vst [vmem:[#allocation44_spill] sm:$0xff] %v13965_v52  ;;  %v2841_v43 = vmax.f32 %v13909_v53, %v2735_v41  ;;  %v2843_v56 = vmax.f32 %v13881_v40, %v2799_v11  ;;  %v2736_v17 = vsel %vm2699_vm10, %v8256_v30, %v8260_v23  ;;  %4198 = vmatprep.subr.mxu0 %v20708_v29  ;;  %v13996_v28 = vpop.permute.xlu1 %8393  ;;  %v8271_v23 = vunpack.i.h.bf16 %v13318_v13  ;;  %v4109_v13 = vld [vmem:[%s19161_s3 + $0x8] sm:$0xff] }
 0x394   :  { %v2768_v59 = vsel %vm2699_vm10, %v8255_v58, %v8256_v30  ;;  %v2800_v31 = vsel %vm2699_vm10, %v8261_v20, %v8255_v58  ;;  %v8647_v8 = vpack.i.bf16 %v13347_v5, %v13352_v36  ;;  %4423 = vmatprep.subr.mxu1 %v20708_v29  ;;  %v2319_v40 = vsel %vm2314_vm9, %v8251_v61, %v8265_v35 }
 0x395   :  { %v2846_v53 = vmax.f32 %v2351_v22, %v2704_v49  ;;  %v2383_v41 = vsel %vm2314_vm9, %v8270_v51, %v8250_v24  ;;  %4199 = vmatpush1.msra.mxu0 %v4110_v48  ;;  %4424 = vmatpush1.msra.mxu1 %v4142_v16  ;;  %v2415_v20 = vsel %vm2314_vm9, %v8265_v35, %v8270_v51  ;;  %v8281_v30 = vunpack.i.h.bf16 %v13373_v42  ;;  %v4141_v49 = vld [vmem:[%s19161_s3 + $0x108] sm:$0xff]  ;;  %v20847_v48 = vld [vmem:[#allocation9_spill] sm:$0xff] }
 0x396   :  { %v2845_v63 = vmax.f32 %v2383_v41, %v2736_v17  ;;  %v8280_v11 = vunpack.i.l.bf16 %v13373_v42  ;;  %8648 = vrot.lane.b32.xlu0 %v8647_v8, %s9453_s1  ;;  %8673 = vrot.lane.b32.xlu1 %v8662_v25, %s9454_s2  ;;  %v20843_v24 = vld [vmem:[#allocation15_spill] sm:$0xff]  ;;  %v2844_v35 = vmax.f32 %v2415_v20, %v2768_v59  ;;  %v2847_v58 = vmax.f32 %v2319_v40, %v2800_v31  ;;  %v20851_v40 = vld [vmem:[#allocation150_spill] sm:$0xff]  ;;  %v20853_v20 = vld [vmem:[#allocation25_spill] sm:$0xff] }
 0x397   :  { %v14017_v61 = vmax.f32 %v20843_v24, %v2841_v43  ;;  %v8276_v51 = vunpack.i.h.bf16 %v13454_v21  ;;  %4200 = vmatprep.subr.mxu0 %v20708_v29  ;;  %v20845_v42 = vld [vmem:[#allocation147_spill] sm:$0xff]  ;;  %v8275_v25 = vunpack.i.l.bf16 %v13454_v21  ;;  %v8657_v22 = vpack.i.bf16 %v13738_v3, %v13735_v47  ;;  %4425 = vmatprep.subr.mxu1 %v20708_v29  ;;  %v20848_v43 = vld [vmem:[#allocation78_spill] sm:$0xff] }
 0x398   :  { %v14022_v8 = vmax.f32 %v20845_v42, %v2840_v50  ;;  %v8677_v16 = vpack.i.bf16 %v13820_v18, %v20847_v48  ;;  %v14031_v17 = vmax.f32 %v20848_v43, %v2843_v56  ;;  %v20850_v59 = vunpack.i.h.bf16 %v13274_v62  ;;  %4201 = vmatpush1.msra.mxu0 %v4109_v13  ;;  %4426 = vmatpush1.msra.mxu1 %v4141_v49  ;;  %v20855_v42 = vld [vmem:[#allocation89_spill] sm:$0xff]  ;;  %v20856_v13 = vld [vmem:[#allocation18_spill] sm:$0xff] }
 0x399   :  { %20844 = vst [vmem:[#allocation114_spill] sm:$0xff] %v14017_v61  ;;  %v8286_v50 = vunpack.i.h.bf16 %v13498_v55  ;;  %v8285_v21 = vunpack.i.l.bf16 %v13498_v55  ;;  %v14042_v41 = vmax.f32 %v20851_v40, %v2846_v53  ;;  %v14045_v24 = vmax.f32 %v20853_v20, %v2845_v63  ;;  %v14054_v55 = vpop.permute.xlu1 %8403  ;;  %v4108_v53 = vld [vmem:[%s19161_s3] sm:$0xff]  ;;  %v20858_v40 = vld [vmem:[#allocation11_spill] sm:$0xff]  ;;  %4202 = vmatprep.subr.mxu0 %v20708_v29  ;;  %4427 = vmatprep.subr.mxu1 %v20708_v29 }
 0x39a   :  { %20846 = vst [vmem:[#allocation28_spill] sm:$0xff] %v14022_v8  ;;  %20849 = vst [vmem:[#allocation198_spill] sm:$0xff] %v14031_v17  ;;  %v14037_v31 = vsel %vm2314_vm9, %v8271_v23, %v20850_v59  ;;  %v2769_v56 = vsel %vm2699_vm10, %v8280_v11, %v8281_v30  ;;  %v8291_v43 = vunpack.i.h.bf16 %v20855_v42  ;;  %8658 = vrot.lane.b32.xlu0 %v8657_v22, %s9453_s1  ;;  %8678 = vrot.lane.b32.xlu1 %v8677_v16, %s9453_s1  ;;  %v14052_v59 = vpop.permute.xlu0 %8383  ;;  %v4140_v63 = vld [vmem:[%s19161_s3 + $0x100] sm:$0xff] }
 0x39b   :  { %20852 = vst [vmem:[#allocation199_spill] sm:$0xff] %v14042_v41  ;;  %20854 = vst [vmem:[#allocation31_spill] sm:$0xff] %v14045_v24  ;;  %v14063_v49 = vmax.f32 %v20856_v13, %v2844_v35  ;;  %v14066_v20 = vmax.f32 %v20858_v40, %v2847_v58  ;;  %v2416_v16 = vsel %vm2314_vm9, %v8276_v51, %v8271_v23  ;;  %v20860_v47 = vunpack.i.h.bf16 %v13274_v62  ;;  %v20861_v58 = vld [vmem:[#allocation127_spill] sm:$0xff]  ;;  %v4139_v62 = vld [vmem:[%s19161_s3 + $0xf8] sm:$0xff] }
 0x39c   :  { %v14074_v3 = vsel %vm2314_vm9, %v8275_v25, %v8276_v51  ;;  %v8687_v13 = vpack.i.bf16 %v20861_v58, %v13875_v33  ;;  %v2705_v23 = vsel %vm2699_vm10, %v8285_v21, %v8286_v50  ;;  %v2737_v40 = vsel %vm2699_vm10, %v8281_v30, %v8285_v21  ;;  %4203 = vmatpush1.msra.mxu0 %v4108_v53  ;;  %v20865_v21 = vld [vmem:[#allocation148_spill] sm:$0xff] }
 0x39d   :  { %20857 = vst [vmem:[#allocation128_spill] sm:$0xff] %v14063_v49  ;;  %20859 = vst [vmem:[#allocation39_spill] sm:$0xff] %v14066_v20  ;;  %v14080_v35 = vsel %vm2314_vm9, %v20860_v47, %v8275_v25  ;;  %v8301_v51 = vunpack.i.h.bf16 %v13540_v4  ;;  %4428 = vmatpush1.msra.mxu1 %v4140_v63  ;;  %v4171_v47 = vld [vmem:[%s19161_s3 + $0x1f8] sm:$0xff]  ;;  %v2848_v53 = vmax.f32 %v2416_v16, %v2769_v56  ;;  %v20863_v63 = vunpack.i.l.bf16 %v20855_v42  ;;  %v14118_v16 = vpop.permute.xlu1 %8418 }
 0x39e   :  { %8668 = vrot.lane.b32.xlu0 %v8657_v22, %s9454_s2  ;;  %8688 = vrot.lane.b32.xlu1 %v8687_v13, %s9453_s1  ;;  %v8296_v5 = vunpack.i.h.bf16 %v20864_v45  ;;  %v8295_v25 = vunpack.i.l.bf16 %v20864_v45  ;;  %v2801_v22 = vsel %vm2699_vm10, %v8286_v50, %v8280_v11  ;;  %v8315_v13 = vunpack.i.l.bf16 %v20865_v21  ;;  %v14116_v56 = vpop.permute.xlu0 %8388  ;;  %20866 = vst [vmem:[#allocation42_spill] sm:$0xff] %v14118_v16  ;;  %v4138_v45 = vld [vmem:[%s19161_s3 + $0xf0] sm:$0xff] }
 0x39f   :  { %v14107_v48 = vsel %vm2314_vm9, %v20863_v63, %v8291_v43  ;;  %4204 = vmatprep.subr.mxu0 %v20708_v29  ;;  %4429 = vmatprep.subr.mxu1 %v20708_v29  ;;  %v8682_v63 = vpack.i.bf16 %v13862_v14, %v13859_v7  ;;  %v8697_v30 = vpack.i.bf16 %v13875_v33, %v13862_v14  ;;  %v20867_v58 = vunpack.i.l.bf16 %v13540_v4 }
 0x3a0   :  { %4205 = vmatpush2.msra.mxu0 %v4139_v62  ;;  %4430 = vmatpush2.msra.mxu1 %v4171_v47  ;;  %v2849_v11 = vmax.f32 %v14037_v31, %v2737_v40  ;;  %v2850_v50 = vmax.f32 %v14080_v35, %v2705_v23  ;;  %v4170_v62 = vld [vmem:[%s19161_s3 + $0x1f0] sm:$0xff]  ;;  %v20868_v47 = vunpack.i.l.bf16 %v13623_v27  ;;  %v20869_v35 = vunpack.i.h.bf16 %v13623_v27 }
 0x3a1   :  { %v2706_v16 = vsel %vm2699_vm10, %v20867_v58, %v8301_v51  ;;  %4206 = vmatprep.subr.mxu0 %v20708_v29  ;;  %4431 = vmatprep.subr.mxu1 %v20708_v29  ;;  %v20870_v58 = vunpack.i.h.bf16 %v20862_v39  ;;  %v20871_v40 = vunpack.i.l.bf16 %v20862_v39  ;;  %v14163_v36 = vsel %vm2699_vm10, %v8295_v25, %v8296_v5 }
 0x3a2   :  { %v2321_v31 = vsel %vm2314_vm9, %v8291_v43, %v20868_v47  ;;  %v2354_v23 = vsel %vm2314_vm9, %v20869_v35, %v8315_v13  ;;  %8683 = vrot.lane.b32.xlu0 %v8682_v63, %s9453_s1  ;;  %8698 = vrot.lane.b32.xlu1 %v8697_v30, %s9454_s2  ;;  %v4137_v43 = vld [vmem:[%s19161_s3 + $0xe8] sm:$0xff]  ;;  %v2851_v35 = vmax.f32 %v14074_v3, %v2801_v22  ;;  %v8316_v30 = vunpack.i.h.bf16 %v20865_v21 }
 0x3a3   :  { %v2707_v14 = vsel %vm2699_vm10, %v20871_v40, %v20870_v58  ;;  %v20872_v47 = vld [vmem:[#allocation23_spill] sm:$0xff]  ;;  %4207 = vmatpush2.msra.mxu0 %v4138_v45  ;;  %v2802_v63 = vsel %vm2699_vm10, %v8301_v51, %v8295_v25  ;;  %v14169_v58 = vpop.permute.xlu0 %8398  ;;  %v14171_v40 = vpop.permute.xlu1 %8423  ;;  %v8702_v3 = vpack.i.bf16 %v13965_v52, %v13962_v6  ;;  %4432 = vmatpush2.msra.mxu1 %v4170_v62  ;;  %v20874_v45 = vld [vmem:[#allocation157_spill] sm:$0xff]  ;;  %v8321_v62 = vunpack.i.h.bf16 %v13752_v38  ;;  %v20951_v52 = vld [vmem:[#allocation106_spill] sm:$0xff] }
 0x3a4   :  { %v14158_v33 = vmax.f32 %v20872_v47, %v2848_v53  ;;  %v8692_v53 = vpack.i.bf16 %v13859_v7, %v13820_v18  ;;  %4208 = vmatprep.subr.mxu0 %v20708_v29  ;;  %v4169_v22 = vld [vmem:[%s19161_s3 + $0x1e8] sm:$0xff]  ;;  %v2854_v51 = vmax.f32 %v14107_v48, %v2706_v16  ;;  %v2855_v25 = vmax.f32 %v2321_v31, %v2802_v63  ;;  %v20876_v18 = vld [vmem:[#allocation165_spill] sm:$0xff]  ;;  %v4168_v48 = vld [vmem:[%s19161_s3 + $0x1e0] sm:$0xff] }
 0x3a5   :  { %v2858_v21 = vmax.f32 %v2354_v23, %v2707_v14  ;;  %4433 = vmatprep.subr.mxu1 %v20708_v29  ;;  %4209 = vmatpush2.msra.mxu0 %v4137_v43  ;;  %v14184_v47 = vmax.f32 %v20874_v45, %v2849_v11  ;;  %v14187_v7 = vmax.f32 %v20876_v18, %v2850_v50  ;;  %v8320_v6 = vunpack.i.l.bf16 %v13752_v38  ;;  %v4136_v14 = vld [vmem:[%s19161_s3 + $0xe0] sm:$0xff]  ;;  %v20878_v16 = vld [vmem:[#allocation168_spill] sm:$0xff]  ;;  %v20885_v45 = vld [vmem:[#allocation101_spill] sm:$0xff] }
 0x3a6   :  { %20873 = vst [vmem:[#allocation104_spill] sm:$0xff] %v14158_v33  ;;  %8693 = vrot.lane.b32.xlu0 %v8692_v53, %s9454_s2  ;;  %8703 = vrot.lane.b32.xlu1 %v8702_v3, %s9453_s1  ;;  %v14200_v11 = vmax.f32 %v20878_v16, %v2851_v35  ;;  %v20880_v18 = vunpack.i.l.bf16 %v13540_v4  ;;  %v8311_v50 = vunpack.i.h.bf16 %v13705_v34  ;;  %v20881_v31 = vunpack.i.l.bf16 %v13623_v27  ;;  %v20883_v53 = vld [vmem:[#allocation90_spill] sm:$0xff]  ;;  %v20887_v16 = vld [vmem:[#allocation92_spill] sm:$0xff] }
 0x3a7   :  { %20875 = vst [vmem:[#allocation27_spill] sm:$0xff] %v14184_v47  ;;  %20877 = vst [vmem:[#allocation163_spill] sm:$0xff] %v14187_v7  ;;  %4434 = vmatpush2.msra.mxu1 %v4169_v22  ;;  %4210 = vmatprep.subr.mxu0 %v20708_v29  ;;  %v14214_v43 = vsel %vm2314_vm9, %v8315_v13, %v8316_v30  ;;  %v20882_v35 = vunpack.i.l.bf16 %v20855_v42  ;;  %v14222_v34 = vpop.permute.xlu1 %8428  ;;  %v8707_v63 = vpack.i.bf16 %v13938_v60, %v13902_v2 }
 0x3a8   :  { %20879 = vst [vmem:[#allocation139_spill] sm:$0xff] %v14200_v11  ;;  %v2738_v38 = vsel %vm2699_vm10, %v8296_v5, %v20880_v18  ;;  %v2417_v23 = vsel %vm2314_vm9, %v20881_v31, %v8310_v19  ;;  %v14220_v5 = vpop.permute.xlu0 %8408  ;;  %4435 = vmatprep.subr.mxu1 %v20708_v29  ;;  %v14228_v22 = vmax.f32 %v20883_v53, %v2854_v51  ;;  %v8341_v31 = vunpack.i.h.bf16 %v13707_v44 }
 0x3a9   :  { %v2385_v4 = vsel %vm2314_vm9, %v8310_v19, %v20882_v35  ;;  %v14231_v13 = vmax.f32 %v20885_v45, %v2855_v25  ;;  %v14234_v42 = vmax.f32 %v20887_v16, %v2858_v21  ;;  %4211 = vmatpush2.msra.mxu0 %v4136_v14  ;;  %4436 = vmatpush2.msra.mxu1 %v4168_v48  ;;  %v4135_v19 = vld [vmem:[%s19161_s3 + $0xd8] sm:$0xff]  ;;  %v8340_v35 = vunpack.i.l.bf16 %v13707_v44  ;;  %v4134_v16 = vld [vmem:[%s19161_s3 + $0xd0] sm:$0xff] }
 0x3aa   :  { %20884 = vst [vmem:[#allocation29_spill] sm:$0xff] %v14228_v22  ;;  %v2852_v18 = vmax.f32 %v2417_v23, %v14163_v36  ;;  %v2771_v51 = vsel %vm2699_vm10, %v8320_v6, %v8321_v62  ;;  %8708 = vrot.lane.b32.xlu0 %v8707_v63, %s9453_s1  ;;  %8713 = vrot.lane.b32.xlu1 %v8702_v3, %s9454_s2  ;;  %v4167_v25 = vld [vmem:[%s19161_s3 + $0x1d8] sm:$0xff]  ;;  %v8331_v36 = vunpack.i.h.bf16 %v13790_v54  ;;  %v8330_v48 = vunpack.i.l.bf16 %v13790_v54 }
 0x3ab   :  { %20886 = vst [vmem:[#allocation166_spill] sm:$0xff] %v14231_v13  ;;  %20888 = vst [vmem:[#allocation65_spill] sm:$0xff] %v14234_v42  ;;  %v2418_v21 = vsel %vm2314_vm9, %v8316_v30, %v8311_v50  ;;  %v2853_v14 = vmax.f32 %v2385_v4, %v2738_v38  ;;  %4212 = vmatprep.subr.mxu0 %v20708_v29  ;;  %v20889_v44 = vunpack.i.l.bf16 %v20862_v39  ;;  %v14260_v53 = vpop.permute.xlu1 %8438  ;;  %4437 = vmatprep.subr.mxu1 %v20708_v29 }
 0x3ac   :  { %v14258_v3 = vpop.permute.xlu0 %8413  ;;  %v8727_v45 = vpack.i.bf16 %v13959_v32, %v14017_v61  ;;  %4213 = vmatpush2.msra.mxu0 %v4135_v19  ;;  %v20890_v30 = vunpack.i.h.bf16 %v20862_v39  ;;  %v2856_v38 = vmax.f32 %v2418_v21, %v2771_v51  ;;  %v8336_v4 = vunpack.i.h.bf16 %v13851_v46  ;;  %4438 = vmatpush2.msra.mxu1 %v4167_v25  ;;  %v4166_v19 = vld [vmem:[%s19161_s3 + $0x1d0] sm:$0xff]  ;;  %v20892_v51 = vld [vmem:[#allocation169_spill] sm:$0xff] }
 0x3ad   :  { %v2739_v23 = vsel %vm2699_vm10, %v8321_v62, %v20889_v44  ;;  %v8335_v62 = vunpack.i.l.bf16 %v13851_v46  ;;  %4214 = vmatprep.subr.mxu0 %v20708_v29  ;;  %v20891_v39 = vunpack.i.h.bf16 %v13623_v27  ;;  %v14283_v21 = vmax.f32 %v20892_v51, %v2852_v18  ;;  %v20894_v44 = vld [vmem:[#allocation97_spill] sm:$0xff]  ;;  %4439 = vmatprep.subr.mxu1 %v20708_v29 }
 0x3ae   :  { %v2803_v54 = vsel %vm2699_vm10, %v20890_v30, %v8320_v6  ;;  %v2708_v46 = vsel %vm2699_vm10, %v8340_v35, %v8341_v31  ;;  %v8345_v25 = vunpack.i.l.bf16 %v13754_v10  ;;  %8718 = vrot.lane.b32.xlu0 %v8707_v63, %s9454_s2  ;;  %8728 = vrot.lane.b32.xlu1 %v8727_v45, %s9453_s1  ;;  %v14291_v30 = vmax.f32 %v20894_v44, %v2853_v14  ;;  %v20896_v63 = vld [vmem:[#allocation211_spill] sm:$0xff] }
 0x3af   :  { %v2386_v6 = vsel %vm2314_vm9, %v8311_v50, %v20891_v39  ;;  %20893 = vst [vmem:[#allocation149_spill] sm:$0xff] %v14283_v21  ;;  %v2355_v27 = vsel %vm2314_vm9, %v8330_v48, %v8331_v36  ;;  %v8350_v50 = vunpack.i.l.bf16 %v13792_v9  ;;  %v2859_v18 = vmax.f32 %v14214_v43, %v2803_v54  ;;  %v14300_v51 = vpop.permute.xlu1 %8448  ;;  %4215 = vmatpush2.msra.mxu0 %v4134_v16  ;;  %v4165_v16 = vld [vmem:[%s19161_s3 + $0x1c8] sm:$0xff] }
 0x3b0   :  { %20895 = vst [vmem:[#allocation40_spill] sm:$0xff] %v14291_v30  ;;  %v2857_v2 = vmax.f32 %v2386_v6, %v2739_v23  ;;  %v14298_v39 = vpop.permute.xlu0 %8433  ;;  %v8722_v45 = vpack.i.bf16 %v14022_v8, %v20896_v63  ;;  %v8737_v14 = vpack.i.bf16 %v14017_v61, %v14022_v8  ;;  %4440 = vmatpush2.msra.mxu1 %v4166_v19  ;;  %v4133_v23 = vld [vmem:[%s19161_s3 + $0xc8] sm:$0xff]  ;;  %v20897_v6 = vld [vmem:[#allocation30_spill] sm:$0xff]  ;;  %v8351_v63 = vunpack.i.h.bf16 %v13792_v9 }
 0x3b1   :  { %v14310_v44 = vmax.f32 %v20897_v6, %v2856_v38  ;;  %v2323_v43 = vsel %vm2314_vm9, %v8331_v36, %v8345_v25  ;;  %v2772_v54 = vsel %vm2699_vm10, %v8335_v62, %v8336_v4  ;;  %4216 = vmatprep.subr.mxu0 %v20708_v29  ;;  %4441 = vmatprep.subr.mxu1 %v20708_v29  ;;  %v4132_v6 = vld [vmem:[%s19161_s3 + $0xc0] sm:$0xff] }
 0x3b2   :  { %v2862_v19 = vmax.f32 %v2355_v27, %v2708_v46  ;;  %v2740_v38 = vsel %vm2699_vm10, %v8336_v4, %v8340_v35  ;;  %v2804_v36 = vsel %vm2699_vm10, %v8341_v31, %v8335_v62  ;;  %8723 = vrot.lane.b32.xlu0 %v8722_v45, %s9453_s1  ;;  %8738 = vrot.lane.b32.xlu1 %v8737_v14, %s9454_s2  ;;  %v20899_v46 = vld [vmem:[#allocation195_spill] sm:$0xff]  ;;  %v20900_v14 = vld [vmem:[#allocation124_spill] sm:$0xff]  ;;  %v20903_v35 = vld [vmem:[#allocation98_spill] sm:$0xff] }
 0x3b3   :  { %20898 = vst [vmem:[#allocation167_spill] sm:$0xff] %v14310_v44  ;;  %v2387_v8 = vsel %vm2314_vm9, %v8350_v50, %v8330_v48  ;;  %v2419_v9 = vsel %vm2314_vm9, %v8345_v25, %v8350_v50  ;;  %4217 = vmatpush2.msra.mxu0 %v4133_v23  ;;  %v14340_v45 = vpop.permute.xlu1 %8453  ;;  %v8732_v61 = vpack.i.bf16 %v20900_v14, %v14031_v17  ;;  %v4164_v25 = vld [vmem:[%s19161_s3 + $0x1c0] sm:$0xff]  ;;  %v20905_v31 = vld [vmem:[#allocation123_spill] sm:$0xff] }
 0x3b4   :  { %v2860_v4 = vmax.f32 %v2419_v9, %v2772_v54  ;;  %v14338_v62 = vpop.permute.xlu0 %8443  ;;  %v8752_v48 = vpack.i.bf16 %v14066_v20, %v14042_v41  ;;  %4442 = vmatpush2.msra.mxu1 %v4165_v16  ;;  %4218 = vmatprep.subr.mxu0 %v20708_v29  ;;  %v20901_v50 = vld [vmem:[#allocation34_spill] sm:$0xff]  ;;  %v2861_v54 = vmax.f32 %v2387_v8, %v2740_v38  ;;  %v20907_v16 = vunpack.i.h.bf16 %v13754_v10  ;;  %v4163_v8 = vld [vmem:[%s19161_s3 + $0x1b8] sm:$0xff] }
 0x3b5   :  { %v14351_v23 = vmax.f32 %v20901_v50, %v2857_v2  ;;  %v2863_v9 = vmax.f32 %v2323_v43, %v2804_v36  ;;  %4443 = vmatprep.subr.mxu1 %v20708_v29  ;;  %4219 = vmatpush2.msra.mxu0 %v4132_v6  ;;  %v14355_v27 = vmax.f32 %v20903_v35, %v2859_v18  ;;  %v4131_v2 = vld [vmem:[%s19161_s3 + $0xb8] sm:$0xff]  ;;  %v20908_v18 = vunpack.i.h.bf16 %v20899_v46  ;;  %v20910_v36 = vld [vmem:[#allocation196_spill] sm:$0xff] }
 0x3b6   :  { %v14358_v14 = vmax.f32 %v20905_v31, %v2862_v19  ;;  %v14364_v41 = vsel %vm2314_vm9, %v8351_v63, %v20907_v16  ;;  %8733 = vrot.lane.b32.xlu0 %v8732_v61, %s9453_s1  ;;  %8753 = vrot.lane.b32.xlu1 %v8752_v48, %s9453_s1  ;;  %v20909_v43 = vunpack.i.l.bf16 %v20899_v46  ;;  %v8356_v61 = vunpack.i.h.bf16 %v13919_v15  ;;  %v20912_v16 = vld [vmem:[#allocation141_spill] sm:$0xff] }
 0x3b7   :  { %20902 = vst [vmem:[#allocation37_spill] sm:$0xff] %v14351_v23  ;;  %20904 = vst [vmem:[#allocation164_spill] sm:$0xff] %v14355_v27  ;;  %v8742_v38 = vpack.i.bf16 %v14031_v17, %v13959_v32  ;;  %4444 = vmatpush2.msra.mxu1 %v4164_v25  ;;  %v14386_v6 = vmax.f32 %v20910_v36, %v2860_v4  ;;  %v14390_v31 = vpop.permute.xlu1 %8473  ;;  %v8747_v50 = vpack.i.bf16 %v14045_v24, %v14063_v49  ;;  %v20915_v25 = vld [vmem:[#allocation134_spill] sm:$0xff]  ;;  %v4130_v36 = vld [vmem:[%s19161_s3 + $0xb0] sm:$0xff] }
 0x3b8   :  { %20906 = vst [vmem:[#allocation145_spill] sm:$0xff] %v14358_v14  ;;  %v14380_v19 = vsel %vm2699_vm10, %v20909_v43, %v20908_v18  ;;  %v14388_v35 = vpop.permute.xlu0 %8458  ;;  %v8767_v18 = vpack.i.bf16 %v14158_v33, %v20912_v16  ;;  %4220 = vmatprep.subr.mxu0 %v20708_v29  ;;  %4445 = vmatprep.subr.mxu1 %v20708_v29  ;;  %v20913_v43 = vld [vmem:[#allocation192_spill] sm:$0xff]  ;;  %v8355_v49 = vunpack.i.l.bf16 %v13919_v15 }
 0x3b9   :  { %20911 = vst [vmem:[#allocation61_spill] sm:$0xff] %v14386_v6  ;;  %v14399_v20 = vmax.f32 %v20913_v43, %v2861_v54  ;;  %v14402_v4 = vmax.f32 %v20915_v25, %v2863_v9  ;;  %4221 = vmatpush2.msra.mxu0 %v4131_v2  ;;  %4446 = vmatpush2.msra.mxu1 %v4163_v8  ;;  %v20917_v16 = vld [vmem:[#allocation76_spill] sm:$0xff]  ;;  %v8366_v8 = vunpack.i.h.bf16 %v13953_v57  ;;  %v8365_v9 = vunpack.i.l.bf16 %v13953_v57  ;;  %v4161_v57 = vld [vmem:[%s19161_s3 + $0x1a8] sm:$0xff] }
 0x3ba   :  { %8743 = vrot.lane.b32.xlu0 %v8742_v38, %s9454_s2  ;;  %8763 = vrot.lane.b32.xlu1 %v8752_v48, %s9454_s2  ;;  %v8777_v24 = vpack.i.bf16 %v20917_v16, %v14200_v11  ;;  %v4162_v2 = vld [vmem:[%s19161_s3 + $0x1b0] sm:$0xff]  ;;  %v2420_v15 = vsel %vm2314_vm9, %v8356_v61, %v8351_v63  ;;  %v14426_v38 = vpack.i.bf16 %v14291_v30, %v14283_v21  ;;  %v4129_v48 = vld [vmem:[%s19161_s3 + $0xa8] sm:$0xff]  ;;  %v20919_v25 = vunpack.i.h.bf16 %v13754_v10 }
 0x3bb   :  { %20914 = vst [vmem:[#allocation201_spill] sm:$0xff] %v14399_v20  ;;  %20916 = vst [vmem:[#allocation137_spill] sm:$0xff] %v14402_v4  ;;  %4222 = vmatprep.subr.mxu0 %v20708_v29  ;;  %v14434_v63 = vpop.permute.xlu1 %8483  ;;  %v14438_v16 = vpack.i.bf16 %v14231_v13, %v14228_v22  ;;  %4447 = vmatprep.subr.mxu1 %v20708_v29  ;;  %v2324_v43 = vsel %vm2314_vm9, %v8355_v49, %v8356_v61  ;;  %v20920_v61 = vunpack.i.l.bf16 %v20899_v46 }
 0x3bc   :  { %v14432_v54 = vpop.permute.xlu0 %8463  ;;  %4223 = vmatpush2.msra.mxu0 %v4130_v36  ;;  %4448 = vmatpush2.msra.mxu1 %v4162_v2  ;;  %v2864_v21 = vmax.f32 %v2420_v15, %v14380_v19  ;;  %v20918_v36 = vld [vmem:[#allocation130_spill] sm:$0xff]  ;;  %v2356_v13 = vsel %vm2314_vm9, %v20919_v25, %v8355_v49  ;;  %v8381_v15 = vunpack.i.h.bf16 %v13994_v1  ;;  %v20921_v22 = vunpack.i.h.bf16 %v13921_v26 }
 0x3bd   :  { %4224 = vmatprep.subr.mxu0 %v20708_v29  ;;  %v4128_v2 = vld [vmem:[%s19161_s3 + $0xa0] sm:$0xff]  ;;  %v2805_v19 = vsel %vm2699_vm10, %v8366_v8, %v20920_v61  ;;  %4449 = vmatprep.subr.mxu1 %v20708_v29  ;;  %v20922_v30 = vunpack.i.l.bf16 %v13921_v26  ;;  %v2709_v49 = vsel %vm2699_vm10, %v8365_v9, %v8366_v8  ;;  %v20923_v25 = vunpack.i.h.bf16 %v20899_v46 }
 0x3be   :  { %8748 = vrot.lane.b32.xlu0 %v8747_v50, %s9453_s1  ;;  %8768 = vrot.lane.b32.xlu1 %v8767_v18, %s9453_s1  ;;  %v8380_v18 = vunpack.i.l.bf16 %v13994_v1  ;;  %v8375_v8 = vunpack.i.l.bf16 %v13955_v12  ;;  %v20927_v46 = vld [vmem:[#allocation54_spill] sm:$0xff] }
 0x3bf   :  { %4225 = vmatpush2.msra.mxu0 %v4129_v48  ;;  %v14477_v10 = vsel %vm2314_vm9, %v20922_v30, %v20921_v22  ;;  %v2741_v61 = vsel %vm2699_vm10, %v20923_v25, %v8365_v9  ;;  %v14487_v32 = vpop.permute.xlu1 %8498  ;;  %4450 = vmatpush2.msra.mxu1 %v4161_v57  ;;  %v4160_v22 = vld [vmem:[%s19161_s3 + $0x1a0] sm:$0xff]  ;;  %v8376_v30 = vunpack.i.h.bf16 %v13955_v12  ;;  %v20924_v48 = vld [vmem:[#allocation197_spill] sm:$0xff]  ;;  %v2867_v25 = vmax.f32 %v2324_v43, %v2805_v19 }
 0x3c0   :  { %v14485_v1 = vpop.permute.xlu0 %8468  ;;  %4226 = vmatprep.subr.mxu0 %v20708_v29  ;;  %4451 = vmatprep.subr.mxu1 %v20708_v29  ;;  %v14501_v57 = vmax.f32 %v20924_v48, %v2864_v21  ;;  %v14508_v12 = vpack.i.bf16 %v14402_v4, %v14358_v14  ;;  %v4127_v9 = vld [vmem:[%s19161_s3 + $0x98] sm:$0xff]  ;;  %v2865_v43 = vmax.f32 %v14364_v41, %v2741_v61  ;;  %v20929_v19 = vunpack.i.l.bf16 %v14052_v59 }
 0x3c1   :  { %4227 = vmatpush2.msra.mxu0 %v4128_v2  ;;  %v4159_v21 = vld [vmem:[%s19161_s3 + $0x198] sm:$0xff]  ;;  %v2866_v2 = vmax.f32 %v2356_v13, %v2709_v49  ;;  %4452 = vmatpush2.msra.mxu1 %v4160_v22  ;;  %v14532_v41 = vsel %vm2699_vm10, %v8375_v8, %v8376_v30  ;;  %v8395_v49 = vunpack.i.l.bf16 %v13996_v28  ;;  %v14538_v61 = vpack.i.bf16 %v14399_v20, %v14386_v6  ;;  %v4126_v22 = vld [vmem:[%s19161_s3 + $0x90] sm:$0xff] }
 0x3c2   :  { %20925 = vst [vmem:[#allocation94_spill] sm:$0xff] %v14501_v57  ;;  %8758 = vrot.lane.b32.xlu0 %v8747_v50, %s9454_s2  ;;  %8778 = vrot.lane.b32.xlu1 %v8777_v24, %s9453_s1  ;;  %v2710_v50 = vsel %vm2699_vm10, %v8380_v18, %v8381_v15  ;;  %v4158_v24 = vld [vmem:[%s19161_s3 + $0x190] sm:$0xff]  ;;  %v14547_v48 = vmax.f32 %v20927_v46, %v2867_v25  ;;  %v20930_v6 = vunpack.i.h.bf16 %v13921_v26 }
 0x3c3   :  { %v14526_v14 = vpop.permute.xlu1 %8503  ;;  %4228 = vmatprep.subr.mxu0 %v20708_v29  ;;  %4453 = vmatprep.subr.mxu1 %v20708_v29  ;;  %v2870_v13 = vmax.f32 %v14477_v10, %v2710_v50  ;;  %v20932_v4 = vpack.i.bf16 %v14200_v11, %v14187_v7  ;;  %v20933_v46 = vld [vmem:[#allocation112_spill] sm:$0xff]  ;;  %v20935_v10 = vld [vmem:[#allocation41_spill] sm:$0xff]  ;;  %v14572_v20 = vsel %vm2699_vm10, %v8376_v30, %v8380_v18 }
 0x3c4   :  { %v14524_v17 = vpop.permute.xlu0 %8478  ;;  %20926 = vst [vmem:[#allocation63_spill] sm:$0xff] %v14526_v14  ;;  %4229 = vmatpush2.msra.mxu0 %v4127_v9  ;;  %4454 = vmatpush2.msra.mxu1 %v4159_v21  ;;  %20928 = vst [vmem:[#allocation142_spill] sm:$0xff] %v14547_v48  ;;  %v2325_v9 = vsel %vm2314_vm9, %v20930_v6, %v20929_v19  ;;  %v20931_v21 = vpack.i.bf16 %v14187_v7, %v14184_v47  ;;  %v20937_v19 = vunpack.i.h.bf16 %v14052_v59 }
 0x3c5   :  { %v14565_v25 = vmax.f32 %v20933_v46, %v2865_v43  ;;  %v14568_v50 = vmax.f32 %v20935_v10, %v2866_v2  ;;  %4230 = vmatprep.subr.mxu0 %v20708_v29  ;;  %4455 = vmatprep.subr.mxu1 %v20708_v29  ;;  %v2806_v6 = vsel %vm2699_vm10, %v8381_v15, %v8375_v8  ;;  %v20938_v43 = vunpack.i.h.bf16 %v14054_v55  ;;  %v4125_v15 = vld [vmem:[%s19161_s3 + $0x88] sm:$0xff] }
 0x3c6   :  { %8773 = vrot.lane.b32.xlu0 %v20931_v21, %s9453_s1  ;;  %8788 = vrot.lane.b32.xlu1 %v20932_v4, %s9454_s2  ;;  %v2358_v4 = vsel %vm2314_vm9, %v20937_v19, %v8395_v49  ;;  %v20939_v2 = vunpack.i.l.bf16 %v14054_v55  ;;  %v4157_v8 = vld [vmem:[%s19161_s3 + $0x188] sm:$0xff]  ;;  %v20942_v46 = vunpack.i.h.bf16 %v13996_v28  ;;  %v2871_v19 = vmax.f32 %v2325_v9, %v2806_v6  ;;  %v4124_v6 = vld [vmem:[%s19161_s3 + $0x80] sm:$0xff] }
 0x3c7   :  { %20934 = vst [vmem:[#allocation203_spill] sm:$0xff] %v14565_v25  ;;  %20936 = vst [vmem:[#allocation204_spill] sm:$0xff] %v14568_v50  ;;  %v14590_v21 = vpop.permute.xlu1 %8513  ;;  %4231 = vmatpush2.msra.mxu0 %v4126_v22  ;;  %4456 = vmatpush2.msra.mxu1 %v4158_v24  ;;  %v20944_v22 = vld [vmem:[#allocation52_spill] sm:$0xff]  ;;  %v20946_v11 = vpack.i.bf16 %v14184_v47, %v14158_v33  ;;  %v20957_v33 = vunpack.i.l.bf16 %v14052_v59 }
 0x3c8   :  { %v2711_v18 = vsel %vm2699_vm10, %v20939_v2, %v20938_v43  ;;  %v14588_v30 = vpop.permute.xlu0 %8488  ;;  %20941 = vst [vmem:[#allocation122_spill] sm:$0xff] %v14590_v21  ;;  %v14602_v10 = vsel %vm2314_vm9, %v8395_v49, %v20942_v46  ;;  %v8390_v43 = vunpack.i.l.bf16 %v14116_v56  ;;  %v20943_v2 = vld [vmem:[#allocation180_spill] sm:$0xff]  ;;  %4232 = vmatprep.subr.mxu0 %v20708_v29  ;;  %4457 = vmatprep.subr.mxu1 %v20708_v29  ;;  %v20947_v49 = vld [vmem:[#allocation193_spill] sm:$0xff] }
 0x3c9   :  { %20940 = vst [vmem:[#allocation58_spill] sm:$0xff] %v14588_v30  ;;  %v14610_v7 = vmax.f32 %v20944_v22, %v2870_v13  ;;  %v4156_v13 = vld [vmem:[%s19161_s3 + $0x180] sm:$0xff]  ;;  %v2874_v46 = vmax.f32 %v2358_v4, %v2711_v18  ;;  %4233 = vmatpush2.msra.mxu0 %v4125_v15  ;;  %4458 = vmatpush2.msra.mxu1 %v4157_v8  ;;  %v20950_v47 = vld [vmem:[#allocation184_spill] sm:$0xff] }
 0x3ca   :  { %8783 = vrot.lane.b32.xlu0 %v20946_v11, %s9454_s2  ;;  %8793 = vrot.lane.b32.xlu1 %v14426_v38, %s9453_s1  ;;  %v20952_v4 = vld [vmem:[#allocation14_spill] sm:$0xff]  ;;  %v20954_v15 = vld [vmem:[#allocation100_spill] sm:$0xff]  ;;  %v20956_v11 = vunpack.i.l.bf16 %v13921_v26  ;;  %v2421_v60 = vsel %vm2314_vm9, %v20957_v33, %v8390_v43  ;;  %v8391_v33 = vunpack.i.h.bf16 %v14116_v56 }
 0x3cb   :  { %20945 = vst [vmem:[#allocation53_spill] sm:$0xff] %v14610_v7  ;;  %v14632_v9 = vpop.permute.xlu1 %8523  ;;  %v14640_v18 = vpack.i.bf16 %v20952_v4, %v20951_v52  ;;  %4234 = vmatprep.subr.mxu0 %v20708_v29  ;;  %4459 = vmatprep.subr.mxu1 %v20708_v29  ;;  %v14645_v8 = vmax.f32 %v20954_v15, %v2871_v19  ;;  %v8401_v4 = vunpack.i.h.bf16 %v14169_v58  ;;  %v8400_v52 = vunpack.i.l.bf16 %v14169_v58  ;;  %v20960_v15 = vld [vmem:[#allocation103_spill] sm:$0xff]  ;;  %v20968_v56 = vld [vmem:[#allocation42_spill] sm:$0xff]  ;;  %v20977_v58 = vld [vmem:[#allocation56_spill] sm:$0xff] }
 0x3cc   :  { %v14630_v24 = vpop.permute.xlu0 %8493  ;;  %20949 = vst [vmem:[#allocation161_spill] sm:$0xff] %v14632_v9  ;;  %v2389_v22 = vsel %vm2314_vm9, %v8390_v43, %v20956_v11  ;;  %4235 = vmatpush2.msra.mxu0 %v4124_v6  ;;  %4460 = vmatpush2.msra.mxu1 %v4156_v13  ;;  %v14664_v9 = vmax.f32 %v20960_v15, %v2874_v46  ;;  %v20963_v13 = vld [vmem:[#allocation24_spill] sm:$0xff]  ;;  %v20965_v46 = vld [vmem:[#allocation10_spill] sm:$0xff]  ;;  %v20966_v15 = vld [vmem:[#allocation187_spill] sm:$0xff]  ;;  %v20974_v43 = vunpack.i.h.bf16 %v14052_v59 }
 0x3cd   :  { %20948 = vst [vmem:[#allocation120_spill] sm:$0xff] %v14630_v24  ;;  %20953 = vst [vmem:[#allocation55_spill] sm:$0xff] %v14640_v18  ;;  %5614 = vmatprep.subr.mxu0 %v20708_v29  ;;  %v2868_v14 = vmax.f32 %v2421_v60, %v14532_v41  ;;  %v14680_v21 = vpack.i.bf16 %v20966_v15, %v20965_v46  ;;  %v8421_v24 = vunpack.i.h.bf16 %v20968_v56  ;;  %v20971_v29 = vld [vmem:[#allocation177_spill] sm:$0xff]  ;;  %v20972_v60 = vunpack.i.l.bf16 %v14054_v55 }
 0x3ce   :  { %20955 = vst [vmem:[#allocation48_spill] sm:$0xff] %v14645_v8  ;;  %8798 = vrot.lane.b32.xlu0 %v14438_v16, %s9453_s1  ;;  %8803 = vrot.lane.b32.xlu1 %v14426_v38, %s9454_s2  ;;  %20961 = vst [vmem:[#allocation51_spill] sm:$0xff] %v14664_v9  ;;  %v2869_v38 = vmax.f32 %v2389_v22, %v14572_v20  ;;  %v14685_v6 = vpack.i.bf16 %v14645_v8, %v14610_v7  ;;  %v8411_v22 = vunpack.i.h.bf16 %v14220_v5 }
 0x3cf   :  { %v14676_v11 = vpop.permute.xlu1 %8528  ;;  %20967 = vst [vmem:[#allocation93_spill] sm:$0xff] %v14680_v21  ;;  %v2743_v20 = vsel %vm2699_vm10, %v8401_v4, %v20972_v60  ;;  %v2775_v41 = vsel %vm2699_vm10, %v8400_v52, %v8401_v4  ;;  %v8410_v46 = vunpack.i.l.bf16 %v14220_v5  ;;  %v20973_v15 = vpack.i.bf16 %v14234_v42, %v14351_v23 }
 0x3d0   :  { %v14674_v18 = vpop.permute.xlu0 %8508  ;;  %20969 = vst [vmem:[#allocation47_spill] sm:$0xff] %v14685_v6  ;;  %v2390_v60 = vsel %vm2314_vm9, %v8391_v33, %v20974_v43  ;;  %v20975_v7 = vunpack.i.h.bf16 %v13996_v28  ;;  %v8420_v5 = vunpack.i.l.bf16 %v20968_v56  ;;  %v20976_v8 = vunpack.i.h.bf16 %v14054_v55  ;;  %v20997_v6 = vld [vmem:[#allocation45_spill] sm:$0xff] }
 0x3d1   :  { %20964 = vst [vmem:[#allocation49_spill] sm:$0xff] %v14674_v18  ;;  %v14717_v21 = vmax.f32 %v20977_v58, %v2868_v14  ;;  %v8416_v43 = vunpack.i.h.bf16 %v14258_v3  ;;  %v8415_v28 = vunpack.i.l.bf16 %v14258_v3  ;;  %v2873_v56 = vmax.f32 %v2390_v60, %v2743_v20  ;;  %v20989_v14 = vld [vmem:[#allocation186_spill] sm:$0xff] }
 0x3d2   :  { %8808 = vrot.lane.b32.xlu0 %v14438_v16, %s9454_s2  ;;  %8818 = vrot.lane.b32.xlu1 %v20973_v15, %s9453_s1  ;;  %v2422_v4 = vsel %vm2314_vm9, %v20975_v7, %v8391_v33  ;;  %v2807_v16 = vsel %vm2699_vm10, %v20976_v8, %v8400_v52  ;;  %v20979_v15 = vld [vmem:[#allocation43_spill] sm:$0xff]  ;;  %v2359_v58 = vsel %vm2314_vm9, %v8410_v46, %v8411_v22 }
 0x3d3   :  { %20978 = vst [vmem:[#allocation174_spill] sm:$0xff] %v14717_v21  ;;  %v14720_v59 = vmax.f32 %v20979_v15, %v2869_v38  ;;  %v14726_v7 = vpop.permute.xlu1 %8543  ;;  %v2872_v33 = vmax.f32 %v2422_v4, %v2775_v41  ;;  %v20984_v52 = vld [vmem:[#allocation151_spill] sm:$0xff]  ;;  %v2875_v8 = vmax.f32 %v14602_v10, %v2807_v16  ;;  %v8430_v38 = vunpack.i.l.bf16 %v14222_v34  ;;  %v20993_v41 = vld [vmem:[#allocation20_spill] sm:$0xff] }
 0x3d4   :  { %v14724_v26 = vpop.permute.xlu0 %8518  ;;  %20981 = vst [vmem:[#allocation162_spill] sm:$0xff] %v14726_v7  ;;  %v20985_v3 = vpack.i.bf16 %v14310_v44, %v20918_v36  ;;  %v20986_v20 = vpack.i.bf16 %v14351_v23, %v14310_v44  ;;  %v2712_v10 = vsel %vm2699_vm10, %v8420_v5, %v8421_v24  ;;  %v8426_v4 = vunpack.i.h.bf16 %v14171_v40  ;;  %v20992_v23 = vld [vmem:[#allocation155_spill] sm:$0xff]  ;;  %v20999_v7 = vld [vmem:[#allocation109_spill] sm:$0xff] }
 0x3d5   :  { %20980 = vst [vmem:[#allocation126_spill] sm:$0xff] %v14720_v59  ;;  %v8425_v16 = vunpack.i.l.bf16 %v14171_v40  ;;  %v2776_v36 = vsel %vm2699_vm10, %v8415_v28, %v8416_v43  ;;  %v14761_v60 = vpack.i.bf16 %v14720_v59, %v14717_v21  ;;  %v14765_v55 = vpack.i.bf16 %v20993_v41, %v20992_v23  ;;  %v20995_v40 = vld [vmem:[#allocation38_spill] sm:$0xff] }
 0x3d6   :  { %8813 = vrot.lane.b32.xlu0 %v20985_v3, %s9453_s1  ;;  %8828 = vrot.lane.b32.xlu1 %v20986_v20, %s9454_s2  ;;  %v8431_v3 = vunpack.i.h.bf16 %v14222_v34  ;;  %v14768_v19 = vmax.f32 %v20995_v40, %v2872_v33  ;;  %v14771_v34 = vmax.f32 %v20997_v6, %v2873_v56  ;;  %v2878_v15 = vmax.f32 %v2359_v58, %v2712_v10  ;;  %v21002_v40 = vld [vmem:[#allocation75_spill] sm:$0xff] }
 0x3d7   :  { %v14757_v20 = vpop.permute.xlu1 %8553  ;;  %20994 = vst [vmem:[#allocation213_spill] sm:$0xff] %v14765_v55  ;;  %v2423_v21 = vsel %vm2314_vm9, %v8425_v16, %v8430_v38  ;;  %v2808_v41 = vsel %vm2699_vm10, %v8421_v24, %v8415_v28  ;;  %v8436_v23 = vunpack.i.h.bf16 %v14298_v39  ;;  %v21001_v6 = vpack.i.bf16 %v20827_v37, %v14355_v27  ;;  %v21022_v37 = vld [vmem:[#allocation206_spill] sm:$0xff] }
 0x3d8   :  { %v14755_v44 = vpop.permute.xlu0 %8533  ;;  %20991 = vst [vmem:[#allocation210_spill] sm:$0xff] %v14757_v20  ;;  %20996 = vst [vmem:[#allocation160_spill] sm:$0xff] %v14768_v19  ;;  %v14776_v20 = vmax.f32 %v20999_v7, %v2875_v8  ;;  %v8441_v7 = vunpack.i.h.bf16 %v14260_v53  ;;  %v8440_v33 = vunpack.i.l.bf16 %v14260_v53  ;;  %v2327_v24 = vsel %vm2314_vm9, %v8411_v22, %v8425_v16 }
 0x3d9   :  { %20990 = vst [vmem:[#allocation95_spill] sm:$0xff] %v14755_v44  ;;  %20998 = vst [vmem:[#allocation209_spill] sm:$0xff] %v14771_v34  ;;  %v2744_v44 = vsel %vm2699_vm10, %v8416_v43, %v8420_v5  ;;  %v2391_v5 = vsel %vm2314_vm9, %v8430_v38, %v8410_v46  ;;  %v2876_v43 = vmax.f32 %v2423_v21, %v2776_v36  ;;  %v8445_v8 = vunpack.i.l.bf16 %v14338_v62 }
 0x3da   :  { %21000 = vst [vmem:[#allocation69_spill] sm:$0xff] %v14776_v20  ;;  %8823 = vrot.lane.b32.xlu0 %v21001_v6, %s9453_s1  ;;  %8843 = vrot.lane.b32.xlu1 %v14508_v12, %s9453_s1  ;;  %v2392_v28 = vsel %vm2314_vm9, %v8431_v3, %v8426_v4  ;;  %v2877_v56 = vmax.f32 %v2391_v5, %v2744_v44  ;;  %v8446_v21 = vunpack.i.h.bf16 %v14338_v62  ;;  %v8435_v53 = vunpack.i.l.bf16 %v14298_v39  ;;  %v21007_v6 = vld [vmem:[#allocation113_spill] sm:$0xff] }
 0x3db   :  { %v14800_v10 = vpop.permute.xlu1 %8568  ;;  %v14803_v46 = vmax.f32 %v21002_v40, %v2878_v15  ;;  %v2879_v36 = vmax.f32 %v2327_v24, %v2808_v41  ;;  %v2424_v22 = vsel %vm2314_vm9, %v8436_v23, %v8431_v3  ;;  %v8451_v38 = vunpack.i.h.bf16 %v14300_v51  ;;  %v21005_v41 = vld [vmem:[#allocation159_spill] sm:$0xff] }
 0x3dc   :  { %v14798_v58 = vpop.permute.xlu0 %8538  ;;  %v21004_v16 = vpack.i.bf16 %v14355_v27, %v14234_v42  ;;  %v14818_v15 = vmax.f32 %v21005_v41, %v2876_v43  ;;  %v2777_v39 = vsel %vm2699_vm10, %v8440_v33, %v8441_v7  ;;  %v14827_v5 = vmax.f32 %v21007_v6, %v2877_v56  ;;  %v21010_v41 = vld [vmem:[#allocation72_spill] sm:$0xff] }
 0x3dd   :  { %21003 = vst [vmem:[#allocation87_spill] sm:$0xff] %v14803_v46  ;;  %v2745_v24 = vsel %vm2699_vm10, %v8441_v7, %v8445_v8  ;;  %v8460_v43 = vunpack.i.l.bf16 %v14388_v35  ;;  %v14838_v44 = vmax.f32 %v21010_v41, %v2879_v36  ;;  %v2880_v62 = vmax.f32 %v2424_v22, %v2777_v39 }
 0x3de   :  { %8833 = vrot.lane.b32.xlu0 %v21004_v16, %s9454_s2  ;;  %8853 = vrot.lane.b32.xlu1 %v14508_v12, %s9454_s2  ;;  %21006 = vst [vmem:[#allocation74_spill] sm:$0xff] %v14818_v15  ;;  %21008 = vst [vmem:[#allocation64_spill] sm:$0xff] %v14827_v5  ;;  %v8461_v12 = vunpack.i.h.bf16 %v14388_v35  ;;  %v2713_v3 = vsel %vm2699_vm10, %v8445_v8, %v8446_v21  ;;  %v2809_v56 = vsel %vm2699_vm10, %v8446_v21, %v8440_v33 }
 0x3df   :  { %v14835_v16 = vpop.permute.xlu1 %8573  ;;  %21011 = vst [vmem:[#allocation66_spill] sm:$0xff] %v14838_v44  ;;  %v2328_v7 = vsel %vm2314_vm9, %v8435_v53, %v8436_v23  ;;  %v2360_v35 = vsel %vm2314_vm9, %v8426_v4, %v8435_v53  ;;  %v21012_v6 = vunpack.i.l.bf16 %v14300_v51  ;;  %v21013_v8 = vpack.i.bf16 %v14501_v57, %v20943_v2 }
 0x3e0   :  { %v14833_v40 = vpop.permute.xlu0 %8548  ;;  %21009 = vst [vmem:[#allocation154_spill] sm:$0xff] %v14835_v16  ;;  %v2881_v33 = vmax.f32 %v2392_v28, %v2745_v24  ;;  %v8456_v36 = vunpack.i.h.bf16 %v14340_v45  ;;  %v8455_v23 = vunpack.i.l.bf16 %v14340_v45  ;;  %v2882_v21 = vmax.f32 %v2360_v35, %v2713_v3 }
 0x3e1   :  { %v2361_v59 = vsel %vm2314_vm9, %v21012_v6, %v8451_v38  ;;  %v2883_v53 = vmax.f32 %v2328_v7, %v2809_v56  ;;  %v2714_v22 = vsel %vm2699_vm10, %v8460_v43, %v8461_v12  ;;  %v8465_v39 = vunpack.i.l.bf16 %v14432_v54 }
 0x3e2   :  { %8838 = vrot.lane.b32.xlu0 %v14538_v61, %s9453_s1  ;;  %8858 = vrot.lane.b32.xlu1 %v21013_v8, %s9453_s1  ;;  %v21015_v8 = vld [vmem:[#allocation207_spill] sm:$0xff]  ;;  %v8476_v24 = vunpack.i.h.bf16 %v14390_v31  ;;  %v8475_v45 = vunpack.i.l.bf16 %v14390_v31  ;;  %v8466_v56 = vunpack.i.h.bf16 %v14432_v54  ;;  %v8486_v7 = vunpack.i.h.bf16 %v14434_v63 }
 0x3e3   :  { %v14867_v6 = vpop.permute.xlu1 %8583  ;;  %v14870_v28 = vmax.f32 %v21015_v8, %v2880_v62  ;;  %v8485_v35 = vunpack.i.l.bf16 %v14434_v63  ;;  %v21017_v62 = vpack.i.bf16 %v20947_v49, %v14547_v48  ;;  %v21018_v8 = vld [vmem:[#allocation143_spill] sm:$0xff]  ;;  %v2778_v54 = vsel %vm2699_vm10, %v8455_v23, %v8456_v36 }
 0x3e4   :  { %v14865_v41 = vpop.permute.xlu0 %8558  ;;  %v14888_v4 = vmax.f32 %v21018_v8, %v2881_v33  ;;  %v2886_v3 = vmax.f32 %v2361_v59, %v2714_v22  ;;  %v14894_v63 = vpack.i.bf16 %v14838_v44, %v14803_v46  ;;  %v14900_v42 = vmax.f32 %v21022_v37, %v2883_v53 }
 0x3e5   :  { %21014 = vst [vmem:[#allocation158_spill] sm:$0xff] %v14865_v41  ;;  %21016 = vst [vmem:[#allocation86_spill] sm:$0xff] %v14870_v28  ;;  %v8470_v33 = vunpack.i.l.bf16 %v14485_v1  ;;  %v2746_v59 = vsel %vm2699_vm10, %v8456_v36, %v8460_v43  ;;  %v2810_v22 = vsel %vm2699_vm10, %v8461_v12, %v8455_v23  ;;  %v14917_v37 = vpack.i.bf16 %v14827_v5, %v14818_v15  ;;  %v21026_v23 = vld [vmem:[#allocation70_spill] sm:$0xff] }
 0x3e6   :  { %8848 = vrot.lane.b32.xlu0 %v14538_v61, %s9454_s2  ;;  %8868 = vrot.lane.b32.xlu1 %v21017_v62, %s9453_s1  ;;  %21019 = vst [vmem:[#allocation176_spill] sm:$0xff] %v14888_v4  ;;  %v21020_v61 = vld [vmem:[#allocation152_spill] sm:$0xff]  ;;  %21023 = vst [vmem:[#allocation171_spill] sm:$0xff] %v14900_v42  ;;  %v2329_v62 = vsel %vm2314_vm9, %v8451_v38, %v8465_v39  ;;  %v2362_v38 = vsel %vm2314_vm9, %v8466_v56, %v8475_v45  ;;  %v8480_v43 = vunpack.i.l.bf16 %v14524_v17 }
 0x3e7   :  { %v14897_v2 = vmax.f32 %v21020_v61, %v2882_v21  ;;  %v14907_v31 = vpop.permute.xlu1 %8593  ;;  %v2330_v21 = vsel %vm2314_vm9, %v8475_v45, %v8476_v24  ;;  %v2715_v53 = vsel %vm2699_vm10, %v8485_v35, %v8486_v7  ;;  %v8481_v61 = vunpack.i.h.bf16 %v14524_v17 }
 0x3e8   :  { %v14905_v8 = vpop.permute.xlu0 %8563  ;;  %v21024_v12 = vpack.i.bf16 %v14568_v50, %v14565_v25  ;;  %v21025_v36 = vpack.i.bf16 %v14547_v48, %v14568_v50  ;;  %v14934_v46 = vmax.f32 %v21026_v23, %v2886_v3  ;;  %v2887_v45 = vmax.f32 %v2329_v62, %v2810_v22 }
 0x3e9   :  { %21021 = vst [vmem:[#allocation36_spill] sm:$0xff] %v14897_v2  ;;  %v8471_v15 = vunpack.i.h.bf16 %v14485_v1  ;;  %v21028_v44 = vunpack.i.l.bf16 %v14300_v51  ;;  %v2425_v5 = vsel %vm2314_vm9, %v8465_v39, %v8470_v33  ;;  %v8490_v27 = vunpack.i.l.bf16 %v14588_v30 }
 0x3ea   :  { %8863 = vrot.lane.b32.xlu0 %v21024_v12, %s9453_s1  ;;  %8878 = vrot.lane.b32.xlu1 %v21025_v36, %s9454_s2  ;;  %21027 = vst [vmem:[#allocation2_spill] sm:$0xff] %v14934_v46  ;;  %v19674_v12 = vunpack.i.h.bf16 %v14588_v30  ;;  %v2890_v3 = vmax.f32 %v2362_v38, %v2715_v53  ;;  %v8501_v62 = vunpack.i.h.bf16 %v14487_v32  ;;  %v8500_v1 = vunpack.i.l.bf16 %v14487_v32  ;;  %v21032_v32 = vld [vmem:[#allocation68_spill] sm:$0xff] }
 0x3eb   :  { %v2393_v17 = vsel %vm2314_vm9, %v8470_v33, %v21028_v44  ;;  %v14947_v36 = vpop.permute.xlu1 %8598  ;;  %v2747_v44 = vsel %vm2699_vm10, %v8481_v61, %v8485_v35  ;;  %v2779_v39 = vsel %vm2699_vm10, %v8480_v43, %v8481_v61  ;;  %v2811_v33 = vsel %vm2699_vm10, %v8486_v7, %v8480_v43 }
 0x3ec   :  { %v14945_v50 = vpop.permute.xlu0 %8578  ;;  %v21030_v22 = vpack.i.bf16 %v14565_v25, %v14501_v57  ;;  %v21031_v38 = vpack.i.bf16 %v20947_v49, %v20950_v47  ;;  %v14968_v53 = vmax.f32 %v21032_v32, %v2887_v45  ;;  %v2884_v35 = vmax.f32 %v2425_v5, %v2778_v54  ;;  %v21035_v54 = vld [vmem:[#allocation116_spill] sm:$0xff] }
 0x3ed   :  { %21029 = vst [vmem:[#allocation8_spill] sm:$0xff] %v14945_v50  ;;  %v2885_v23 = vmax.f32 %v2393_v17, %v2746_v59  ;;  %v2394_v7 = vsel %vm2314_vm9, %v8471_v15, %v8466_v56  ;;  %v2426_v43 = vsel %vm2314_vm9, %v8476_v24, %v8471_v15  ;;  %v14986_v59 = vmax.f32 %v21035_v54, %v2890_v3  ;;  %v21037_v24 = vld [vmem:[#allocation122_spill] sm:$0xff]  ;;  %v21039_v54 = vld [vmem:[#allocation208_spill] sm:$0xff] }
 0x3ee   :  { %8873 = vrot.lane.b32.xlu0 %v21030_v22, %s9454_s2  ;;  %8888 = vrot.lane.b32.xlu1 %v21031_v38, %s9454_s2  ;;  %21033 = vst [vmem:[#allocation80_spill] sm:$0xff] %v14968_v53  ;;  %v2363_v22 = vsel %vm2314_vm9, %v8490_v27, %v19674_v12  ;;  %v21034_v38 = vld [vmem:[#allocation120_spill] sm:$0xff]  ;;  %v2888_v17 = vmax.f32 %v2426_v43, %v2779_v39  ;;  %v8515_v49 = vunpack.i.l.bf16 %v21037_v24  ;;  %v21038_v12 = vld [vmem:[#allocation55_spill] sm:$0xff]  ;;  %v8511_v57 = vunpack.i.h.bf16 %v14674_v18 }
 0x3ef   :  { %v8496_v51 = vunpack.i.h.bf16 %v21034_v38  ;;  %21036 = vst [vmem:[#allocation62_spill] sm:$0xff] %v14986_v59  ;;  %v2889_v32 = vmax.f32 %v2394_v7, %v2747_v44  ;;  %v2891_v56 = vmax.f32 %v2330_v21, %v2811_v33  ;;  %v2716_v15 = vsel %vm2699_vm10, %v8500_v1, %v8501_v62  ;;  %v21041_v21 = vld [vmem:[#allocation205_spill] sm:$0xff]  ;;  %v21043_v33 = vld [vmem:[#allocation63_spill] sm:$0xff] }
 0x3f0   :  { %v14981_v45 = vpop.permute.xlu0 %8588  ;;  %v14983_v5 = vpop.permute.xlu1 %8613  ;;  %v14999_v39 = vmax.f32 %v21039_v54, %v2884_v35  ;;  %v15002_v44 = vmax.f32 %v21041_v21, %v2885_v23  ;;  %v2894_v43 = vmax.f32 %v2363_v22, %v2716_v15  ;;  %v19680_v61 = vunpack.i.l.bf16 %v21043_v33  ;;  %v21044_v54 = vld [vmem:[#allocation21_spill] sm:$0xff]  ;;  %v21046_v21 = vld [vmem:[#allocation111_spill] sm:$0xff] }
 0x3f1   :  { %v2748_v47 = vsel %vm2699_vm10, %v8496_v51, %v8500_v1  ;;  %v15016_v23 = vmax.f32 %v21044_v54, %v2888_v17  ;;  %v15019_v3 = vmax.f32 %v21046_v21, %v2889_v32  ;;  %v21048_v22 = vld [vmem:[#allocation119_spill] sm:$0xff]  ;;  %v8495_v1 = vunpack.i.l.bf16 %v21034_v38  ;;  %v21051_v17 = vld [vmem:[#allocation161_spill] sm:$0xff] }
 0x3f2   :  { %8883 = vrot.lane.b32.xlu0 %v21038_v12, %s9453_s1  ;;  %8898 = vrot.lane.b32.xlu1 %v14761_v60, %s9453_s1  ;;  %21040 = vst [vmem:[#allocation59_spill] sm:$0xff] %v14999_v39  ;;  %21042 = vst [vmem:[#allocation57_spill] sm:$0xff] %v15002_v44  ;;  %v15022_v15 = vmax.f32 %v21048_v22, %v2891_v56  ;;  %v2395_v7 = vsel %vm2314_vm9, %v19680_v61, %v8490_v27  ;;  %v21050_v30 = vunpack.i.h.bf16 %v21037_v24  ;;  %v21052_v38 = vld [vmem:[#allocation83_spill] sm:$0xff] }
 0x3f3   :  { %21045 = vst [vmem:[#allocation182_spill] sm:$0xff] %v15016_v23  ;;  %21047 = vst [vmem:[#allocation7_spill] sm:$0xff] %v15019_v3  ;;  %v19685_v54 = vunpack.i.h.bf16 %v21051_v17  ;;  %v8525_v32 = vunpack.i.l.bf16 %v21051_v17  ;;  %v15040_v56 = vmax.f32 %v21052_v38, %v2894_v43  ;;  %v2893_v21 = vmax.f32 %v2395_v7, %v2748_v47  ;;  %v21058_v22 = vld [vmem:[#allocation47_spill] sm:$0xff] }
 0x3f4   :  { %v15009_v48 = vpop.permute.xlu0 %8603  ;;  %v15011_v25 = vpop.permute.xlu1 %8623  ;;  %21049 = vst [vmem:[#allocation60_spill] sm:$0xff] %v15022_v15  ;;  %v2781_v35 = vsel %vm2699_vm10, %v8515_v49, %v21050_v30  ;;  %v15046_v30 = vpack.i.bf16 %v15002_v44, %v14999_v39  ;;  %v21055_v61 = vunpack.i.h.bf16 %v21043_v33  ;;  %v15061_v7 = vsel %vm2699_vm10, %v8495_v1, %v8496_v51  ;;  %v21059_v39 = vld [vmem:[#allocation26_spill] sm:$0xff] }
 0x3f5   :  { %21053 = vst [vmem:[#allocation183_spill] sm:$0xff] %v15040_v56  ;;  %21056 = vst [vmem:[#allocation3_spill] sm:$0xff] %v15061_v7  ;;  %v15065_v27 = vsel %vm2699_vm10, %v8501_v62, %v8495_v1  ;;  %v8521_v43 = vunpack.i.h.bf16 %v14724_v26  ;;  %v21060_v44 = vld [vmem:[#allocation178_spill] sm:$0xff]  ;;  %v15082_v62 = vpack.i.bf16 %v14968_v53, %v14934_v46  ;;  %v21062_v1 = vld [vmem:[#allocation135_spill] sm:$0xff]  ;;  %v21066_v33 = vunpack.i.l.bf16 %v14674_v18 }
 0x3f6   :  { %8893 = vrot.lane.b32.xlu0 %v21038_v12, %s9454_s2  ;;  %8908 = vrot.lane.b32.xlu1 %v14761_v60, %s9454_s2  ;;  %21054 = vst [vmem:[#allocation77_spill] sm:$0xff] %v15046_v30  ;;  %v2428_v12 = vsel %vm2314_vm9, %v8511_v57, %v21055_v61  ;;  %v8531_v60 = vunpack.i.h.bf16 %v14676_v11  ;;  %21057 = vst [vmem:[#allocation132_spill] sm:$0xff] %v15065_v27  ;;  %v15071_v61 = vsel %vm2314_vm9, %v8525_v32, %v19685_v54  ;;  %v21063_v56 = vld [vmem:[#allocation200_spill] sm:$0xff]  ;;  %v21064_v54 = vld [vmem:[#allocation82_spill] sm:$0xff] }
 0x3f7   :  { %v21061_v51 = vpack.i.bf16 %v21059_v39, %v21060_v44  ;;  %v15086_v17 = vpack.i.bf16 %v21063_v56, %v21062_v1  ;;  %v15089_v27 = vmax.f32 %v21064_v54, %v2893_v21  ;;  %v2896_v7 = vmax.f32 %v2428_v12, %v2781_v35  ;;  %v21069_v54 = vld [vmem:[#allocation110_spill] sm:$0xff]  ;;  %v21070_v21 = vld [vmem:[#allocation131_spill] sm:$0xff] }
 0x3f8   :  { %v15055_v38 = vpop.permute.xlu0 %8608  ;;  %v15057_v47 = vpop.permute.xlu1 %8638  ;;  %v2332_v30 = vsel %vm2314_vm9, %v21066_v33, %v8511_v57  ;;  %v21067_v55 = vunpack.i.l.bf16 %v14676_v11  ;;  %v8520_v46 = vunpack.i.l.bf16 %v14724_v26  ;;  %v15108_v35 = vpack.i.bf16 %v21070_v21, %v21069_v54  ;;  %v21072_v12 = vld [vmem:[#allocation162_spill] sm:$0xff]  ;;  %v21074_v26 = vld [vmem:[#allocation99_spill] sm:$0xff] }
 0x3f9   :  { %21065 = vst [vmem:[#allocation181_spill] sm:$0xff] %v15089_v27  ;;  %v8546_v1 = vunpack.i.h.bf16 %v21072_v12  ;;  %v15114_v33 = vpack.i.bf16 %v15019_v3, %v15016_v23  ;;  %v15126_v21 = vpack.i.bf16 %v15022_v15, %v14986_v59  ;;  %v21077_v57 = vld [vmem:[#allocation175_spill] sm:$0xff]  ;;  %v21085_v15 = vld [vmem:[#allocation146_spill] sm:$0xff] }
 0x3fa   :  { %8903 = vrot.lane.b32.xlu0 %v21058_v22, %s9453_s1  ;;  %8918 = vrot.lane.b32.xlu1 %v21061_v51, %s9453_s1  ;;  %v15099_v51 = vsel %vm2699_vm10, %v21067_v55, %v8531_v60  ;;  %21071 = vst [vmem:[#allocation6_spill] sm:$0xff] %v15108_v35  ;;  %v2813_v55 = vsel %vm2699_vm10, %v8521_v43, %v8515_v49  ;;  %v21079_v23 = vld [vmem:[#allocation95_spill] sm:$0xff]  ;;  %v21087_v49 = vunpack.i.l.bf16 %v21072_v12  ;;  %v8571_v12 = vunpack.i.h.bf16 %v14800_v10 }
 0x3fb   :  { %21068 = vst [vmem:[#allocation108_spill] sm:$0xff] %v15099_v51  ;;  %21073 = vst [vmem:[#allocation67_spill] sm:$0xff] %v15114_v33  ;;  %v21075_v51 = vpack.i.bf16 %v21060_v44, %v21074_v26  ;;  %v15129_v54 = vmax.f32 %v21077_v57, %v2896_v7  ;;  %v8536_v3 = vunpack.i.h.bf16 %v21079_v23  ;;  %v8535_v27 = vunpack.i.l.bf16 %v21079_v23  ;;  %v21084_v57 = vld [vmem:[#allocation189_spill] sm:$0xff] }
 0x3fc   :  { %v15102_v53 = vpop.permute.xlu0 %8618  ;;  %v15104_v56 = vpop.permute.xlu1 %8643  ;;  %21076 = vst [vmem:[#allocation71_spill] sm:$0xff] %v15126_v21  ;;  %v21081_v44 = vunpack.i.h.bf16 %v21037_v24  ;;  %v15150_v26 = vpack.i.bf16 %v21085_v15, %v21084_v57  ;;  %v2899_v23 = vmax.f32 %v2332_v30, %v2813_v55  ;;  %v8551_v24 = vunpack.i.h.bf16 %v14833_v40 }
 0x3fd   :  { %21078 = vst [vmem:[#allocation81_spill] sm:$0xff] %v15129_v54  ;;  %v8550_v54 = vunpack.i.l.bf16 %v14833_v40  ;;  %v21089_v15 = vpack.i.bf16 %v14768_v19, %v20963_v13  ;;  %v21090_v30 = vpack.i.bf16 %v14664_v9, %v14771_v34  ;;  %v2718_v55 = vsel %vm2699_vm10, %v8535_v27, %v8536_v3 }
 0x3fe   :  { %8913 = vrot.lane.b32.xlu0 %v21058_v22, %s9454_s2  ;;  %8928 = vrot.lane.b32.xlu1 %v21075_v51, %s9454_s2  ;;  %v15136_v22 = vsel %vm2699_vm10, %v8520_v46, %v8521_v43  ;;  %v15142_v51 = vsel %vm2699_vm10, %v21081_v44, %v8520_v46  ;;  %21086 = vst [vmem:[#allocation13_spill] sm:$0xff] %v15150_v26  ;;  %v21088_v46 = vld [vmem:[#allocation210_spill] sm:$0xff]  ;;  %v21091_v21 = vunpack.i.l.bf16 %v14798_v58  ;;  %v21094_v35 = vunpack.i.h.bf16 %v14865_v41 }
 0x3ff   :  { %21080 = vst [vmem:[#allocation84_spill] sm:$0xff] %v15136_v22  ;;  %21082 = vst [vmem:[#allocation88_spill] sm:$0xff] %v15142_v51  ;;  %v2334_v43 = vsel %vm2314_vm9, %v21087_v49, %v8546_v1  ;;  %v8556_v44 = vunpack.i.h.bf16 %v21088_v46  ;;  %v8555_v40 = vunpack.i.l.bf16 %v21088_v46  ;;  %v21093_v51 = vld [vmem:[#allocation107_spill] sm:$0xff]  ;;  %v2750_v46 = vsel %vm2699_vm10, %v8531_v60, %v8535_v27 }
 0x400   :  { %v15144_v59 = vpop.permute.xlu0 %8628  ;;  %v15146_v7 = vpop.permute.xlu1 %8653  ;;  %v2397_v57 = vsel %vm2314_vm9, %v21091_v21, %v8525_v32  ;;  %v2783_v49 = vsel %vm2699_vm10, %v8550_v54, %v8551_v24  ;;  %v8566_v21 = vunpack.i.h.bf16 %v14905_v8  ;;  %v21095_v27 = vpack.i.bf16 %v20963_v13, %v21059_v39 }
 0x401   :  { %21083 = vst [vmem:[#allocation115_spill] sm:$0xff] %v15146_v7  ;;  %v8560_v7 = vunpack.i.l.bf16 %v14865_v41  ;;  %v2815_v32 = vsel %vm2699_vm10, %v8556_v44, %v8550_v54  ;;  %v2901_v33 = vmax.f32 %v2397_v57, %v2750_v46  ;;  %v21096_v60 = vpack.i.bf16 %v14771_v34, %v14768_v19  ;;  %v21097_v54 = vld [vmem:[#allocation73_spill] sm:$0xff]  ;;  %v21104_v19 = vld [vmem:[#allocation118_spill] sm:$0xff] }
 0x402   :  { %8923 = vrot.lane.b32.xlu0 %v21089_v15, %s9453_s1  ;;  %8938 = vrot.lane.b32.xlu1 %v21090_v30, %s9453_s1  ;;  %v8570_v15 = vunpack.i.l.bf16 %v14800_v10  ;;  %v21092_v30 = vld [vmem:[#allocation188_spill] sm:$0xff]  ;;  %v2902_v10 = vmax.f32 %v15071_v61, %v2718_v55  ;;  %v21099_v61 = vunpack.i.l.bf16 %v14676_v11  ;;  %v21100_v55 = vunpack.i.h.bf16 %v14798_v58 }
 0x403   :  { %v15185_v18 = vpack.i.bf16 %v21093_v51, %v21092_v30  ;;  %v2367_v51 = vsel %vm2314_vm9, %v8560_v7, %v21094_v35  ;;  %v15208_v30 = vmax.f32 %v21097_v54, %v2899_v23  ;;  %v15218_v35 = vsel %vm2699_vm10, %v8555_v40, %v8556_v44 }
 0x404   :  { %v15179_v26 = vpop.permute.xlu0 %8633  ;;  %v15181_v22 = vpop.permute.xlu1 %8663  ;;  %v15214_v57 = vsel %vm2699_vm10, %v8536_v3, %v21099_v61  ;;  %v2430_v46 = vsel %vm2314_vm9, %v8546_v1, %v21100_v55  ;;  %v19708_v11 = vunpack.i.l.bf16 %v14835_v16  ;;  %v2752_v39 = vsel %vm2699_vm10, %v8566_v21, %v8570_v15  ;;  %v21102_v1 = vld [vmem:[#allocation217_spill] sm:$0xff] }
 0x405   :  { %21098 = vst [vmem:[#allocation17_spill] sm:$0xff] %v15208_v30  ;;  %v2904_v23 = vmax.f32 %v2430_v46, %v2783_v49  ;;  %v15236_v55 = vmax.f32 %v21102_v1, %v2902_v10  ;;  %v15239_v49 = vmax.f32 %v21104_v19, %v2901_v33  ;;  %v21107_v46 = vld [vmem:[#allocation93_spill] sm:$0xff]  ;;  %v8581_v10 = vunpack.i.h.bf16 %v14945_v50 }
 0x406   :  { %8933 = vrot.lane.b32.xlu0 %v21095_v27, %s9454_s2  ;;  %8948 = vrot.lane.b32.xlu1 %v21096_v60, %s9454_s2  ;;  %v2720_v27 = vsel %vm2699_vm10, %v8570_v15, %v8571_v12  ;;  %v2907_v60 = vmax.f32 %v2334_v43, %v2815_v32  ;;  %v8565_v32 = vunpack.i.l.bf16 %v14905_v8  ;;  %v2399_v15 = vsel %vm2314_vm9, %v19708_v11, %v8560_v7  ;;  %v21110_v7 = vld [vmem:[#allocation173_spill] sm:$0xff] }
 0x407   :  { %v2910_v61 = vmax.f32 %v2367_v51, %v2720_v27  ;;  %21103 = vst [vmem:[#allocation147_spill] sm:$0xff] %v15236_v55  ;;  %21105 = vst [vmem:[#allocation78_spill] sm:$0xff] %v15239_v49  ;;  %v21106_v51 = vpack.i.bf16 %v20971_v29, %v14776_v20  ;;  %v15258_v8 = vsel %vm2699_vm10, %v8551_v24, %v8555_v40  ;;  %v21108_v27 = vld [vmem:[#allocation32_spill] sm:$0xff]  ;;  %v19713_v43 = vunpack.i.l.bf16 %v14945_v50  ;;  %v21112_v19 = vld [vmem:[#allocation133_spill] sm:$0xff] }
 0x408   :  { %v15227_v54 = vpop.permute.xlu0 %8648  ;;  %v15229_v3 = vpop.permute.xlu1 %8673  ;;  %v15261_v1 = vmax.f32 %v21108_v27, %v2904_v23  ;;  %v15267_v11 = vmax.f32 %v21110_v7, %v2907_v60  ;;  %v21114_v34 = vunpack.i.h.bf16 %v14867_v6  ;;  %v21115_v24 = vunpack.i.l.bf16 %v14867_v6 }
 0x409   :  { %21101 = vst [vmem:[#allocation15_spill] sm:$0xff] %v15227_v54  ;;  %v15270_v33 = vmax.f32 %v21112_v19, %v2910_v61  ;;  %v15282_v23 = vsel %vm2699_vm10, %v8565_v32, %v8566_v21  ;;  %v15286_v60 = vsel %vm2699_vm10, %v8571_v12, %v8565_v32  ;;  %v8676_v61 = vunpack.i.h.bf16 %v15229_v3 }
 0x40a   :  { %8943 = vrot.lane.b32.xlu0 %v21106_v51, %s9453_s1  ;;  %8958 = vrot.lane.b32.xlu1 %v21107_v46, %s9453_s1  ;;  %21109 = vst [vmem:[#allocation150_spill] sm:$0xff] %v15261_v1  ;;  %v2909_v51 = vmax.f32 %v2399_v15, %v2752_v39  ;;  %21111 = vst [vmem:[#allocation25_spill] sm:$0xff] %v15267_v11  ;;  %v15278_v40 = vsel %vm2699_vm10, %v21115_v24, %v21114_v34  ;;  %v8675_v15 = vunpack.i.l.bf16 %v15229_v3  ;;  %v21122_v24 = vld [vmem:[#allocation4_spill] sm:$0xff] }
 0x40b   :  { %21113 = vst [vmem:[#allocation89_spill] sm:$0xff] %v15270_v33  ;;  %21116 = vst [vmem:[#allocation18_spill] sm:$0xff] %v15282_v23  ;;  %v21118_v19 = vpack.i.bf16 %v14776_v20, %v14664_v9  ;;  %v21119_v34 = vunpack.i.h.bf16 %v14907_v31  ;;  %v21120_v21 = vunpack.i.l.bf16 %v14907_v31  ;;  %v21121_v32 = vunpack.i.h.bf16 %v14835_v16 }
 0x40c   :  { %v8659_v13 = vpop.permute.xlu0 %8658  ;;  %v15264_v44 = vpop.permute.xlu1 %8678  ;;  %21117 = vst [vmem:[#allocation11_spill] sm:$0xff] %v15286_v60  ;;  %v8665_v27 = vunpack.i.l.bf16 %v15181_v22  ;;  %v21126_v23 = vunpack.i.l.bf16 %v14867_v6  ;;  %v21127_v16 = vunpack.i.h.bf16 %v14981_v45 }
 0x40d   :  { %v8661_v39 = vunpack.i.h.bf16 %v8659_v13  ;;  %v15302_v12 = vsel %vm2314_vm9, %v21120_v21, %v21119_v34  ;;  %v15308_v3 = vsel %vm2314_vm9, %v8581_v10, %v21121_v32  ;;  %v8660_v7 = vunpack.i.l.bf16 %v8659_v13  ;;  %v21124_v34 = vld [vmem:[#allocation179_spill] sm:$0xff] }
 0x40e   :  { %8953 = vrot.lane.b32.xlu0 %v21118_v19, %s9454_s2  ;;  %8968 = vrot.lane.b32.xlu1 %v21107_v46, %s9454_s2  ;;  %v15312_v19 = vmax.f32 %v21122_v24, %v2909_v51  ;;  %v15318_v46 = vsel %vm2314_vm9, %v19713_v43, %v8581_v10  ;;  %v8666_v32 = vunpack.i.h.bf16 %v15181_v22  ;;  %v3724_v21 = vsel %vm2699_vm10, %v8675_v15, %v8676_v61  ;;  %v21133_v10 = vld [vmem:[#allocation144_spill] sm:$0xff] }
 0x40f   :  { %v3372_v13 = vsel %vm2314_vm9, %v8661_v39, %v8665_v27  ;;  %v21125_v33 = vpack.i.bf16 %v20971_v29, %v21124_v34  ;;  %v3404_v43 = vsel %vm2314_vm9, %v8660_v7, %v8661_v39  ;;  %v15354_v39 = vsel %vm2699_vm10, %v21127_v16, %v21126_v23 }
 0x410   :  { %21123 = vst [vmem:[#allocation156_spill] sm:$0xff] %v15312_v19  ;;  %v8669_v9 = vpop.permute.xlu0 %8668  ;;  %v15322_v20 = vpop.permute.xlu1 %8688  ;;  %v3854_v11 = vmax.f32 %v3372_v13, %v3724_v21  ;;  %v3340_v16 = vsel %vm2314_vm9, %v8665_v27, %v8666_v32 }
 0x411   :  { %v8671_v51 = vunpack.i.h.bf16 %v8669_v9  ;;  %v8670_v24 = vunpack.i.l.bf16 %v8669_v9  ;;  %v3436_v9 = vsel %vm2314_vm9, %v8666_v32, %v8660_v7  ;;  %v21128_v7 = vld [vmem:[#allocation153_spill] sm:$0xff]  ;;  %v8690_v13 = vunpack.i.l.bf16 %v15322_v20  ;;  %v21131_v32 = vld [vmem:[#allocation50_spill] sm:$0xff] }
 0x412   :  { %8963 = vrot.lane.b32.xlu0 %v21125_v33, %s9454_s2  ;;  %8978 = vrot.lane.b32.xlu1 %v14894_v63, %s9453_s1 }
 0x413   :  { %v3788_v22 = vsel %vm2699_vm10, %v8670_v24, %v8671_v51  ;;  %v3756_v54 = vsel %vm2699_vm10, %v8671_v51, %v8675_v15  ;;  %v3820_v23 = vsel %vm2699_vm10, %v8676_v61, %v8670_v24 }
 0x414   :  { %v3852_v29 = vmax.f32 %v3436_v9, %v3788_v22  ;;  %v8684_v33 = vpop.permute.xlu0 %8683  ;;  %v8699_v34 = vpop.permute.xlu1 %8698  ;;  %v3853_v19 = vmax.f32 %v3404_v43, %v3756_v54  ;;  %v8681_v54 = vunpack.i.h.bf16 %v15264_v44  ;;  %v21129_v43 = vld [vmem:[#allocation117_spill] sm:$0xff]  ;;  %v3855_v22 = vmax.f32 %v3340_v16, %v3820_v23 }
 0x415   :  { %v8686_v1 = vunpack.i.h.bf16 %v8684_v33  ;;  %v8685_v55 = vunpack.i.l.bf16 %v8684_v33  ;;  %v8701_v50 = vunpack.i.h.bf16 %v8699_v34  ;;  %v8700_v60 = vunpack.i.l.bf16 %v8699_v34 }
 0x416   :  { %v3980_v21 = vmax.f32 %v21128_v7, %v3852_v29  ;;  %8973 = vrot.lane.b32.xlu0 %v14917_v37, %s9453_s1  ;;  %8988 = vrot.lane.b32.xlu1 %v14894_v63, %s9454_s2  ;;  %v3981_v34 = vmax.f32 %v21129_v43, %v3853_v19  ;;  %v21130_v7 = vld [vmem:[#allocation121_spill] sm:$0xff]  ;;  %v3983_v24 = vmax.f32 %v21131_v32, %v3855_v22 }
 0x417   :  { %v3373_v33 = vsel %vm2314_vm9, %v8685_v55, %v8686_v1  ;;  %v3725_v63 = vsel %vm2699_vm10, %v8700_v60, %v8701_v50  ;;  %v3982_v15 = vmax.f32 %v21130_v7, %v3854_v11  ;;  %v3405_v27 = vsel %vm2314_vm9, %v8681_v54, %v8685_v55 }
 0x418   :  { %v8694_v51 = vpop.permute.xlu0 %8693  ;;  %v8704_v9 = vpop.permute.xlu1 %8703  ;;  %4236 = vmatprep.mubr.f32.mxu0 %v3981_v34  ;;  %v3341_v16 = vsel %vm2314_vm9, %v8686_v1, %v8690_v13  ;;  %v3437_v11 = vsel %vm2314_vm9, %v8690_v13, %v8681_v54  ;;  %v21132_v34 = vpack.i.bf16 %v14870_v28, %v20984_v52  ;;  %v3858_v23 = vmax.f32 %v3373_v33, %v3725_v63  ;;  %v21137_v63 = vld [vmem:[#allocation35_spill] sm:$0xff] }
 0x419   :  { %v8696_v19 = vunpack.i.h.bf16 %v8694_v51  ;;  %v8695_v43 = vunpack.i.l.bf16 %v8694_v51  ;;  %4237 = vmatmul.mubr.f32.vlgmr.msra.gmra.mxu0 %v3980_v21  ;;  %v8706_v51 = vunpack.i.h.bf16 %v8704_v9  ;;  %4461 = vmatprep.mubr.f32.mxu1 %v3983_v24  ;;  %v8705_v32 = vunpack.i.l.bf16 %v8704_v9  ;;  %v21138_v24 = vld [vmem:[#allocation194_spill] sm:$0xff]  ;;  %v21140_v9 = vld [vmem:[#allocation136_spill] sm:$0xff] }
 0x41a   :  { %8983 = vrot.lane.b32.xlu0 %v14917_v37, %s9454_s2  ;;  %8998 = vrot.lane.b32.xlu1 %v21132_v34, %s9453_s1 }
 0x41b   :  { %v3757_v55 = vsel %vm2699_vm10, %v8696_v19, %v8700_v60  ;;  %v3821_v21 = vsel %vm2699_vm10, %v8701_v50, %v8695_v43  ;;  %v3789_v37 = vsel %vm2699_vm10, %v8695_v43, %v8696_v19  ;;  %4462 = vmatmul.mubr.f32.vlgmr.msra.gmra.mxu1 %v3982_v15  ;;  %v21134_v50 = vld [vmem:[#allocation102_spill] sm:$0xff] }
 0x41c   :  { %v8709_v1 = vpop.permute.xlu0 %8708  ;;  %v8714_v22 = vpop.permute.xlu1 %8713  ;;  %v3857_v13 = vmax.f32 %v3405_v27, %v3757_v55  ;;  %v3859_v54 = vmax.f32 %v3341_v16, %v3821_v21  ;;  %v3856_v7 = vmax.f32 %v3437_v11, %v3789_v37  ;;  %v21135_v41 = vpack.i.bf16 %v21133_v10, %v21134_v50  ;;  %v21136_v19 = vld [vmem:[#allocation202_spill] sm:$0xff] }
 0x41d   :  { %v8711_v34 = vunpack.i.h.bf16 %v8709_v1  ;;  %v8716_v61 = vunpack.i.h.bf16 %v8714_v22  ;;  %v8715_v29 = vunpack.i.l.bf16 %v8714_v22  ;;  %v8710_v60 = vunpack.i.l.bf16 %v8709_v1 }
 0x41e   :  { %8993 = vrot.lane.b32.xlu0 %v21135_v41, %s9453_s1  ;;  %v3985_v33 = vmax.f32 %v21136_v19, %v3857_v13  ;;  %v3987_v43 = vmax.f32 %v21137_v63, %v3859_v54  ;;  %v3984_v49 = vmax.f32 %v21138_v24, %v3856_v7  ;;  %v21139_v27 = vmax.f32 %v15308_v3, %v15278_v40  ;;  %v21146_v3 = vld [vmem:[#allocation33_spill] sm:$0xff] }
 0x41f   :  { %v21141_v16 = vunpack.i.h.bf16 %v14947_v36  ;;  %v21142_v11 = vunpack.i.l.bf16 %v14947_v36  ;;  %v21143_v41 = vunpack.i.h.bf16 %v14981_v45  ;;  %v21144_v21 = vunpack.i.l.bf16 %v14981_v45 }
 0x420   :  { %v15406_v15 = vmax.f32 %v21140_v9, %v21139_v27  ;;  %v21145_v40 = vpack.i.bf16 %v20984_v52, %v21133_v10  ;;  %v3986_v1 = vmax.f32 %v21146_v3, %v3858_v23  ;;  %v21148_v13 = vunpack.i.h.bf16 %v14867_v6  ;;  %v8719_v7 = vpop.permute.xlu0 %8718  ;;  %v15437_v19 = vpop.permute.xlu1 %8728  ;;  %4241 = vmatprep.mubr.f32.mxu0 %v3985_v33  ;;  %4466 = vmatprep.mubr.f32.mxu1 %v3987_v43 }
 0x421   :  { %v15414_v55 = vsel %vm2699_vm10, %v21142_v11, %v21141_v16  ;;  %v15422_v37 = vsel %vm2699_vm10, %v21144_v21, %v21143_v41  ;;  %v21147_v22 = vmov %v21144_v21  ;;  %v3438_v63 = vsel %vm2314_vm9, %v8711_v34, %v8705_v32  ;;  %4242 = vmatmul.mubr.f32.gmra.mxu0 %v3984_v49 }
 0x422   :  { %9008 = vrot.lane.b32.xlu1 %v21145_v40, %s9454_s2  ;;  %v15435_v54 = vsel %vm2699_vm10, %v21148_v13, %v21147_v22  ;;  %v3790_v24 = vsel %vm2699_vm10, %v8715_v29, %v8716_v61  ;;  %v2915_v45 = vmax.f32 %v15318_v46, %v15354_v39  ;;  %v21149_v6 = vunpack.i.h.bf16 %v14983_v5  ;;  %4467 = vmatmul.mubr.f32.gmra.mxu1 %v3986_v1  ;;  %v21153_v46 = vld [vmem:[#allocation22_spill] sm:$0xff] }
 0x423   :  { %v21150_v23 = vunpack.i.l.bf16 %v14983_v5  ;;  %v8721_v9 = vunpack.i.h.bf16 %v8719_v7  ;;  %v8720_v33 = vunpack.i.l.bf16 %v8719_v7  ;;  %v21151_v43 = vunpack.i.h.bf16 %v15009_v48 }
 0x424   :  { %v21152_v16 = vunpack.i.l.bf16 %v15009_v48  ;;  %v21154_v39 = vpack.i.bf16 %v21134_v50, %v21153_v46  ;;  %v3406_v41 = vsel %vm2314_vm9, %v8705_v32, %v8706_v51  ;;  %v3342_v21 = vsel %vm2314_vm9, %v8710_v60, %v8711_v34  ;;  %v15480_v13 = vpop.permute.xlu0 %8723 }
 0x425   :  { %v15451_v27 = vsel %vm2314_vm9, %v21150_v23, %v21149_v6  ;;  %v3374_v49 = vsel %vm2314_vm9, %v8706_v51, %v8710_v60  ;;  %v21155_v40 = vpack.i.bf16 %v20989_v14, %v14900_v42  ;;  %v3758_v3 = vsel %vm2699_vm10, %v8716_v61, %v8720_v33  ;;  %v8739_v51 = vpop.permute.xlu1 %8738 }
 0x426   :  { %v2722_v11 = vsel %vm2699_vm10, %v21152_v16, %v21151_v43  ;;  %9003 = vrot.lane.b32.xlu0 %v21154_v39, %s9454_s2  ;;  %v3822_v1 = vsel %vm2699_vm10, %v8721_v9, %v8715_v29  ;;  %v3860_v22 = vmax.f32 %v3438_v63, %v3790_v24  ;;  %v3726_v32 = vsel %vm2699_vm10, %v8720_v33, %v8721_v9  ;;  %v21157_v9 = vld [vmem:[#allocation44_spill] sm:$0xff]  ;;  %v21158_v16 = vld [vmem:[#allocation125_spill] sm:$0xff] }
 0x427   :  { %9018 = vrot.lane.b32.xlu1 %v21155_v40, %s9453_s1  ;;  %v8626_v34 = vunpack.i.h.bf16 %v15011_v25  ;;  %v3861_v60 = vmax.f32 %v3406_v41, %v3758_v3  ;;  %v3863_v7 = vmax.f32 %v3342_v21, %v3822_v1  ;;  %v3862_v6 = vmax.f32 %v3374_v49, %v3726_v32  ;;  %v21159_v41 = vld [vmem:[#allocation191_spill] sm:$0xff]  ;;  %v21162_v32 = vld [vmem:[#allocation85_spill] sm:$0xff] }
 0x428   :  { %v19728_v23 = vunpack.i.l.bf16 %v15011_v25  ;;  %v19725_v43 = vunpack.i.l.bf16 %v15055_v38  ;;  %v19727_v61 = vunpack.i.h.bf16 %v15102_v53  ;;  %v8620_v29 = vunpack.i.l.bf16 %v15102_v53 }
 0x429   :  { %v2918_v63 = vmax.f32 %v15302_v12, %v2722_v11  ;;  %v21156_v24 = vpack.i.bf16 %v14897_v2, %v14888_v4  ;;  %v3989_v33 = vmax.f32 %v21157_v9, %v3861_v60  ;;  %v3991_v39 = vmax.f32 %v21158_v16, %v3863_v7  ;;  %v21161_v11 = vld [vmem:[#allocation190_spill] sm:$0xff] }
 0x42a   :  { %v3990_v21 = vmax.f32 %v21159_v41, %v3862_v6  ;;  %v19726_v49 = vunpack.i.h.bf16 %v15055_v38  ;;  %v19729_v40 = vunpack.i.h.bf16 %v15057_v47  ;;  %v19730_v3 = vunpack.i.l.bf16 %v15057_v47 }
 0x42b   :  { %9013 = vrot.lane.b32.xlu0 %v21156_v24, %s9453_s1  ;;  %v21160_v12 = vpack.i.bf16 %v14900_v42, %v14897_v2  ;;  %v3988_v1 = vmax.f32 %v21161_v11, %v3860_v22  ;;  %v15503_v24 = vmax.f32 %v21162_v32, %v2915_v45  ;;  %v21163_v60 = vunpack.i.l.bf16 %v15009_v48  ;;  %v15521_v22 = vpop.permute.xlu0 %8733  ;;  %v15523_v45 = vpop.permute.xlu1 %8753  ;;  %4246 = vmatprep.mubr.f32.mxu0 %v3989_v33 }
 0x42c   :  { %v21164_v7 = vunpack.i.h.bf16 %v14947_v36  ;;  %v21165_v9 = vunpack.i.l.bf16 %v14947_v36  ;;  %v21166_v16 = vunpack.i.h.bf16 %v15009_v48  ;;  %4471 = vmatprep.mubr.f32.mxu1 %v3991_v39  ;;  %v15535_v48 = vsel %vm2699_vm10, %v8620_v29, %v19727_v61 }
 0x42d   :  { %9028 = vrot.lane.b32.xlu1 %v21160_v12, %s9454_s2  ;;  %v21167_v12 = vunpack.i.l.bf16 %v14907_v31  ;;  %v8731_v36 = vunpack.i.h.bf16 %v15437_v19  ;;  %v8735_v32 = vunpack.i.l.bf16 %v15521_v22  ;;  %4247 = vmatmul.mubr.f32.gmra.mxu0 %v3988_v1  ;;  %v8730_v33 = vunpack.i.l.bf16 %v15437_v19 }
 0x42e   :  { %v15511_v6 = vsel %vm2699_vm10, %v21164_v7, %v21163_v60  ;;  %v15519_v41 = vsel %vm2699_vm10, %v21166_v16, %v21165_v9  ;;  %4472 = vmatmul.mubr.f32.gmra.mxu1 %v3990_v21  ;;  %v8726_v39 = vunpack.i.h.bf16 %v15480_v13  ;;  %v8741_v60 = vunpack.i.h.bf16 %v8739_v51  ;;  %v21169_v16 = vld [vmem:[#allocation96_spill] sm:$0xff]  ;;  %v21172_v21 = vld [vmem:[#allocation19_spill] sm:$0xff] }
 0x42f   :  { %v2401_v11 = vsel %vm2314_vm9, %v19725_v43, %v21167_v12  ;;  %v8740_v7 = vunpack.i.l.bf16 %v8739_v51  ;;  %v21168_v9 = vpack.i.bf16 %v14888_v4, %v14870_v28  ;;  %v15546_v12 = vmax.f32 %v21169_v16, %v2918_v63  ;;  %v8764_v61 = vpop.permute.xlu1 %8763 }
 0x430   :  { %v15552_v1 = vsel %vm2699_vm10, %v19728_v23, %v8626_v34  ;;  %v21171_v19 = vunpack.i.h.bf16 %v14983_v5  ;;  %v15566_v63 = vsel %vm2699_vm10, %v19730_v3, %v19729_v40  ;;  %v2917_v16 = vmax.f32 %v2401_v11, %v15511_v6 }
 0x431   :  { %9023 = vrot.lane.b32.xlu0 %v21168_v9, %s9454_s2  ;;  %21170 = vst [vmem:[#allocation12_spill] sm:$0xff] %v15546_v12  ;;  %v21173_v9 = vpack.i.bf16 %v20989_v14, %v21172_v21  ;;  %v2819_v43 = vsel %vm2699_vm10, %v8626_v34, %v8620_v29  ;;  %v3439_v23 = vsel %vm2314_vm9, %v8735_v32, %v8726_v39  ;;  %v8630_v3 = vunpack.i.l.bf16 %v15144_v59  ;;  %v21202_v12 = vld [vmem:[#allocation139_spill] sm:$0xff] }
 0x432   :  { %v2434_v51 = vsel %vm2314_vm9, %v21171_v19, %v19726_v49  ;;  %v8744_v49 = vpop.permute.xlu0 %8743  ;;  %v3407_v6 = vsel %vm2314_vm9, %v8726_v39, %v8730_v33  ;;  %v3343_v34 = vsel %vm2314_vm9, %v8731_v36, %v8735_v32  ;;  %v3791_v29 = vsel %vm2699_vm10, %v8740_v7, %v8741_v60 }
 0x433   :  { %9038 = vrot.lane.b32.xlu1 %v21173_v9, %s9454_s2  ;;  %v2920_v19 = vmax.f32 %v2434_v51, %v15535_v48  ;;  %v8746_v52 = vunpack.i.h.bf16 %v8744_v49  ;;  %v8745_v10 = vunpack.i.l.bf16 %v8744_v49  ;;  %v21174_v9 = vld [vmem:[#allocation213_spill] sm:$0xff]  ;;  %v3375_v11 = vsel %vm2314_vm9, %v8730_v33, %v8731_v36  ;;  %v15599_v14 = vpop.permute.xlu1 %8768 }
 0x434   :  { %v21175_v48 = vld [vmem:[#allocation77_spill] sm:$0xff]  ;;  %v3864_v40 = vmax.f32 %v3439_v23, %v3791_v29  ;;  %v2923_v32 = vmax.f32 %v15451_v27, %v2819_v43  ;;  %v8756_v46 = vunpack.i.h.bf16 %v15523_v45  ;;  %v8755_v2 = vunpack.i.l.bf16 %v15523_v45  ;;  %v21176_v23 = vld [vmem:[#allocation114_spill] sm:$0xff] }
 0x435   :  { %9033 = vrot.lane.b32.xlu0 %v21174_v9, %s9453_s1  ;;  %v3759_v49 = vsel %vm2699_vm10, %v8741_v60, %v8745_v10  ;;  %v3823_v51 = vsel %vm2699_vm10, %v8746_v52, %v8740_v7  ;;  %v3727_v39 = vsel %vm2699_vm10, %v8745_v10, %v8746_v52  ;;  %v8766_v60 = vunpack.i.h.bf16 %v8764_v61  ;;  %v21177_v10 = vld [vmem:[#allocation198_spill] sm:$0xff] }
 0x436   :  { %v8749_v21 = vpop.permute.xlu0 %8748  ;;  %v3865_v50 = vmax.f32 %v3407_v6, %v3759_v49  ;;  %v3867_v36 = vmax.f32 %v3343_v34, %v3823_v51  ;;  %v3866_v33 = vmax.f32 %v3375_v11, %v3727_v39  ;;  %v8765_v42 = vunpack.i.l.bf16 %v8764_v61  ;;  %v21178_v43 = vld [vmem:[#allocation46_spill] sm:$0xff]  ;;  %v21180_v61 = vld [vmem:[#allocation28_spill] sm:$0xff]  ;;  %v21181_v11 = vld [vmem:[#allocation5_spill] sm:$0xff] }
 0x437   :  { %9048 = vrot.lane.b32.xlu1 %v21175_v48, %s9453_s1  ;;  %v8751_v28 = vunpack.i.h.bf16 %v8749_v21  ;;  %v19738_v6 = vunpack.i.l.bf16 %v15104_v56  ;;  %v21179_v34 = vunpack.i.h.bf16 %v15144_v59  ;;  %v8750_v45 = vunpack.i.l.bf16 %v8749_v21  ;;  %v15630_v21 = vpop.permute.xlu1 %8778 }
 0x438   :  { %v3993_v52 = vmax.f32 %v21176_v23, %v3865_v50  ;;  %v3995_v27 = vmax.f32 %v21177_v10, %v3867_v36  ;;  %v3994_v7 = vmax.f32 %v21178_v43, %v3866_v33  ;;  %v15619_v50 = vmax.f32 %v21181_v11, %v2917_v16  ;;  %v21185_v16 = vld [vmem:[#allocation140_spill] sm:$0xff] }
 0x439   :  { %9043 = vrot.lane.b32.xlu0 %v21174_v9, %s9454_s2  ;;  %v15613_v29 = vsel %vm2314_vm9, %v8630_v3, %v21179_v34  ;;  %v3992_v9 = vmax.f32 %v21180_v61, %v3864_v40  ;;  %v21183_v49 = vunpack.i.l.bf16 %v15011_v25  ;;  %v21184_v51 = vunpack.i.h.bf16 %v15102_v53  ;;  %v21187_v25 = vld [vmem:[#allocation91_spill] sm:$0xff]  ;;  %v21189_v34 = vld [vmem:[#allocation58_spill] sm:$0xff] }
 0x43a   :  { %21182 = vst [vmem:[#allocation148_spill] sm:$0xff] %v15619_v50  ;;  %v8680_v36 = vunpack.i.l.bf16 %v15264_v44  ;;  %v8759_v33 = vpop.permute.xlu0 %8758  ;;  %4251 = vmatprep.mubr.f32.mxu0 %v3993_v52  ;;  %4476 = vmatprep.mubr.f32.mxu1 %v3995_v27  ;;  %v3376_v40 = vsel %vm2314_vm9, %v8751_v28, %v8755_v2  ;;  %v15638_v23 = vmax.f32 %v21187_v25, %v2923_v32  ;;  %v21190_v61 = vunpack.i.h.bf16 %v21189_v34  ;;  %v21194_v52 = vld [vmem:[#allocation39_spill] sm:$0xff] }
 0x43b   :  { %9058 = vrot.lane.b32.xlu1 %v21175_v48, %s9454_s2  ;;  %v15627_v39 = vsel %vm2699_vm10, %v21184_v51, %v21183_v49  ;;  %v15635_v48 = vmax.f32 %v21185_v16, %v2920_v19  ;;  %v8761_v53 = vunpack.i.h.bf16 %v8759_v33  ;;  %v8760_v10 = vunpack.i.l.bf16 %v8759_v33  ;;  %4252 = vmatmul.mubr.f32.gmra.mxu0 %v3992_v9  ;;  %v21191_v9 = vld [vmem:[#allocation63_spill] sm:$0xff]  ;;  %v8789_v51 = vpop.permute.xlu1 %8788 }
 0x43c   :  { %21188 = vst [vmem:[#allocation157_spill] sm:$0xff] %v15638_v23  ;;  %4477 = vmatmul.mubr.f32.gmra.mxu1 %v3994_v7  ;;  %v15644_v44 = vsel %vm2314_vm9, %v19738_v6, %v8630_v3  ;;  %v3344_v19 = vsel %vm2314_vm9, %v8755_v2, %v8756_v46  ;;  %v3728_v32 = vsel %vm2699_vm10, %v8765_v42, %v8766_v60  ;;  %v21192_v11 = vunpack.i.l.bf16 %v21191_v9 }
 0x43d   :  { %21186 = vst [vmem:[#allocation23_spill] sm:$0xff] %v15635_v48  ;;  %9053 = vrot.lane.b32.xlu0 %v15082_v62, %s9453_s1  ;;  %v3408_v27 = vsel %vm2314_vm9, %v8750_v45, %v8751_v28  ;;  %v3760_v3 = vsel %vm2699_vm10, %v8761_v53, %v8765_v42  ;;  %v3824_v43 = vsel %vm2699_vm10, %v8766_v60, %v8760_v10  ;;  %v8691_v16 = vunpack.i.h.bf16 %v15322_v20 }
 0x43e   :  { %v3870_v7 = vmax.f32 %v3376_v40, %v3728_v32  ;;  %v15666_v2 = vsel %vm2314_vm9, %v21190_v61, %v8680_v36  ;;  %v15672_v49 = vsel %vm2314_vm9, %v8680_v36, %v21192_v11  ;;  %v8774_v28 = vpop.permute.xlu0 %8773  ;;  %v3869_v33 = vmax.f32 %v3408_v27, %v3760_v3  ;;  %v21193_v61 = vld [vmem:[#allocation31_spill] sm:$0xff] }
 0x43f   :  { %9068 = vrot.lane.b32.xlu1 %v15086_v17, %s9453_s1  ;;  %v3871_v42 = vmax.f32 %v3344_v19, %v3824_v43  ;;  %v8780_v60 = vunpack.i.l.bf16 %v15630_v21  ;;  %v8776_v40 = vunpack.i.h.bf16 %v8774_v28  ;;  %v8775_v25 = vunpack.i.l.bf16 %v8774_v28  ;;  %v21195_v27 = vld [vmem:[#allocation199_spill] sm:$0xff] }
 0x440   :  { %v8791_v32 = vunpack.i.h.bf16 %v8789_v51  ;;  %v8790_v34 = vunpack.i.l.bf16 %v8789_v51  ;;  %v3997_v6 = vmax.f32 %v21193_v61, %v3869_v33  ;;  %v8771_v11 = vunpack.i.h.bf16 %v15599_v14 }
 0x441   :  { %9063 = vrot.lane.b32.xlu0 %v15082_v62, %s9454_s2  ;;  %v3999_v36 = vmax.f32 %v21194_v52, %v3871_v42  ;;  %v3440_v20 = vsel %vm2314_vm9, %v8756_v46, %v8750_v45  ;;  %v3792_v19 = vsel %vm2699_vm10, %v8760_v10, %v8761_v53  ;;  %v3998_v3 = vmax.f32 %v21195_v27, %v3870_v7  ;;  %v21196_v62 = vld [vmem:[#allocation3_spill] sm:$0xff]  ;;  %v8794_v52 = vpop.permute.xlu1 %8793 }
 0x442   :  { %v2892_v28 = vmax.f32 %v15672_v49, %v21196_v62  ;;  %v8784_v51 = vpop.permute.xlu0 %8783  ;;  %4256 = vmatprep.mubr.f32.mxu0 %v3997_v6  ;;  %v3868_v33 = vmax.f32 %v3440_v20, %v3792_v19  ;;  %v21197_v46 = vunpack.i.h.bf16 %v21191_v9  ;;  %v3409_v7 = vsel %vm2314_vm9, %v8771_v11, %v8775_v25  ;;  %v21198_v49 = vld [vmem:[#allocation128_spill] sm:$0xff]  ;;  %v21199_v6 = vld [vmem:[#allocation6_spill] sm:$0xff]  ;;  %v21200_v20 = vld [vmem:[#allocation67_spill] sm:$0xff] }
 0x443   :  { %9078 = vrot.lane.b32.xlu1 %v15086_v17, %s9454_s2  ;;  %4481 = vmatprep.mubr.f32.mxu1 %v3999_v36  ;;  %v3377_v17 = vsel %vm2314_vm9, %v8775_v25, %v8776_v40  ;;  %v8786_v53 = vunpack.i.h.bf16 %v8784_v51  ;;  %v8785_v10 = vunpack.i.l.bf16 %v8784_v51  ;;  %v3345_v61 = vsel %vm2314_vm9, %v8776_v40, %v8780_v60 }
 0x444   :  { %v2396_v45 = vsel %vm2314_vm9, %v21197_v46, %v8691_v16  ;;  %4482 = vmatmul.mubr.f32.gmra.mxu1 %v3998_v3  ;;  %v3996_v42 = vmax.f32 %v21198_v49, %v3868_v33  ;;  %v3441_v9 = vsel %vm2314_vm9, %v8780_v60, %v8771_v11  ;;  %v3729_v36 = vsel %vm2699_vm10, %v8790_v34, %v8791_v32 }
 0x445   :  { %9073 = vrot.lane.b32.xlu0 %v21199_v6, %s9453_s1  ;;  %v3761_v25 = vsel %vm2699_vm10, %v8786_v53, %v8790_v34  ;;  %v3825_v19 = vsel %vm2699_vm10, %v8791_v32, %v8785_v10  ;;  %v3793_v27 = vsel %vm2699_vm10, %v8785_v10, %v8786_v53  ;;  %v3874_v3 = vmax.f32 %v3377_v17, %v3729_v36  ;;  %v8804_v60 = vpop.permute.xlu1 %8803  ;;  %v21201_v32 = vld [vmem:[#allocation27_spill] sm:$0xff]  ;;  %v21203_v17 = vld [vmem:[#allocation104_spill] sm:$0xff]  ;;  %v21207_v36 = vld [vmem:[#allocation49_spill] sm:$0xff] }
 0x446   :  { %v8796_v40 = vunpack.i.h.bf16 %v8794_v52  ;;  %4257 = vmatmul.mubr.f32.gmra.mxu0 %v3996_v42  ;;  %v8799_v62 = vpop.permute.xlu0 %8798  ;;  %v3873_v11 = vmax.f32 %v3409_v7, %v3761_v25  ;;  %v3875_v51 = vmax.f32 %v3345_v61, %v3825_v19  ;;  %v3872_v33 = vmax.f32 %v3441_v9, %v3793_v27  ;;  %v21206_v61 = vld [vmem:[#allocation132_spill] sm:$0xff] }
 0x447   :  { %9088 = vrot.lane.b32.xlu1 %v21200_v20, %s9453_s1  ;;  %v8795_v46 = vunpack.i.l.bf16 %v8794_v52  ;;  %v8801_v49 = vunpack.i.h.bf16 %v8799_v62  ;;  %v8806_v43 = vunpack.i.h.bf16 %v8804_v60  ;;  %v8805_v4 = vunpack.i.l.bf16 %v8804_v60 }
 0x448   :  { %v8800_v23 = vunpack.i.l.bf16 %v8799_v62  ;;  %v4001_v34 = vmax.f32 %v21201_v32, %v3873_v11  ;;  %v4003_v53 = vmax.f32 %v21202_v12, %v3875_v51  ;;  %v4000_v10 = vmax.f32 %v21203_v17, %v3872_v33  ;;  %v21209_v12 = vld [vmem:[#allocation163_spill] sm:$0xff]  ;;  %v21210_v62 = vld [vmem:[#allocation88_spill] sm:$0xff]  ;;  %v21211_v33 = vld [vmem:[#allocation170_spill] sm:$0xff] }
 0x449   :  { %9083 = vrot.lane.b32.xlu0 %v21199_v6, %s9454_s2  ;;  %v21204_v42 = vunpack.i.l.bf16 %v15057_v47  ;;  %v21205_v7 = vunpack.i.h.bf16 %v15179_v26  ;;  %v2895_v9 = vmax.f32 %v15666_v2, %v21206_v61  ;;  %v21208_v25 = vunpack.i.l.bf16 %v21207_v36  ;;  %v15740_v51 = vpop.permute.xlu1 %8818 }
 0x44a   :  { %v4002_v19 = vmax.f32 %v21209_v12, %v3874_v3  ;;  %v19742_v27 = vunpack.i.l.bf16 %v15179_v26  ;;  %v2897_v60 = vmax.f32 %v2396_v45, %v21210_v62  ;;  %v8809_v11 = vpop.permute.xlu0 %8808  ;;  %4261 = vmatprep.mubr.f32.mxu0 %v4001_v34  ;;  %4486 = vmatprep.mubr.f32.mxu1 %v4003_v53  ;;  %v3442_v2 = vsel %vm2314_vm9, %v8801_v49, %v8795_v46  ;;  %v21213_v45 = vld [vmem:[#allocation84_spill] sm:$0xff]  ;;  %v21214_v34 = vld [vmem:[#allocation71_spill] sm:$0xff] }
 0x44b   :  { %v15727_v52 = vsel %vm2699_vm10, %v21205_v7, %v21204_v42  ;;  %v2364_v6 = vsel %vm2314_vm9, %v8691_v16, %v21208_v25  ;;  %9098 = vrot.lane.b32.xlu1 %v21200_v20, %s9454_s2  ;;  %v3794_v16 = vsel %vm2699_vm10, %v8805_v4, %v8806_v43  ;;  %v15747_v32 = vmax.f32 %v21211_v33, %v2892_v28 }
 0x44c   :  { %v8725_v20 = vunpack.i.l.bf16 %v15480_v13  ;;  %v8811_v3 = vunpack.i.h.bf16 %v8809_v11  ;;  %v8810_v17 = vunpack.i.l.bf16 %v8809_v11  ;;  %4262 = vmatmul.mubr.f32.gmra.mxu0 %v4000_v10  ;;  %4487 = vmatmul.mubr.f32.gmra.mxu1 %v4002_v19  ;;  %v2898_v42 = vmax.f32 %v2364_v6, %v21213_v45  ;;  %v21215_v13 = vld [vmem:[#allocation13_spill] sm:$0xff] }
 0x44d   :  { %21212 = vst [vmem:[#allocation165_spill] sm:$0xff] %v15747_v32  ;;  %9093 = vrot.lane.b32.xlu0 %v21214_v34, %s9453_s1  ;;  %v3410_v53 = vsel %vm2314_vm9, %v8795_v46, %v8796_v40  ;;  %v3346_v7 = vsel %vm2314_vm9, %v8800_v23, %v8801_v49  ;;  %v3378_v28 = vsel %vm2314_vm9, %v8796_v40, %v8800_v23  ;;  %v21216_v46 = vld [vmem:[#allocation127_spill] sm:$0xff]  ;;  %v8829_v12 = vpop.permute.xlu1 %8828  ;;  %v8736_v33 = vunpack.i.h.bf16 %v15521_v22  ;;  %v21228_v22 = vld [vmem:[#allocation149_spill] sm:$0xff] }
 0x44e   :  { %v3762_v10 = vsel %vm2699_vm10, %v8806_v43, %v8810_v17  ;;  %v3826_v61 = vsel %vm2699_vm10, %v8811_v3, %v8805_v4  ;;  %v3876_v36 = vmax.f32 %v3442_v2, %v3794_v16  ;;  %v3730_v25 = vsel %vm2699_vm10, %v8810_v17, %v8811_v3  ;;  %v15770_v49 = vpop.permute.xlu0 %8813  ;;  %v21219_v43 = vld [vmem:[#allocation16_spill] sm:$0xff]  ;;  %v21223_v17 = vld [vmem:[#allocation166_spill] sm:$0xff] }
 0x44f   :  { %9108 = vrot.lane.b32.xlu1 %v21215_v13, %s9453_s1  ;;  %v15768_v6 = vmax.f32 %v21216_v46, %v2897_v60  ;;  %v3877_v23 = vmax.f32 %v3410_v53, %v3762_v10  ;;  %v3879_v40 = vmax.f32 %v3346_v7, %v3826_v61  ;;  %v3878_v19 = vmax.f32 %v3378_v28, %v3730_v25  ;;  %v21224_v53 = vld [vmem:[#allocation29_spill] sm:$0xff]  ;;  %v21226_v61 = vld [vmem:[#allocation215_spill] sm:$0xff] }
 0x450   :  { %v21218_v62 = vmax.f32 %v15613_v29, %v15566_v63  ;;  %v21220_v4 = vunpack.i.h.bf16 %v15179_v26  ;;  %v21221_v2 = vunpack.i.l.bf16 %v14798_v58  ;;  %v21222_v29 = vld [vmem:[#allocation40_spill] sm:$0xff]  ;;  %v21225_v28 = vld [vmem:[#allocation9_spill] sm:$0xff]  ;;  %v15802_v25 = vmax.f32 %v21226_v61, %v2898_v42 }
 0x451   :  { %21217 = vst [vmem:[#allocation168_spill] sm:$0xff] %v15768_v6  ;;  %9103 = vrot.lane.b32.xlu0 %v21214_v34, %s9454_s2  ;;  %v4005_v3 = vmax.f32 %v21222_v29, %v3877_v23  ;;  %v4007_v45 = vmax.f32 %v21223_v17, %v3879_v40  ;;  %v4006_v7 = vmax.f32 %v21224_v53, %v3878_v19  ;;  %v15812_v40 = vpop.permute.xlu1 %8843  ;;  %v21232_v19 = vld [vmem:[#allocation161_spill] sm:$0xff]  ;;  %v8821_v29 = vunpack.i.h.bf16 %v15740_v51 }
 0x452   :  { %v15776_v11 = vmax.f32 %v21219_v43, %v21218_v62  ;;  %v15784_v60 = vsel %vm2699_vm10, %v19742_v27, %v21220_v4  ;;  %v2429_v16 = vsel %vm2314_vm9, %v8725_v20, %v21221_v2  ;;  %v15799_v10 = vmax.f32 %v21225_v28, %v2895_v9  ;;  %21227 = vst [vmem:[#allocation90_spill] sm:$0xff] %v15802_v25  ;;  %v21229_v62 = vld [vmem:[#allocation181_spill] sm:$0xff]  ;;  %v21230_v43 = vld [vmem:[#allocation108_spill] sm:$0xff]  ;;  %v15810_v4 = vpop.permute.xlu0 %8823 }
 0x453   :  { %9118 = vrot.lane.b32.xlu1 %v21215_v13, %s9454_s2  ;;  %v4004_v46 = vmax.f32 %v21228_v22, %v3876_v36  ;;  %v9127_v34 = vpack.i.bf16 %v21229_v62, %v15747_v32  ;;  %v2900_v23 = vmax.f32 %v2429_v16, %v21230_v43  ;;  %4266 = vmatprep.mubr.f32.mxu0 %v4005_v3  ;;  %v21231_v9 = vld [vmem:[#allocation81_spill] sm:$0xff]  ;;  %v21233_v2 = vunpack.i.h.bf16 %v21232_v19  ;;  %v21236_v22 = vld [vmem:[#allocation79_spill] sm:$0xff] }
 0x454   :  { %4491 = vmatprep.mubr.f32.mxu1 %v4007_v45  ;;  %v15816_v42 = vpack.i.bf16 %v15768_v6, %v21231_v9  ;;  %v21234_v36 = vunpack.i.h.bf16 %v14798_v58  ;;  %v8825_v17 = vunpack.i.l.bf16 %v15810_v4  ;;  %v8820_v3 = vunpack.i.l.bf16 %v15740_v51  ;;  %v21235_v58 = vld [vmem:[#allocation183_spill] sm:$0xff] }
 0x455   :  { %v2333_v13 = vsel %vm2314_vm9, %v21233_v2, %v8725_v20  ;;  %4267 = vmatmul.mubr.f32.gmra.mxu0 %v4004_v46  ;;  %4492 = vmatmul.mubr.f32.gmra.mxu1 %v4006_v7  ;;  %v8816_v45 = vunpack.i.h.bf16 %v15770_v49  ;;  %v8831_v53 = vunpack.i.h.bf16 %v8829_v12  ;;  %v8830_v28 = vunpack.i.l.bf16 %v8829_v12  ;;  %v21238_v46 = vld [vmem:[#allocation162_spill] sm:$0xff]  ;;  %v8854_v2 = vpop.permute.xlu1 %8853 }
 0x456   :  { %v2398_v16 = vsel %vm2314_vm9, %v21234_v36, %v8736_v33  ;;  %9113 = vrot.lane.b32.xlu0 %v15185_v18, %s9453_s1  ;;  %v9132_v20 = vpack.i.bf16 %v15799_v10, %v21235_v58  ;;  %v15837_v61 = vpack.i.bf16 %v15208_v30, %v15802_v25  ;;  %v2903_v7 = vmax.f32 %v2333_v13, %v15214_v57  ;;  %v8834_v19 = vpop.permute.xlu0 %8833  ;;  %v21243_v58 = vld [vmem:[#allocation211_spill] sm:$0xff] }
 0x457   :  { %9128 = vrot.lane.b32.xlu1 %v9127_v34, %s9453_s1  ;;  %v15841_v51 = vmax.f32 %v21236_v22, %v2900_v23  ;;  %v21239_v43 = vunpack.i.l.bf16 %v21238_v46  ;;  %v3443_v36 = vsel %vm2314_vm9, %v8825_v17, %v8816_v45  ;;  %v2905_v63 = vmax.f32 %v2398_v16, %v15258_v8 }
 0x458   :  { %v8770_v27 = vunpack.i.l.bf16 %v15599_v14  ;;  %v8836_v25 = vunpack.i.h.bf16 %v8834_v19  ;;  %v8835_v57 = vunpack.i.l.bf16 %v8834_v19  ;;  %v3411_v23 = vsel %vm2314_vm9, %v8816_v45, %v8820_v3 }
 0x459   :  { %21237 = vst [vmem:[#allocation101_spill] sm:$0xff] %v15841_v51  ;;  %v15847_v12 = vsel %vm2314_vm9, %v8736_v33, %v21239_v43  ;;  %v3347_v33 = vsel %vm2314_vm9, %v8821_v29, %v8825_v17  ;;  %v3795_v13 = vsel %vm2699_vm10, %v8830_v28, %v8831_v53  ;;  %v3379_v22 = vsel %vm2314_vm9, %v8820_v3, %v8821_v29  ;;  %v15871_v46 = vpop.permute.xlu1 %8858 }
 0x45a   :  { %9123 = vrot.lane.b32.xlu0 %v15185_v18, %s9454_s2  ;;  %v3763_v14 = vsel %vm2699_vm10, %v8831_v53, %v8835_v57  ;;  %v3827_v18 = vsel %vm2699_vm10, %v8836_v25, %v8830_v28  ;;  %v3880_v8 = vmax.f32 %v3443_v36, %v3795_v13  ;;  %v3731_v16 = vsel %vm2699_vm10, %v8835_v57, %v8836_v25  ;;  %v8839_v45 = vpop.permute.xlu0 %8838  ;;  %v21240_v28 = vld [vmem:[#allocation37_spill] sm:$0xff]  ;;  %v21241_v13 = vld [vmem:[#allocation164_spill] sm:$0xff] }
 0x45b   :  { %9138 = vrot.lane.b32.xlu1 %v9127_v34, %s9454_s2  ;;  %v8846_v17 = vunpack.i.h.bf16 %v15812_v40  ;;  %v3881_v43 = vmax.f32 %v3411_v23, %v3763_v14  ;;  %v3883_v19 = vmax.f32 %v3347_v33, %v3827_v18  ;;  %v3882_v29 = vmax.f32 %v3379_v22, %v3731_v16  ;;  %v21242_v57 = vld [vmem:[#allocation65_spill] sm:$0xff]  ;;  %v21245_v33 = vld [vmem:[#allocation124_spill] sm:$0xff]  ;;  %v21246_v16 = vld [vmem:[#allocation78_spill] sm:$0xff] }
 0x45c   :  { %v8845_v34 = vunpack.i.l.bf16 %v15812_v40  ;;  %v8856_v3 = vunpack.i.h.bf16 %v8854_v2  ;;  %v8855_v9 = vunpack.i.l.bf16 %v8854_v2  ;;  %v8841_v53 = vunpack.i.h.bf16 %v8839_v45  ;;  %v21244_v40 = vld [vmem:[#allocation167_spill] sm:$0xff]  ;;  %v21253_v23 = vld [vmem:[#allocation61_spill] sm:$0xff] }
 0x45d   :  { %v8840_v30 = vunpack.i.l.bf16 %v8839_v45  ;;  %v4009_v36 = vmax.f32 %v21240_v28, %v3881_v43  ;;  %v4011_v25 = vmax.f32 %v21241_v13, %v3883_v19  ;;  %v4010_v6 = vmax.f32 %v21242_v57, %v3882_v29  ;;  %v15889_v18 = vpop.permute.xlu1 %8868  ;;  %v21247_v45 = vld [vmem:[#allocation158_spill] sm:$0xff] }
 0x45e   :  { %9133 = vrot.lane.b32.xlu0 %v9132_v20, %s9453_s1  ;;  %v15879_v32 = vmax.f32 %v21243_v58, %v2903_v7  ;;  %v4008_v2 = vmax.f32 %v21244_v40, %v3880_v8  ;;  %v15887_v22 = vmax.f32 %v21245_v33, %v2905_v63  ;;  %v8849_v14 = vpop.permute.xlu0 %8848  ;;  %v9167_v58 = vpack.i.bf16 %v21246_v16, %v15841_v51 }
 0x45f   :  { %9148 = vrot.lane.b32.xlu1 %v15816_v42, %s9453_s1  ;;  %4271 = vmatprep.mubr.f32.mxu0 %v4009_v36  ;;  %v3380_v7 = vsel %vm2314_vm9, %v8841_v53, %v8845_v34  ;;  %v21248_v43 = vunpack.i.h.bf16 %v21247_v45  ;;  %v8781_v63 = vunpack.i.h.bf16 %v15630_v21  ;;  %v8851_v8 = vunpack.i.h.bf16 %v8849_v14 }
 0x460   :  { %4496 = vmatprep.mubr.f32.mxu1 %v4011_v25  ;;  %v8850_v29 = vunpack.i.l.bf16 %v8849_v14  ;;  %4272 = vmatmul.mubr.f32.gmra.mxu0 %v4008_v2  ;;  %v3412_v28 = vsel %vm2314_vm9, %v8840_v30, %v8841_v53  ;;  %v3348_v36 = vsel %vm2314_vm9, %v8845_v34, %v8846_v17  ;;  %v3444_v13 = vsel %vm2314_vm9, %v8846_v17, %v8840_v30  ;;  %v21249_v34 = vld [vmem:[#allocation154_spill] sm:$0xff] }
 0x461   :  { %v15899_v19 = vsel %vm2314_vm9, %v21248_v43, %v8770_v27  ;;  %4497 = vmatmul.mubr.f32.gmra.mxu1 %v4010_v6  ;;  %v3732_v25 = vsel %vm2699_vm10, %v8855_v9, %v8856_v3  ;;  %v3764_v21 = vsel %vm2699_vm10, %v8851_v8, %v8855_v9  ;;  %v21250_v57 = vunpack.i.l.bf16 %v21249_v34  ;;  %v8879_v40 = vpop.permute.xlu1 %8878 }
 0x462   :  { %9143 = vrot.lane.b32.xlu0 %v9132_v20, %s9454_s2  ;;  %v3828_v6 = vsel %vm2699_vm10, %v8856_v3, %v8850_v29  ;;  %v3796_v20 = vsel %vm2699_vm10, %v8850_v29, %v8851_v8  ;;  %v3886_v53 = vmax.f32 %v3380_v7, %v3732_v25  ;;  %v8864_v17 = vpop.permute.xlu0 %8863  ;;  %v3885_v2 = vmax.f32 %v3412_v28, %v3764_v21  ;;  %v21251_v7 = vld [vmem:[#allocation201_spill] sm:$0xff] }
 0x463   :  { %9158 = vrot.lane.b32.xlu1 %v15816_v42, %s9454_s2  ;;  %v2431_v30 = vsel %vm2314_vm9, %v8770_v27, %v21250_v57  ;;  %v3887_v33 = vmax.f32 %v3348_v36, %v3828_v6  ;;  %v3884_v42 = vmax.f32 %v3444_v13, %v3796_v20  ;;  %v8866_v14 = vunpack.i.h.bf16 %v8864_v17  ;;  %v21252_v29 = vld [vmem:[#allocation137_spill] sm:$0xff]  ;;  %v21254_v57 = vld [vmem:[#allocation18_spill] sm:$0xff]  ;;  %v21257_v6 = vld [vmem:[#allocation11_spill] sm:$0xff] }
 0x464   :  { %v8865_v45 = vunpack.i.l.bf16 %v8864_v17  ;;  %v8881_v9 = vunpack.i.h.bf16 %v8879_v40  ;;  %v8880_v43 = vunpack.i.l.bf16 %v8879_v40  ;;  %v8870_v3 = vunpack.i.l.bf16 %v15889_v18  ;;  %v21256_v13 = vld [vmem:[#allocation145_spill] sm:$0xff] }
 0x465   :  { %v4013_v8 = vmax.f32 %v21251_v7, %v3885_v2  ;;  %v4015_v25 = vmax.f32 %v21252_v29, %v3887_v33  ;;  %v4012_v27 = vmax.f32 %v21253_v23, %v3884_v42  ;;  %v2908_v51 = vmax.f32 %v2431_v30, %v21254_v57  ;;  %v15939_v2 = vpop.permute.xlu1 %8888  ;;  %v21258_v30 = vld [vmem:[#allocation8_spill] sm:$0xff]  ;;  %v21260_v7 = vld [vmem:[#allocation147_spill] sm:$0xff] }
 0x466   :  { %9153 = vrot.lane.b32.xlu0 %v15837_v61, %s9453_s1  ;;  %v21255_v28 = vunpack.i.h.bf16 %v21249_v34  ;;  %v4014_v21 = vmax.f32 %v21256_v13, %v3886_v53  ;;  %v2911_v20 = vmax.f32 %v15899_v19, %v21257_v6  ;;  %v8861_v17 = vunpack.i.h.bf16 %v15871_v46  ;;  %v8874_v40 = vpop.permute.xlu0 %8873 }
 0x467   :  { %9168 = vrot.lane.b32.xlu1 %v9167_v58, %s9453_s1  ;;  %4276 = vmatprep.mubr.f32.mxu0 %v4013_v8  ;;  %v3381_v23 = vsel %vm2314_vm9, %v8865_v45, %v8866_v14  ;;  %v3733_v34 = vsel %vm2699_vm10, %v8880_v43, %v8881_v9  ;;  %v21259_v33 = vunpack.i.l.bf16 %v21258_v30  ;;  %v8876_v42 = vunpack.i.h.bf16 %v8874_v40  ;;  %v21265_v30 = vld [vmem:[#allocation203_spill] sm:$0xff] }
 0x468   :  { %v2400_v36 = vsel %vm2314_vm9, %v21255_v28, %v8781_v63  ;;  %4501 = vmatprep.mubr.f32.mxu1 %v4015_v25  ;;  %v8875_v19 = vunpack.i.l.bf16 %v8874_v40  ;;  %4277 = vmatmul.mubr.f32.gmra.mxu0 %v4012_v27  ;;  %v9172_v29 = vpack.i.bf16 %v15879_v32, %v21260_v7  ;;  %v3413_v25 = vsel %vm2314_vm9, %v8861_v17, %v8865_v45 }
 0x469   :  { %v2368_v53 = vsel %vm2314_vm9, %v8781_v63, %v21259_v33  ;;  %4502 = vmatmul.mubr.f32.gmra.mxu1 %v4014_v21  ;;  %v2913_v8 = vmax.f32 %v2400_v36, %v15435_v54  ;;  %v3349_v57 = vsel %vm2314_vm9, %v8866_v14, %v8870_v3  ;;  %v3445_v63 = vsel %vm2314_vm9, %v8870_v3, %v8861_v17  ;;  %v15970_v14 = vpop.permute.xlu1 %8898 }
 0x46a   :  { %9163 = vrot.lane.b32.xlu0 %v15837_v61, %s9454_s2  ;;  %v3765_v27 = vsel %vm2699_vm10, %v8876_v42, %v8880_v43  ;;  %v3829_v54 = vsel %vm2699_vm10, %v8881_v9, %v8875_v19  ;;  %v3797_v61 = vsel %vm2699_vm10, %v8875_v19, %v8876_v42  ;;  %v3890_v28 = vmax.f32 %v3381_v23, %v3733_v34  ;;  %v15968_v36 = vpop.permute.xlu0 %8883  ;;  %v21262_v43 = vld [vmem:[#allocation172_spill] sm:$0xff]  ;;  %v21263_v9 = vld [vmem:[#allocation214_spill] sm:$0xff] }
 0x46b   :  { %9178 = vrot.lane.b32.xlu1 %v9167_v58, %s9454_s2  ;;  %v8815_v45 = vunpack.i.l.bf16 %v15770_v49  ;;  %v3889_v13 = vmax.f32 %v3413_v25, %v3765_v27  ;;  %v3891_v3 = vmax.f32 %v3349_v57, %v3829_v54  ;;  %v3888_v21 = vmax.f32 %v3445_v63, %v3797_v61  ;;  %v21264_v23 = vld [vmem:[#allocation150_spill] sm:$0xff]  ;;  %v21270_v57 = vld [vmem:[#allocation141_spill] sm:$0xff]  ;;  %v21272_v27 = vld [vmem:[#allocation204_spill] sm:$0xff] }
 0x46c   :  { %v21261_v58 = vmax.f32 %v15847_v12, %v15218_v35  ;;  %v15979_v17 = vmax.f32 %v21263_v9, %v2908_v51  ;;  %v8826_v40 = vunpack.i.h.bf16 %v15810_v4  ;;  %v9187_v49 = vpack.i.bf16 %v15887_v22, %v21264_v23  ;;  %v21266_v42 = vld [vmem:[#allocation142_spill] sm:$0xff]  ;;  %v21278_v9 = vld [vmem:[#allocation105_spill] sm:$0xff] }
 0x46d   :  { %v2914_v34 = vmax.f32 %v2368_v53, %v15422_v37  ;;  %v4017_v33 = vmax.f32 %v21265_v30, %v3889_v13  ;;  %v4019_v19 = vmax.f32 %v21266_v42, %v3891_v3  ;;  %v21267_v35 = vld [vmem:[#allocation94_spill] sm:$0xff]  ;;  %v21268_v25 = vunpack.i.l.bf16 %v15179_v26  ;;  %v21271_v37 = vld [vmem:[#allocation76_spill] sm:$0xff] }
 0x46e   :  { %v15976_v6 = vmax.f32 %v21262_v43, %v21261_v58  ;;  %9173 = vrot.lane.b32.xlu0 %v9172_v29, %s9453_s1  ;;  %v4016_v12 = vmax.f32 %v21267_v35, %v3888_v21  ;;  %v21269_v51 = vunpack.i.h.bf16 %v15057_v47  ;;  %v15998_v63 = vmax.f32 %v21270_v57, %v2911_v20  ;;  %v16014_v3 = vpop.permute.xlu0 %8893 }
 0x46f   :  { %v16001_v53 = vmax.f32 %v21271_v37, %v2913_v8  ;;  %9188 = vrot.lane.b32.xlu1 %v9187_v49, %s9453_s1  ;;  %v4018_v54 = vmax.f32 %v21272_v27, %v3890_v28  ;;  %v8646_v61 = vunpack.i.h.bf16 %v15104_v56  ;;  %v21273_v26 = vunpack.i.h.bf16 %v14907_v31  ;;  %v8909_v8 = vpop.permute.xlu1 %8908  ;;  %4281 = vmatprep.mubr.f32.mxu0 %v4017_v33  ;;  %v21280_v33 = vld [vmem:[#allocation216_spill] sm:$0xff] }
 0x470   :  { %v15995_v4 = vsel %vm2699_vm10, %v21269_v51, %v21268_v25  ;;  %v21274_v13 = vunpack.i.l.bf16 %v15055_v38  ;;  %4506 = vmatprep.mubr.f32.mxu1 %v4019_v19  ;;  %v21275_v21 = vunpack.i.l.bf16 %v14983_v5  ;;  %v21276_v31 = vunpack.i.h.bf16 %v15055_v38  ;;  %4282 = vmatmul.mubr.f32.gmra.mxu0 %v4016_v12  ;;  %v21281_v38 = vld [vmem:[#allocation156_spill] sm:$0xff]  ;;  %v21283_v25 = vld [vmem:[#allocation89_spill] sm:$0xff] }
 0x471   :  { %v2337_v47 = vsel %vm2314_vm9, %v21273_v26, %v8815_v45  ;;  %v8860_v43 = vunpack.i.l.bf16 %v15871_v46  ;;  %4507 = vmatmul.mubr.f32.gmra.mxu1 %v4018_v54  ;;  %v16032_v5 = vmax.f32 %v21280_v33, %v2914_v34  ;;  %v9207_v42 = vpack.i.bf16 %v21281_v38, %v15979_v17  ;;  %v21285_v54 = vld [vmem:[#allocation212_spill] sm:$0xff] }
 0x472   :  { %v2433_v20 = vsel %vm2314_vm9, %v8815_v45, %v21274_v13  ;;  %v2370_v28 = vsel %vm2314_vm9, %v8826_v40, %v21275_v21  ;;  %v2402_v58 = vsel %vm2314_vm9, %v21276_v31, %v8826_v40  ;;  %v21277_v45 = vmax.f32 %v15644_v44, %v15727_v52  ;;  %9183 = vrot.lane.b32.xlu0 %v9172_v29, %s9454_s2  ;;  %v21282_v40 = vld [vmem:[#allocation25_spill] sm:$0xff]  ;;  %v8904_v34 = vpop.permute.xlu0 %8903 }
 0x473   :  { %v9192_v19 = vpack.i.bf16 %v21282_v40, %v15976_v6  ;;  %v2916_v46 = vmax.f32 %v2433_v20, %v15414_v55  ;;  %v2919_v35 = vmax.f32 %v2337_v47, %v15519_v41  ;;  %9198 = vrot.lane.b32.xlu1 %v9187_v49, %s9454_s2  ;;  %v2921_v44 = vmax.f32 %v2402_v58, %v15627_v39  ;;  %v16044_v12 = vpop.permute.xlu1 %8918  ;;  %v21287_v47 = vld [vmem:[#allocation130_spill] sm:$0xff]  ;;  %v21289_v21 = vld [vmem:[#allocation129_spill] sm:$0xff] }
 0x474   :  { %v16029_v30 = vmax.f32 %v21278_v9, %v21277_v45  ;;  %v2922_v52 = vmax.f32 %v2370_v28, %v15552_v1  ;;  %v16048_v29 = vpack.i.bf16 %v16001_v53, %v15406_v15  ;;  %v16052_v51 = vpack.i.bf16 %v15998_v63, %v21283_v25 }
 0x475   :  { %v21284_v55 = vunpack.i.l.bf16 %v15104_v56  ;;  %v8901_v39 = vunpack.i.h.bf16 %v15970_v14  ;;  %v8906_v49 = vunpack.i.h.bf16 %v8904_v34  ;;  %v8900_v1 = vunpack.i.l.bf16 %v15970_v14  ;;  %v21291_v14 = vld [vmem:[#allocation138_spill] sm:$0xff] }
 0x476   :  { %21279 = vst [vmem:[#allocation92_spill] sm:$0xff] %v16029_v30  ;;  %v8911_v57 = vunpack.i.h.bf16 %v8909_v8  ;;  %v8910_v37 = vunpack.i.l.bf16 %v8909_v8  ;;  %v8905_v27 = vunpack.i.l.bf16 %v8904_v34  ;;  %9193 = vrot.lane.b32.xlu0 %v9192_v19, %s9453_s1  ;;  %v16062_v26 = vmax.f32 %v21285_v54, %v2916_v46  ;;  %v8914_v31 = vpop.permute.xlu0 %8913 }
 0x477   :  { %v2435_v41 = vsel %vm2314_vm9, %v8860_v43, %v21284_v55  ;;  %v16065_v13 = vmax.f32 %v21287_v47, %v2919_v35  ;;  %9208 = vrot.lane.b32.xlu1 %v9207_v42, %s9453_s1  ;;  %v16070_v20 = vpack.i.bf16 %v15503_v24, %v16032_v5  ;;  %v16073_v28 = vmax.f32 %v21289_v21, %v2921_v44  ;;  %v16078_v58 = vpop.permute.xlu1 %8928  ;;  %v21294_v21 = vld [vmem:[#allocation185_spill] sm:$0xff] }
 0x478   :  { %21286 = vst [vmem:[#allocation169_spill] sm:$0xff] %v16062_v26  ;;  %v16076_v8 = vmax.f32 %v21291_v14, %v2922_v52  ;;  %v3446_v45 = vsel %vm2314_vm9, %v8906_v49, %v8900_v1  ;;  %v21293_v9 = vunpack.i.h.bf16 %v15144_v59  ;;  %v2924_v46 = vmax.f32 %v2435_v41, %v15784_v60 }
 0x479   :  { %21288 = vst [vmem:[#allocation97_spill] sm:$0xff] %v16065_v13  ;;  %21290 = vst [vmem:[#allocation30_spill] sm:$0xff] %v16073_v28  ;;  %v8916_v35 = vunpack.i.h.bf16 %v8914_v31  ;;  %v8915_v34 = vunpack.i.l.bf16 %v8914_v31  ;;  %v3382_v44 = vsel %vm2314_vm9, %v8901_v39, %v8905_v27  ;;  %v3414_v52 = vsel %vm2314_vm9, %v8900_v1, %v8901_v39 }
 0x47a   :  { %21292 = vst [vmem:[#allocation195_spill] sm:$0xff] %v16076_v8  ;;  %v2339_v33 = vsel %vm2314_vm9, %v21293_v9, %v8860_v43  ;;  %9203 = vrot.lane.b32.xlu0 %v9192_v19, %s9454_s2  ;;  %v3350_v55 = vsel %vm2314_vm9, %v8905_v27, %v8906_v49  ;;  %v3798_v59 = vsel %vm2699_vm10, %v8910_v37, %v8911_v57  ;;  %v16104_v54 = vpop.permute.xlu0 %8923 }
 0x47b   :  { %v3734_v43 = vsel %vm2699_vm10, %v8915_v34, %v8916_v35  ;;  %9218 = vrot.lane.b32.xlu1 %v9207_v42, %s9454_s2  ;;  %v3766_v60 = vsel %vm2699_vm10, %v8911_v57, %v8915_v34  ;;  %v3830_v19 = vsel %vm2699_vm10, %v8916_v35, %v8910_v37  ;;  %v3892_v41 = vmax.f32 %v3446_v45, %v3798_v59  ;;  %v16106_v49 = vpop.permute.xlu1 %8938  ;;  %v21297_v45 = vld [vmem:[#allocation48_spill] sm:$0xff] }
 0x47c   :  { %v2927_v39 = vmax.f32 %v2339_v33, %v15995_v4  ;;  %v3894_v1 = vmax.f32 %v3382_v44, %v3734_v43  ;;  %v3893_v27 = vmax.f32 %v3414_v52, %v3766_v60  ;;  %v3895_v47 = vmax.f32 %v3350_v55, %v3830_v19  ;;  %v21296_v4 = vld [vmem:[#allocation126_spill] sm:$0xff]  ;;  %v21298_v33 = vld [vmem:[#allocation53_spill] sm:$0xff]  ;;  %v21300_v55 = vld [vmem:[#allocation180_spill] sm:$0xff] }
 0x47d   :  { %v16109_v14 = vmax.f32 %v21294_v21, %v2924_v46  ;;  %v8871_v42 = vunpack.i.h.bf16 %v15889_v18  ;;  %v16114_v57 = vpack.i.bf16 %v15619_v50, %v16062_v26  ;;  %v8891_v37 = vunpack.i.h.bf16 %v15939_v2  ;;  %v21299_v44 = vld [vmem:[#allocation174_spill] sm:$0xff]  ;;  %v21303_v21 = vld [vmem:[#allocation157_spill] sm:$0xff] }
 0x47e   :  { %9213 = vrot.lane.b32.xlu0 %v16052_v51, %s9453_s1  ;;  %v4021_v31 = vmax.f32 %v21296_v4, %v3893_v27  ;;  %v4023_v9 = vmax.f32 %v21297_v45, %v3895_v47  ;;  %v4022_v35 = vmax.f32 %v21298_v33, %v3894_v1  ;;  %v8890_v46 = vunpack.i.l.bf16 %v15939_v2  ;;  %v16133_v19 = vpop.permute.xlu0 %8933  ;;  %v21308_v50 = vld [vmem:[#allocation106_spill] sm:$0xff] }
 0x47f   :  { %21295 = vst [vmem:[#allocation34_spill] sm:$0xff] %v16109_v14  ;;  %v8886_v34 = vunpack.i.h.bf16 %v15968_v36  ;;  %v8885_v18 = vunpack.i.l.bf16 %v15968_v36  ;;  %9228 = vrot.lane.b32.xlu1 %v16048_v29, %s9453_s1  ;;  %v4020_v52 = vmax.f32 %v21299_v44, %v3892_v41  ;;  %v16129_v59 = vmax.f32 %v21300_v55, %v2927_v39  ;;  %v8949_v1 = vpop.permute.xlu1 %8948  ;;  %v21301_v36 = vld [vmem:[#allocation15_spill] sm:$0xff]  ;;  %v21302_v39 = vld [vmem:[#allocation12_spill] sm:$0xff] }
 0x480   :  { %v8896_v43 = vunpack.i.h.bf16 %v16014_v3  ;;  %v8895_v60 = vunpack.i.l.bf16 %v16014_v3  ;;  %4286 = vmatprep.mubr.f32.mxu0 %v4021_v31  ;;  %4511 = vmatprep.mubr.f32.mxu1 %v4023_v9  ;;  %v16137_v2 = vpack.i.bf16 %v16073_v28, %v15635_v48  ;;  %v2404_v41 = vsel %vm2314_vm9, %v8646_v61, %v8871_v42 }
 0x481   :  { %4287 = vmatmul.mubr.f32.gmra.mxu0 %v4020_v52  ;;  %4512 = vmatmul.mubr.f32.gmra.mxu1 %v4022_v35  ;;  %v16146_v3 = vpack.i.bf16 %v16065_v13, %v21302_v39  ;;  %v16152_v47 = vpack.i.bf16 %v16029_v30, %v16109_v14  ;;  %v16156_v4 = vpack.i.bf16 %v21303_v21, %v16076_v8  ;;  %v8926_v55 = vunpack.i.h.bf16 %v16104_v54  ;;  %v21306_v39 = vld [vmem:[#allocation184_spill] sm:$0xff]  ;;  %v21307_v13 = vld [vmem:[#allocation193_spill] sm:$0xff] }
 0x482   :  { %9223 = vrot.lane.b32.xlu0 %v16052_v51, %s9454_s2  ;;  %v2789_v31 = vsel %vm2699_vm10, %v8890_v46, %v8891_v37  ;;  %v2340_v45 = vsel %vm2314_vm9, %v8885_v18, %v8886_v34  ;;  %v2436_v9 = vsel %vm2314_vm9, %v8886_v34, %v8646_v61  ;;  %v2372_v51 = vsel %vm2314_vm9, %v8871_v42, %v8885_v18  ;;  %v16176_v52 = vpop.permute.xlu0 %8943 }
 0x483   :  { %9238 = vrot.lane.b32.xlu1 %v16048_v29, %s9454_s2  ;;  %v2725_v33 = vsel %vm2699_vm10, %v8895_v60, %v8896_v43  ;;  %v2757_v35 = vsel %vm2699_vm10, %v8891_v37, %v8895_v60  ;;  %v2821_v44 = vsel %vm2699_vm10, %v8896_v43, %v8890_v46  ;;  %v16178_v56 = vpop.permute.xlu1 %8958  ;;  %v8941_v29 = vunpack.i.h.bf16 %v16106_v49 }
 0x484   :  { %v8940_v34 = vunpack.i.l.bf16 %v16106_v49  ;;  %v8945_v42 = vunpack.i.l.bf16 %v16176_v52  ;;  %v2928_v18 = vmax.f32 %v2436_v9, %v2789_v31  ;;  %v8951_v27 = vunpack.i.h.bf16 %v8949_v1 }
 0x485   :  { %v8950_v37 = vunpack.i.l.bf16 %v8949_v1  ;;  %v2929_v46 = vmax.f32 %v2404_v41, %v2757_v35  ;;  %v2930_v43 = vmax.f32 %v2372_v51, %v2725_v33  ;;  %v2931_v60 = vmax.f32 %v2340_v45, %v2821_v44 }
 0x486   :  { %9233 = vrot.lane.b32.xlu0 %v16070_v20, %s9453_s1  ;;  %v8921_v14 = vunpack.i.h.bf16 %v16044_v12  ;;  %v8920_v49 = vunpack.i.l.bf16 %v16044_v12  ;;  %v8931_v61 = vunpack.i.h.bf16 %v16078_v58  ;;  %v8930_v31 = vunpack.i.l.bf16 %v16078_v58  ;;  %v8954_v9 = vpop.permute.xlu0 %8953 }
 0x487   :  { %9248 = vrot.lane.b32.xlu1 %v16114_v57, %s9453_s1  ;;  %v16193_v30 = vpop.permute.xlu1 %8968  ;;  %v3447_v1 = vsel %vm2314_vm9, %v8945_v42, %v8926_v55  ;;  %v21304_v41 = vunpack.i.l.bf16 %v21301_v36  ;;  %v21305_v45 = vunpack.i.l.bf16 %v16104_v54  ;;  %v3383_v12 = vsel %vm2314_vm9, %v8940_v34, %v8941_v29 }
 0x488   :  { %v8956_v33 = vunpack.i.h.bf16 %v8954_v9  ;;  %v8955_v35 = vunpack.i.l.bf16 %v8954_v9  ;;  %v8936_v58 = vunpack.i.h.bf16 %v16133_v19  ;;  %v3415_v44 = vsel %vm2314_vm9, %v8926_v55, %v8940_v34 }
 0x489   :  { %v2437_v51 = vsel %vm2314_vm9, %v21305_v45, %v21304_v41  ;;  %v3351_v8 = vsel %vm2314_vm9, %v8941_v29, %v8945_v42  ;;  %v3799_v48 = vsel %vm2699_vm10, %v8950_v37, %v8951_v27  ;;  %v8935_v34 = vunpack.i.l.bf16 %v16133_v19  ;;  %v21309_v19 = vld [vmem:[#allocation14_spill] sm:$0xff] }
 0x48a   :  { %9243 = vrot.lane.b32.xlu0 %v16070_v20, %s9454_s2  ;;  %v3735_v41 = vsel %vm2699_vm10, %v8955_v35, %v8956_v33  ;;  %v3767_v9 = vsel %vm2699_vm10, %v8951_v27, %v8955_v35  ;;  %v3831_v20 = vsel %vm2699_vm10, %v8956_v33, %v8950_v37  ;;  %v3896_v45 = vmax.f32 %v3447_v1, %v3799_v48  ;;  %v16223_v29 = vpop.permute.xlu0 %8963 }
 0x48b   :  { %9258 = vrot.lane.b32.xlu1 %v16114_v57, %s9454_s2  ;;  %v3898_v55 = vmax.f32 %v3383_v12, %v3735_v41  ;;  %v8979_v42 = vpop.permute.xlu1 %8978  ;;  %v3897_v21 = vmax.f32 %v3415_v44, %v3767_v9  ;;  %v3899_v28 = vmax.f32 %v3351_v8, %v3831_v20  ;;  %v16226_v26 = vmax.f32 %v21306_v39, %v2928_v18  ;;  %v21310_v8 = vld [vmem:[#allocation209_spill] sm:$0xff]  ;;  %v21313_v12 = vld [vmem:[#allocation51_spill] sm:$0xff] }
 0x48c   :  { %v16229_v57 = vmax.f32 %v21307_v13, %v2929_v46  ;;  %v16232_v27 = vmax.f32 %v21308_v50, %v2930_v43  ;;  %v16236_v48 = vpack.i.bf16 %v16129_v59, %v15776_v11  ;;  %v16239_v37 = vmax.f32 %v21309_v19, %v2931_v60  ;;  %v21311_v13 = vld [vmem:[#allocation69_spill] sm:$0xff]  ;;  %v21312_v43 = vld [vmem:[#allocation160_spill] sm:$0xff] }
 0x48d   :  { %v2790_v1 = vsel %vm2699_vm10, %v8930_v31, %v8931_v61  ;;  %v4025_v39 = vmax.f32 %v21310_v8, %v3897_v21  ;;  %v4027_v18 = vmax.f32 %v21311_v13, %v3899_v28  ;;  %v2373_v50 = vsel %vm2314_vm9, %v8920_v49, %v8921_v14 }
 0x48e   :  { %9253 = vrot.lane.b32.xlu0 %v16146_v3, %s9453_s1  ;;  %v2932_v46 = vmax.f32 %v2437_v51, %v2790_v1  ;;  %v4024_v60 = vmax.f32 %v21312_v43, %v3896_v45  ;;  %v4026_v33 = vmax.f32 %v21313_v12, %v3898_v55  ;;  %v8651_v35 = vunpack.i.h.bf16 %v21301_v36  ;;  %v8974_v41 = vpop.permute.xlu0 %8973 }
 0x48f   :  { %9268 = vrot.lane.b32.xlu1 %v16137_v2, %s9453_s1  ;;  %v21314_v44 = vunpack.i.l.bf16 %v21301_v36  ;;  %v2726_v28 = vsel %vm2699_vm10, %v8935_v34, %v8936_v58  ;;  %v2758_v51 = vsel %vm2699_vm10, %v8931_v61, %v8935_v34  ;;  %v8989_v9 = vpop.permute.xlu1 %8988  ;;  %4291 = vmatprep.mubr.f32.mxu0 %v4025_v39  ;;  %v2822_v20 = vsel %vm2699_vm10, %v8936_v58, %v8930_v31  ;;  %v21316_v58 = vld [vmem:[#allocation99_spill] sm:$0xff] }
 0x490   :  { %4516 = vmatprep.mubr.f32.mxu1 %v4027_v18  ;;  %v8976_v45 = vunpack.i.h.bf16 %v8974_v41  ;;  %v8991_v55 = vunpack.i.h.bf16 %v8989_v9  ;;  %v8990_v19 = vunpack.i.l.bf16 %v8989_v9  ;;  %4292 = vmatmul.mubr.f32.gmra.mxu0 %v4024_v60  ;;  %v8981_v1 = vunpack.i.h.bf16 %v8979_v42 }
 0x491   :  { %v2405_v21 = vsel %vm2314_vm9, %v21314_v44, %v8920_v49  ;;  %4517 = vmatmul.mubr.f32.gmra.mxu1 %v4026_v33  ;;  %v8980_v49 = vunpack.i.l.bf16 %v8979_v42  ;;  %v8975_v8 = vunpack.i.l.bf16 %v8974_v41  ;;  %v16268_v61 = vpack.i.bf16 %v16229_v57, %v16226_v26 }
 0x492   :  { %9263 = vrot.lane.b32.xlu0 %v16146_v3, %s9454_s2  ;;  %v21315_v34 = vunpack.i.l.bf16 %v16104_v54  ;;  %v16275_v39 = vmax.f32 %v21316_v58, %v2932_v46  ;;  %v2933_v13 = vmax.f32 %v2405_v21, %v2758_v51  ;;  %v2934_v18 = vmax.f32 %v2373_v50, %v2726_v28  ;;  %v8984_v60 = vpop.permute.xlu0 %8983 }
 0x493   :  { %9278 = vrot.lane.b32.xlu1 %v16137_v2, %s9454_s2  ;;  %v8946_v3 = vunpack.i.h.bf16 %v16176_v52  ;;  %v3384_v43 = vsel %vm2314_vm9, %v8976_v45, %v8980_v49  ;;  %v3736_v54 = vsel %vm2699_vm10, %v8990_v19, %v8991_v55  ;;  %v8965_v46 = vunpack.i.l.bf16 %v16223_v29  ;;  %v16286_v50 = vpop.permute.xlu1 %8998 }
 0x494   :  { %v2341_v31 = vsel %vm2314_vm9, %v8921_v14, %v21315_v34  ;;  %21317 = vst [vmem:[#allocation98_spill] sm:$0xff] %v16275_v39  ;;  %v8966_v14 = vunpack.i.h.bf16 %v16223_v29  ;;  %v8986_v12 = vunpack.i.h.bf16 %v8984_v60  ;;  %v8985_v33 = vunpack.i.l.bf16 %v8984_v60 }
 0x495   :  { %v2935_v42 = vmax.f32 %v2341_v31, %v2822_v20  ;;  %v8961_v2 = vunpack.i.h.bf16 %v16178_v56  ;;  %v3416_v52 = vsel %vm2314_vm9, %v8975_v8, %v8976_v45  ;;  %v3352_v44 = vsel %vm2314_vm9, %v8980_v49, %v8981_v1 }
 0x496   :  { %9273 = vrot.lane.b32.xlu0 %v16156_v4, %s9453_s1  ;;  %v3448_v21 = vsel %vm2314_vm9, %v8981_v1, %v8975_v8  ;;  %v3902_v28 = vmax.f32 %v3384_v43, %v3736_v54  ;;  %v3768_v29 = vsel %vm2699_vm10, %v8986_v12, %v8990_v19  ;;  %v3832_v51 = vsel %vm2699_vm10, %v8991_v55, %v8985_v33  ;;  %v16306_v20 = vpop.permute.xlu0 %8993  ;;  %v21318_v8 = vld [vmem:[#allocation178_spill] sm:$0xff] }
 0x497   :  { %9288 = vrot.lane.b32.xlu1 %v16152_v47, %s9453_s1  ;;  %v3800_v41 = vsel %vm2699_vm10, %v8985_v33, %v8986_v12  ;;  %v8970_v9 = vunpack.i.l.bf16 %v16193_v30  ;;  %v3901_v45 = vmax.f32 %v3416_v52, %v3768_v29  ;;  %v3903_v49 = vmax.f32 %v3352_v44, %v3832_v51  ;;  %v16315_v58 = vpop.permute.xlu1 %9008  ;;  %v21319_v43 = vld [vmem:[#allocation26_spill] sm:$0xff]  ;;  %v21324_v44 = vld [vmem:[#allocation87_spill] sm:$0xff] }
 0x498   :  { %v3900_v1 = vmax.f32 %v3448_v21, %v3800_v41  ;;  %v16309_v34 = vmax.f32 %v21318_v8, %v2933_v13  ;;  %v8960_v31 = vunpack.i.l.bf16 %v16178_v56  ;;  %v8971_v19 = vunpack.i.h.bf16 %v16193_v30  ;;  %v21321_v13 = vld [vmem:[#allocation64_spill] sm:$0xff]  ;;  %v21322_v33 = vld [vmem:[#allocation66_spill] sm:$0xff] }
 0x499   :  { %v2791_v55 = vsel %vm2699_vm10, %v8965_v46, %v8966_v14  ;;  %v16318_v54 = vmax.f32 %v21319_v43, %v2934_v18  ;;  %v2759_v60 = vsel %vm2699_vm10, %v8966_v14, %v8970_v9  ;;  %v4029_v12 = vmax.f32 %v21321_v13, %v3901_v45  ;;  %v21323_v18 = vld [vmem:[#allocation74_spill] sm:$0xff] }
 0x49a   :  { %9283 = vrot.lane.b32.xlu0 %v16156_v4, %s9454_s2  ;;  %v4031_v56 = vmax.f32 %v21322_v33, %v3903_v49  ;;  %v2438_v30 = vsel %vm2314_vm9, %v8961_v2, %v8651_v35  ;;  %v2823_v52 = vsel %vm2699_vm10, %v8971_v19, %v8965_v46  ;;  %v4028_v14 = vmax.f32 %v21323_v18, %v3900_v1  ;;  %v21325_v4 = vld [vmem:[#allocation24_spill] sm:$0xff]  ;;  %v16343_v45 = vpop.permute.xlu0 %9003  ;;  %v21327_v46 = vld [vmem:[#allocation115_spill] sm:$0xff] }
 0x49b   :  { %21320 = vst [vmem:[#allocation123_spill] sm:$0xff] %v16318_v54  ;;  %9298 = vrot.lane.b32.xlu1 %v16152_v47, %s9454_s2  ;;  %v4030_v21 = vmax.f32 %v21324_v44, %v3902_v28  ;;  %v16337_v29 = vmax.f32 %v21325_v4, %v2935_v42  ;;  %v2406_v51 = vsel %vm2314_vm9, %v8651_v35, %v8946_v3  ;;  %v16352_v1 = vpop.permute.xlu1 %9018  ;;  %v8655_v36 = vunpack.i.l.bf16 %v21327_v46 }
 0x49c   :  { %v2936_v41 = vmax.f32 %v2438_v30, %v2791_v55  ;;  %4296 = vmatprep.mubr.f32.mxu0 %v4029_v12  ;;  %4521 = vmatprep.mubr.f32.mxu1 %v4031_v56  ;;  %v2342_v47 = vsel %vm2314_vm9, %v8960_v31, %v8961_v2  ;;  %v16350_v28 = vsel %vm2699_vm10, %v8970_v9, %v8971_v19  ;;  %v21328_v55 = vld [vmem:[#allocation179_spill] sm:$0xff]  ;;  %v9006_v12 = vunpack.i.h.bf16 %v16343_v45 }
 0x49d   :  { %21326 = vst [vmem:[#allocation196_spill] sm:$0xff] %v16337_v29  ;;  %v2937_v42 = vmax.f32 %v2406_v51, %v2759_v60  ;;  %4297 = vmatmul.mubr.f32.gmra.mxu0 %v4028_v14  ;;  %4522 = vmatmul.mubr.f32.gmra.mxu1 %v4030_v21  ;;  %v2939_v35 = vmax.f32 %v2342_v47, %v2823_v52  ;;  %v21330_v52 = vld [vmem:[#allocation187_spill] sm:$0xff]  ;;  %v9005_v14 = vunpack.i.l.bf16 %v16343_v45  ;;  %v9020_v44 = vunpack.i.l.bf16 %v16352_v1 }
 0x49e   :  { %9293 = vrot.lane.b32.xlu0 %v16236_v48, %s9453_s1  ;;  %v16359_v8 = vsel %vm2314_vm9, %v8946_v3, %v8960_v31  ;;  %v9327_v2 = vpack.i.bf16 %v16309_v34, %v16275_v39  ;;  %v9312_v9 = vpack.i.bf16 %v16239_v37, %v16232_v27  ;;  %v16370_v43 = vmax.f32 %v21328_v55, %v2936_v41  ;;  %v9014_v60 = vpop.permute.xlu0 %9013  ;;  %v21329_v31 = vld [vmem:[#allocation177_spill] sm:$0xff] }
 0x49f   :  { %9308 = vrot.lane.b32.xlu1 %v16268_v61, %s9453_s1  ;;  %v2938_v19 = vmax.f32 %v16359_v8, %v16350_v28  ;;  %v16374_v3 = vpack.i.bf16 %v16337_v29, %v16318_v54  ;;  %v16377_v13 = vmax.f32 %v21329_v31, %v2937_v42  ;;  %v9016_v33 = vunpack.i.h.bf16 %v9014_v60  ;;  %v9029_v30 = vpop.permute.xlu1 %9028 }
 0x4a0   :  { %v9015_v56 = vunpack.i.l.bf16 %v9014_v60  ;;  %v16381_v18 = vmax.f32 %v21330_v52, %v2939_v35  ;;  %v9031_v21 = vunpack.i.h.bf16 %v9029_v30  ;;  %v9001_v4 = vunpack.i.h.bf16 %v16286_v50 }
 0x4a1   :  { %v9000_v51 = vunpack.i.l.bf16 %v16286_v50  ;;  %v9010_v41 = vunpack.i.l.bf16 %v16315_v58  ;;  %v9030_v47 = vunpack.i.l.bf16 %v9029_v30  ;;  %v8996_v28 = vunpack.i.h.bf16 %v16306_v20 }
 0x4a2   :  { %9303 = vrot.lane.b32.xlu0 %v16236_v48, %s9454_s2  ;;  %v8995_v45 = vunpack.i.l.bf16 %v16306_v20  ;;  %v9011_v42 = vunpack.i.h.bf16 %v16315_v58  ;;  %v3385_v35 = vsel %vm2314_vm9, %v9015_v56, %v9016_v33  ;;  %v3417_v20 = vsel %vm2314_vm9, %v9001_v4, %v9015_v56 }
 0x4a3   :  { %9318 = vrot.lane.b32.xlu1 %v16268_v61, %s9454_s2  ;;  %v9024_v48 = vpop.permute.xlu0 %9023  ;;  %v2760_v8 = vsel %vm2699_vm10, %v9006_v12, %v9010_v41  ;;  %v3737_v50 = vsel %vm2699_vm10, %v9030_v47, %v9031_v21  ;;  %v2792_v61 = vsel %vm2699_vm10, %v9005_v14, %v9006_v12  ;;  %v3353_v58 = vsel %vm2314_vm9, %v9016_v33, %v9020_v44 }
 0x4a4   :  { %v9026_v55 = vunpack.i.h.bf16 %v9024_v48  ;;  %v9025_v60 = vunpack.i.l.bf16 %v9024_v48  ;;  %v3449_v30 = vsel %vm2314_vm9, %v9020_v44, %v9001_v4  ;;  %v3906_v52 = vmax.f32 %v3385_v35, %v3737_v50 }
 0x4a5   :  { %v16401_v31 = vpop.permute.xlu1 %9038  ;;  %v2439_v56 = vsel %vm2314_vm9, %v9000_v51, %v8655_v36  ;;  %v2375_v44 = vsel %vm2314_vm9, %v8995_v45, %v8996_v28  ;;  %v2407_v4 = vsel %vm2314_vm9, %v8655_v36, %v8995_v45  ;;  %v21333_v36 = vld [vmem:[#allocation86_spill] sm:$0xff]  ;;  %v21334_v45 = vld [vmem:[#allocation36_spill] sm:$0xff] }
 0x4a6   :  { %9313 = vrot.lane.b32.xlu0 %v9312_v9, %s9453_s1  ;;  %v3769_v48 = vsel %vm2699_vm10, %v9026_v55, %v9030_v47  ;;  %v3833_v12 = vsel %vm2699_vm10, %v9031_v21, %v9025_v60  ;;  %v3801_v49 = vsel %vm2699_vm10, %v9025_v60, %v9026_v55  ;;  %v2728_v47 = vsel %vm2699_vm10, %v9010_v41, %v9011_v42  ;;  %v21331_v60 = vld [vmem:[#allocation176_spill] sm:$0xff] }
 0x4a7   :  { %9328 = vrot.lane.b32.xlu1 %v9327_v2, %s9453_s1  ;;  %v9034_v54 = vpop.permute.xlu0 %9033  ;;  %v3905_v33 = vmax.f32 %v3417_v20, %v3769_v48  ;;  %v3907_v39 = vmax.f32 %v3353_v58, %v3833_v12  ;;  %v3904_v29 = vmax.f32 %v3449_v30, %v3801_v49  ;;  %v2824_v21 = vsel %vm2699_vm10, %v9011_v42, %v9005_v14  ;;  %v21332_v20 = vld [vmem:[#allocation171_spill] sm:$0xff]  ;;  %v21335_v14 = vld [vmem:[#allocation10_spill] sm:$0xff] }
 0x4a8   :  { %v2940_v50 = vmax.f32 %v2439_v56, %v2792_v61  ;;  %v2941_v55 = vmax.f32 %v2407_v4, %v2760_v8  ;;  %v2343_v30 = vsel %vm2314_vm9, %v8996_v28, %v9000_v51  ;;  %v4034_v48 = vmax.f32 %v21334_v45, %v3906_v52 }
 0x4a9   :  { %v16429_v35 = vpop.permute.xlu1 %9048  ;;  %v4033_v49 = vmax.f32 %v21331_v60, %v3905_v33  ;;  %v4035_v58 = vmax.f32 %v21332_v20, %v3907_v39  ;;  %v4032_v41 = vmax.f32 %v21333_v36, %v3904_v29  ;;  %v16440_v42 = vmax.f32 %v21335_v14, %v2938_v19  ;;  %v21339_v19 = vld [vmem:[#allocation102_spill] sm:$0xff]  ;;  %v21342_v60 = vld [vmem:[#allocation151_spill] sm:$0xff] }
 0x4aa   :  { %9323 = vrot.lane.b32.xlu0 %v9312_v9, %s9454_s2  ;;  %v2942_v61 = vmax.f32 %v2375_v44, %v2728_v47  ;;  %v2943_v8 = vmax.f32 %v2343_v30, %v2824_v21  ;;  %v9021_v9 = vunpack.i.h.bf16 %v16352_v1  ;;  %v9036_v39 = vunpack.i.h.bf16 %v9034_v54  ;;  %v21341_v21 = vld [vmem:[#allocation144_spill] sm:$0xff] }
 0x4ab   :  { %9338 = vrot.lane.b32.xlu1 %v9327_v2, %s9454_s2  ;;  %21336 = vst [vmem:[#allocation192_spill] sm:$0xff] %v16440_v42  ;;  %v9044_v12 = vpop.permute.xlu0 %9043  ;;  %4301 = vmatprep.mubr.f32.mxu0 %v4033_v49  ;;  %v9347_v29 = vpack.i.bf16 %v16377_v13, %v16370_v43  ;;  %v21337_v2 = vld [vmem:[#allocation22_spill] sm:$0xff]  ;;  %v16449_v28 = vmax.f32 %v21339_v19, %v2941_v55  ;;  %v9041_v52 = vunpack.i.h.bf16 %v16401_v31  ;;  %v9040_v44 = vunpack.i.l.bf16 %v16401_v31 }
 0x4ac   :  { %4526 = vmatprep.mubr.f32.mxu1 %v4035_v58  ;;  %v9045_v56 = vunpack.i.l.bf16 %v9044_v12  ;;  %4302 = vmatmul.mubr.f32.gmra.mxu0 %v4032_v41  ;;  %v16446_v51 = vmax.f32 %v21337_v2, %v2940_v50  ;;  %v9352_v1 = vpack.i.bf16 %v16381_v18, %v16440_v42  ;;  %v9035_v4 = vunpack.i.l.bf16 %v9034_v54 }
 0x4ad   :  { %v9059_v33 = vpop.permute.xlu1 %9058  ;;  %4527 = vmatmul.mubr.f32.gmra.mxu1 %v4034_v48  ;;  %21340 = vst [vmem:[#allocation197_spill] sm:$0xff] %v16449_v28  ;;  %v9046_v47 = vunpack.i.h.bf16 %v9044_v12  ;;  %v16459_v50 = vmax.f32 %v21341_v21, %v2942_v61  ;;  %v16462_v55 = vmax.f32 %v21342_v60, %v2943_v8  ;;  %v21343_v49 = vunpack.i.h.bf16 %v21327_v46 }
 0x4ae   :  { %21338 = vst [vmem:[#allocation134_spill] sm:$0xff] %v16446_v51  ;;  %9333 = vrot.lane.b32.xlu0 %v16374_v3, %s9453_s1  ;;  %v9051_v58 = vunpack.i.h.bf16 %v16429_v35  ;;  %v9050_v36 = vunpack.i.l.bf16 %v16429_v35  ;;  %v2761_v41 = vsel %vm2699_vm10, %v9041_v52, %v9045_v56  ;;  %v9061_v14 = vunpack.i.h.bf16 %v9059_v33 }
 0x4af   :  { %9348 = vrot.lane.b32.xlu1 %v9347_v29, %s9453_s1  ;;  %v2408_v20 = vsel %vm2314_vm9, %v21343_v49, %v9021_v9  ;;  %v9054_v30 = vpop.permute.xlu0 %9053  ;;  %v21344_v31 = vmov %v21343_v49  ;;  %v9060_v61 = vunpack.i.l.bf16 %v9059_v33  ;;  %v9367_v46 = vpack.i.bf16 %v16449_v28, %v16446_v51 }
 0x4b0   :  { %v2440_v54 = vsel %vm2314_vm9, %v9036_v39, %v21344_v31  ;;  %v9056_v45 = vunpack.i.h.bf16 %v9054_v30  ;;  %v9055_v8 = vunpack.i.l.bf16 %v9054_v30  ;;  %v2793_v12 = vsel %vm2699_vm10, %v9040_v44, %v9041_v52 }
 0x4b1   :  { %v16476_v48 = vpop.permute.xlu1 %9068  ;;  %v2344_v35 = vsel %vm2314_vm9, %v9035_v4, %v9036_v39  ;;  %v2729_v2 = vsel %vm2699_vm10, %v9045_v56, %v9046_v47  ;;  %v2376_v33 = vsel %vm2314_vm9, %v9021_v9, %v9035_v4  ;;  %v2944_v19 = vmax.f32 %v2440_v54, %v2793_v12  ;;  %v21345_v54 = vld [vmem:[#allocation186_spill] sm:$0xff] }
 0x4b2   :  { %9343 = vrot.lane.b32.xlu0 %v16374_v3, %s9454_s2  ;;  %v2945_v21 = vmax.f32 %v2408_v20, %v2761_v41  ;;  %v3450_v60 = vsel %vm2314_vm9, %v9056_v45, %v9050_v36  ;;  %v2825_v52 = vsel %vm2699_vm10, %v9046_v47, %v9040_v44  ;;  %v3418_v56 = vsel %vm2314_vm9, %v9050_v36, %v9051_v58 }
 0x4b3   :  { %9358 = vrot.lane.b32.xlu1 %v9347_v29, %s9454_s2  ;;  %v9064_v3 = vpop.permute.xlu0 %9063  ;;  %v2946_v31 = vmax.f32 %v2376_v33, %v2729_v2  ;;  %v3386_v29 = vsel %vm2314_vm9, %v9051_v58, %v9055_v8  ;;  %v3354_v9 = vsel %vm2314_vm9, %v9055_v8, %v9056_v45  ;;  %v3802_v4 = vsel %vm2699_vm10, %v9060_v61, %v9061_v14 }
 0x4b4   :  { %v9066_v49 = vunpack.i.h.bf16 %v9064_v3  ;;  %v9065_v30 = vunpack.i.l.bf16 %v9064_v3  ;;  %v3908_v58 = vmax.f32 %v3450_v60, %v3802_v4  ;;  %v16512_v36 = vmax.f32 %v21345_v54, %v2945_v21  ;;  %v21351_v4 = vld [vmem:[#allocation2_spill] sm:$0xff] }
 0x4b5   :  { %v9079_v39 = vpop.permute.xlu1 %9078  ;;  %v9070_v2 = vunpack.i.l.bf16 %v16476_v48  ;;  %v2947_v42 = vmax.f32 %v2344_v35, %v2825_v52  ;;  %v21352_v52 = vld [vmem:[#allocation155_spill] sm:$0xff] }
 0x4b6   :  { %9353 = vrot.lane.b32.xlu0 %v9352_v1, %s9453_s1  ;;  %v3738_v44 = vsel %vm2699_vm10, %v9065_v30, %v9066_v49  ;;  %v3770_v47 = vsel %vm2699_vm10, %v9061_v14, %v9065_v30  ;;  %v3834_v20 = vsel %vm2699_vm10, %v9066_v49, %v9060_v61  ;;  %v9081_v33 = vunpack.i.h.bf16 %v9079_v39  ;;  %v21346_v61 = vld [vmem:[#allocation57_spill] sm:$0xff]  ;;  %v21347_v49 = vld [vmem:[#allocation80_spill] sm:$0xff]  ;;  %v21348_v30 = vld [vmem:[#allocation19_spill] sm:$0xff] }
 0x4b7   :  { %9368 = vrot.lane.b32.xlu1 %v9367_v46, %s9453_s1  ;;  %v3910_v41 = vmax.f32 %v3386_v29, %v3738_v44  ;;  %v9074_v45 = vpop.permute.xlu0 %9073  ;;  %v3909_v8 = vmax.f32 %v3418_v56, %v3770_v47  ;;  %v3911_v12 = vmax.f32 %v3354_v9, %v3834_v20  ;;  %v9080_v3 = vunpack.i.l.bf16 %v9079_v39  ;;  %v21350_v39 = vld [vmem:[#allocation59_spill] sm:$0xff] }
 0x4b8   :  { %v9076_v51 = vunpack.i.h.bf16 %v9074_v45  ;;  %v9071_v14 = vunpack.i.h.bf16 %v16476_v48  ;;  %v16520_v29 = vmax.f32 %v21348_v30, %v2944_v19  ;;  %v4036_v9 = vmax.f32 %v21350_v39, %v3908_v58 }
 0x4b9   :  { %v9089_v28 = vpop.permute.xlu1 %9088  ;;  %v4037_v60 = vmax.f32 %v21346_v61, %v3909_v8  ;;  %v4039_v21 = vmax.f32 %v21347_v49, %v3911_v12  ;;  %v4038_v35 = vmax.f32 %v21351_v4, %v3910_v41  ;;  %v16528_v48 = vmax.f32 %v21352_v52, %v2946_v31  ;;  %v21354_v31 = vld [vmem:[#allocation20_spill] sm:$0xff] }
 0x4ba   :  { %9363 = vrot.lane.b32.xlu0 %v9352_v1, %s9454_s2  ;;  %21349 = vst [vmem:[#allocation54_spill] sm:$0xff] %v16520_v29  ;;  %v2441_v56 = vsel %vm2314_vm9, %v9076_v51, %v9070_v2  ;;  %v9075_v1 = vunpack.i.l.bf16 %v9074_v45  ;;  %v9372_v19 = vpack.i.bf16 %v16462_v55, %v16459_v50  ;;  %v2794_v47 = vsel %vm2699_vm10, %v9080_v3, %v9081_v33 }
 0x4bb   :  { %9378 = vrot.lane.b32.xlu1 %v9367_v46, %s9454_s2  ;;  %21353 = vst [vmem:[#allocation112_spill] sm:$0xff] %v16528_v48  ;;  %v9084_v44 = vpop.permute.xlu0 %9083  ;;  %4306 = vmatprep.mubr.f32.mxu0 %v4037_v60  ;;  %v9387_v58 = vpack.i.bf16 %v16512_v36, %v16520_v29  ;;  %v16537_v41 = vmax.f32 %v21354_v31, %v2947_v42  ;;  %v9091_v12 = vunpack.i.h.bf16 %v9089_v28  ;;  %v21359_v31 = vld [vmem:[#allocation110_spill] sm:$0xff] }
 0x4bc   :  { %4531 = vmatprep.mubr.f32.mxu1 %v4039_v21  ;;  %v9086_v20 = vunpack.i.h.bf16 %v9084_v44  ;;  %v9085_v54 = vunpack.i.l.bf16 %v9084_v44  ;;  %4307 = vmatmul.mubr.f32.gmra.mxu0 %v4036_v9  ;;  %v2409_v45 = vsel %vm2314_vm9, %v9070_v2, %v9071_v14  ;;  %v2948_v8 = vmax.f32 %v2441_v56, %v2794_v47  ;;  %v21357_v47 = vld [vmem:[#allocation200_spill] sm:$0xff] }
 0x4bd   :  { %v9099_v46 = vpop.permute.xlu1 %9098  ;;  %4532 = vmatmul.mubr.f32.gmra.mxu1 %v4038_v35  ;;  %v2345_v42 = vsel %vm2314_vm9, %v9075_v1, %v9076_v51  ;;  %v2377_v2 = vsel %vm2314_vm9, %v9071_v14, %v9075_v1  ;;  %v9090_v21 = vunpack.i.l.bf16 %v9089_v28  ;;  %v9392_v1 = vpack.i.bf16 %v16537_v41, %v16528_v48  ;;  %v21362_v48 = vld [vmem:[#allocation60_spill] sm:$0xff] }
 0x4be   :  { %9373 = vrot.lane.b32.xlu0 %v9372_v19, %s9453_s1  ;;  %v2730_v61 = vsel %vm2699_vm10, %v9085_v54, %v9086_v20  ;;  %v2762_v60 = vsel %vm2699_vm10, %v9081_v33, %v9085_v54  ;;  %v2826_v49 = vsel %vm2699_vm10, %v9086_v20, %v9080_v3  ;;  %v9101_v9 = vunpack.i.h.bf16 %v9099_v46  ;;  %v21355_v33 = vld [vmem:[#allocation135_spill] sm:$0xff] }
 0x4bf   :  { %9388 = vrot.lane.b32.xlu1 %v9387_v58, %s9453_s1  ;;  %v2949_v30 = vmax.f32 %v2409_v45, %v2762_v60  ;;  %v9094_v56 = vpop.permute.xlu0 %9093  ;;  %v2950_v39 = vmax.f32 %v2377_v2, %v2730_v61  ;;  %v9100_v4 = vunpack.i.l.bf16 %v9099_v46  ;;  %v16554_v44 = vmax.f32 %v21355_v33, %v2948_v8  ;;  %v21360_v60 = vld [vmem:[#allocation131_spill] sm:$0xff] }
 0x4c0   :  { %v9096_v35 = vunpack.i.h.bf16 %v9094_v56  ;;  %v2951_v3 = vmax.f32 %v2345_v42, %v2826_v49  ;;  %v9095_v54 = vunpack.i.l.bf16 %v9094_v56  ;;  %v3419_v46 = vsel %vm2314_vm9, %v9090_v21, %v9091_v12 }
 0x4c1   :  { %v9109_v52 = vpop.permute.xlu1 %9108  ;;  %21356 = vst [vmem:[#allocation41_spill] sm:$0xff] %v16554_v44  ;;  %v16557_v20 = vmax.f32 %v21357_v47, %v2949_v30  ;;  %v16570_v45 = vmax.f32 %v21359_v31, %v2950_v39 }
 0x4c2   :  { %9383 = vrot.lane.b32.xlu0 %v9372_v19, %s9454_s2  ;;  %v3451_v51 = vsel %vm2314_vm9, %v9096_v35, %v9090_v21  ;;  %v16575_v49 = vmax.f32 %v21360_v60, %v2951_v3  ;;  %v3387_v42 = vsel %vm2314_vm9, %v9091_v12, %v9095_v54  ;;  %v3355_v2 = vsel %vm2314_vm9, %v9095_v54, %v9096_v35 }
 0x4c3   :  { %21358 = vst [vmem:[#allocation52_spill] sm:$0xff] %v16557_v20  ;;  %9398 = vrot.lane.b32.xlu1 %v9387_v58, %s9454_s2  ;;  %v9104_v28 = vpop.permute.xlu0 %9103  ;;  %v9407_v14 = vpack.i.bf16 %v16557_v20, %v16554_v44  ;;  %v3803_v58 = vsel %vm2699_vm10, %v9100_v4, %v9101_v9  ;;  %v9110_v60 = vunpack.i.l.bf16 %v9109_v52  ;;  %v21361_v44 = vld [vmem:[#allocation7_spill] sm:$0xff] }
 0x4c4   :  { %v9106_v8 = vunpack.i.h.bf16 %v9104_v28  ;;  %v9105_v19 = vunpack.i.l.bf16 %v9104_v28  ;;  %v3912_v21 = vmax.f32 %v3451_v51, %v3803_v58  ;;  %v9111_v51 = vunpack.i.h.bf16 %v9109_v52 }
 0x4c5   :  { %v9119_v61 = vpop.permute.xlu1 %9118 }
 0x4c6   :  { %9393 = vrot.lane.b32.xlu0 %v9392_v1, %s9453_s1  ;;  %v3739_v30 = vsel %vm2699_vm10, %v9105_v19, %v9106_v8  ;;  %v9121_v56 = vunpack.i.h.bf16 %v9119_v61  ;;  %v3771_v39 = vsel %vm2699_vm10, %v9101_v9, %v9105_v19  ;;  %v3835_v33 = vsel %vm2699_vm10, %v9106_v8, %v9100_v4  ;;  %v21363_v4 = vld [vmem:[#allocation182_spill] sm:$0xff] }
 0x4c7   :  { %9408 = vrot.lane.b32.xlu1 %v9407_v14, %s9453_s1  ;;  %v3914_v3 = vmax.f32 %v3387_v42, %v3739_v30  ;;  %v9120_v12 = vunpack.i.l.bf16 %v9119_v61  ;;  %v3913_v28 = vmax.f32 %v3419_v46, %v3771_v39  ;;  %v3915_v31 = vmax.f32 %v3355_v2, %v3835_v33  ;;  %v21364_v46 = vld [vmem:[#allocation62_spill] sm:$0xff] }
 0x4c8   :  { %v9114_v47 = vpop.permute.xlu0 %9113  ;;  %v4040_v8 = vmax.f32 %v21363_v4, %v3912_v21 }
 0x4c9   :  { %v9116_v35 = vunpack.i.h.bf16 %v9114_v47  ;;  %v9129_v54 = vpop.permute.xlu1 %9128  ;;  %v9115_v58 = vunpack.i.l.bf16 %v9114_v47  ;;  %v4041_v20 = vmax.f32 %v21361_v44, %v3913_v28  ;;  %v4043_v29 = vmax.f32 %v21362_v48, %v3915_v31 }
 0x4ca   :  { %9403 = vrot.lane.b32.xlu0 %v9392_v1, %s9454_s2  ;;  %v4042_v19 = vmax.f32 %v21364_v46, %v3914_v3  ;;  %v2795_v61 = vsel %vm2699_vm10, %v9120_v12, %v9121_v56  ;;  %v9412_v44 = vpack.i.bf16 %v16575_v49, %v16570_v45  ;;  %v9131_v30 = vunpack.i.h.bf16 %v9129_v54  ;;  %v21367_v46 = vld [vmem:[#allocation146_spill] sm:$0xff] }
 0x4cb   :  { %v2442_v9 = vsel %vm2314_vm9, %v9116_v35, %v9110_v60  ;;  %9418 = vrot.lane.b32.xlu1 %v9407_v14, %s9454_s2  ;;  %4311 = vmatprep.mubr.f32.mxu0 %v4041_v20  ;;  %v2410_v14 = vsel %vm2314_vm9, %v9110_v60, %v9111_v51  ;;  %v2346_v21 = vsel %vm2314_vm9, %v9115_v58, %v9116_v35  ;;  %v9130_v3 = vunpack.i.l.bf16 %v9129_v54  ;;  %v21365_v35 = vld [vmem:[#allocation189_spill] sm:$0xff] }
 0x4cc   :  { %v9124_v52 = vpop.permute.xlu0 %9123  ;;  %4536 = vmatprep.mubr.f32.mxu1 %v4043_v29  ;;  %v2952_v1 = vmax.f32 %v2442_v9, %v2795_v61  ;;  %4312 = vmatmul.mubr.f32.gmra.mxu0 %v4040_v8  ;;  %v2378_v29 = vsel %vm2314_vm9, %v9111_v51, %v9115_v58  ;;  %v21368_v61 = vld [vmem:[#allocation188_spill] sm:$0xff] }
 0x4cd   :  { %v9126_v48 = vunpack.i.h.bf16 %v9124_v52  ;;  %v9125_v42 = vunpack.i.l.bf16 %v9124_v52  ;;  %v9139_v2 = vpop.permute.xlu1 %9138  ;;  %4537 = vmatmul.mubr.f32.gmra.mxu1 %v4042_v19  ;;  %v21370_v52 = vld [vmem:[#allocation107_spill] sm:$0xff] }
 0x4ce   :  { %9413 = vrot.lane.b32.xlu0 %v9412_v44, %s9453_s1  ;;  %v16615_v9 = vmax.f32 %v21365_v35, %v2952_v1  ;;  %v9141_v4 = vunpack.i.h.bf16 %v9139_v2  ;;  %v9140_v8 = vunpack.i.l.bf16 %v9139_v2 }
 0x4cf   :  { %v2731_v20 = vsel %vm2699_vm10, %v9125_v42, %v9126_v48  ;;  %v2763_v39 = vsel %vm2699_vm10, %v9121_v56, %v9125_v42  ;;  %v2827_v33 = vsel %vm2699_vm10, %v9126_v48, %v9120_v12 }
 0x4d0   :  { %v2953_v47 = vmax.f32 %v2410_v14, %v2763_v39  ;;  %v2954_v28 = vmax.f32 %v2378_v29, %v2731_v20  ;;  %v2955_v31 = vmax.f32 %v2346_v21, %v2827_v33  ;;  %v9134_v60 = vpop.permute.xlu0 %9133  ;;  %21366 = vst [vmem:[#allocation100_spill] sm:$0xff] %v16615_v9  ;;  %v3420_v20 = vsel %vm2314_vm9, %v9130_v3, %v9131_v30 }
 0x4d1   :  { %v9149_v51 = vpop.permute.xlu1 %9148  ;;  %v9136_v58 = vunpack.i.h.bf16 %v9134_v60  ;;  %v9135_v54 = vunpack.i.l.bf16 %v9134_v60  ;;  %v3804_v39 = vsel %vm2699_vm10, %v9140_v8, %v9141_v4 }
 0x4d2   :  { %v16618_v19 = vmax.f32 %v21367_v46, %v2953_v47  ;;  %v16621_v56 = vmax.f32 %v21368_v61, %v2954_v28  ;;  %v16624_v12 = vmax.f32 %v21370_v52, %v2955_v31  ;;  %9423 = vrot.lane.b32.xlu0 %v9412_v44, %s9454_s2  ;;  %v9151_v61 = vunpack.i.h.bf16 %v9149_v51 }
 0x4d3   :  { %v3452_v2 = vsel %vm2314_vm9, %v9136_v58, %v9130_v3  ;;  %v3388_v44 = vsel %vm2314_vm9, %v9131_v30, %v9135_v54  ;;  %v3356_v33 = vsel %vm2314_vm9, %v9135_v54, %v9136_v58  ;;  %v9150_v52 = vunpack.i.l.bf16 %v9149_v51  ;;  %v4637_v51 = vld [vmem:[%s19162_s4 + $0x78] sm:$0xff] }
 0x4d4   :  { %21369 = vst [vmem:[#allocation103_spill] sm:$0xff] %v16621_v56  ;;  %v9144_v48 = vpop.permute.xlu0 %9143  ;;  %v9427_v1 = vpack.i.bf16 %v16618_v19, %v16615_v9  ;;  %v9432_v42 = vpack.i.bf16 %v16624_v12, %v16621_v56  ;;  %v3916_v31 = vmax.f32 %v3452_v2, %v3804_v39  ;;  %v21371_v2 = vld [vmem:[#allocation165_spill] sm:$0xff] }
 0x4d5   :  { %v9159_v14 = vpop.permute.xlu1 %9158  ;;  %v9146_v21 = vunpack.i.h.bf16 %v9144_v48  ;;  %v9145_v29 = vunpack.i.l.bf16 %v9144_v48 }
 0x4d6   :  { %9428 = vrot.lane.b32.xlu1 %v9427_v1, %s9453_s1  ;;  %9433 = vrot.lane.b32.xlu0 %v9432_v42, %s9453_s1  ;;  %v9161_v48 = vunpack.i.h.bf16 %v9159_v14  ;;  %v9160_v58 = vunpack.i.l.bf16 %v9159_v14  ;;  %v4636_v14 = vld [vmem:[%s19162_s4 + $0x70] sm:$0xff] }
 0x4d7   :  { %v3740_v47 = vsel %vm2699_vm10, %v9145_v29, %v9146_v21  ;;  %v3772_v28 = vsel %vm2699_vm10, %v9141_v4, %v9145_v29  ;;  %v3836_v3 = vsel %vm2699_vm10, %v9146_v21, %v9140_v8  ;;  %v4044_v21 = vmax.f32 %v21371_v2, %v3916_v31  ;;  %v21372_v29 = vld [vmem:[#allocation183_spill] sm:$0xff]  ;;  %v4861_v31 = vld [vmem:[%s19163_s5 + $0x78] sm:$0xff] }
 0x4d8   :  { %v3918_v60 = vmax.f32 %v3388_v44, %v3740_v47  ;;  %v9154_v35 = vpop.permute.xlu0 %9153  ;;  %v3917_v30 = vmax.f32 %v3420_v20, %v3772_v28  ;;  %v3919_v46 = vmax.f32 %v3356_v33, %v3836_v3  ;;  %v3421_v44 = vsel %vm2314_vm9, %v9150_v52, %v9151_v61 }
 0x4d9   :  { %v9156_v56 = vunpack.i.h.bf16 %v9154_v35  ;;  %v16649_v9 = vpop.permute.xlu1 %9168  ;;  %v9155_v54 = vunpack.i.l.bf16 %v9154_v35  ;;  %v3805_v28 = vsel %vm2699_vm10, %v9160_v58, %v9161_v48 }
 0x4da   :  { %9438 = vrot.lane.b32.xlu1 %v9427_v1, %s9454_s2  ;;  %9443 = vrot.lane.b32.xlu0 %v9432_v42, %s9454_s2  ;;  %v4045_v4 = vmax.f32 %v21229_v62, %v3917_v30  ;;  %v4047_v8 = vmax.f32 %v15799_v10, %v3919_v46  ;;  %v4046_v20 = vmax.f32 %v21372_v29, %v3918_v60  ;;  %v4635_v60 = vld [vmem:[%s19162_s4 + $0x68] sm:$0xff]  ;;  %v9171_v46 = vunpack.i.h.bf16 %v16649_v9 }
 0x4db   :  { %v3453_v62 = vsel %vm2314_vm9, %v9156_v56, %v9150_v52  ;;  %v3389_v33 = vsel %vm2314_vm9, %v9151_v61, %v9155_v54  ;;  %v3357_v47 = vsel %vm2314_vm9, %v9155_v54, %v9156_v56  ;;  %v21399_v0 = vld [vmem:[#allocation103_spill] sm:$0xff] }
 0x4dc   :  { %v9164_v39 = vpop.permute.xlu0 %9163  ;;  %4316 = vmatprep.mubr.f32.mxu0 %v4045_v4  ;;  %4541 = vmatprep.mubr.f32.mxu1 %v4047_v8  ;;  %v3920_v30 = vmax.f32 %v3453_v62, %v3805_v28  ;;  %v9170_v8 = vunpack.i.l.bf16 %v16649_v9  ;;  %v4860_v9 = vld [vmem:[%s19163_s5 + $0x70] sm:$0xff] }
 0x4dd   :  { %v9166_v1 = vunpack.i.h.bf16 %v9164_v39  ;;  %v9165_v10 = vunpack.i.l.bf16 %v9164_v39  ;;  %v9179_v42 = vpop.permute.xlu1 %9178  ;;  %4317 = vmatmul.mubr.f32.gmra.mxu0 %v4044_v21  ;;  %4542 = vmatmul.mubr.f32.gmra.mxu1 %v4046_v20  ;;  %v21374_v39 = vld [vmem:[#allocation17_spill] sm:$0xff] }
 0x4de   :  { %4731 = vperm.xlu1 %7526, %v4637_v51   ;;  %4726 = vperm.xlu0 %7525, %v4636_v14   ;;  %v9181_v2 = vunpack.i.h.bf16 %v9179_v42  ;;  %v9180_v21 = vunpack.i.l.bf16 %v9179_v42  ;;  %v4238_v14 = vpop.f32.mrf.mxu0  ;;  %v4634_v42 = vld [vmem:[%s19162_s4 + $0x60] sm:$0xff] }
 0x4df   :  { %v3741_v3 = vsel %vm2699_vm10, %v9165_v10, %v9166_v1  ;;  %v3773_v35 = vsel %vm2699_vm10, %v9161_v48, %v9165_v10  ;;  %v3837_v56 = vsel %vm2699_vm10, %v9166_v1, %v9160_v58  ;;  %v21373_v48 = vld [vmem:[#allocation168_spill] sm:$0xff]  ;;  %v21375_v1 = vld [vmem:[#allocation81_spill] sm:$0xff] }
 0x4e0   :  { %v3922_v61 = vmax.f32 %v3389_v33, %v3741_v3  ;;  %v9174_v52 = vpop.permute.xlu0 %9173  ;;  %v3921_v54 = vmax.f32 %v3421_v44, %v3773_v35  ;;  %v3923_v4 = vmax.f32 %v3357_v47, %v3837_v56  ;;  %v4048_v10 = vmax.f32 %v21375_v1, %v3920_v30  ;;  %v21376_v33 = vld [vmem:[#allocation90_spill] sm:$0xff]  ;;  %v4240_v47 = vpop.f32.mrf.mxu0 }
 0x4e1   :  { %v16687_v29 = vpop.permute.xlu1 %9188  ;;  %v9176_v20 = vunpack.i.h.bf16 %v9174_v52  ;;  %v9175_v51 = vunpack.i.l.bf16 %v9174_v52  ;;  %v3422_v30 = vsel %vm2314_vm9, %v9170_v8, %v9171_v46 }
 0x4e2   :  { %4955 = vperm.xlu1 %7526, %v4861_v31   ;;  %4721 = vperm.xlu0 %7525, %v4635_v60   ;;  %v4049_v58 = vmax.f32 %v21373_v48, %v3921_v54  ;;  %v4051_v62 = vmax.f32 %v21374_v39, %v3923_v4  ;;  %v4050_v44 = vmax.f32 %v21376_v33, %v3922_v61  ;;  %v4463_v31 = vpop.f32.mrf.mxu1  ;;  %v4633_v39 = vld [vmem:[%s19162_s4 + $0x58] sm:$0xff]  ;;  %v9191_v33 = vunpack.i.h.bf16 %v16687_v29 }
 0x4e3   :  { %v3454_v3 = vsel %vm2314_vm9, %v9176_v20, %v9170_v8  ;;  %v3806_v61 = vsel %vm2699_vm10, %v9180_v21, %v9181_v2  ;;  %v3390_v52 = vsel %vm2314_vm9, %v9171_v46, %v9175_v51  ;;  %v16709_v54 = vadd.f32 %v4463_v31, %v4238_v14  ;;  %v4859_v8 = vld [vmem:[%s19163_s5 + $0x68] sm:$0xff] }
 0x4e4   :  { %4321 = vmatprep.mubr.f32.mxu0 %v4049_v58  ;;  %4546 = vmatprep.mubr.f32.mxu1 %v4051_v62  ;;  %v9184_v28 = vpop.permute.xlu0 %9183  ;;  %v3358_v4 = vsel %vm2314_vm9, %v9175_v51, %v9176_v20  ;;  %v4465_v48 = vpop.f32.mrf.mxu1  ;;  %v3924_v62 = vmax.f32 %v3454_v3, %v3806_v61 }
 0x4e5   :  { %v16701_v60 = vpop.permute.xlu1 %9198  ;;  %v9186_v35 = vunpack.i.h.bf16 %v9184_v28  ;;  %v9185_v56 = vunpack.i.l.bf16 %v9184_v28  ;;  %4322 = vmatmul.mubr.f32.gmra.mxu0 %v4048_v10  ;;  %4547 = vmatmul.mubr.f32.gmra.mxu1 %v4050_v44  ;;  %v9190_v44 = vunpack.i.l.bf16 %v16687_v29  ;;  %v4243_v28 = vpop.f32.mrf.mxu0  ;;  %v21377_v29 = vld [vmem:[#allocation101_spill] sm:$0xff] }
 0x4e6   :  { %4950 = vperm.xlu1 %7526, %v4860_v9   ;;  %4716 = vperm.xlu0 %7525, %v4634_v42   ;;  %v9201_v9 = vunpack.i.h.bf16 %v16701_v60  ;;  %v4052_v61 = vmax.f32 %v21377_v29, %v3924_v62 }
 0x4e7   :  { %v3742_v58 = vsel %vm2699_vm10, %v9185_v56, %v9186_v35  ;;  %v3774_v46 = vsel %vm2699_vm10, %v9181_v2, %v9185_v56  ;;  %v3838_v14 = vsel %vm2699_vm10, %v9186_v35, %v9180_v21  ;;  %v9200_v2 = vunpack.i.l.bf16 %v16701_v60  ;;  %v4468_v56 = vpop.f32.mrf.mxu1  ;;  %v4632_v60 = vld [vmem:[%s19162_s4 + $0x50] sm:$0xff] }
 0x4e8   :  { %v3926_v20 = vmax.f32 %v3390_v52, %v3742_v58  ;;  %v9194_v51 = vpop.permute.xlu0 %9193  ;;  %v3925_v1 = vmax.f32 %v3422_v30, %v3774_v46  ;;  %v3927_v10 = vmax.f32 %v3358_v4, %v3838_v14  ;;  %v16733_v35 = vadd.f32 %v4468_v56, %v4243_v28  ;;  %v4245_v30 = vpop.f32.mrf.mxu0  ;;  %v4858_v4 = vld [vmem:[%s19163_s5 + $0x60] sm:$0xff] }
 0x4e9   :  { %v16728_v42 = vpop.permute.xlu1 %9208  ;;  %v9196_v47 = vunpack.i.h.bf16 %v9194_v51  ;;  %v9195_v31 = vunpack.i.l.bf16 %v9194_v51  ;;  %v4470_v48 = vpop.f32.mrf.mxu1  ;;  %v3807_v62 = vsel %vm2699_vm10, %v9200_v2, %v9201_v9  ;;  %v4857_v51 = vld [vmem:[%s19163_s5 + $0x58] sm:$0xff] }
 0x4ea   :  { %4945 = vperm.xlu1 %7526, %v4859_v8   ;;  %4711 = vperm.xlu0 %7525, %v4633_v39   ;;  %v4053_v21 = vmax.f32 %v21246_v16, %v3925_v1  ;;  %v4055_v3 = vmax.f32 %v15879_v32, %v3927_v10  ;;  %v4054_v52 = vmax.f32 %v21260_v7, %v3926_v20  ;;  %v4631_v1 = vld [vmem:[%s19162_s4 + $0x48] sm:$0xff] }
 0x4eb   :  { %v3455_v32 = vsel %vm2314_vm9, %v9196_v47, %v9190_v44  ;;  %v3423_v7 = vsel %vm2314_vm9, %v9190_v44, %v9191_v33  ;;  %v3391_v46 = vsel %vm2314_vm9, %v9191_v33, %v9195_v31  ;;  %v3359_v14 = vsel %vm2314_vm9, %v9195_v31, %v9196_v47 }
 0x4ec   :  { %v9204_v58 = vpop.permute.xlu0 %9203  ;;  %4326 = vmatprep.mubr.f32.mxu0 %v4053_v21  ;;  %4551 = vmatprep.mubr.f32.mxu1 %v4055_v3  ;;  %v3928_v44 = vmax.f32 %v3455_v32, %v3807_v62  ;;  %v9211_v21 = vunpack.i.h.bf16 %v16728_v42  ;;  %v9210_v3 = vunpack.i.l.bf16 %v16728_v42 }
 0x4ed   :  { %v9219_v16 = vpop.permute.xlu1 %9218  ;;  %v9206_v8 = vunpack.i.h.bf16 %v9204_v58  ;;  %v9205_v39 = vunpack.i.l.bf16 %v9204_v58  ;;  %4327 = vmatmul.mubr.f32.gmra.mxu0 %v4052_v61  ;;  %4552 = vmatmul.mubr.f32.gmra.mxu1 %v4054_v52  ;;  %v4248_v52 = vpop.f32.mrf.mxu0 }
 0x4ee   :  { %4940 = vperm.xlu1 %7526, %v4858_v4   ;;  %4706 = vperm.xlu0 %7525, %v4632_v60   ;;  %v9221_v30 = vunpack.i.h.bf16 %v9219_v16  ;;  %v9220_v4 = vunpack.i.l.bf16 %v9219_v16  ;;  %v4630_v16 = vld [vmem:[%s19162_s4 + $0x40] sm:$0xff] }
 0x4ef   :  { %v3743_v20 = vsel %vm2699_vm10, %v9205_v39, %v9206_v8  ;;  %v3775_v10 = vsel %vm2699_vm10, %v9201_v9, %v9205_v39  ;;  %v3839_v33 = vsel %vm2699_vm10, %v9206_v8, %v9200_v2  ;;  %v4473_v9 = vpop.f32.mrf.mxu1  ;;  %v4250_v32 = vpop.f32.mrf.mxu0  ;;  %v4056_v8 = vmax.f32 %v21264_v23, %v3928_v44  ;;  %v4856_v39 = vld [vmem:[%s19163_s5 + $0x50] sm:$0xff] }
 0x4f0   :  { %v3930_v47 = vmax.f32 %v3391_v46, %v3743_v20  ;;  %v9214_v28 = vpop.permute.xlu0 %9213  ;;  %v3929_v31 = vmax.f32 %v3423_v7, %v3775_v10  ;;  %v3931_v56 = vmax.f32 %v3359_v14, %v3839_v33  ;;  %v16771_v58 = vadd.f32 %v4473_v9, %v4248_v52  ;;  %v4855_v10 = vld [vmem:[%s19163_s5 + $0x48] sm:$0xff]  ;;  %v4629_v33 = vld [vmem:[%s19162_s4 + $0x38] sm:$0xff] }
 0x4f1   :  { %v16767_v29 = vpop.permute.xlu1 %9228  ;;  %v9216_v61 = vunpack.i.h.bf16 %v9214_v28  ;;  %v9215_v60 = vunpack.i.l.bf16 %v9214_v28  ;;  %v4475_v7 = vpop.f32.mrf.mxu1 }
 0x4f2   :  { %4935 = vperm.xlu1 %7526, %v4857_v51   ;;  %4701 = vperm.xlu0 %7525, %v4631_v1   ;;  %v4057_v2 = vmax.f32 %v15887_v22, %v3929_v31  ;;  %v4059_v48 = vmax.f32 %v21282_v40, %v3931_v56  ;;  %v4058_v42 = vmax.f32 %v15976_v6, %v3930_v47  ;;  %v9231_v31 = vunpack.i.h.bf16 %v16767_v29 }
 0x4f3   :  { %v3456_v22 = vsel %vm2314_vm9, %v9216_v61, %v9210_v3  ;;  %v3424_v6 = vsel %vm2314_vm9, %v9210_v3, %v9211_v21  ;;  %v3392_v62 = vsel %vm2314_vm9, %v9211_v21, %v9215_v60  ;;  %v3360_v20 = vsel %vm2314_vm9, %v9215_v60, %v9216_v61 }
 0x4f4   :  { %v9224_v46 = vpop.permute.xlu0 %9223  ;;  %4331 = vmatprep.mubr.f32.mxu0 %v4057_v2  ;;  %4556 = vmatprep.mubr.f32.mxu1 %v4059_v48  ;;  %v3808_v51 = vsel %vm2699_vm10, %v9220_v4, %v9221_v30  ;;  %v9230_v52 = vunpack.i.l.bf16 %v16767_v29  ;;  %v4854_v29 = vld [vmem:[%s19163_s5 + $0x40] sm:$0xff] }
 0x4f5   :  { %v9239_v40 = vpop.permute.xlu1 %9238  ;;  %v9226_v14 = vunpack.i.h.bf16 %v9224_v46  ;;  %v9225_v23 = vunpack.i.l.bf16 %v9224_v46  ;;  %4332 = vmatmul.mubr.f32.gmra.mxu0 %v4056_v8  ;;  %4557 = vmatmul.mubr.f32.gmra.mxu1 %v4058_v42  ;;  %v3932_v28 = vmax.f32 %v3456_v22, %v3808_v51 }
 0x4f6   :  { %4930 = vperm.xlu1 %7526, %v4856_v39   ;;  %4696 = vperm.xlu0 %7525, %v4630_v16   ;;  %v9241_v60 = vunpack.i.h.bf16 %v9239_v40  ;;  %v9240_v9 = vunpack.i.l.bf16 %v9239_v40  ;;  %v4628_v39 = vld [vmem:[%s19162_s4 + $0x30] sm:$0xff] }
 0x4f7   :  { %v3744_v1 = vsel %vm2699_vm10, %v9225_v23, %v9226_v14  ;;  %v3776_v44 = vsel %vm2699_vm10, %v9221_v30, %v9225_v23  ;;  %v3840_v47 = vsel %vm2699_vm10, %v9226_v14, %v9220_v4  ;;  %v4060_v8 = vmax.f32 %v15979_v17, %v3932_v28 }
 0x4f8   :  { %v3934_v56 = vmax.f32 %v3392_v62, %v3744_v1  ;;  %v9234_v21 = vpop.permute.xlu0 %9233  ;;  %v3933_v3 = vmax.f32 %v3424_v6, %v3776_v44  ;;  %v3935_v61 = vmax.f32 %v3360_v20, %v3840_v47  ;;  %v3809_v22 = vsel %vm2699_vm10, %v9240_v9, %v9241_v60  ;;  %v4853_v1 = vld [vmem:[%s19163_s5 + $0x38] sm:$0xff] }
 0x4f9   :  { %v16805_v2 = vpop.permute.xlu1 %9248  ;;  %v9236_v48 = vunpack.i.h.bf16 %v9234_v21  ;;  %v9235_v32 = vunpack.i.l.bf16 %v9234_v21 }
 0x4fa   :  { %4925 = vperm.xlu1 %7526, %v4855_v10   ;;  %4691 = vperm.xlu0 %7525, %v4629_v33   ;;  %v4061_v30 = vmax.f32 %v21281_v38, %v3933_v3  ;;  %v4063_v4 = vmax.f32 %v15998_v63, %v3935_v61  ;;  %v4062_v42 = vmax.f32 %v21283_v25, %v3934_v56  ;;  %v4627_v10 = vld [vmem:[%s19162_s4 + $0x28] sm:$0xff]  ;;  %v9251_v3 = vunpack.i.h.bf16 %v16805_v2 }
 0x4fb   :  { %v3457_v16 = vsel %vm2314_vm9, %v9236_v48, %v9230_v52  ;;  %v4253_v46 = vpop.f32.mrf.mxu0  ;;  %v3425_v25 = vsel %vm2314_vm9, %v9230_v52, %v9231_v31  ;;  %v3393_v40 = vsel %vm2314_vm9, %v9231_v31, %v9235_v32  ;;  %v3361_v23 = vsel %vm2314_vm9, %v9235_v32, %v9236_v48 }
 0x4fc   :  { %v9244_v7 = vpop.permute.xlu0 %9243  ;;  %4336 = vmatprep.mubr.f32.mxu0 %v4061_v30  ;;  %4561 = vmatprep.mubr.f32.mxu1 %v4063_v4  ;;  %v4478_v14 = vpop.f32.mrf.mxu1  ;;  %v3936_v6 = vmax.f32 %v3457_v16, %v3809_v22  ;;  %v9250_v61 = vunpack.i.l.bf16 %v16805_v2  ;;  %v4852_v2 = vld [vmem:[%s19163_s5 + $0x30] sm:$0xff] }
 0x4fd   :  { %v16819_v38 = vpop.permute.xlu1 %9258  ;;  %v9246_v63 = vunpack.i.h.bf16 %v9244_v7  ;;  %v9245_v17 = vunpack.i.l.bf16 %v9244_v7  ;;  %4337 = vmatmul.mubr.f32.gmra.mxu0 %v4060_v8  ;;  %4562 = vmatmul.mubr.f32.gmra.mxu1 %v4062_v42  ;;  %v16831_v20 = vadd.f32 %v4478_v14, %v4253_v46  ;;  %v4255_v51 = vpop.f32.mrf.mxu0  ;;  %v4625_v14 = vld [vmem:[%s19162_s4 + $0x18] sm:$0xff] }
 0x4fe   :  { %4920 = vperm.xlu1 %7526, %v4854_v29   ;;  %4686 = vperm.xlu0 %7525, %v4628_v39   ;;  %v4480_v28 = vpop.f32.mrf.mxu1  ;;  %v9261_v52 = vunpack.i.h.bf16 %v16819_v38  ;;  %v9260_v30 = vunpack.i.l.bf16 %v16819_v38  ;;  %v4064_v8 = vmax.f32 %v15406_v15, %v3936_v6  ;;  %v4626_v29 = vld [vmem:[%s19162_s4 + $0x20] sm:$0xff]  ;;  %v3426_v7 = vsel %vm2314_vm9, %v9250_v61, %v9251_v3 }
 0x4ff   :  { %v3745_v62 = vsel %vm2699_vm10, %v9245_v17, %v9246_v63  ;;  %v3777_v33 = vsel %vm2699_vm10, %v9241_v60, %v9245_v17  ;;  %v3841_v44 = vsel %vm2699_vm10, %v9246_v63, %v9240_v9 }
 0x500   :  { %v3938_v47 = vmax.f32 %v3393_v40, %v3745_v62  ;;  %v9254_v31 = vpop.permute.xlu0 %9253  ;;  %v3937_v56 = vmax.f32 %v3425_v25, %v3777_v33  ;;  %v3939_v21 = vmax.f32 %v3361_v23, %v3841_v44  ;;  %v3810_v46 = vsel %vm2699_vm10, %v9260_v30, %v9261_v52  ;;  %v4851_v40 = vld [vmem:[%s19163_s5 + $0x28] sm:$0xff] }
 0x501   :  { %v16846_v48 = vpop.permute.xlu1 %9268  ;;  %v9256_v32 = vunpack.i.h.bf16 %v9254_v31  ;;  %v9255_v60 = vunpack.i.l.bf16 %v9254_v31 }
 0x502   :  { %4915 = vperm.xlu1 %7526, %v4853_v1   ;;  %4681 = vperm.xlu0 %7525, %v4627_v10   ;;  %v4065_v9 = vmax.f32 %v16001_v53, %v3937_v56  ;;  %v4067_v4 = vmax.f32 %v15503_v24, %v3939_v21  ;;  %v4066_v42 = vmax.f32 %v16032_v5, %v3938_v47  ;;  %v9271_v38 = vunpack.i.h.bf16 %v16846_v48 }
 0x503   :  { %v3458_v53 = vsel %vm2314_vm9, %v9256_v32, %v9250_v61  ;;  %v3394_v63 = vsel %vm2314_vm9, %v9251_v3, %v9255_v60  ;;  %v3362_v17 = vsel %vm2314_vm9, %v9255_v60, %v9256_v32  ;;  %v9270_v51 = vunpack.i.l.bf16 %v16846_v48  ;;  %v21378_v32 = vld [vmem:[#allocation148_spill] sm:$0xff] }
 0x504   :  { %v9264_v39 = vpop.permute.xlu0 %9263  ;;  %4341 = vmatprep.mubr.f32.mxu0 %v4065_v9  ;;  %4566 = vmatprep.mubr.f32.mxu1 %v4067_v4  ;;  %v4483_v5 = vpop.f32.mrf.mxu1  ;;  %v3940_v62 = vmax.f32 %v3458_v53, %v3810_v46  ;;  %v21380_v9 = vld [vmem:[#allocation169_spill] sm:$0xff] }
 0x505   :  { %v16861_v16 = vpop.permute.xlu1 %9278  ;;  %v9266_v24 = vunpack.i.h.bf16 %v9264_v39  ;;  %v9265_v15 = vunpack.i.l.bf16 %v9264_v39  ;;  %4342 = vmatmul.mubr.f32.gmra.mxu0 %v4064_v8  ;;  %4567 = vmatmul.mubr.f32.gmra.mxu1 %v4066_v42  ;;  %v21381_v8 = vld [vmem:[#allocation12_spill] sm:$0xff] }
 0x506   :  { %4910 = vperm.xlu1 %7526, %v4852_v2   ;;  %4676 = vperm.xlu0 %7525, %v4626_v29   ;;  %v4485_v22 = vpop.f32.mrf.mxu1  ;;  %v4258_v10 = vpop.f32.mrf.mxu0  ;;  %v9281_v28 = vunpack.i.h.bf16 %v16861_v16  ;;  %v9280_v31 = vunpack.i.l.bf16 %v16861_v16  ;;  %v4068_v4 = vmax.f32 %v21380_v9, %v3940_v62  ;;  %v4850_v2 = vld [vmem:[%s19163_s5 + $0x20] sm:$0xff]  ;;  %v4624_v29 = vld [vmem:[%s19162_s4 + $0x10] sm:$0xff]  ;;  %v21383_v9 = vld [vmem:[#allocation157_spill] sm:$0xff] }
 0x507   :  { %v3746_v25 = vsel %vm2699_vm10, %v9265_v15, %v9266_v24  ;;  %v3778_v23 = vsel %vm2699_vm10, %v9261_v52, %v9265_v15  ;;  %v3842_v6 = vsel %vm2699_vm10, %v9266_v24, %v9260_v30  ;;  %v16887_v56 = vadd.f32 %v4483_v5, %v4258_v10  ;;  %v21379_v30 = vld [vmem:[#allocation97_spill] sm:$0xff] }
 0x508   :  { %v3942_v1 = vmax.f32 %v3394_v63, %v3746_v25  ;;  %v9274_v33 = vpop.permute.xlu0 %9273  ;;  %v3941_v44 = vmax.f32 %v3426_v7, %v3778_v23  ;;  %v3943_v47 = vmax.f32 %v3362_v17, %v3842_v6  ;;  %v4260_v61 = vpop.f32.mrf.mxu0  ;;  %v3427_v7 = vsel %vm2314_vm9, %v9270_v51, %v9271_v38  ;;  %v4849_v6 = vld [vmem:[%s19163_s5 + $0x18] sm:$0xff] }
 0x509   :  { %v16889_v21 = vpop.permute.xlu1 %9288  ;;  %v9276_v3 = vunpack.i.h.bf16 %v9274_v33  ;;  %v9275_v52 = vunpack.i.l.bf16 %v9274_v33  ;;  %v3811_v63 = vsel %vm2699_vm10, %v9280_v31, %v9281_v28 }
 0x50a   :  { %4905 = vperm.xlu1 %7526, %v4851_v40   ;;  %4671 = vperm.xlu0 %7525, %v4625_v14   ;;  %v4069_v48 = vmax.f32 %v21378_v32, %v3941_v44  ;;  %v4071_v60 = vmax.f32 %v21379_v30, %v3943_v47  ;;  %v4070_v42 = vmax.f32 %v21381_v8, %v3942_v1  ;;  %v9291_v1 = vunpack.i.h.bf16 %v16889_v21  ;;  %v21384_v8 = vld [vmem:[#allocation23_spill] sm:$0xff] }
 0x50b   :  { %v3459_v39 = vsel %vm2314_vm9, %v9276_v3, %v9270_v51  ;;  %v3395_v17 = vsel %vm2314_vm9, %v9271_v38, %v9275_v52  ;;  %v3363_v25 = vsel %vm2314_vm9, %v9275_v52, %v9276_v3  ;;  %v4623_v38 = vld [vmem:[%s19162_s4 + $0x8] sm:$0xff]  ;;  %v9290_v61 = vunpack.i.l.bf16 %v16889_v21  ;;  %v4848_v21 = vld [vmem:[%s19163_s5 + $0x10] sm:$0xff] }
 0x50c   :  { %v9284_v53 = vpop.permute.xlu0 %9283  ;;  %4346 = vmatprep.mubr.f32.mxu0 %v4069_v48  ;;  %4571 = vmatprep.mubr.f32.mxu1 %v4071_v60  ;;  %v4263_v5 = vpop.f32.mrf.mxu0  ;;  %v3944_v22 = vmax.f32 %v3459_v39, %v3811_v63  ;;  %v4622_v39 = vld [vmem:[%s19162_s4] sm:$0xff] }
 0x50d   :  { %v16903_v16 = vpop.permute.xlu1 %9298  ;;  %v9286_v24 = vunpack.i.h.bf16 %v9284_v53  ;;  %v9285_v15 = vunpack.i.l.bf16 %v9284_v53  ;;  %4347 = vmatmul.mubr.f32.gmra.mxu0 %v4068_v4  ;;  %4572 = vmatmul.mubr.f32.gmra.mxu1 %v4070_v42  ;;  %v4488_v46 = vpop.f32.mrf.mxu1  ;;  %v3428_v63 = vsel %vm2314_vm9, %v9290_v61, %v9291_v1 }
 0x50e   :  { %4900 = vperm.xlu1 %7526, %v4850_v2   ;;  %4666 = vperm.xlu0 %7525, %v4624_v29   ;;  %v16915_v14 = vadd.f32 %v4488_v46, %v4263_v5  ;;  %v4265_v23 = vpop.f32.mrf.mxu0  ;;  %v9301_v52 = vunpack.i.h.bf16 %v16903_v16  ;;  %v9300_v32 = vunpack.i.l.bf16 %v16903_v16  ;;  %v4072_v42 = vmax.f32 %v21384_v8, %v3944_v22  ;;  %v21385_v2 = vld [vmem:[#allocation195_spill] sm:$0xff] }
 0x50f   :  { %v3747_v40 = vsel %vm2699_vm10, %v9285_v15, %v9286_v24  ;;  %v3779_v62 = vsel %vm2699_vm10, %v9281_v28, %v9285_v15  ;;  %v3843_v51 = vsel %vm2699_vm10, %v9286_v24, %v9280_v31  ;;  %v4490_v33 = vpop.f32.mrf.mxu1  ;;  %v21382_v31 = vld [vmem:[#allocation30_spill] sm:$0xff] }
 0x510   :  { %v3946_v10 = vmax.f32 %v3395_v17, %v3747_v40  ;;  %v9294_v44 = vpop.permute.xlu0 %9293  ;;  %v3945_v47 = vmax.f32 %v3427_v7, %v3779_v62  ;;  %v3947_v3 = vmax.f32 %v3363_v25, %v3843_v51  ;;  %v3812_v17 = vsel %vm2699_vm10, %v9300_v32, %v9301_v52  ;;  %v4847_v62 = vld [vmem:[%s19163_s5 + $0x8] sm:$0xff]  ;;  %v4653_v51 = vld [vmem:[%s19162_s4 + $0xf8] sm:$0xff] }
 0x511   :  { %v16931_v48 = vpop.permute.xlu1 %9308  ;;  %v9296_v30 = vunpack.i.h.bf16 %v9294_v44  ;;  %v9295_v28 = vunpack.i.l.bf16 %v9294_v44 }
 0x512   :  { %4895 = vperm.xlu1 %7526, %v4849_v6   ;;  %4661 = vperm.xlu0 %7525, %v4623_v38   ;;  %v4073_v60 = vmax.f32 %v21382_v31, %v3945_v47  ;;  %v4075_v4 = vmax.f32 %v21383_v9, %v3947_v3  ;;  %v4074_v29 = vmax.f32 %v21385_v2, %v3946_v10  ;;  %v21387_v2 = vld [vmem:[#allocation34_spill] sm:$0xff] }
 0x513   :  { %v3460_v53 = vsel %vm2314_vm9, %v9296_v30, %v9290_v61  ;;  %v3396_v46 = vsel %vm2314_vm9, %v9291_v1, %v9295_v28  ;;  %v3364_v22 = vsel %vm2314_vm9, %v9295_v28, %v9296_v30  ;;  %v9311_v30 = vunpack.i.h.bf16 %v16931_v48 }
 0x514   :  { %v9304_v16 = vpop.permute.xlu0 %9303  ;;  %4351 = vmatprep.mubr.f32.mxu0 %v4073_v60  ;;  %4576 = vmatprep.mubr.f32.mxu1 %v4075_v4  ;;  %v3948_v40 = vmax.f32 %v3460_v53, %v3812_v17  ;;  %v9310_v28 = vunpack.i.l.bf16 %v16931_v48  ;;  %v4846_v48 = vld [vmem:[%s19163_s5] sm:$0xff] }
 0x515   :  { %v9319_v24 = vpop.permute.xlu1 %9318  ;;  %v9306_v15 = vunpack.i.h.bf16 %v9304_v16  ;;  %v9305_v5 = vunpack.i.l.bf16 %v9304_v16  ;;  %v4268_v7 = vpop.f32.mrf.mxu0  ;;  %4352 = vmatmul.mubr.f32.gmra.mxu0 %v4072_v42  ;;  %4577 = vmatmul.mubr.f32.gmra.mxu1 %v4074_v29 }
 0x516   :  { %v4493_v25 = vpop.f32.mrf.mxu1  ;;  %4890 = vperm.xlu1 %7526, %v4848_v21   ;;  %4656 = vperm.xlu0 %7525, %v4622_v39   ;;  %v9321_v31 = vunpack.i.h.bf16 %v9319_v24  ;;  %v9320_v4 = vunpack.i.l.bf16 %v9319_v24  ;;  %v4076_v29 = vmax.f32 %v21387_v2, %v3948_v40  ;;  %v4652_v39 = vld [vmem:[%s19162_s4 + $0xf0] sm:$0xff]  ;;  %v4650_v2 = vld [vmem:[%s19162_s4 + $0xe0] sm:$0xff] }
 0x517   :  { %v3748_v23 = vsel %vm2699_vm10, %v9305_v5, %v9306_v15  ;;  %v16955_v6 = vadd.f32 %v4493_v25, %v4268_v7  ;;  %v4270_v38 = vpop.f32.mrf.mxu0  ;;  %v3780_v1 = vsel %vm2699_vm10, %v9301_v52, %v9305_v5  ;;  %v3844_v10 = vsel %vm2699_vm10, %v9306_v15, %v9300_v32  ;;  %v21386_v52 = vld [vmem:[#allocation92_spill] sm:$0xff]  ;;  %v4651_v25 = vld [vmem:[%s19162_s4 + $0xe8] sm:$0xff] }
 0x518   :  { %v3950_v33 = vmax.f32 %v3396_v46, %v3748_v23  ;;  %v4495_v44 = vpop.f32.mrf.mxu1  ;;  %v9314_v47 = vpop.permute.xlu0 %9313  ;;  %v3949_v3 = vmax.f32 %v3428_v63, %v3780_v1  ;;  %v3951_v61 = vmax.f32 %v3364_v22, %v3844_v10  ;;  %v3813_v63 = vsel %vm2699_vm10, %v9320_v4, %v9321_v31  ;;  %v4877_v46 = vld [vmem:[%s19163_s5 + $0xf8] sm:$0xff] }
 0x519   :  { %v16969_v60 = vpop.permute.xlu1 %9328  ;;  %v9316_v9 = vunpack.i.h.bf16 %v9314_v47  ;;  %v9315_v8 = vunpack.i.l.bf16 %v9314_v47 }
 0x51a   :  { %4885 = vperm.xlu1 %7526, %v4847_v62   ;;  %4811 = vperm.xlu0 %7525, %v4653_v51   ;;  %v4077_v42 = vmax.f32 %v21386_v52, %v3949_v3  ;;  %v4079_v32 = vmax.f32 %v16129_v59, %v3951_v61  ;;  %v4078_v21 = vmax.f32 %v15776_v11, %v3950_v33  ;;  %v9331_v10 = vunpack.i.h.bf16 %v16969_v60 }
 0x51b   :  { %v3461_v16 = vsel %vm2314_vm9, %v9316_v9, %v9310_v28  ;;  %v3429_v11 = vsel %vm2314_vm9, %v9310_v28, %v9311_v30  ;;  %v3397_v5 = vsel %vm2314_vm9, %v9311_v30, %v9315_v8  ;;  %v3365_v7 = vsel %vm2314_vm9, %v9315_v8, %v9316_v9 }
 0x51c   :  { %v9324_v53 = vpop.permute.xlu0 %9323  ;;  %4356 = vmatprep.mubr.f32.mxu0 %v4077_v42  ;;  %4581 = vmatprep.mubr.f32.mxu1 %v4079_v32  ;;  %v3952_v23 = vmax.f32 %v3461_v16, %v3813_v63  ;;  %v9330_v33 = vunpack.i.l.bf16 %v16969_v60  ;;  %v4876_v32 = vld [vmem:[%s19163_s5 + $0xf0] sm:$0xff] }
 0x51d   :  { %v9339_v24 = vpop.permute.xlu1 %9338  ;;  %v9326_v59 = vunpack.i.h.bf16 %v9324_v53  ;;  %v9325_v15 = vunpack.i.l.bf16 %v9324_v53  ;;  %4357 = vmatmul.mubr.f32.gmra.mxu0 %v4076_v29  ;;  %4582 = vmatmul.mubr.f32.gmra.mxu1 %v4078_v21 }
 0x51e   :  { %4880 = vperm.xlu1 %7526, %v4846_v48   ;;  %4806 = vperm.xlu0 %7525, %v4652_v39   ;;  %v9341_v44 = vunpack.i.h.bf16 %v9339_v24  ;;  %v9340_v30 = vunpack.i.l.bf16 %v9339_v24  ;;  %v4080_v42 = vmax.f32 %v16226_v26, %v3952_v23 }
 0x51f   :  { %v3749_v17 = vsel %vm2699_vm10, %v9325_v15, %v9326_v59  ;;  %v3781_v22 = vsel %vm2699_vm10, %v9321_v31, %v9325_v15  ;;  %v3845_v40 = vsel %vm2699_vm10, %v9326_v59, %v9320_v4  ;;  %v4875_v59 = vld [vmem:[%s19163_s5 + $0xe8] sm:$0xff]  ;;  %v4649_v15 = vld [vmem:[%s19162_s4 + $0xd8] sm:$0xff] }
 0x520   :  { %v3954_v38 = vmax.f32 %v3397_v5, %v3749_v17  ;;  %v9334_v62 = vpop.permute.xlu0 %9333  ;;  %v3953_v51 = vmax.f32 %v3429_v11, %v3781_v22  ;;  %v3955_v1 = vmax.f32 %v3365_v7, %v3845_v40  ;;  %v4273_v61 = vpop.f32.mrf.mxu0  ;;  %v3814_v16 = vsel %vm2699_vm10, %v9340_v30, %v9341_v44 }
 0x521   :  { %v17005_v47 = vpop.permute.xlu1 %9348  ;;  %v9336_v3 = vunpack.i.h.bf16 %v9334_v62  ;;  %v9335_v28 = vunpack.i.l.bf16 %v9334_v62  ;;  %v4498_v31 = vpop.f32.mrf.mxu1 }
 0x522   :  { %5035 = vperm.xlu1 %7526, %v4877_v46   ;;  %4801 = vperm.xlu0 %7525, %v4651_v25   ;;  %v4081_v9 = vmax.f32 %v16229_v57, %v3953_v51  ;;  %v4083_v4 = vmax.f32 %v16239_v37, %v3955_v1  ;;  %v17009_v8 = vadd.f32 %v4498_v31, %v4273_v61  ;;  %v4275_v52 = vpop.f32.mrf.mxu0  ;;  %v9351_v22 = vunpack.i.h.bf16 %v17005_v47  ;;  %v21389_v31 = vld [vmem:[#allocation98_spill] sm:$0xff] }
 0x523   :  { %v4082_v60 = vmax.f32 %v16232_v27, %v3954_v38  ;;  %v4500_v29 = vpop.f32.mrf.mxu1  ;;  %v3462_v57 = vsel %vm2314_vm9, %v9336_v3, %v9330_v33  ;;  %v3430_v27 = vsel %vm2314_vm9, %v9330_v33, %v9331_v10  ;;  %v3398_v39 = vsel %vm2314_vm9, %v9331_v10, %v9335_v28  ;;  %v4874_v52 = vld [vmem:[%s19163_s5 + $0xe0] sm:$0xff] }
 0x524   :  { %v9344_v21 = vpop.permute.xlu0 %9343  ;;  %4361 = vmatprep.mubr.f32.mxu0 %v4081_v9  ;;  %4586 = vmatprep.mubr.f32.mxu1 %v4083_v4  ;;  %v3366_v53 = vsel %vm2314_vm9, %v9335_v28, %v9336_v3  ;;  %v3956_v7 = vmax.f32 %v3462_v57, %v3814_v16  ;;  %v9350_v40 = vunpack.i.l.bf16 %v17005_v47  ;;  %v21388_v3 = vld [vmem:[#allocation196_spill] sm:$0xff]  ;;  %v21390_v47 = vld [vmem:[#allocation123_spill] sm:$0xff] }
 0x525   :  { %v9359_v37 = vpop.permute.xlu1 %9358  ;;  %v9346_v48 = vunpack.i.h.bf16 %v9344_v21  ;;  %v9345_v26 = vunpack.i.l.bf16 %v9344_v21  ;;  %4362 = vmatmul.mubr.f32.gmra.mxu0 %v4080_v42  ;;  %4587 = vmatmul.mubr.f32.gmra.mxu1 %v4082_v60  ;;  %v4648_v42 = vld [vmem:[%s19162_s4 + $0xd0] sm:$0xff] }
 0x526   :  { %5030 = vperm.xlu1 %7526, %v4876_v32   ;;  %4796 = vperm.xlu0 %7525, %v4650_v2   ;;  %v9361_v23 = vunpack.i.h.bf16 %v9359_v37  ;;  %v9360_v1 = vunpack.i.l.bf16 %v9359_v37  ;;  %v4084_v9 = vmax.f32 %v21389_v31, %v3956_v7  ;;  %v3431_v57 = vsel %vm2314_vm9, %v9350_v40, %v9351_v22  ;;  %v4646_v31 = vld [vmem:[%s19162_s4 + $0xc0] sm:$0xff] }
 0x527   :  { %v3750_v24 = vsel %vm2699_vm10, %v9345_v26, %v9346_v48  ;;  %v3782_v11 = vsel %vm2699_vm10, %v9341_v44, %v9345_v26  ;;  %v3846_v5 = vsel %vm2699_vm10, %v9346_v48, %v9340_v30 }
 0x528   :  { %v3958_v63 = vmax.f32 %v3398_v39, %v3750_v24  ;;  %v9354_v17 = vpop.permute.xlu0 %9353  ;;  %v3957_v46 = vmax.f32 %v3430_v27, %v3782_v11  ;;  %v3959_v25 = vmax.f32 %v3366_v53, %v3846_v5  ;;  %v4278_v51 = vpop.f32.mrf.mxu0  ;;  %v3815_v26 = vsel %vm2699_vm10, %v9360_v1, %v9361_v23  ;;  %v4873_v39 = vld [vmem:[%s19163_s5 + $0xd8] sm:$0xff]  ;;  %v4647_v53 = vld [vmem:[%s19162_s4 + $0xc8] sm:$0xff] }
 0x529   :  { %v17043_v38 = vpop.permute.xlu1 %9368  ;;  %v9356_v62 = vunpack.i.h.bf16 %v9354_v17  ;;  %v9355_v10 = vunpack.i.l.bf16 %v9354_v17  ;;  %v4503_v33 = vpop.f32.mrf.mxu1 }
 0x52a   :  { %5025 = vperm.xlu1 %7526, %v4875_v59   ;;  %4791 = vperm.xlu0 %7525, %v4649_v15   ;;  %v4085_v44 = vmax.f32 %v16309_v34, %v3957_v46  ;;  %v4087_v61 = vmax.f32 %v21388_v3, %v3959_v25  ;;  %v17047_v30 = vadd.f32 %v4503_v33, %v4278_v51  ;;  %v4280_v28 = vpop.f32.mrf.mxu0  ;;  %v9370_v17 = vunpack.i.l.bf16 %v17043_v38 }
 0x52b   :  { %v4086_v4 = vmax.f32 %v21390_v47, %v3958_v63  ;;  %v4505_v60 = vpop.f32.mrf.mxu1  ;;  %v3463_v34 = vsel %vm2314_vm9, %v9356_v62, %v9350_v40  ;;  %v3399_v37 = vsel %vm2314_vm9, %v9351_v22, %v9355_v10  ;;  %v3367_v48 = vsel %vm2314_vm9, %v9355_v10, %v9356_v62  ;;  %v4872_v28 = vld [vmem:[%s19163_s5 + $0xd0] sm:$0xff] }
 0x52c   :  { %v9364_v32 = vpop.permute.xlu0 %9363  ;;  %4366 = vmatprep.mubr.f32.mxu0 %v4085_v44  ;;  %4591 = vmatprep.mubr.f32.mxu1 %v4087_v61  ;;  %v3960_v59 = vmax.f32 %v3463_v34, %v3815_v26  ;;  %v9371_v63 = vunpack.i.h.bf16 %v17043_v38  ;;  %v21391_v38 = vld [vmem:[#allocation192_spill] sm:$0xff] }
 0x52d   :  { %v9379_v2 = vpop.permute.xlu1 %9378  ;;  %v9366_v29 = vunpack.i.h.bf16 %v9364_v32  ;;  %v9365_v21 = vunpack.i.l.bf16 %v9364_v32  ;;  %4367 = vmatmul.mubr.f32.gmra.mxu0 %v4084_v9  ;;  %4592 = vmatmul.mubr.f32.gmra.mxu1 %v4086_v4 }
 0x52e   :  { %5020 = vperm.xlu1 %7526, %v4874_v52   ;;  %4786 = vperm.xlu0 %7525, %v4648_v42   ;;  %v9381_v46 = vunpack.i.h.bf16 %v9379_v2  ;;  %v9380_v62 = vunpack.i.l.bf16 %v9379_v2  ;;  %v4088_v3 = vmax.f32 %v16370_v43, %v3960_v59  ;;  %v3432_v52 = vsel %vm2314_vm9, %v9370_v17, %v9371_v63  ;;  %v4871_v2 = vld [vmem:[%s19163_s5 + $0xc8] sm:$0xff] }
 0x52f   :  { %v3751_v27 = vsel %vm2699_vm10, %v9365_v21, %v9366_v29  ;;  %v3783_v16 = vsel %vm2699_vm10, %v9361_v23, %v9365_v21  ;;  %v3847_v24 = vsel %vm2699_vm10, %v9366_v29, %v9360_v1  ;;  %v4645_v29 = vld [vmem:[%s19162_s4 + $0xb8] sm:$0xff] }
 0x530   :  { %v3962_v15 = vmax.f32 %v3399_v37, %v3751_v27  ;;  %v9374_v11 = vpop.permute.xlu0 %9373  ;;  %v3961_v5 = vmax.f32 %v3431_v57, %v3783_v16  ;;  %v3963_v7 = vmax.f32 %v3367_v48, %v3847_v24  ;;  %v4283_v40 = vpop.f32.mrf.mxu0  ;;  %v3816_v32 = vsel %vm2699_vm10, %v9380_v62, %v9381_v46 }
 0x531   :  { %v17081_v25 = vpop.permute.xlu1 %9388  ;;  %v9376_v22 = vunpack.i.h.bf16 %v9374_v11  ;;  %v9375_v51 = vunpack.i.l.bf16 %v9374_v11  ;;  %v4508_v23 = vpop.f32.mrf.mxu1 }
 0x532   :  { %5015 = vperm.xlu1 %7526, %v4873_v39   ;;  %4781 = vperm.xlu0 %7525, %v4647_v53   ;;  %v4089_v1 = vmax.f32 %v16377_v13, %v3961_v5  ;;  %v4091_v10 = vmax.f32 %v16381_v18, %v3963_v7  ;;  %v17085_v33 = vadd.f32 %v4508_v23, %v4283_v40  ;;  %v4285_v44 = vpop.f32.mrf.mxu0  ;;  %v9391_v53 = vunpack.i.h.bf16 %v17081_v25  ;;  %v21392_v7 = vld [vmem:[#allocation197_spill] sm:$0xff] }
 0x533   :  { %v4090_v61 = vmax.f32 %v21391_v38, %v3962_v15  ;;  %v4510_v9 = vpop.f32.mrf.mxu1  ;;  %v3464_v13 = vsel %vm2314_vm9, %v9376_v22, %v9370_v17  ;;  %v3400_v42 = vsel %vm2314_vm9, %v9371_v63, %v9375_v51  ;;  %v3368_v60 = vsel %vm2314_vm9, %v9375_v51, %v9376_v22 }
 0x534   :  { %v9384_v47 = vpop.permute.xlu0 %9383  ;;  %4371 = vmatprep.mubr.f32.mxu0 %v4089_v1  ;;  %4596 = vmatprep.mubr.f32.mxu1 %v4091_v10  ;;  %v3964_v37 = vmax.f32 %v3464_v13, %v3816_v32  ;;  %v9390_v16 = vunpack.i.l.bf16 %v17081_v25  ;;  %v4870_v25 = vld [vmem:[%s19163_s5 + $0xc0] sm:$0xff] }
 0x535   :  { %v9399_v18 = vpop.permute.xlu1 %9398  ;;  %v9386_v4 = vunpack.i.h.bf16 %v9384_v47  ;;  %v9385_v43 = vunpack.i.l.bf16 %v9384_v47  ;;  %4372 = vmatmul.mubr.f32.gmra.mxu0 %v4088_v3  ;;  %4597 = vmatmul.mubr.f32.gmra.mxu1 %v4090_v61 }
 0x536   :  { %5010 = vperm.xlu1 %7526, %v4872_v28   ;;  %4776 = vperm.xlu0 %7525, %v4646_v31   ;;  %v9401_v24 = vunpack.i.h.bf16 %v9399_v18  ;;  %v9400_v11 = vunpack.i.l.bf16 %v9399_v18  ;;  %v4869_v28 = vld [vmem:[%s19163_s5 + $0xb8] sm:$0xff]  ;;  %v4643_v31 = vld [vmem:[%s19162_s4 + $0xa8] sm:$0xff] }
 0x537   :  { %v3752_v34 = vsel %vm2699_vm10, %v9385_v43, %v9386_v4  ;;  %v3784_v21 = vsel %vm2699_vm10, %v9381_v46, %v9385_v43  ;;  %v3848_v57 = vsel %vm2699_vm10, %v9386_v4, %v9380_v62  ;;  %v21393_v46 = vld [vmem:[#allocation134_spill] sm:$0xff]  ;;  %v4644_v62 = vld [vmem:[%s19162_s4 + $0xb0] sm:$0xff] }
 0x538   :  { %v3966_v48 = vmax.f32 %v3400_v42, %v3752_v34  ;;  %v9394_v26 = vpop.permute.xlu0 %9393  ;;  %v3965_v27 = vmax.f32 %v3432_v52, %v3784_v21  ;;  %v3967_v39 = vmax.f32 %v3368_v60, %v3848_v57  ;;  %v4092_v22 = vmax.f32 %v21393_v46, %v3964_v37 }
 0x539   :  { %v17119_v59 = vpop.permute.xlu1 %9408  ;;  %v9396_v15 = vunpack.i.h.bf16 %v9394_v26  ;;  %v9395_v5 = vunpack.i.l.bf16 %v9394_v26  ;;  %v3817_v38 = vsel %vm2699_vm10, %v9400_v11, %v9401_v24 }
 0x53a   :  { %5005 = vperm.xlu1 %7526, %v4871_v2   ;;  %4771 = vperm.xlu0 %7525, %v4645_v29   ;;  %v4093_v63 = vmax.f32 %v21392_v7, %v3965_v27  ;;  %v4095_v17 = vmax.f32 %v16462_v55, %v3967_v39  ;;  %v4094_v40 = vmax.f32 %v16459_v50, %v3966_v48  ;;  %v9411_v18 = vunpack.i.h.bf16 %v17119_v59 }
 0x53b   :  { %v3465_v23 = vsel %vm2314_vm9, %v9396_v15, %v9390_v16  ;;  %v3433_v50 = vsel %vm2314_vm9, %v9390_v16, %v9391_v53  ;;  %v3401_v10 = vsel %vm2314_vm9, %v9391_v53, %v9395_v5  ;;  %v3369_v3 = vsel %vm2314_vm9, %v9395_v5, %v9396_v15  ;;  %v21394_v53 = vld [vmem:[#allocation54_spill] sm:$0xff]  ;;  %v4868_v15 = vld [vmem:[%s19163_s5 + $0xb0] sm:$0xff] }
 0x53c   :  { %v9404_v51 = vpop.permute.xlu0 %9403  ;;  %4376 = vmatprep.mubr.f32.mxu0 %v4093_v63  ;;  %4601 = vmatprep.mubr.f32.mxu1 %v4095_v17  ;;  %v3968_v13 = vmax.f32 %v3465_v23, %v3817_v38  ;;  %v9410_v60 = vunpack.i.l.bf16 %v17119_v59 }
 0x53d   :  { %v9406_v1 = vunpack.i.h.bf16 %v9404_v51  ;;  %v9405_v55 = vunpack.i.l.bf16 %v9404_v51  ;;  %4377 = vmatmul.mubr.f32.gmra.mxu0 %v4092_v22  ;;  %4602 = vmatmul.mubr.f32.gmra.mxu1 %v4094_v40  ;;  %v9419_v44 = vpop.permute.xlu1 %9418 }
 0x53e   :  { %5000 = vperm.xlu1 %7526, %v4870_v25   ;;  %4766 = vperm.xlu0 %7525, %v4644_v62   ;;  %v9421_v32 = vunpack.i.h.bf16 %v9419_v44  ;;  %v9420_v34 = vunpack.i.l.bf16 %v9419_v44  ;;  %v4096_v16 = vmax.f32 %v21394_v53, %v3968_v13  ;;  %v3434_v63 = vsel %vm2314_vm9, %v9410_v60, %v9411_v18  ;;  %v4867_v25 = vld [vmem:[%s19163_s5 + $0xa8] sm:$0xff]  ;;  %v4641_v62 = vld [vmem:[%s19162_s4 + $0x98] sm:$0xff] }
 0x53f   :  { %v3753_v61 = vsel %vm2699_vm10, %v9405_v55, %v9406_v1  ;;  %v3785_v9 = vsel %vm2699_vm10, %v9401_v24, %v9405_v55  ;;  %v3849_v47 = vsel %vm2699_vm10, %v9406_v1, %v9400_v11  ;;  %v21395_v24 = vld [vmem:[#allocation112_spill] sm:$0xff]  ;;  %v4642_v11 = vld [vmem:[%s19162_s4 + $0xa0] sm:$0xff] }
 0x540   :  { %v3970_v4 = vmax.f32 %v3401_v10, %v3753_v61  ;;  %v9414_v43 = vpop.permute.xlu0 %9413  ;;  %v3969_v52 = vmax.f32 %v3433_v50, %v3785_v9  ;;  %v3971_v42 = vmax.f32 %v3369_v3, %v3849_v47  ;;  %v3818_v22 = vsel %vm2699_vm10, %v9420_v34, %v9421_v32  ;;  %v21396_v9 = vld [vmem:[#allocation52_spill] sm:$0xff] }
 0x541   :  { %v9416_v2 = vunpack.i.h.bf16 %v9414_v43  ;;  %v4288_v29 = vpop.f32.mrf.mxu0  ;;  %v4513_v21 = vpop.f32.mrf.mxu1  ;;  %v9415_v57 = vunpack.i.l.bf16 %v9414_v43 }
 0x542   :  { %v17155_v37 = vadd.f32 %v4513_v21, %v4288_v29  ;;  %4995 = vperm.xlu1 %7526, %v4869_v28   ;;  %4761 = vperm.xlu0 %7525, %v4643_v31   ;;  %v4097_v48 = vmax.f32 %v16512_v36, %v3969_v52  ;;  %v4099_v26 = vmax.f32 %v16537_v41, %v3971_v42  ;;  %v4866_v52 = vld [vmem:[%s19163_s5 + $0xa0] sm:$0xff]  ;;  %v4640_v42 = vld [vmem:[%s19162_s4 + $0x90] sm:$0xff] }
 0x543   :  { %v4290_v27 = vpop.f32.mrf.mxu0  ;;  %v4515_v39 = vpop.f32.mrf.mxu1  ;;  %v4098_v59 = vmax.f32 %v21395_v24, %v3970_v4  ;;  %v3466_v36 = vsel %vm2314_vm9, %v9416_v2, %v9410_v60  ;;  %v3402_v17 = vsel %vm2314_vm9, %v9411_v18, %v9415_v57  ;;  %v3370_v46 = vsel %vm2314_vm9, %v9415_v57, %v9416_v2  ;;  %v21397_v4 = vld [vmem:[#allocation41_spill] sm:$0xff] }
 0x544   :  { %v9424_v5 = vpop.permute.xlu0 %9423  ;;  %4381 = vmatprep.mubr.f32.mxu0 %v4097_v48  ;;  %4606 = vmatprep.mubr.f32.mxu1 %v4099_v26  ;;  %v3972_v1 = vmax.f32 %v3466_v36, %v3818_v22  ;;  %v4865_v27 = vld [vmem:[%s19163_s5 + $0x98] sm:$0xff]  ;;  %v4639_v39 = vld [vmem:[%s19162_s4 + $0x88] sm:$0xff] }
 0x545   :  { %v9426_v41 = vunpack.i.h.bf16 %v9424_v5  ;;  %v9425_v7 = vunpack.i.l.bf16 %v9424_v5  ;;  %4382 = vmatmul.mubr.f32.gmra.mxu0 %v4096_v16  ;;  %4607 = vmatmul.mubr.f32.gmra.mxu1 %v4098_v59 }
 0x546   :  { %4990 = vperm.xlu1 %7526, %v4868_v15   ;;  %4756 = vperm.xlu0 %7525, %v4642_v11   ;;  %v4100_v43 = vmax.f32 %v21397_v4, %v3972_v1  ;;  %v5259_v4 = vld [vmem:[%s19164_s7 + $0xe8] sm:$0xff] }
 0x547   :  { %v3754_v40 = vsel %vm2699_vm10, %v9425_v7, %v9426_v41  ;;  %v3786_v51 = vsel %vm2699_vm10, %v9421_v32, %v9425_v7  ;;  %v3850_v23 = vsel %vm2699_vm10, %v9426_v41, %v9420_v34 }
 0x548   :  { %v3974_v55 = vmax.f32 %v3402_v17, %v3754_v40  ;;  %v9429_v50 = vpop.permute.xlu1 %9428  ;;  %v9434_v10 = vpop.permute.xlu0 %9433  ;;  %v3973_v44 = vmax.f32 %v3434_v63, %v3786_v51  ;;  %v3975_v3 = vmax.f32 %v3370_v46, %v3850_v23  ;;  %v21398_v40 = vld [vmem:[#allocation100_spill] sm:$0xff]  ;;  %v4638_v23 = vld [vmem:[%s19162_s4 + $0x80] sm:$0xff] }
 0x549   :  { %v9431_v38 = vunpack.i.h.bf16 %v9429_v50  ;;  %v9430_v61 = vunpack.i.l.bf16 %v9429_v50  ;;  %v9435_v28 = vunpack.i.l.bf16 %v9434_v10  ;;  %v9436_v31 = vunpack.i.h.bf16 %v9434_v10  ;;  %v4864_v51 = vld [vmem:[%s19163_s5 + $0x90] sm:$0xff]  ;;  %v5261_v50 = vld [vmem:[%s19164_s7 + $0xf8] sm:$0xff] }
 0x54a   :  { %4985 = vperm.xlu1 %7526, %v4867_v25   ;;  %4751 = vperm.xlu0 %7525, %v4641_v62   ;;  %v4101_v47 = vmax.f32 %v21396_v9, %v3973_v44  ;;  %v4103_v13 = vmax.f32 %v16575_v49, %v3975_v3  ;;  %v4102_v18 = vmax.f32 %v16570_v45, %v3974_v55  ;;  %v5245_v10 = vld [vmem:[%s19164_s7 + $0x78] sm:$0xff]  ;;  %v5260_v9 = vld [vmem:[%s19164_s7 + $0xf0] sm:$0xff] }
 0x54b   :  { %v3403_v60 = vsel %vm2314_vm9, %v9431_v38, %v9435_v28  ;;  %v3435_v21 = vsel %vm2314_vm9, %v9430_v61, %v9431_v38  ;;  %v3371_v57 = vsel %vm2314_vm9, %v9435_v28, %v9436_v31  ;;  %v3467_v48 = vsel %vm2314_vm9, %v9436_v31, %v9430_v61 }
 0x54c   :  { %v9439_v32 = vpop.permute.xlu1 %9438  ;;  %v9444_v34 = vpop.permute.xlu0 %9443  ;;  %4386 = vmatprep.mubr.f32.mxu0 %v4101_v47  ;;  %4611 = vmatprep.mubr.f32.mxu1 %v4103_v13  ;;  %v5244_v47 = vld [vmem:[%s19164_s7 + $0x70] sm:$0xff] }
 0x54d   :  { %v9441_v49 = vunpack.i.h.bf16 %v9439_v32  ;;  %v9440_v2 = vunpack.i.l.bf16 %v9439_v32  ;;  %v9446_v45 = vunpack.i.h.bf16 %v9444_v34  ;;  %v9445_v29 = vunpack.i.l.bf16 %v9444_v34  ;;  %4387 = vmatmul.mubr.f32.gmra.mxu0 %v4100_v43  ;;  %4612 = vmatmul.mubr.f32.gmra.mxu1 %v4102_v18  ;;  %v5243_v43 = vld [vmem:[%s19164_s7 + $0x68] sm:$0xff]  ;;  %v5242_v32 = vld [vmem:[%s19164_s7 + $0x60] sm:$0xff] }
 0x54e   :  { %4980 = vperm.xlu1 %7526, %v4866_v52   ;;  %4746 = vperm.xlu0 %7525, %v4640_v42  }
 0x54f   :  { %v3755_v26 = vsel %vm2699_vm10, %v9445_v29, %v9446_v45  ;;  %v3787_v53 = vsel %vm2699_vm10, %v9441_v49, %v9445_v29  ;;  %v3851_v16 = vsel %vm2699_vm10, %v9446_v45, %v9440_v2  ;;  %v3819_v24 = vsel %vm2699_vm10, %v9440_v2, %v9441_v49  ;;  %v5257_v49 = vld [vmem:[%s19164_s7 + $0xd8] sm:$0xff] }
 0x550   :  { %v3978_v59 = vmax.f32 %v3403_v60, %v3755_v26  ;;  %v3977_v15 = vmax.f32 %v3435_v21, %v3787_v53  ;;  %v3979_v11 = vmax.f32 %v3371_v57, %v3851_v16  ;;  %v3976_v5 = vmax.f32 %v3467_v48, %v3819_v24  ;;  %v4293_v36 = vpop.f32.mrf.mxu0  ;;  %v5258_v60 = vld [vmem:[%s19164_s7 + $0xe0] sm:$0xff]  ;;  %v5241_v2 = vld [vmem:[%s19164_s7 + $0x58] sm:$0xff]  ;;  %v5255_v24 = vld [vmem:[%s19164_s7 + $0xc8] sm:$0xff] }
 0x551   :  { %v4518_v41 = vpop.f32.mrf.mxu1 }
 0x552   :  { %v17221_v7 = vadd.f32 %v4518_v41, %v4293_v36  ;;  %4975 = vperm.xlu1 %7526, %v4865_v27   ;;  %4741 = vperm.xlu0 %7525, %v4639_v39   ;;  %v4105_v63 = vmax.f32 %v16618_v19, %v3977_v15  ;;  %v4107_v17 = vmax.f32 %v16624_v12, %v3979_v11  ;;  %v4295_v46 = vpop.f32.mrf.mxu0  ;;  %v4863_v19 = vld [vmem:[%s19163_s5 + $0x88] sm:$0xff]  ;;  %v4862_v12 = vld [vmem:[%s19163_s5 + $0x80] sm:$0xff]  ;;  %v5256_v27 = vld [vmem:[%s19164_s7 + $0xd0] sm:$0xff] }
 0x553   :  { %v4520_v22 = vpop.f32.mrf.mxu1  ;;  %v4104_v25 = vmax.f32 %v21398_v40, %v3976_v5  ;;  %v4106_v62 = vmax.f32 %v21399_v0, %v3978_v59  ;;  %v5240_v39 = vld [vmem:[%s19164_s7 + $0x50] sm:$0xff]  ;;  %v5239_v59 = vld [vmem:[%s19164_s7 + $0x48] sm:$0xff]  ;;  %v5254_v11 = vld [vmem:[%s19164_s7 + $0xc0] sm:$0xff] }
 0x554   :  { %4391 = vmatprep.mubr.f32.mxu0 %v4105_v63  ;;  %4616 = vmatprep.mubr.f32.mxu1 %v4107_v17  ;;  %v5238_v5 = vld [vmem:[%s19164_s7 + $0x40] sm:$0xff]  ;;  %v5253_v63 = vld [vmem:[%s19164_s7 + $0xb8] sm:$0xff] }
 0x555   :  { %4392 = vmatmul.mubr.f32.gmra.mxu0 %v4104_v25  ;;  %4617 = vmatmul.mubr.f32.gmra.mxu1 %v4106_v62  ;;  %v5237_v17 = vld [vmem:[%s19164_s7 + $0x38] sm:$0xff]  ;;  %v5252_v62 = vld [vmem:[%s19164_s7 + $0xb0] sm:$0xff] }
 0x556   :  { %4970 = vperm.xlu1 %7526, %v4864_v51   ;;  %4736 = vperm.xlu0 %7525, %v4638_v23   ;;  %v5236_v51 = vld [vmem:[%s19164_s7 + $0x30] sm:$0xff] }
 0x559   :  { %v17239_v1 = vpop.permute.xlu1 %4731  ;;  %v17241_v55 = vpop.permute.xlu0 %4726 }
 0x55a   :  { %4965 = vperm.xlu1 %7526, %v4863_v19   ;;  %4960 = vperm.xlu0 %7525, %v4862_v12   ;;  %v5251_v19 = vld [vmem:[%s19164_s7 + $0xa8] sm:$0xff] }
 0x55b   :  { %v5235_v12 = vld [vmem:[%s19164_s7 + $0x28] sm:$0xff] }
 0x55d   :  { %v17249_v44 = vpop.f32.mrf.mxu0  ;;  %v17251_v3 = vpop.f32.mrf.mxu1 }
 0x55e   :  { %v17253_v38 = vpop.permute.xlu1 %4955  ;;  %v17255_v61 = vpop.permute.xlu0 %4721  ;;  %5451 = vperm.xlu1 %7526, %v5261_v50   ;;  %5371 = vperm.xlu0 %7525, %v5245_v10  }
 0x55f   :  { %v4300_v28 = vpop.f32.mrf.mxu0  ;;  %v4525_v31 = vpop.f32.mrf.mxu1 }
 0x560   :  { %v5250_v28 = vld [vmem:[%s19164_s7 + $0xa0] sm:$0xff] }
 0x561   :  { %v5234_v31 = vld [vmem:[%s19164_s7 + $0x20] sm:$0xff] }
 0x562   :  { %v17263_v13 = vpop.permute.xlu1 %4950  ;;  %v17265_v18 = vpop.permute.xlu0 %4716  ;;  %5446 = vperm.xlu1 %7526, %v5260_v9   ;;  %5366 = vperm.xlu0 %7525, %v5244_v47  }
 0x566   :  { %v17273_v52 = vpop.permute.xlu1 %4945  ;;  %v17275_v42 = vpop.permute.xlu0 %4711  ;;  %5441 = vperm.xlu1 %7526, %v5259_v4   ;;  %5361 = vperm.xlu0 %7525, %v5243_v43   ;;  %v5249_v4 = vld [vmem:[%s19164_s7 + $0x98] sm:$0xff] }
 0x567   :  { %v5233_v43 = vld [vmem:[%s19164_s7 + $0x18] sm:$0xff] }
 0x56a   :  { %v17283_v34 = vpop.permute.xlu1 %4940  ;;  %5436 = vperm.xlu1 %7526, %v5258_v60   ;;  %5356 = vperm.xlu0 %7525, %v5242_v32   ;;  %v17291_v45 = vpop.permute.xlu0 %4706 }
 0x56c   :  { %v4303_v29 = vpop.f32.mrf.mxu0 }
 0x56d   :  { %v4528_v21 = vpop.f32.mrf.mxu1 }
 0x56e   :  { %v17293_v57 = vpop.permute.xlu1 %4935  ;;  %5431 = vperm.xlu1 %7526, %v5257_v49   ;;  %5351 = vperm.xlu0 %7525, %v5241_v2   ;;  %v4305_v48 = vpop.f32.mrf.mxu0  ;;  %v4529_v60 = vadd.f32 %v4528_v21, %v4303_v29 }
 0x56f   :  { %v4530_v26 = vpop.f32.mrf.mxu1  ;;  %v17301_v53 = vpop.permute.xlu0 %4701 }
 0x570   :  { %v4827_v29 = vmul.f32 %v17255_v61, %v4529_v60 }
 0x572   :  { %v17303_v16 = vpop.permute.xlu1 %4930  ;;  %5426 = vperm.xlu1 %7526, %v5256_v27   ;;  %5346 = vperm.xlu0 %7525, %v5240_v39  }
 0x573   :  { %v17319_v36 = vpop.permute.xlu0 %4696 }
 0x576   :  { %v17311_v15 = vpop.permute.xlu1 %4925  ;;  %5421 = vperm.xlu1 %7526, %v5255_v24   ;;  %5341 = vperm.xlu0 %7525, %v5239_v59   ;;  %v5248_v24 = vld [vmem:[%s19164_s7 + $0x90] sm:$0xff] }
 0x577   :  { %v17329_v40 = vpop.permute.xlu0 %4691  ;;  %v5232_v59 = vld [vmem:[%s19164_s7 + $0x10] sm:$0xff] }
 0x57a   :  { %v17321_v41 = vpop.permute.xlu1 %4920  ;;  %5416 = vperm.xlu1 %7526, %v5254_v11   ;;  %5336 = vperm.xlu0 %7525, %v5238_v5  }
 0x57b   :  { %v17345_v50 = vpop.permute.xlu0 %4686 }
 0x57c   :  { %v4308_v46 = vpop.f32.mrf.mxu0 }
 0x57d   :  { %v4533_v22 = vpop.f32.mrf.mxu1 }
 0x57e   :  { %5411 = vperm.xlu1 %7526, %v5253_v63   ;;  %5331 = vperm.xlu0 %7525, %v5237_v17   ;;  %v4310_v25 = vpop.f32.mrf.mxu0  ;;  %v17337_v23 = vpop.permute.xlu1 %4915  ;;  %v4534_v9 = vadd.f32 %v4533_v22, %v4308_v46  ;;  %v5247_v46 = vld [vmem:[%s19164_s7 + $0x88] sm:$0xff]  ;;  %v5051_v22 = vadd.f32 %v17273_v52, %v4827_v29  ;;  %v4824_v52 = vmul.f32 %v17291_v45, %v17155_v37  ;;  %v5293_v37 = vld [vmem:[%s19164_s7 + $0x1f8] sm:$0xff] }
 0x57f   :  { %v4535_v0 = vpop.f32.mrf.mxu1  ;;  %v17355_v47 = vpop.permute.xlu0 %4681 }
 0x580   :  { %v4828_v48 = vmul.f32 %v17241_v55, %v4534_v9  ;;  %v4524_v55 = vadd.f32 %v17251_v3, %v17249_v44  ;;  %v5231_v44 = vld [vmem:[%s19164_s7 + $0x8] sm:$0xff]  ;;  %v4825_v3 = vmul.f32 %v17275_v42, %v17221_v7  ;;  %v21400_v0 = vmov 0.0  }
 0x582   :  { %5406 = vperm.xlu1 %7526, %v5252_v62   ;;  %5326 = vperm.xlu0 %7525, %v5236_v51   ;;  %v17347_v10 = vpop.permute.xlu1 %4910  ;;  %v5052_v5 = vadd.f32 %v17263_v13, %v4828_v48  ;;  %v4826_v61 = vmul.f32 %v17265_v18, %v4524_v55  ;;  %v5246_v18 = vld [vmem:[%s19164_s7 + $0x80] sm:$0xff]  ;;  %v5083_v62 = vmax.f32 %v5051_v22, 0.0  ;;  %v5049_v7 = vadd.f32 %v17293_v57, %v4825_v3 }
 0x583   :  { %v17373_v21 = vpop.permute.xlu0 %4676  ;;  %v4822_v57 = vmul.f32 %v17319_v36, %v17047_v30 }
 0x584   :  { %v5084_v13 = vmax.f32 %v5052_v5, 0.0  ;;  %v5081_v45 = vmax.f32 %v5049_v7, 0.0 }
 0x586   :  { %5401 = vperm.xlu1 %7526, %v5251_v19   ;;  %5321 = vperm.xlu0 %7525, %v5235_v12   ;;  %v17363_v32 = vpop.permute.xlu1 %4905  ;;  %v4823_v19 = vmul.f32 %v17301_v53, %v17085_v33  ;;  %v5048_v12 = vadd.f32 %v17303_v16, %v4824_v52  ;;  %v5277_v33 = vld [vmem:[%s19164_s7 + $0x178] sm:$0xff] }
 0x587   :  { %v17393_v25 = vpop.permute.xlu0 %4671 }
 0x588   :  { %v5080_v9 = vmax.f32 %v5048_v12, 0.0  ;;  %v5272_v12 = vld [vmem:[%s19164_s7 + $0x150] sm:$0xff] }
 0x58a   :  { %5396 = vperm.xlu1 %7526, %v5250_v28   ;;  %5316 = vperm.xlu0 %7525, %v5234_v31   ;;  %v17379_v63 = vpop.permute.xlu1 %4900  ;;  %v5047_v28 = vadd.f32 %v17311_v15, %v4823_v19 }
 0x58b   :  { %v4667_v31 = vpop.permute.xlu0 %4666 }
 0x58c   :  { %v4313_v49 = vpop.f32.mrf.mxu0 }
 0x58d   :  { %v4538_v2 = vpop.f32.mrf.mxu1 }
 0x58e   :  { %v4539_v26 = vadd.f32 %v4538_v2, %v4313_v49  ;;  %5391 = vperm.xlu1 %7526, %v5249_v4   ;;  %5311 = vperm.xlu0 %7525, %v5233_v43   ;;  %v4315_v27 = vpop.f32.mrf.mxu0  ;;  %v17402_v42 = vpop.permute.xlu1 %4895  ;;  %v4821_v4 = vmul.f32 %v17329_v40, %v17009_v8  ;;  %v5046_v43 = vadd.f32 %v17321_v41, %v4822_v57  ;;  %v5292_v49 = vld [vmem:[%s19164_s7 + $0x1f0] sm:$0xff]  ;;  %v5079_v2 = vmax.f32 %v5047_v28, 0.0  ;;  %v5271_v57 = vld [vmem:[%s19164_s7 + $0x148] sm:$0xff] }
 0x58f   :  { %v4540_v39 = vpop.f32.mrf.mxu1  ;;  %v4820_v8 = vmul.f32 %v17345_v50, %v16955_v6  ;;  %v5276_v40 = vld [vmem:[%s19164_s7 + $0x170] sm:$0xff]  ;;  %v5291_v6 = vld [vmem:[%s19164_s7 + $0x1e8] sm:$0xff]  ;;  %v4818_v50 = vmul.f32 %v17373_v21, %v16887_v56  ;;  %v5290_v21 = vld [vmem:[%s19164_s7 + $0x1e0] sm:$0xff] }
 0x590   :  { %v4829_v11 = vmul.f32 %v17239_v1, %v4539_v26  ;;  %v5045_v41 = vadd.f32 %v17337_v23, %v4821_v4  ;;  %v5078_v48 = vmax.f32 %v5046_v43, 0.0  ;;  %v4819_v26 = vmul.f32 %v17355_v47, %v16915_v14  ;;  %v4662_v39 = vpop.permute.xlu0 %4661  ;;  %v5275_v14 = vld [vmem:[%s19164_s7 + $0x168] sm:$0xff]  ;;  %v5270_v4 = vld [vmem:[%s19164_s7 + $0x140] sm:$0xff]  ;;  %v5285_v43 = vld [vmem:[%s19164_s7 + $0x1b8] sm:$0xff] }
 0x591   :  { %v5044_v27 = vadd.f32 %v17347_v10, %v4820_v8  ;;  %v5042_v55 = vadd.f32 %v17379_v63, %v4818_v50  ;;  %v5274_v63 = vld [vmem:[%s19164_s7 + $0x160] sm:$0xff] }
 0x592   :  { %v5053_v17 = vadd.f32 %v17253_v38, %v4829_v11  ;;  %5386 = vperm.xlu1 %7526, %v5248_v24   ;;  %5306 = vperm.xlu0 %7525, %v5232_v59   ;;  %v5050_v38 = vadd.f32 %v17283_v34, %v4826_v61  ;;  %v5230_v34 = vld [vmem:[%s19164_s7] sm:$0xff]  ;;  %v4891_v60 = vpop.permute.xlu1 %4890  ;;  %v5077_v23 = vmax.f32 %v5045_v41, 0.0  ;;  %v5043_v24 = vadd.f32 %v17363_v32, %v4819_v26  ;;  %v5283_v26 = vld [vmem:[%s19164_s7 + $0x1a8] sm:$0xff] }
 0x593   :  { %v5076_v29 = vmax.f32 %v5044_v27, 0.0  ;;  %v4817_v11 = vmul.f32 %v17393_v25, %v16831_v20  ;;  %v5074_v22 = vmax.f32 %v5042_v55, 0.0  ;;  %v5267_v27 = vld [vmem:[%s19164_s7 + $0x128] sm:$0xff] }
 0x594   :  { %v5085_v1 = vmax.f32 %v5053_v17, 0.0  ;;  %v5082_v51 = vmax.f32 %v5050_v38, 0.0  ;;  %v5075_v17 = vmax.f32 %v5043_v24, 0.0  ;;  %v4657_v61 = vpop.permute.xlu0 %4656 }
 0x595   :  { %v5041_v20 = vadd.f32 %v17402_v42, %v4817_v11 }
 0x596   :  { %5381 = vperm.xlu1 %7526, %v5247_v46   ;;  %5615 = vmatpush1.msra.mxu0 %v5085_v1  ;;  %v4886_v59 = vpop.permute.xlu1 %4885  ;;  %v4816_v46 = vmul.f32 %v4667_v31, %v16771_v58  ;;  %v4815_v1 = vmul.f32 %v4662_v39, %v16733_v35  ;;  %v5289_v58 = vld [vmem:[%s19164_s7 + $0x1d8] sm:$0xff] }
 0x597   :  { %5301 = vperm.xlu0 %7525, %v5231_v44   ;;  %5616 = vmatprep.subr.mxu0 %v21400_v0  ;;  %v5073_v38 = vmax.f32 %v5041_v20, 0.0  ;;  %v5273_v35 = vld [vmem:[%s19164_s7 + $0x158] sm:$0xff]  ;;  %v5279_v20 = vld [vmem:[%s19164_s7 + $0x188] sm:$0xff] }
 0x598   :  { %5617 = vmatpush1.msra.mxu0 %v5084_v13  ;;  %v5040_v44 = vadd.f32 %v4891_v60, %v4816_v46  ;;  %v4814_v13 = vmul.f32 %v4657_v61, %v16709_v54  ;;  %v5039_v25 = vadd.f32 %v4886_v59, %v4815_v1  ;;  %v5288_v54 = vld [vmem:[%s19164_s7 + $0x1d0] sm:$0xff]  ;;  %v5269_v60 = vld [vmem:[%s19164_s7 + $0x138] sm:$0xff]  ;;  %v5282_v59 = vld [vmem:[%s19164_s7 + $0x1a0] sm:$0xff]  ;;  %v17548_v46 = vpop.permute.xlu0 %4811 }
 0x599   :  { %5618 = vmatprep.subr.mxu0 %v21400_v0 }
 0x59a   :  { %5376 = vperm.xlu1 %7526, %v5246_v18   ;;  %5619 = vmatpush1.msra.mxu0 %v5083_v62  ;;  %v4881_v3 = vpop.permute.xlu1 %4880  ;;  %v5072_v62 = vmax.f32 %v5040_v44, 0.0  ;;  %v5071_v19 = vmax.f32 %v5039_v25, 0.0 }
 0x59b   :  { %5296 = vperm.xlu0 %7525, %v5230_v34   ;;  %5620 = vmatprep.subr.mxu0 %v21400_v0  ;;  %v5038_v7 = vadd.f32 %v4881_v3, %v4814_v13  ;;  %v5262_v13 = vld [vmem:[%s19164_s7 + $0x100] sm:$0xff] }
 0x59c   :  { %5621 = vmatpush1.msra.mxu0 %v5082_v51 }
 0x59d   :  { %v4318_v53 = vpop.f32.mrf.mxu0  ;;  %v4543_v16 = vpop.f32.mrf.mxu1  ;;  %5622 = vmatprep.subr.mxu0 %v21400_v0 }
 0x59e   :  { %v17425_v30 = vadd.f32 %v4543_v16, %v4318_v53  ;;  %5611 = vperm.xlu1 %7526, %v5293_v37   ;;  %5623 = vmatpush1.msra.mxu0 %v5081_v45  ;;  %v5070_v37 = vmax.f32 %v5038_v7, 0.0  ;;  %v5287_v45 = vld [vmem:[%s19164_s7 + $0x1c8] sm:$0xff]  ;;  %v17564_v25 = vpop.permute.xlu1 %5035 }
 0x59f   :  { %5531 = vperm.xlu0 %7525, %v5277_v33   ;;  %v4320_v15 = vpop.f32.mrf.mxu0  ;;  %v4545_v36 = vpop.f32.mrf.mxu1  ;;  %5624 = vmatprep.subr.mxu0 %v21400_v0 }
 0x5a0   :  { %5625 = vmatpush1.msra.mxu0 %v5080_v9  ;;  %v5286_v9 = vld [vmem:[%s19164_s7 + $0x1c0] sm:$0xff] }
 0x5a1   :  { %5626 = vmatprep.subr.mxu0 %v21400_v0 }
 0x5a2   :  { %5606 = vperm.xlu1 %7526, %v5292_v49   ;;  %5627 = vmatpush1.msra.mxu0 %v5079_v2  ;;  %v5103_v49 = vld [vmem:[%s19165_s6 + $0x8] sm:$0xff] }
 0x5a3   :  { %5526 = vperm.xlu0 %7525, %v5276_v40   ;;  %5628 = vmatprep.subr.mxu0 %v21400_v0  ;;  %v5284_v40 = vld [vmem:[%s19164_s7 + $0x1b0] sm:$0xff] }
 0x5a4   :  { %5629 = vmatpush1.msra.mxu0 %v5078_v48  ;;  %5678 = vmatprep.mubr.f32.mxu0 %v5103_v49  ;;  %v5268_v48 = vld [vmem:[%s19164_s7 + $0x130] sm:$0xff] }
 0x5a5   :  { %v4323_v10 = vpop.f32.mrf.mxu0  ;;  %v4548_v47 = vpop.f32.mrf.mxu1  ;;  %5630 = vmatprep.subr.mxu0 %v21400_v0 }
 0x5a6   :  { %v17455_v5 = vadd.f32 %v4548_v47, %v4323_v10  ;;  %5601 = vperm.xlu1 %7526, %v5291_v6   ;;  %5631 = vmatpush1.msra.mxu0 %v5077_v23  ;;  %v5281_v10 = vld [vmem:[%s19164_s7 + $0x198] sm:$0xff] }
 0x5a7   :  { %5521 = vperm.xlu0 %7525, %v5275_v14   ;;  %v4325_v56 = vpop.f32.mrf.mxu0  ;;  %v4550_v32 = vpop.f32.mrf.mxu1  ;;  %5632 = vmatprep.subr.mxu0 %v21400_v0  ;;  %v5266_v14 = vld [vmem:[%s19164_s7 + $0x120] sm:$0xff]  ;;  %v5265_v47 = vld [vmem:[%s19164_s7 + $0x118] sm:$0xff] }
 0x5a8   :  { %5633 = vmatpush1.msra.mxu0 %v5076_v29 }
 0x5a9   :  { %5634 = vmatprep.subr.mxu0 %v21400_v0 }
 0x5aa   :  { %5596 = vperm.xlu1 %7526, %v5290_v21   ;;  %5635 = vmatpush1.msra.mxu0 %v5075_v17  ;;  %v5280_v21 = vld [vmem:[%s19164_s7 + $0x190] sm:$0xff] }
 0x5ab   :  { %5516 = vperm.xlu0 %7525, %v5274_v63   ;;  %5636 = vmatprep.subr.mxu0 %v21400_v0  ;;  %v5264_v17 = vld [vmem:[%s19164_s7 + $0x110] sm:$0xff]  ;;  %v5263_v63 = vld [vmem:[%s19164_s7 + $0x108] sm:$0xff] }
 0x5ac   :  { %5637 = vmatpush1.msra.mxu0 %v5074_v22 }
 0x5ad   :  { %5638 = vmatprep.subr.mxu0 %v21400_v0  ;;  %v4328_v18 = vpop.f32.mrf.mxu0  ;;  %v4553_v52 = vpop.f32.mrf.mxu1 }
 0x5ae   :  { %v17477_v42 = vadd.f32 %v4553_v52, %v4328_v18  ;;  %5591 = vperm.xlu1 %7526, %v5289_v58   ;;  %5639 = vmatpush1.msra.mxu0 %v5073_v38  ;;  %v5278_v58 = vld [vmem:[%s19164_s7 + $0x180] sm:$0xff]  ;;  %v4807_v38 = vpop.permute.xlu0 %4806 }
 0x5af   :  { %5511 = vperm.xlu0 %7525, %v5273_v35   ;;  %v4330_v34 = vpop.f32.mrf.mxu0  ;;  %v4555_v51 = vpop.f32.mrf.mxu1  ;;  %5640 = vmatprep.subr.mxu0 %v21400_v0 }
 0x5b0   :  { %5641 = vmatpush1.msra.mxu0 %v5072_v62  ;;  %v5031_v51 = vpop.permute.xlu1 %5030 }
 0x5b1   :  { %5642 = vmatprep.subr.mxu0 %v21400_v0 }
 0x5b2   :  { %5586 = vperm.xlu1 %7526, %v5288_v54   ;;  %5643 = vmatpush1.msra.mxu0 %v5071_v19  ;;  %v4802_v52 = vpop.permute.xlu0 %4801 }
 0x5b3   :  { %5506 = vperm.xlu0 %7525, %v5272_v12   ;;  %5644 = vmatprep.subr.mxu0 %v21400_v0 }
 0x5b4   :  { %5645 = vmatpush1.msra.mxu0 %v5070_v37 }
 0x5b5   :  { %v4333_v28 = vpop.f32.mrf.mxu0  ;;  %v4558_v31 = vpop.f32.mrf.mxu1  ;;  %5646 = vmatprep.subr.mxu0 %v21400_v0 }
 0x5b6   :  { %v17495_v33 = vadd.f32 %v4558_v31, %v4333_v28  ;;  %5581 = vperm.xlu1 %7526, %v5287_v45   ;;  %v4797_v54 = vpop.permute.xlu0 %4796 }
 0x5b7   :  { %5501 = vperm.xlu0 %7525, %v5271_v57   ;;  %v4335_v53 = vpop.f32.mrf.mxu0  ;;  %v4560_v16 = vpop.f32.mrf.mxu1 }
 0x5b8   :  { %v5026_v57 = vpop.permute.xlu1 %5025 }
 0x5ba   :  { %5576 = vperm.xlu1 %7526, %v5286_v9   ;;  %v4792_v28 = vpop.permute.xlu0 %4791 }
 0x5bb   :  { %5496 = vperm.xlu0 %7525, %v5270_v4  }
 0x5bc   :  { %v5021_v16 = vpop.permute.xlu1 %5020 }
 0x5bd   :  { %v4338_v15 = vpop.f32.mrf.mxu0  ;;  %v4563_v36 = vpop.f32.mrf.mxu1 }
 0x5be   :  { %v17512_v2 = vadd.f32 %v4563_v36, %v4338_v15  ;;  %5571 = vperm.xlu1 %7526, %v5285_v43   ;;  %v4787_v43 = vpop.permute.xlu0 %4786 }
 0x5bf   :  { %5491 = vperm.xlu0 %7525, %v5269_v60   ;;  %v4340_v8 = vpop.f32.mrf.mxu0  ;;  %v4565_v41 = vpop.f32.mrf.mxu1 }
 0x5c0   :  { %v5016_v60 = vpop.permute.xlu1 %5015 }
 0x5c2   :  { %5566 = vperm.xlu1 %7526, %v5284_v40   ;;  %v4782_v49 = vpop.permute.xlu0 %4781 }
 0x5c3   :  { %5486 = vperm.xlu0 %7525, %v5268_v48  }
 0x5c4   :  { %v5011_v40 = vpop.permute.xlu1 %5010 }
 0x5c5   :  { %v4343_v39 = vpop.f32.mrf.mxu0  ;;  %v4568_v6 = vpop.f32.mrf.mxu1 }
 0x5c6   :  { %v17526_v23 = vadd.f32 %v4568_v6, %v4343_v39  ;;  %5561 = vperm.xlu1 %7526, %v5283_v26   ;;  %v4777_v48 = vpop.permute.xlu0 %4776 }
 0x5c7   :  { %5481 = vperm.xlu0 %7525, %v5267_v27   ;;  %v4345_v50 = vpop.f32.mrf.mxu0  ;;  %v4570_v24 = vpop.f32.mrf.mxu1 }
 0x5c8   :  { %v5006_v50 = vpop.permute.xlu1 %5005 }
 0x5ca   :  { %5556 = vperm.xlu1 %7526, %v5282_v59   ;;  %v4772_v24 = vpop.permute.xlu0 %4771 }
 0x5cb   :  { %5476 = vperm.xlu0 %7525, %v5266_v14  }
 0x5cd   :  { %v4348_v29 = vpop.f32.mrf.mxu0  ;;  %v4573_v11 = vpop.f32.mrf.mxu1 }
 0x5ce   :  { %v17540_v55 = vadd.f32 %v4573_v11, %v4348_v29  ;;  %5551 = vperm.xlu1 %7526, %v5281_v10   ;;  %v5001_v10 = vpop.permute.xlu1 %5000  ;;  %v4767_v11 = vpop.permute.xlu0 %4766 }
 0x5cf   :  { %5471 = vperm.xlu0 %7525, %v5265_v47   ;;  %v4350_v56 = vpop.f32.mrf.mxu0  ;;  %v4575_v32 = vpop.f32.mrf.mxu1 }
 0x5d2   :  { %5546 = vperm.xlu1 %7526, %v5280_v21   ;;  %v4996_v56 = vpop.permute.xlu1 %4995 }
 0x5d3   :  { %5466 = vperm.xlu0 %7525, %v5264_v17   ;;  %v4762_v17 = vpop.permute.xlu0 %4761 }
 0x5d5   :  { %v4353_v61 = vpop.f32.mrf.mxu0  ;;  %v4578_v22 = vpop.f32.mrf.mxu1 }
 0x5d6   :  { %v17556_v1 = vadd.f32 %v4578_v22, %v4353_v61  ;;  %5541 = vperm.xlu1 %7526, %v5279_v20   ;;  %v4991_v22 = vpop.permute.xlu1 %4990 }
 0x5d7   :  { %5461 = vperm.xlu0 %7525, %v5263_v63   ;;  %v4355_v44 = vpop.f32.mrf.mxu0  ;;  %v4580_v3 = vpop.f32.mrf.mxu1 }
 0x5d8   :  { %v4757_v44 = vpop.permute.xlu0 %4756 }
 0x5da   :  { %5536 = vperm.xlu1 %7526, %v5278_v58  }
 0x5db   :  { %5456 = vperm.xlu0 %7525, %v5262_v13  }
 0x5dd   :  { %v4358_v35 = vpop.f32.mrf.mxu0  ;;  %v4583_v18 = vpop.f32.mrf.mxu1 }
 0x5de   :  { %v17566_v62 = vadd.f32 %v4583_v18, %v4358_v35 }
 0x5df   :  { %v4360_v7 = vpop.f32.mrf.mxu0  ;;  %v4585_v34 = vpop.f32.mrf.mxu1 }
 0x5e5   :  { %v4363_v19 = vpop.f32.mrf.mxu0  ;;  %v4588_v12 = vpop.f32.mrf.mxu1 }
 0x5e7   :  { %v4365_v37 = vpop.f32.mrf.mxu0  ;;  %v4590_v45 = vpop.f32.mrf.mxu1 }
 0x5ed   :  { %v4368_v31 = vpop.f32.mrf.mxu0  ;;  %v4593_v53 = vpop.f32.mrf.mxu1 }
 0x5ef   :  { %v4370_v9 = vpop.f32.mrf.mxu0  ;;  %v4595_v4 = vpop.f32.mrf.mxu1 }
 0x5f5   :  { %v4373_v15 = vpop.f32.mrf.mxu0  ;;  %v4598_v36 = vpop.f32.mrf.mxu1 }
 0x5f6   :  { %v4599_v45 = vadd.f32 %v4598_v36, %v4373_v15 }
 0x5f7   :  { %v4375_v8 = vpop.f32.mrf.mxu0  ;;  %v4600_v41 = vpop.f32.mrf.mxu1 }
 0x5f8   :  { %v4986_v8 = vpop.permute.xlu1 %4985  ;;  %v4594_v41 = vadd.f32 %v4593_v53, %v4368_v31  ;;  %v4836_v53 = vmul.f32 %v4767_v11, %v17540_v55  ;;  %v4834_v55 = vmul.f32 %v4757_v44, %v17512_v2 }
 0x5fd   :  { %v4378_v26 = vpop.f32.mrf.mxu0  ;;  %v4603_v27 = vpop.f32.mrf.mxu1 }
 0x5fe   :  { %v4604_v35 = vadd.f32 %v4603_v27, %v4378_v26  ;;  %v4840_v26 = vmul.f32 %v4787_v43, %v4594_v41  ;;  %v5111_v41 = vld [vmem:[%s19165_s6 + $0x48] sm:$0xff] }
 0x5ff   :  { %v4380_v39 = vpop.f32.mrf.mxu0  ;;  %v4605_v6 = vpop.f32.mrf.mxu1 }
 0x600   :  { %v4842_v39 = vmul.f32 %v4797_v54, %v4604_v35 }
 0x605   :  { %v4383_v59 = vpop.f32.mrf.mxu0  ;;  %v4608_v14 = vpop.f32.mrf.mxu1 }
 0x606   :  { %v4609_v3 = vadd.f32 %v4608_v14, %v4383_v59  ;;  %v4841_v59 = vmul.f32 %v4792_v28, %v4599_v45  ;;  %v5107_v45 = vld [vmem:[%s19165_s6 + $0x28] sm:$0xff] }
 0x607   :  { %v4385_v47 = vpop.f32.mrf.mxu0  ;;  %v4610_v29 = vpop.f32.mrf.mxu1 }
 0x608   :  { %v4843_v9 = vmul.f32 %v4802_v52, %v4609_v3  ;;  %v4752_v29 = vpop.permute.xlu0 %4751 }
 0x60a   :  { %v5067_v14 = vadd.f32 %v5026_v57, %v4843_v9  ;;  %v5106_v9 = vld [vmem:[%s19165_s6 + $0x20] sm:$0xff] }
 0x60c   :  { %v5099_v15 = vmax.f32 %v5067_v14, 0.0  ;;  %v4747_v54 = vpop.permute.xlu0 %4746  ;;  %v5116_v14 = vld [vmem:[%s19165_s6 + $0x70] sm:$0xff] }
 0x60d   :  { %v4388_v32 = vpop.f32.mrf.mxu0  ;;  %v4613_v21 = vpop.f32.mrf.mxu1 }
 0x60e   :  { %v4614_v61 = vadd.f32 %v4613_v21, %v4388_v32  ;;  %v4589_v32 = vadd.f32 %v4588_v12, %v4363_v19  ;;  %v4837_v12 = vmul.f32 %v4772_v24, %v17556_v1  ;;  %v5060_v1 = vadd.f32 %v4991_v22, %v4836_v53  ;;  %v5135_v53 = vld [vmem:[%s19165_s6 + $0x108] sm:$0xff] }
 0x60f   :  { %v4390_v20 = vpop.f32.mrf.mxu0  ;;  %v4615_v63 = vpop.f32.mrf.mxu1 }
 0x610   :  { %v4844_v18 = vmul.f32 %v4807_v38, %v4614_v61  ;;  %v5066_v38 = vadd.f32 %v5021_v16, %v4842_v39  ;;  %v4981_v20 = vpop.permute.xlu1 %4980  ;;  %v4839_v52 = vmul.f32 %v4782_v49, %v4589_v32  ;;  %v5061_v36 = vadd.f32 %v4996_v56, %v4837_v12  ;;  %v5110_v39 = vld [vmem:[%s19165_s6 + $0x40] sm:$0xff]  ;;  %v5131_v12 = vld [vmem:[%s19165_s6 + $0xe8] sm:$0xff] }
 0x611   :  { %v5058_v11 = vadd.f32 %v4981_v20, %v4834_v55  ;;  %v5092_v56 = vmax.f32 %v5060_v1, 0.0  ;;  %v4832_v63 = vmul.f32 %v4747_v54, %v17477_v42  ;;  %v5114_v32 = vld [vmem:[%s19165_s6 + $0x60] sm:$0xff]  ;;  %v5123_v20 = vld [vmem:[%s19165_s6 + $0xa8] sm:$0xff]  ;;  %v5140_v1 = vld [vmem:[%s19165_s6 + $0x130] sm:$0xff] }
 0x612   :  { %v5068_v6 = vadd.f32 %v5031_v51, %v4844_v18  ;;  %v5064_v51 = vadd.f32 %v5011_v40, %v4840_v26  ;;  %v5098_v19 = vmax.f32 %v5066_v38, 0.0  ;;  %v5063_v57 = vadd.f32 %v5006_v50, %v4839_v52  ;;  %v5118_v26 = vld [vmem:[%s19165_s6 + $0x80] sm:$0xff]  ;;  %v5121_v38 = vld [vmem:[%s19165_s6 + $0x98] sm:$0xff]  ;;  %v5127_v54 = vld [vmem:[%s19165_s6 + $0xc8] sm:$0xff] }
 0x613   :  { %v5093_v24 = vmax.f32 %v5061_v36, 0.0  ;;  %v5090_v2 = vmax.f32 %v5058_v11, 0.0  ;;  %v5122_v52 = vld [vmem:[%s19165_s6 + $0xa0] sm:$0xff]  ;;  %v5145_v55 = vld [vmem:[%s19165_s6 + $0x158] sm:$0xff]  ;;  %v5148_v11 = vld [vmem:[%s19165_s6 + $0x170] sm:$0xff] }
 0x614   :  { %v5100_v27 = vmax.f32 %v5068_v6, 0.0  ;;  %v4976_v31 = vpop.permute.xlu1 %4975  ;;  %v5096_v43 = vmax.f32 %v5064_v51, 0.0  ;;  %v5095_v49 = vmax.f32 %v5063_v57, 0.0  ;;  %v5113_v6 = vld [vmem:[%s19165_s6 + $0x58] sm:$0xff]  ;;  %v5130_v57 = vld [vmem:[%s19165_s6 + $0xe0] sm:$0xff] }
 0x615   :  { %v4393_v58 = vpop.f32.mrf.mxu0  ;;  %v4618_v13 = vpop.f32.mrf.mxu1  ;;  %v5129_v51 = vld [vmem:[%s19165_s6 + $0xd8] sm:$0xff]  ;;  %v5138_v36 = vld [vmem:[%s19165_s6 + $0x120] sm:$0xff] }
 0x616   :  { %v4619_v7 = vadd.f32 %v4618_v13, %v4393_v58 }
 0x617   :  { %v4395_v34 = vpop.f32.mrf.mxu0  ;;  %v4620_v37 = vpop.f32.mrf.mxu1 }
 0x618   :  { %v4845_v4 = vmul.f32 %v17548_v46, %v4619_v7  ;;  %v5065_v46 = vadd.f32 %v5016_v60, %v4841_v59  ;;  %v4742_v60 = vpop.permute.xlu0 %4741  ;;  %v5102_v34 = vld [vmem:[%s19165_s6] sm:$0xff]  ;;  %v5104_v37 = vld [vmem:[%s19165_s6 + $0x10] sm:$0xff]  ;;  %v5117_v59 = vld [vmem:[%s19165_s6 + $0x78] sm:$0xff] }
 0x619   :  { %v4831_v44 = vmul.f32 %v4742_v60, %v17455_v5  ;;  %v5136_v60 = vld [vmem:[%s19165_s6 + $0x110] sm:$0xff] }
 0x61a   :  { %v5069_v47 = vadd.f32 %v17564_v25, %v4845_v4  ;;  %v4838_v25 = vmul.f32 %v4777_v48, %v17566_v62  ;;  %v5097_v28 = vmax.f32 %v5065_v46, 0.0  ;;  %v4835_v62 = vmul.f32 %v4762_v17, %v17526_v23  ;;  %v4971_v48 = vpop.permute.xlu1 %4970  ;;  %v5109_v4 = vld [vmem:[%s19165_s6 + $0x38] sm:$0xff] }
 0x61b   :  { %v4833_v23 = vmul.f32 %v4752_v29, %v17495_v33  ;;  %v5056_v3 = vadd.f32 %v4971_v48, %v4832_v63  ;;  %v5115_v29 = vld [vmem:[%s19165_s6 + $0x68] sm:$0xff]  ;;  %v5125_v46 = vld [vmem:[%s19165_s6 + $0xb8] sm:$0xff]  ;;  %v5142_v48 = vld [vmem:[%s19165_s6 + $0x140] sm:$0xff] }
 0x61c   :  { %v5101_v21 = vmax.f32 %v5069_v47, 0.0  ;;  %v5062_v16 = vadd.f32 %v5001_v10, %v4838_v25  ;;  %v5059_v50 = vadd.f32 %v4986_v8, %v4835_v62  ;;  %v4737_v10 = vpop.permute.xlu0 %4736  ;;  %v5108_v8 = vld [vmem:[%s19165_s6 + $0x30] sm:$0xff]  ;;  %v5126_v25 = vld [vmem:[%s19165_s6 + $0xc0] sm:$0xff]  ;;  %v5139_v62 = vld [vmem:[%s19165_s6 + $0x128] sm:$0xff] }
 0x61d   :  { %v5057_v61 = vadd.f32 %v4976_v31, %v4833_v23  ;;  %v4830_v13 = vmul.f32 %v4737_v10, %v17425_v30  ;;  %v5088_v42 = vmax.f32 %v5056_v3, 0.0  ;;  %v5105_v30 = vld [vmem:[%s19165_s6 + $0x18] sm:$0xff]  ;;  %v5112_v47 = vld [vmem:[%s19165_s6 + $0x50] sm:$0xff]  ;;  %v5146_v10 = vld [vmem:[%s19165_s6 + $0x160] sm:$0xff] }
 0x61e   :  { %5647 = vmatpush2.msra.mxu0 %v5101_v21  ;;  %v5094_v40 = vmax.f32 %v5062_v16, 0.0  ;;  %v5091_v17 = vmax.f32 %v5059_v50, 0.0  ;;  %v4966_v22 = vpop.permute.xlu1 %4965  ;;  %v5119_v21 = vld [vmem:[%s19165_s6 + $0x88] sm:$0xff]  ;;  %v5132_v31 = vld [vmem:[%s19165_s6 + $0xf0] sm:$0xff]  ;;  %v5134_v16 = vld [vmem:[%s19165_s6 + $0x100] sm:$0xff] }
 0x61f   :  { %5648 = vmatprep.subr.mxu0 %v21400_v0  ;;  %v5089_v33 = vmax.f32 %v5057_v61, 0.0  ;;  %v5055_v35 = vadd.f32 %v4966_v22, %v4831_v44  ;;  %v5144_v50 = vld [vmem:[%s19165_s6 + $0x150] sm:$0xff]  ;;  %v5149_v23 = vld [vmem:[%s19165_s6 + $0x178] sm:$0xff]  ;;  %v5155_v22 = vld [vmem:[%s19165_s6 + $0x1a8] sm:$0xff] }
 0x620   :  { %5649 = vmatpush2.msra.mxu0 %v5100_v27  ;;  %v4961_v58 = vpop.permute.xlu0 %4960  ;;  %v5120_v27 = vld [vmem:[%s19165_s6 + $0x90] sm:$0xff]  ;;  %v5153_v63 = vld [vmem:[%s19165_s6 + $0x198] sm:$0xff] }
 0x621   :  { %5650 = vmatprep.subr.mxu0 %v21400_v0  ;;  %v5054_v18 = vadd.f32 %v4961_v58, %v4830_v13  ;;  %v5087_v7 = vmax.f32 %v5055_v35, 0.0  ;;  %v5152_v61 = vld [vmem:[%s19165_s6 + $0x190] sm:$0xff]  ;;  %v5157_v3 = vld [vmem:[%s19165_s6 + $0x1b8] sm:$0xff]  ;;  %v5158_v35 = vld [vmem:[%s19165_s6 + $0x1c0] sm:$0xff] }
 0x622   :  { %5651 = vmatpush2.msra.mxu0 %v5099_v15  ;;  %v5124_v15 = vld [vmem:[%s19165_s6 + $0xb0] sm:$0xff] }
 0x623   :  { %5652 = vmatprep.subr.mxu0 %v21400_v0  ;;  %v5086_v5 = vmax.f32 %v5054_v18, 0.0  ;;  %v5156_v58 = vld [vmem:[%s19165_s6 + $0x1b0] sm:$0xff] }
 0x624   :  { %5653 = vmatpush2.msra.mxu0 %v5098_v19  ;;  %v5128_v19 = vld [vmem:[%s19165_s6 + $0xd0] sm:$0xff]  ;;  %v17753_v44 = vpop.permute.xlu0 %5371 }
 0x625   :  { %5654 = vmatprep.subr.mxu0 %v21400_v0  ;;  %v5160_v18 = vld [vmem:[%s19165_s6 + $0x1d0] sm:$0xff] }
 0x626   :  { %5655 = vmatpush2.msra.mxu0 %v5097_v28  ;;  %v5133_v28 = vld [vmem:[%s19165_s6 + $0xf8] sm:$0xff] }
 0x627   :  { %5656 = vmatprep.subr.mxu0 %v21400_v0 }
 0x628   :  { %5657 = vmatpush2.msra.mxu0 %v5096_v43  ;;  %v5137_v43 = vld [vmem:[%s19165_s6 + $0x118] sm:$0xff]  ;;  %v17764_v13 = vpop.permute.xlu0 %5366 }
 0x629   :  { %5658 = vmatprep.subr.mxu0 %v21400_v0 }
 0x62a   :  { %5659 = vmatpush2.msra.mxu0 %v5095_v49  ;;  %v5141_v49 = vld [vmem:[%s19165_s6 + $0x138] sm:$0xff] }
 0x62b   :  { %5660 = vmatprep.subr.mxu0 %v21400_v0 }
 0x62c   :  { %5661 = vmatpush2.msra.mxu0 %v5094_v40  ;;  %v5143_v40 = vld [vmem:[%s19165_s6 + $0x148] sm:$0xff] }
 0x62d   :  { %5662 = vmatprep.subr.mxu0 %v21400_v0 }
 0x62e   :  { %5663 = vmatpush2.msra.mxu0 %v5093_v24  ;;  %v5147_v24 = vld [vmem:[%s19165_s6 + $0x168] sm:$0xff] }
 0x62f   :  { %5664 = vmatprep.subr.mxu0 %v21400_v0 }
 0x630   :  { %5665 = vmatpush2.msra.mxu0 %v5092_v56  ;;  %v5151_v56 = vld [vmem:[%s19165_s6 + $0x188] sm:$0xff] }
 0x631   :  { %5666 = vmatprep.subr.mxu0 %v21400_v0 }
 0x632   :  { %5667 = vmatpush2.msra.mxu0 %v5091_v17  ;;  %v5150_v17 = vld [vmem:[%s19165_s6 + $0x180] sm:$0xff] }
 0x633   :  { %5668 = vmatprep.subr.mxu0 %v21400_v0 }
 0x634   :  { %5669 = vmatpush2.msra.mxu0 %v5090_v2  ;;  %v5154_v2 = vld [vmem:[%s19165_s6 + $0x1a0] sm:$0xff] }
 0x635   :  { %5670 = vmatprep.subr.mxu0 %v21400_v0 }
 0x636   :  { %5671 = vmatpush2.msra.mxu0 %v5089_v33  ;;  %v5159_v33 = vld [vmem:[%s19165_s6 + $0x1c8] sm:$0xff] }
 0x637   :  { %5672 = vmatprep.subr.mxu0 %v21400_v0 }
 0x638   :  { %5673 = vmatpush2.msra.mxu0 %v5088_v42  ;;  %v5161_v42 = vld [vmem:[%s19165_s6 + $0x1d8] sm:$0xff] }
 0x639   :  { %5674 = vmatprep.subr.mxu0 %v21400_v0 }
 0x63a   :  { %5675 = vmatpush2.msra.mxu0 %v5087_v7  ;;  %v17775_v7 = vpop.permute.xlu0 %5361 }
 0x63b   :  { %5676 = vmatprep.subr.mxu0 %v21400_v0 }
 0x63c   :  { %5677 = vmatpush2.msra.mxu0 %v5086_v5  ;;  %v5163_v5 = vld [vmem:[%s19165_s6 + $0x1e8] sm:$0xff] }
 0x63d   :  { %5679 = vmatmul.mubr.f32.vlgmr.msra.gmra.mxu0 %v5102_v34  ;;  %v5162_v34 = vld [vmem:[%s19165_s6 + $0x1e0] sm:$0xff] }
 0x63e   :  { %5683 = vmatprep.mubr.f32.mxu0 %v5105_v30  ;;  %v5165_v30 = vld [vmem:[%s19165_s6 + $0x1f8] sm:$0xff] }
 0x641   :  { %5684 = vmatmul.mubr.f32.gmra.mxu0 %v5104_v37  ;;  %v17786_v37 = vpop.permute.xlu0 %5356 }
 0x642   :  { %5688 = vmatprep.mubr.f32.mxu0 %v5107_v45  ;;  %v5164_v45 = vld [vmem:[%s19165_s6 + $0x1f0] sm:$0xff] }
 0x645   :  { %5689 = vmatmul.mubr.f32.gmra.mxu0 %v5106_v9  ;;  %v5167_v9 = vld [vmem:[%s19165_s6 + $0x208] sm:$0xff] }
 0x646   :  { %5693 = vmatprep.mubr.f32.mxu0 %v5109_v4  ;;  %v5166_v4 = vld [vmem:[%s19165_s6 + $0x200] sm:$0xff] }
 0x649   :  { %5694 = vmatmul.mubr.f32.gmra.mxu0 %v5108_v8  ;;  %v17797_v8 = vpop.permute.xlu0 %5351 }
 0x64a   :  { %5698 = vmatprep.mubr.f32.mxu0 %v5111_v41  ;;  %v5169_v41 = vld [vmem:[%s19165_s6 + $0x218] sm:$0xff] }
 0x64d   :  { %5699 = vmatmul.mubr.f32.gmra.mxu0 %v5110_v39  ;;  %v5168_v39 = vld [vmem:[%s19165_s6 + $0x210] sm:$0xff] }
 0x64e   :  { %5703 = vmatprep.mubr.f32.mxu0 %v5113_v6  ;;  %v5171_v6 = vld [vmem:[%s19165_s6 + $0x228] sm:$0xff] }
 0x651   :  { %5704 = vmatmul.mubr.f32.gmra.mxu0 %v5112_v47  ;;  %v17808_v47 = vpop.permute.xlu0 %5346 }
 0x652   :  { %5708 = vmatprep.mubr.f32.mxu0 %v5115_v29  ;;  %v5170_v29 = vld [vmem:[%s19165_s6 + $0x220] sm:$0xff] }
 0x655   :  { %5709 = vmatmul.mubr.f32.gmra.mxu0 %v5114_v32  ;;  %v5173_v32 = vld [vmem:[%s19165_s6 + $0x238] sm:$0xff] }
 0x656   :  { %5713 = vmatprep.mubr.f32.mxu0 %v5117_v59  ;;  %v5172_v59 = vld [vmem:[%s19165_s6 + $0x230] sm:$0xff] }
 0x659   :  { %5714 = vmatmul.mubr.f32.gmra.mxu0 %v5116_v14  ;;  %v17819_v14 = vpop.permute.xlu0 %5341 }
 0x65a   :  { %5718 = vmatprep.mubr.f32.mxu0 %v5119_v21  ;;  %v5175_v21 = vld [vmem:[%s19165_s6 + $0x248] sm:$0xff] }
 0x65d   :  { %5719 = vmatmul.mubr.f32.gmra.mxu0 %v5118_v26  ;;  %v5174_v26 = vld [vmem:[%s19165_s6 + $0x240] sm:$0xff] }
 0x65e   :  { %5723 = vmatprep.mubr.f32.mxu0 %v5121_v38  ;;  %v5177_v38 = vld [vmem:[%s19165_s6 + $0x258] sm:$0xff] }
 0x661   :  { %5724 = vmatmul.mubr.f32.gmra.mxu0 %v5120_v27  ;;  %v17830_v27 = vpop.permute.xlu0 %5336 }
 0x662   :  { %5728 = vmatprep.mubr.f32.mxu0 %v5123_v20  ;;  %v17832_v20 = vpop.permute.xlu1 %5451 }
 0x665   :  { %5729 = vmatmul.mubr.f32.gmra.mxu0 %v5122_v52  ;;  %v5176_v52 = vld [vmem:[%s19165_s6 + $0x250] sm:$0xff] }
 0x666   :  { %5733 = vmatprep.mubr.f32.mxu0 %v5125_v46  ;;  %v5179_v46 = vld [vmem:[%s19165_s6 + $0x268] sm:$0xff] }
 0x669   :  { %5734 = vmatmul.mubr.f32.gmra.mxu0 %v5124_v15  ;;  %v5178_v15 = vld [vmem:[%s19165_s6 + $0x260] sm:$0xff] }
 0x66a   :  { %5738 = vmatprep.mubr.f32.mxu0 %v5127_v54  ;;  %v17843_v54 = vpop.permute.xlu0 %5331 }
 0x66d   :  { %5739 = vmatmul.mubr.f32.gmra.mxu0 %v5126_v25  ;;  %v5181_v25 = vld [vmem:[%s19165_s6 + $0x278] sm:$0xff] }
 0x66e   :  { %5743 = vmatprep.mubr.f32.mxu0 %v5129_v51  ;;  %v17848_v51 = vpop.permute.xlu1 %5446 }
 0x671   :  { %5744 = vmatmul.mubr.f32.gmra.mxu0 %v5128_v19  ;;  %v5180_v19 = vld [vmem:[%s19165_s6 + $0x270] sm:$0xff] }
 0x672   :  { %5748 = vmatprep.mubr.f32.mxu0 %v5131_v12  ;;  %v5183_v12 = vld [vmem:[%s19165_s6 + $0x288] sm:$0xff] }
 0x675   :  { %5749 = vmatmul.mubr.f32.gmra.mxu0 %v5130_v57  ;;  %v17856_v57 = vpop.permute.xlu0 %5326 }
 0x676   :  { %5753 = vmatprep.mubr.f32.mxu0 %v5133_v28  ;;  %v17858_v28 = vpop.permute.xlu1 %5441 }
 0x679   :  { %5754 = vmatmul.mubr.f32.gmra.mxu0 %v5132_v31  ;;  %v5182_v31 = vld [vmem:[%s19165_s6 + $0x280] sm:$0xff] }
 0x67a   :  { %5758 = vmatprep.mubr.f32.mxu0 %v5135_v53  ;;  %v5185_v53 = vld [vmem:[%s19165_s6 + $0x298] sm:$0xff] }
 0x67d   :  { %5759 = vmatmul.mubr.f32.gmra.mxu0 %v5134_v16  ;;  %v5184_v16 = vld [vmem:[%s19165_s6 + $0x290] sm:$0xff] }
 0x67e   :  { %5763 = vmatprep.mubr.f32.mxu0 %v5137_v43  ;;  %v17869_v43 = vpop.permute.xlu0 %5321 }
 0x681   :  { %5764 = vmatmul.mubr.f32.gmra.mxu0 %v5136_v60  ;;  %v5187_v60 = vld [vmem:[%s19165_s6 + $0x2a8] sm:$0xff] }
 0x682   :  { %5768 = vmatprep.mubr.f32.mxu0 %v5139_v62  ;;  %v17874_v62 = vpop.permute.xlu1 %5436 }
 0x685   :  { %5769 = vmatmul.mubr.f32.gmra.mxu0 %v5138_v36  ;;  %v5186_v36 = vld [vmem:[%s19165_s6 + $0x2a0] sm:$0xff] }
 0x686   :  { %5773 = vmatprep.mubr.f32.mxu0 %v5141_v49  ;;  %v5189_v49 = vld [vmem:[%s19165_s6 + $0x2b8] sm:$0xff] }
 0x689   :  { %5774 = vmatmul.mubr.f32.gmra.mxu0 %v5140_v1  ;;  %v17882_v1 = vpop.permute.xlu0 %5316 }
 0x68a   :  { %5778 = vmatprep.mubr.f32.mxu0 %v5143_v40  ;;  %v17884_v40 = vpop.permute.xlu1 %5431 }
 0x68d   :  { %5779 = vmatmul.mubr.f32.gmra.mxu0 %v5142_v48  ;;  %v5188_v48 = vld [vmem:[%s19165_s6 + $0x2b0] sm:$0xff] }
 0x68e   :  { %5783 = vmatprep.mubr.f32.mxu0 %v5145_v55  ;;  %v5191_v55 = vld [vmem:[%s19165_s6 + $0x2c8] sm:$0xff] }
 0x691   :  { %5784 = vmatmul.mubr.f32.gmra.mxu0 %v5144_v50  ;;  %v5190_v50 = vld [vmem:[%s19165_s6 + $0x2c0] sm:$0xff] }
 0x692   :  { %5788 = vmatprep.mubr.f32.mxu0 %v5147_v24  ;;  %v5312_v24 = vpop.permute.xlu0 %5311 }
 0x695   :  { %5789 = vmatmul.mubr.f32.gmra.mxu0 %v5146_v10  ;;  %v5193_v10 = vld [vmem:[%s19165_s6 + $0x2d8] sm:$0xff] }
 0x696   :  { %5793 = vmatprep.mubr.f32.mxu0 %v5149_v23  ;;  %v17898_v23 = vpop.permute.xlu1 %5426 }
 0x699   :  { %5794 = vmatmul.mubr.f32.gmra.mxu0 %v5148_v11  ;;  %v5192_v11 = vld [vmem:[%s19165_s6 + $0x2d0] sm:$0xff] }
 0x69a   :  { %5798 = vmatprep.mubr.f32.mxu0 %v5151_v56  ;;  %v5195_v56 = vld [vmem:[%s19165_s6 + $0x2e8] sm:$0xff] }
 0x69d   :  { %5799 = vmatmul.mubr.f32.gmra.mxu0 %v5150_v17  ;;  %v5307_v17 = vpop.permute.xlu0 %5306 }
 0x69e   :  { %5803 = vmatprep.mubr.f32.mxu0 %v5153_v63  ;;  %v17906_v63 = vpop.permute.xlu1 %5421 }
 0x6a1   :  { %5804 = vmatmul.mubr.f32.gmra.mxu0 %v5152_v61  ;;  %v5194_v61 = vld [vmem:[%s19165_s6 + $0x2e0] sm:$0xff] }
 0x6a2   :  { %5808 = vmatprep.mubr.f32.mxu0 %v5155_v22  ;;  %v5197_v22 = vld [vmem:[%s19165_s6 + $0x2f8] sm:$0xff] }
 0x6a5   :  { %5809 = vmatmul.mubr.f32.gmra.mxu0 %v5154_v2  ;;  %v5196_v2 = vld [vmem:[%s19165_s6 + $0x2f0] sm:$0xff] }
 0x6a6   :  { %5813 = vmatprep.mubr.f32.mxu0 %v5157_v3  ;;  %v5302_v3 = vpop.permute.xlu0 %5301 }
 0x6a9   :  { %5814 = vmatmul.mubr.f32.gmra.mxu0 %v5156_v58  ;;  %v5199_v58 = vld [vmem:[%s19165_s6 + $0x308] sm:$0xff] }
 0x6aa   :  { %5818 = vmatprep.mubr.f32.mxu0 %v5159_v33  ;;  %v17920_v33 = vpop.permute.xlu1 %5416 }
 0x6ad   :  { %5819 = vmatmul.mubr.f32.gmra.mxu0 %v5158_v35  ;;  %v5198_v35 = vld [vmem:[%s19165_s6 + $0x300] sm:$0xff] }
 0x6ae   :  { %5823 = vmatprep.mubr.f32.mxu0 %v5161_v42  ;;  %v5201_v42 = vld [vmem:[%s19165_s6 + $0x318] sm:$0xff] }
 0x6b1   :  { %5824 = vmatmul.mubr.f32.gmra.mxu0 %v5160_v18  ;;  %v5297_v18 = vpop.permute.xlu0 %5296 }
 0x6b2   :  { %5828 = vmatprep.mubr.f32.mxu0 %v5163_v5 }
 0x6b5   :  { %5829 = vmatmul.mubr.f32.gmra.mxu0 %v5162_v34  ;;  %v17928_v34 = vpop.permute.xlu1 %5411 }
 0x6b6   :  { %5833 = vmatprep.mubr.f32.mxu0 %v5165_v30 }
 0x6b9   :  { %5834 = vmatmul.mubr.f32.gmra.mxu0 %v5164_v45  ;;  %v5200_v45 = vld [vmem:[%s19165_s6 + $0x310] sm:$0xff] }
 0x6ba   :  { %5838 = vmatprep.mubr.f32.mxu0 %v5167_v9 }
 0x6bd   :  { %5839 = vmatmul.mubr.f32.gmra.mxu0 %v5166_v4  ;;  %v5203_v4 = vld [vmem:[%s19165_s6 + $0x328] sm:$0xff] }
 0x6be   :  { %5843 = vmatprep.mubr.f32.mxu0 %v5169_v41 }
 0x6c1   :  { %5844 = vmatmul.mubr.f32.gmra.mxu0 %v5168_v39 }
 0x6c2   :  { %5848 = vmatprep.mubr.f32.mxu0 %v5171_v6 }
 0x6c5   :  { %5849 = vmatmul.mubr.f32.gmra.mxu0 %v5170_v29 }
 0x6c6   :  { %5853 = vmatprep.mubr.f32.mxu0 %v5173_v32  ;;  %v5202_v32 = vld [vmem:[%s19165_s6 + $0x320] sm:$0xff] }
 0x6c9   :  { %5854 = vmatmul.mubr.f32.gmra.mxu0 %v5172_v59 }
 0x6ca   :  { %5858 = vmatprep.mubr.f32.mxu0 %v5175_v21  ;;  %v5205_v21 = vld [vmem:[%s19165_s6 + $0x338] sm:$0xff] }
 0x6cd   :  { %5859 = vmatmul.mubr.f32.gmra.mxu0 %v5174_v26  ;;  %v17950_v26 = vpop.permute.xlu1 %5406 }
 0x6ce   :  { %5863 = vmatprep.mubr.f32.mxu0 %v5177_v38 }
 0x6d1   :  { %5864 = vmatmul.mubr.f32.gmra.mxu0 %v5176_v52 }
 0x6d2   :  { %5868 = vmatprep.mubr.f32.mxu0 %v5179_v46 }
 0x6d5   :  { %5869 = vmatmul.mubr.f32.gmra.mxu0 %v5178_v15 }
 0x6d6   :  { %5873 = vmatprep.mubr.f32.mxu0 %v5181_v25  ;;  %v5204_v25 = vld [vmem:[%s19165_s6 + $0x330] sm:$0xff] }
 0x6d9   :  { %5874 = vmatmul.mubr.f32.gmra.mxu0 %v5180_v19 }
 0x6da   :  { %5878 = vmatprep.mubr.f32.mxu0 %v5183_v12  ;;  %v5207_v12 = vld [vmem:[%s19165_s6 + $0x348] sm:$0xff] }
 0x6dd   :  { %5879 = vmatmul.mubr.f32.gmra.mxu0 %v5182_v31 }
 0x6de   :  { %5883 = vmatprep.mubr.f32.mxu0 %v5185_v53 }
 0x6e1   :  { %5884 = vmatmul.mubr.f32.gmra.mxu0 %v5184_v16  ;;  %v17965_v16 = vpop.permute.xlu1 %5401 }
 0x6e2   :  { %5888 = vmatprep.mubr.f32.mxu0 %v5187_v60 }
 0x6e5   :  { %5889 = vmatmul.mubr.f32.gmra.mxu0 %v5186_v36 }
 0x6e6   :  { %5893 = vmatprep.mubr.f32.mxu0 %v5189_v49  ;;  %v5206_v49 = vld [vmem:[%s19165_s6 + $0x340] sm:$0xff] }
 0x6e9   :  { %5894 = vmatmul.mubr.f32.gmra.mxu0 %v5188_v48 }
 0x6ea   :  { %5898 = vmatprep.mubr.f32.mxu0 %v5191_v55  ;;  %v5209_v55 = vld [vmem:[%s19165_s6 + $0x358] sm:$0xff] }
 0x6ed   :  { %5899 = vmatmul.mubr.f32.gmra.mxu0 %v5190_v50 }
 0x6ee   :  { %5903 = vmatprep.mubr.f32.mxu0 %v5193_v10 }
 0x6f1   :  { %5904 = vmatmul.mubr.f32.gmra.mxu0 %v5192_v11 }
 0x6f2   :  { %5908 = vmatprep.mubr.f32.mxu0 %v5195_v56  ;;  %v5208_v56 = vld [vmem:[%s19165_s6 + $0x350] sm:$0xff] }
 0x6f5   :  { %5909 = vmatmul.mubr.f32.gmra.mxu0 %v5194_v61  ;;  %v5211_v61 = vld [vmem:[%s19165_s6 + $0x368] sm:$0xff] }
 0x6f6   :  { %5913 = vmatprep.mubr.f32.mxu0 %v5197_v22  ;;  %v17991_v22 = vpop.permute.xlu1 %5396 }
 0x6f9   :  { %5914 = vmatmul.mubr.f32.gmra.mxu0 %v5196_v2 }
 0x6fa   :  { %5918 = vmatprep.mubr.f32.mxu0 %v5199_v58 }
 0x6fd   :  { %v5680_v5 = vpop.f32.mrf.mxu0  ;;  %5919 = vmatmul.mubr.f32.gmra.mxu0 %v5198_v35  ;;  %v5210_v35 = vld [vmem:[%s19165_s6 + $0x360] sm:$0xff] }
 0x6fe   :  { %v17930_v30 = vadd.f32 %v5680_v5, %v5297_v18  ;;  %5923 = vmatprep.mubr.f32.mxu0 %v5201_v42  ;;  %v5213_v18 = vld [vmem:[%s19165_s6 + $0x378] sm:$0xff] }
 0x6ff   :  { %v5682_v9 = vpop.f32.mrf.mxu0 }
 0x700   :  { %v19775_v41 = vmax.f32 %v17930_v30, 0.0 }
 0x701   :  { %v5685_v39 = vpop.f32.mrf.mxu0  ;;  %5924 = vmatmul.mubr.f32.gmra.mxu0 %v5200_v45 }
 0x702   :  { %v17939_v6 = vadd.f32 %v5685_v39, %v5302_v3  ;;  %v6064_v29 = vsel %vm6063_vm11, %v19775_v41, -inf  ;;  %5928 = vmatprep.mubr.f32.mxu0 %v5203_v4  ;;  %v5212_v39 = vld [vmem:[%s19165_s6 + $0x370] sm:$0xff] }
 0x703   :  { %v5687_v59 = vpop.f32.mrf.mxu0  ;;  %6065 = vmax.xlane.f32.xlu1 %v6064_v29 }
 0x704   :  { %v19777_v38 = vmax.f32 %v17939_v6, 0.0 }
 0x705   :  { %v5690_v52 = vpop.f32.mrf.mxu0  ;;  %5929 = vmatmul.mubr.f32.gmra.mxu0 %v5202_v32  ;;  %v5215_v32 = vld [vmem:[%s19165_s6 + $0x388] sm:$0xff] }
 0x706   :  { %v17953_v46 = vadd.f32 %v5690_v52, %v5307_v17  ;;  %v6067_v15 = vsel %vm6063_vm11, %v19777_v38, -inf  ;;  %5933 = vmatprep.mubr.f32.mxu0 %v5205_v21 }
 0x707   :  { %v5692_v19 = vpop.f32.mrf.mxu0  ;;  %6068 = vmax.xlane.f32.xlu1 %v6067_v15  ;;  %v5214_v15 = vld [vmem:[%s19165_s6 + $0x380] sm:$0xff] }
 0x708   :  { %v19778_v31 = vmax.f32 %v17953_v46, 0.0  ;;  %v5217_v19 = vld [vmem:[%s19165_s6 + $0x398] sm:$0xff] }
 0x709   :  { %v5695_v53 = vpop.f32.mrf.mxu0  ;;  %5934 = vmatmul.mubr.f32.gmra.mxu0 %v5204_v25 }
 0x70a   :  { %v17967_v60 = vadd.f32 %v5695_v53, %v5312_v24  ;;  %v6070_v36 = vsel %vm6063_vm11, %v19778_v31, -inf  ;;  %5938 = vmatprep.mubr.f32.mxu0 %v5207_v12 }
 0x70b   :  { %v5697_v48 = vpop.f32.mrf.mxu0  ;;  %6071 = vmax.xlane.f32.xlu1 %v6070_v36 }
 0x70c   :  { %v19779_v50 = vmax.f32 %v17967_v60, 0.0  ;;  %v5216_v48 = vld [vmem:[%s19165_s6 + $0x390] sm:$0xff] }
 0x70d   :  { %v5700_v10 = vpop.f32.mrf.mxu0  ;;  %5939 = vmatmul.mubr.f32.gmra.mxu0 %v5206_v49 }
 0x70e   :  { %v17980_v24 = vadd.f32 %v5700_v10, %v17882_v1  ;;  %v6073_v11 = vsel %vm6063_vm11, %v19779_v50, -inf  ;;  %5943 = vmatprep.mubr.f32.mxu0 %v5209_v55  ;;  %v5219_v10 = vld [vmem:[%s19165_s6 + $0x3a8] sm:$0xff] }
 0x70f   :  { %v5702_v17 = vpop.f32.mrf.mxu0  ;;  %6074 = vmax.xlane.f32.xlu1 %v6073_v11 }
 0x710   :  { %v19780_v1 = vmax.f32 %v17980_v24, 0.0 }
 0x711   :  { %v5705_v2 = vpop.f32.mrf.mxu0  ;;  %5944 = vmatmul.mubr.f32.gmra.mxu0 %v5208_v56 }
 0x712   :  { %v17995_v3 = vadd.f32 %v5705_v2, %v17869_v43  ;;  %v6076_v58 = vsel %vm6063_vm11, %v19780_v1, -inf  ;;  %5948 = vmatprep.mubr.f32.mxu0 %v5211_v61  ;;  %v18007_v43 = vpop.permute.xlu1 %5391  ;;  %v5218_v2 = vld [vmem:[%s19165_s6 + $0x3a0] sm:$0xff] }
 0x713   :  { %v5707_v42 = vpop.f32.mrf.mxu0  ;;  %6077 = vmax.xlane.f32.xlu1 %v6076_v58  ;;  %v18054_v58 = vpop.permute.xlu0 %5531 }
 0x714   :  { %v19781_v5 = vmax.f32 %v17995_v3, 0.0  ;;  %v5221_v42 = vld [vmem:[%s19165_s6 + $0x3b8] sm:$0xff] }
 0x715   :  { %v5710_v45 = vpop.f32.mrf.mxu0  ;;  %5949 = vmatmul.mubr.f32.gmra.mxu0 %v5210_v35 }
 0x716   :  { %v18010_v9 = vadd.f32 %v5710_v45, %v17856_v57  ;;  %v6079_v4 = vsel %vm6063_vm11, %v19781_v5, -inf  ;;  %5953 = vmatprep.mubr.f32.mxu0 %v5213_v18  ;;  %v18034_v12 = vpop.permute.xlu1 %5386 }
 0x717   :  { %v5712_v29 = vpop.f32.mrf.mxu0  ;;  %6080 = vmax.xlane.f32.xlu1 %v6079_v4  ;;  %v5220_v4 = vld [vmem:[%s19165_s6 + $0x3b0] sm:$0xff] }
 0x718   :  { %v19782_v59 = vmax.f32 %v18010_v9, 0.0  ;;  %v5223_v29 = vld [vmem:[%s19165_s6 + $0x3c8] sm:$0xff] }
 0x719   :  { %v5715_v21 = vpop.f32.mrf.mxu0  ;;  %5954 = vmatmul.mubr.f32.gmra.mxu0 %v5212_v39 }
 0x71a   :  { %v18023_v57 = vadd.f32 %v5715_v21, %v17843_v54  ;;  %v6082_v52 = vsel %vm6063_vm11, %v19782_v59, -inf  ;;  %5958 = vmatprep.mubr.f32.mxu0 %v5215_v32  ;;  %v18047_v17 = vpop.permute.xlu1 %5381  ;;  %v18066_v21 = vpop.permute.xlu0 %5526 }
 0x71b   :  { %v5717_v25 = vpop.f32.mrf.mxu0  ;;  %6083 = vmax.xlane.f32.xlu1 %v6082_v52 }
 0x71c   :  { %v19783_v54 = vmax.f32 %v18023_v57, 0.0 }
 0x71d   :  { %v5720_v53 = vpop.f32.mrf.mxu0  ;;  %5959 = vmatmul.mubr.f32.gmra.mxu0 %v5214_v15 }
 0x71e   :  { %v5721_v36 = vadd.f32 %v5720_v53, %v17830_v27  ;;  %v6085_v49 = vsel %vm6063_vm11, %v19783_v54, -inf  ;;  %5963 = vmatprep.mubr.f32.mxu0 %v5217_v19  ;;  %v5377_v32 = vpop.permute.xlu1 %5376  ;;  %v5222_v19 = vld [vmem:[%s19165_s6 + $0x3c0] sm:$0xff] }
 0x71f   :  { %v5722_v55 = vpop.f32.mrf.mxu0  ;;  %6086 = vmax.xlane.f32.xlu1 %v6085_v49 }
 0x720   :  { %v6007_v11 = vmax.f32 %v5721_v36, 0.0  ;;  %v5225_v36 = vld [vmem:[%s19165_s6 + $0x3d8] sm:$0xff] }
 0x721   :  { %v5725_v56 = vpop.f32.mrf.mxu0  ;;  %5964 = vmatmul.mubr.f32.gmra.mxu0 %v5216_v48 }
 0x722   :  { %v5726_v27 = vadd.f32 %v5725_v56, %v17819_v14  ;;  %v6088_v61 = vsel %vm6063_vm11, %v6007_v11, -inf  ;;  %5968 = vmatprep.mubr.f32.mxu0 %v5219_v10  ;;  %v6281_v14 = vsel %vm6256_vm12, %v6007_v11, -inf  ;;  %v18076_v48 = vpop.permute.xlu1 %5611  ;;  %v5224_v10 = vld [vmem:[%s19165_s6 + $0x3d0] sm:$0xff]  ;;  %v18082_v11 = vpop.permute.xlu0 %5521 }
 0x723   :  { %v5727_v35 = vpop.f32.mrf.mxu0  ;;  %6089 = vmax.xlane.f32.xlu1 %v6088_v61 }
 0x724   :  { %v6008_v45 = vmax.f32 %v5726_v27, 0.0  ;;  %v5227_v27 = vld [vmem:[%s19165_s6 + $0x3e8] sm:$0xff] }
 0x725   :  { %v5730_v18 = vpop.f32.mrf.mxu0  ;;  %5969 = vmatmul.mubr.f32.gmra.mxu0 %v5218_v2 }
 0x726   :  { %5973 = vmatprep.mubr.f32.mxu0 %v5221_v42  ;;  %v5731_v15 = vadd.f32 %v5730_v18, %v17808_v47  ;;  %v6091_v25 = vsel %vm6063_vm11, %v6008_v45, -inf  ;;  %v6284_v47 = vsel %vm6256_vm12, %v6008_v45, -inf  ;;  %v5226_v42 = vld [vmem:[%s19165_s6 + $0x3e0] sm:$0xff]  ;;  %v5229_v45 = vld [vmem:[%s19165_s6 + $0x3f8] sm:$0xff] }
 0x727   :  { %v5732_v39 = vpop.f32.mrf.mxu0  ;;  %6282 = vmax.xlane.f32.xlu1 %v6281_v14  ;;  %v18095_v14 = vpop.permute.xlu1 %5606 }
 0x728   :  { %v6009_v55 = vmax.f32 %v5731_v15, 0.0 }
 0x729   :  { %v5735_v52 = vpop.f32.mrf.mxu0  ;;  %5974 = vmatmul.mubr.f32.gmra.mxu0 %v5220_v4  ;;  %v18097_v4 = vpop.permute.xlu0 %5516 }
 0x72a   :  { %5978 = vmatprep.mubr.f32.mxu0 %v5223_v29  ;;  %v5736_v2 = vadd.f32 %v5735_v52, %v17797_v8  ;;  %v6094_v35 = vsel %vm6063_vm11, %v6009_v55, -inf  ;;  %v6287_v29 = vsel %vm6256_vm12, %v6009_v55, -inf  ;;  %v5228_v52 = vld [vmem:[%s19165_s6 + $0x3f0] sm:$0xff] }
 0x72b   :  { %v5737_v53 = vpop.f32.mrf.mxu0  ;;  %6092 = vmax.xlane.f32.xlu1 %v6091_v25 }
 0x72c   :  { %v6010_v8 = vmax.f32 %v5736_v2, 0.0 }
 0x72d   :  { %v5740_v49 = vpop.f32.mrf.mxu0  ;;  %5979 = vmatmul.mubr.f32.gmra.mxu0 %v5222_v19  ;;  %v18103_v19 = vpop.permute.xlu1 %5601 }
 0x72e   :  { %5983 = vmatprep.mubr.f32.mxu0 %v5225_v36  ;;  %v5741_v53 = vadd.f32 %v5740_v49, %v17786_v37  ;;  %v6290_v37 = vsel %vm6256_vm12, %v6010_v8, -inf }
 0x72f   :  { %v5742_v56 = vpop.f32.mrf.mxu0  ;;  %6285 = vmax.xlane.f32.xlu1 %v6284_v47  ;;  %v6097_v47 = vsel %vm6063_vm11, %v6010_v8, -inf }
 0x730   :  { %v6011_v2 = vmax.f32 %v5741_v53, 0.0 }
 0x731   :  { %v5745_v61 = vpop.f32.mrf.mxu0  ;;  %5984 = vmatmul.mubr.f32.gmra.mxu0 %v5224_v10  ;;  %v18110_v10 = vpop.permute.xlu0 %5511 }
 0x732   :  { %5988 = vmatprep.mubr.f32.mxu0 %v5227_v27  ;;  %v18119_v49 = vpop.permute.xlu1 %5596  ;;  %v6100_v8 = vsel %vm6063_vm11, %v6011_v2, -inf }
 0x733   :  { %v5747_v18 = vpop.f32.mrf.mxu0  ;;  %6095 = vmax.xlane.f32.xlu1 %v6094_v35 }
 0x735   :  { %v5750_v39 = vpop.f32.mrf.mxu0  ;;  %5989 = vmatmul.mubr.f32.gmra.mxu0 %v5226_v42 }
 0x736   :  { %5993 = vmatprep.mubr.f32.mxu0 %v5229_v45  ;;  %v18122_v45 = vpop.permute.xlu0 %5506 }
 0x737   :  { %v5752_v15 = vpop.f32.mrf.mxu0  ;;  %6288 = vmax.xlane.f32.xlu1 %v6287_v29 }
 0x739   :  { %v5755_v25 = vpop.f32.mrf.mxu0  ;;  %5994 = vmatmul.mubr.f32.gmra.mxu0 %v5228_v52  ;;  %v5746_v52 = vadd.f32 %v5745_v61, %v17775_v7  ;;  %v6293_v61 = vsel %vm6256_vm12, %v6011_v2, -inf }
 0x73a   :  { %v18107_v36 = vadd.f32 %v5755_v25, %v17753_v44 }
 0x73b   :  { %v5757_v55 = vpop.f32.mrf.mxu0  ;;  %6098 = vmax.xlane.f32.xlu1 %v6097_v47 }
 0x73c   :  { %v6014_v56 = vmax.f32 %v18107_v36, 0.0  ;;  %v18133_v55 = vpop.permute.xlu1 %5591 }
 0x73d   :  { %v5760_v27 = vpop.f32.mrf.mxu0 }
 0x73e   :  { %v18113_v35 = vadd.f32 %v5760_v27, %v5377_v32  ;;  %v6109_v42 = vsel %vm6063_vm11, %v6014_v56, -inf  ;;  %v6012_v27 = vmax.f32 %v5746_v52, 0.0 }
 0x73f   :  { %v5762_v44 = vpop.f32.mrf.mxu0  ;;  %6110 = vmax.xlane.f32.xlu0 %v6109_v42  ;;  %6291 = vmax.xlane.f32.xlu1 %v6290_v37  ;;  %v18142_v42 = vpop.permute.xlu0 %5501 }
 0x740   :  { %21401 = vst [vmem:[#allocation42_spill] sm:$0xff] %v18113_v35  ;;  %v19768_v18 = vmax.f32 %v18113_v35, 0.0 }
 0x741   :  { %v5765_v29 = vpop.f32.mrf.mxu0 }
 0x742   :  { %v18126_v32 = vadd.f32 %v5765_v29, %v18047_v17  ;;  %v6112_v15 = vsel %vm6063_vm11, %v19768_v18, -inf }
 0x743   :  { %v5767_v25 = vpop.f32.mrf.mxu0  ;;  %6113 = vmax.xlane.f32.xlu0 %v6112_v15  ;;  %6101 = vmax.xlane.f32.xlu1 %v6100_v8  ;;  %v5751_v15 = vadd.f32 %v5750_v39, %v17764_v13  ;;  %v6103_v8 = vsel %vm6063_vm11, %v6012_v27, -inf }
 0x744   :  { %v19769_v53 = vmax.f32 %v18126_v32, 0.0  ;;  %v18153_v25 = vpop.permute.xlu1 %5586 }
 0x745   :  { %v5770_v47 = vpop.f32.mrf.mxu0  ;;  %v6013_v13 = vmax.f32 %v5751_v15, 0.0 }
 0x746   :  { %v18136_v7 = vadd.f32 %v5770_v47, %v18034_v12  ;;  %v6115_v17 = vsel %vm6063_vm11, %v19769_v53, -inf }
 0x747   :  { %v5772_v37 = vpop.f32.mrf.mxu0  ;;  %6116 = vmax.xlane.f32.xlu0 %v6115_v17  ;;  %6294 = vmax.xlane.f32.xlu1 %v6293_v61  ;;  %v18156_v17 = vpop.permute.xlu0 %5496  ;;  %v6106_v15 = vsel %vm6063_vm11, %v6013_v13, -inf }
 0x748   :  { %v19770_v44 = vmax.f32 %v18136_v7, 0.0  ;;  %v6296_v37 = vsel %vm6256_vm12, %v6012_v27, -inf }
 0x749   :  { %v5775_v29 = vpop.f32.mrf.mxu0 }
 0x74a   :  { %v18147_v52 = vadd.f32 %v5775_v29, %v18007_v43  ;;  %v6118_v12 = vsel %vm6063_vm11, %v19770_v44, -inf }
 0x74b   :  { %v5777_v2 = vpop.f32.mrf.mxu0  ;;  %6119 = vmax.xlane.f32.xlu0 %v6118_v12  ;;  %6104 = vmax.xlane.f32.xlu1 %v6103_v8 }
 0x74c   :  { %v19771_v47 = vmax.f32 %v18147_v52, 0.0  ;;  %v18166_v2 = vpop.permute.xlu1 %5581 }
 0x74d   :  { %v5780_v61 = vpop.f32.mrf.mxu0 }
 0x74e   :  { %v18159_v43 = vadd.f32 %v5780_v61, %v17991_v22  ;;  %v6121_v39 = vsel %vm6063_vm11, %v19771_v47, -inf  ;;  %v18175_v61 = vpop.permute.xlu0 %5491 }
 0x74f   :  { %v5782_v29 = vpop.f32.mrf.mxu0  ;;  %6122 = vmax.xlane.f32.xlu0 %v6121_v39  ;;  %6297 = vmax.xlane.f32.xlu1 %v6296_v37 }
 0x750   :  { %v19772_v12 = vmax.f32 %v18159_v43, 0.0  ;;  %v18185_v44 = vpop.permute.xlu1 %5576 }
 0x751   :  { %v5785_v8 = vpop.f32.mrf.mxu0 }
 0x752   :  { %v18169_v18 = vadd.f32 %v5785_v8, %v17965_v16  ;;  %v6124_v22 = vsel %vm6063_vm11, %v19772_v12, -inf  ;;  %v6299_v8 = vsel %vm6256_vm12, %v6013_v13, -inf }
 0x753   :  { %v5787_v27 = vpop.f32.mrf.mxu0  ;;  %6125 = vmax.xlane.f32.xlu0 %v6124_v22  ;;  %6107 = vmax.xlane.f32.xlu1 %v6106_v15  ;;  %v18188_v15 = vpop.permute.xlu0 %5486 }
 0x754   :  { %v19773_v39 = vmax.f32 %v18169_v18, 0.0 }
 0x755   :  { %v5790_v37 = vpop.f32.mrf.mxu0 }
 0x756   :  { %v18179_v29 = vadd.f32 %v5790_v37, %v17950_v26  ;;  %v6127_v16 = vsel %vm6063_vm11, %v19773_v39, -inf }
 0x757   :  { %v5792_v53 = vpop.f32.mrf.mxu0  ;;  %6128 = vmax.xlane.f32.xlu0 %v6127_v16  ;;  %6300 = vmax.xlane.f32.xlu1 %v6299_v8  ;;  %v18200_v8 = vpop.permute.xlu1 %5571 }
 0x758   :  { %v19774_v22 = vmax.f32 %v18179_v29, 0.0  ;;  %v6302_v53 = vsel %vm6256_vm12, %v6014_v56, -inf }
 0x759   :  { %v5795_v27 = vpop.f32.mrf.mxu0 }
 0x75a   :  { %v18191_v47 = vadd.f32 %v5795_v27, %v17928_v34  ;;  %v6130_v26 = vsel %vm6063_vm11, %v19774_v22, -inf  ;;  %v18206_v27 = vpop.permute.xlu0 %5481 }
 0x75b   :  { %v5797_v13 = vpop.f32.mrf.mxu0  ;;  %6131 = vmax.xlane.f32.xlu0 %v6130_v26  ;;  %6303 = vmax.xlane.f32.xlu1 %v6302_v53  ;;  %v18210_v22 = vpop.permute.xlu1 %5566 }
 0x75c   :  { %v19776_v37 = vmax.f32 %v18191_v47, 0.0 }
 0x75d   :  { %v5800_v16 = vpop.f32.mrf.mxu0 }
 0x75e   :  { %v5801_v12 = vadd.f32 %v5800_v16, %v17920_v33  ;;  %v6133_v34 = vsel %vm6063_vm11, %v19776_v37, -inf  ;;  %v18212_v41 = vpop.permute.xlu0 %5476 }
 0x75f   :  { %v5802_v39 = vpop.f32.mrf.mxu0  ;;  %6134 = vmax.xlane.f32.xlu0 %v6133_v34  ;;  %v18215_v34 = vpop.permute.xlu1 %5561 }
 0x760   :  { %v6023_v36 = vmax.f32 %v5801_v12, 0.0 }
 0x761   :  { %v5805_v56 = vpop.f32.mrf.mxu0 }
 0x762   :  { %v5806_v26 = vadd.f32 %v5805_v56, %v17906_v63  ;;  %v6136_v53 = vsel %vm6063_vm11, %v6023_v36, -inf  ;;  %v6329_v37 = vsel %vm6256_vm12, %v6023_v36, -inf  ;;  %v5472_v56 = vpop.permute.xlu0 %5471 }
 0x763   :  { %v5807_v13 = vpop.f32.mrf.mxu0  ;;  %6137 = vmax.xlane.f32.xlu0 %v6136_v53 }
 0x764   :  { %v6024_v16 = vmax.f32 %v5806_v26, 0.0  ;;  %v18220_v26 = vpop.permute.xlu1 %5556 }
 0x765   :  { %v5810_v33 = vpop.f32.mrf.mxu0 }
 0x766   :  { %v5811_v12 = vadd.f32 %v5810_v33, %v17898_v23  ;;  %v6139_v63 = vsel %vm6063_vm11, %v6024_v16, -inf  ;;  %v6332_v50 = vsel %vm6256_vm12, %v6024_v16, -inf }
 0x767   :  { %v5812_v38 = vpop.f32.mrf.mxu0  ;;  %6330 = vmax.xlane.f32.xlu0 %v6329_v37 }
 0x768   :  { %v6025_v31 = vmax.f32 %v5811_v12, 0.0  ;;  %v5467_v38 = vpop.permute.xlu0 %5466  ;;  %v18224_v59 = vpop.permute.xlu1 %5551 }
 0x769   :  { %v5815_v39 = vpop.f32.mrf.mxu0 }
 0x76a   :  { %v5816_v36 = vadd.f32 %v5815_v39, %v17884_v40  ;;  %v6142_v5 = vsel %vm6063_vm11, %v6025_v31, -inf  ;;  %v6335_v12 = vsel %vm6256_vm12, %v6025_v31, -inf }
 0x76b   :  { %v5817_v13 = vpop.f32.mrf.mxu0  ;;  %6140 = vmax.xlane.f32.xlu0 %v6139_v63 }
 0x76c   :  { %v6026_v63 = vmax.f32 %v5816_v36, 0.0  ;;  %v5462_v13 = vpop.permute.xlu0 %5461 }
 0x76d   :  { %v5820_v53 = vpop.f32.mrf.mxu0 }
 0x76e   :  { %v6145_v40 = vsel %vm6063_vm11, %v6026_v63, -inf }
 0x76f   :  { %v5822_v1 = vpop.f32.mrf.mxu0  ;;  %6333 = vmax.xlane.f32.xlu0 %v6332_v50 }
 0x770   :  { %v5821_v1 = vadd.f32 %v5820_v53, %v17874_v62  ;;  %v5457_v36 = vpop.permute.xlu0 %5456 }
 0x771   :  { %v5825_v37 = vpop.f32.mrf.mxu0 }
 0x772   :  { %v6027_v31 = vmax.f32 %v5821_v1, 0.0 }
 0x773   :  { %v5827_v23 = vpop.f32.mrf.mxu0  ;;  %6143 = vmax.xlane.f32.xlu0 %v6142_v5  ;;  %v18232_v5 = vpop.permute.xlu1 %5546 }
 0x775   :  { %v5830_v33 = vpop.f32.mrf.mxu0 }
 0x777   :  { %v5832_v16 = vpop.f32.mrf.mxu0  ;;  %6336 = vmax.xlane.f32.xlu0 %v6335_v12  ;;  %v6338_v12 = vsel %vm6256_vm12, %v6026_v63, -inf }
 0x779   :  { %v5835_v50 = vpop.f32.mrf.mxu0 }
 0x77a   :  { %v18229_v54 = vadd.f32 %v5835_v50, %v17832_v20  ;;  %v18242_v50 = vpop.permute.xlu1 %5541 }
 0x77b   :  { %v5837_v39 = vpop.f32.mrf.mxu0  ;;  %6146 = vmax.xlane.f32.xlu0 %v6145_v40  ;;  %v5826_v40 = vadd.f32 %v5825_v37, %v17858_v28 }
 0x77c   :  { %v19786_v23 = vmax.f32 %v18229_v54, 0.0 }
 0x77d   :  { %v5840_v0 = vpop.f32.mrf.mxu0 }
 0x77e   :  { %v18235_v35 = vadd.f32 %v5840_v0, %v5457_v36  ;;  %v6157_v20 = vsel %vm6063_vm11, %v19786_v23, -inf  ;;  %v6148_v0 = vsel %vm6063_vm11, %v6027_v31, -inf  ;;  %v6341_v23 = vsel %vm6256_vm12, %v6027_v31, -inf }
 0x77f   :  { %v5842_v62 = vpop.f32.mrf.mxu0  ;;  %6339 = vmax.xlane.f32.xlu0 %v6338_v12  ;;  %6158 = vmax.xlane.f32.xlu1 %v6157_v20  ;;  %v6028_v20 = vmax.f32 %v5826_v40, 0.0 }
 0x780   :  { %v19787_v53 = vmax.f32 %v18235_v35, 0.0 }
 0x781   :  { %v5845_v16 = vpop.f32.mrf.mxu0 }
 0x782   :  { %v18245_v39 = vadd.f32 %v5845_v16, %v5462_v13  ;;  %v6160_v63 = vsel %vm6063_vm11, %v19787_v53, -inf  ;;  %v18258_v13 = vpop.permute.xlu1 %5536 }
 0x783   :  { %v5847_v1 = vpop.f32.mrf.mxu0  ;;  %6149 = vmax.xlane.f32.xlu0 %v6148_v0  ;;  %6161 = vmax.xlane.f32.xlu1 %v6160_v63  ;;  %v5831_v63 = vadd.f32 %v5830_v33, %v17848_v51  ;;  %v6344_v51 = vsel %vm6256_vm12, %v6028_v20, -inf }
 0x784   :  { %v19788_v36 = vmax.f32 %v18245_v39, 0.0 }
 0x785   :  { %v5850_v12 = vpop.f32.mrf.mxu0 }
 0x786   :  { %v18252_v62 = vadd.f32 %v5850_v12, %v5467_v38  ;;  %v6163_v28 = vsel %vm6063_vm11, %v19788_v36, -inf  ;;  %v6151_v38 = vsel %vm6063_vm11, %v6028_v20, -inf }
 0x787   :  { %v5852_v37 = vpop.f32.mrf.mxu0  ;;  %6342 = vmax.xlane.f32.xlu0 %v6341_v23  ;;  %6164 = vmax.xlane.f32.xlu1 %v6163_v28 }
 0x788   :  { %v19789_v16 = vmax.f32 %v18252_v62, 0.0  ;;  %v6029_v37 = vmax.f32 %v5831_v63, 0.0 }
 0x789   :  { %v5855_v0 = vpop.f32.mrf.mxu0 }
 0x78a   :  { %v18262_v1 = vadd.f32 %v5855_v0, %v5472_v56  ;;  %v6166_v31 = vsel %vm6063_vm11, %v19789_v16, -inf }
 0x78b   :  { %v5857_v40 = vpop.f32.mrf.mxu0  ;;  %6152 = vmax.xlane.f32.xlu0 %v6151_v38  ;;  %6167 = vmax.xlane.f32.xlu1 %v6166_v31 }
 0x78c   :  { %v19790_v23 = vmax.f32 %v18262_v1, 0.0  ;;  %v18269_v12 = vpop.xlane.xlu1 %6065 }
 0x78d   :  { %21402 = vst [vmem:[#allocation56_spill] sm:$0xff] %v18269_v12  ;;  %v5860_v28 = vpop.f32.mrf.mxu0 }
 0x78e   :  { %v18272_v53 = vadd.f32 %v5860_v28, %v18212_v41  ;;  %v6169_v56 = vsel %vm6063_vm11, %v19790_v23, -inf  ;;  %v6154_v41 = vsel %vm6063_vm11, %v6029_v37, -inf }
 0x78f   :  { %v5862_v33 = vpop.f32.mrf.mxu0  ;;  %6345 = vmax.xlane.f32.xlu0 %v6344_v51  ;;  %6170 = vmax.xlane.f32.xlu1 %v6169_v56 }
 0x790   :  { %v19791_v0 = vmax.f32 %v18272_v53, 0.0  ;;  %v18279_v38 = vpop.xlane.xlu1 %6068 }
 0x791   :  { %21403 = vst [vmem:[#allocation43_spill] sm:$0xff] %v18279_v38  ;;  %v5865_v31 = vpop.f32.mrf.mxu0 }
 0x792   :  { %v18282_v40 = vadd.f32 %v5865_v31, %v18206_v27  ;;  %v6172_v20 = vsel %vm6063_vm11, %v19791_v0, -inf  ;;  %v6347_v27 = vsel %vm6256_vm12, %v6029_v37, -inf }
 0x793   :  { %v5867_v63 = vpop.f32.mrf.mxu0  ;;  %6155 = vmax.xlane.f32.xlu0 %v6154_v41  ;;  %6173 = vmax.xlane.f32.xlu1 %v6172_v20 }
 0x794   :  { %v19792_v28 = vmax.f32 %v18282_v40, 0.0  ;;  %v18289_v51 = vpop.xlane.xlu1 %6071 }
 0x795   :  { %21404 = vst [vmem:[#allocation38_spill] sm:$0xff] %v18289_v51  ;;  %v5870_v56 = vpop.f32.mrf.mxu0 }
 0x796   :  { %v18292_v33 = vadd.f32 %v5870_v56, %v18188_v15  ;;  %v6175_v31 = vsel %vm6063_vm11, %v19792_v28, -inf  ;;  %v21406_v15 = vmax.f32 %v18229_v54, 0.0 }
 0x797   :  { %v5872_v36 = vpop.f32.mrf.mxu0  ;;  %6348 = vmax.xlane.f32.xlu0 %v6347_v27  ;;  %6176 = vmax.xlane.f32.xlu1 %v6175_v31 }
 0x798   :  { %v19793_v41 = vmax.f32 %v18292_v33, 0.0  ;;  %v18299_v20 = vpop.xlane.xlu1 %6074  ;;  %v6350_v56 = vsel %vm6256_vm12, %v21406_v15, -inf }
 0x799   :  { %21405 = vst [vmem:[#allocation45_spill] sm:$0xff] %v18299_v20  ;;  %v5875_v63 = vpop.f32.mrf.mxu0 }
 0x79a   :  { %v18302_v16 = vadd.f32 %v5875_v63, %v18175_v61  ;;  %v6178_v37 = vsel %vm6063_vm11, %v19793_v41, -inf }
 0x79b   :  { %v5877_v23 = vpop.f32.mrf.mxu0  ;;  %6351 = vmax.xlane.f32.xlu0 %v6350_v56  ;;  %6179 = vmax.xlane.f32.xlu1 %v6178_v37 }
 0x79c   :  { %v19794_v36 = vmax.f32 %v18302_v16, 0.0  ;;  %v18311_v27 = vpop.xlane.xlu1 %6077 }
 0x79d   :  { %v5880_v31 = vpop.f32.mrf.mxu0 }
 0x79e   :  { %v18314_v0 = vadd.f32 %v5880_v31, %v18156_v17  ;;  %v6181_v54 = vsel %vm6063_vm11, %v19794_v36, -inf }
 0x79f   :  { %v5882_v61 = vpop.f32.mrf.mxu0  ;;  %6182 = vmax.xlane.f32.xlu1 %v6181_v54 }
 0x7a0   :  { %v19795_v63 = vmax.f32 %v18314_v0, 0.0  ;;  %v18320_v15 = vpop.xlane.xlu1 %6080 }
 0x7a1   :  { %v5885_v23 = vpop.f32.mrf.mxu0 }
 0x7a2   :  { %v18323_v56 = vadd.f32 %v5885_v23, %v18142_v42  ;;  %v6184_v37 = vsel %vm6063_vm11, %v19795_v63, -inf }
 0x7a3   :  { %v5887_v17 = vpop.f32.mrf.mxu0  ;;  %6185 = vmax.xlane.f32.xlu1 %v6184_v37 }
 0x7a4   :  { %v19796_v31 = vmax.f32 %v18323_v56, 0.0  ;;  %v18329_v28 = vpop.xlane.xlu1 %6083 }
 0x7a5   :  { %v5890_v61 = vpop.f32.mrf.mxu0 }
 0x7a6   :  { %v18332_v54 = vadd.f32 %v5890_v61, %v18122_v45  ;;  %v6187_v41 = vsel %vm6063_vm11, %v19796_v31, -inf }
 0x7a7   :  { %v5892_v42 = vpop.f32.mrf.mxu0  ;;  %6188 = vmax.xlane.f32.xlu1 %v6187_v41 }
 0x7a8   :  { %v19797_v23 = vmax.f32 %v18332_v54, 0.0  ;;  %v18338_v63 = vpop.xlane.xlu1 %6086 }
 0x7a9   :  { %v5895_v36 = vpop.f32.mrf.mxu0 }
 0x7aa   :  { %v18341_v37 = vadd.f32 %v5895_v36, %v18110_v10  ;;  %v6190_v17 = vsel %vm6063_vm11, %v19797_v23, -inf }
 0x7ab   :  { %v5897_v45 = vpop.f32.mrf.mxu0  ;;  %6191 = vmax.xlane.f32.xlu1 %v6190_v17 }
 0x7ac   :  { %v19798_v61 = vmax.f32 %v18341_v37, 0.0  ;;  %v18353_v10 = vpop.xlane.xlu1 %6089 }
 0x7ad   :  { %v5900_v12 = vpop.f32.mrf.mxu0 }
 0x7ae   :  { %v18348_v42 = vadd.f32 %v5900_v12, %v18097_v4  ;;  %v6193_v41 = vsel %vm6063_vm11, %v19798_v61, -inf }
 0x7af   :  { %v5902_v31 = vpop.f32.mrf.mxu0  ;;  %6194 = vmax.xlane.f32.xlu1 %v6193_v41 }
 0x7b0   :  { %v19799_v36 = vmax.f32 %v18348_v42, 0.0  ;;  %v18363_v61 = vpop.xlane.xlu1 %6282 }
 0x7b1   :  { %v5905_v38 = vpop.f32.mrf.mxu0  ;;  %21407 = vst [vmem:[#allocation109_spill] sm:$0xff] %v18363_v61 }
 0x7b2   :  { %v18357_v45 = vadd.f32 %v5905_v38, %v18082_v11  ;;  %v6196_v17 = vsel %vm6063_vm11, %v19799_v36, -inf }
 0x7b3   :  { %v5907_v4 = vpop.f32.mrf.mxu0  ;;  %6197 = vmax.xlane.f32.xlu1 %v6196_v17 }
 0x7b4   :  { %v19800_v12 = vmax.f32 %v18357_v45, 0.0 }
 0x7b5   :  { %v5910_v23 = vpop.f32.mrf.mxu0 }
 0x7b6   :  { %v18366_v31 = vadd.f32 %v5910_v23, %v18066_v21  ;;  %v6199_v41 = vsel %vm6063_vm11, %v19800_v12, -inf  ;;  %v18378_v21 = vpop.xlane.xlu1 %6092 }
 0x7b7   :  { %v5912_v11 = vpop.f32.mrf.mxu0  ;;  %6200 = vmax.xlane.f32.xlu1 %v6199_v41 }
 0x7b8   :  { %v19801_v38 = vmax.f32 %v18366_v31, 0.0 }
 0x7b9   :  { %v5915_v51 = vpop.f32.mrf.mxu0 }
 0x7ba   :  { %v18373_v4 = vadd.f32 %v5915_v51, %v18054_v58  ;;  %v6202_v17 = vsel %vm6063_vm11, %v19801_v38, -inf  ;;  %v18388_v38 = vpop.xlane.xlu1 %6285 }
 0x7bb   :  { %v5917_v36 = vpop.f32.mrf.mxu0  ;;  %6203 = vmax.xlane.f32.xlu1 %v6202_v17  ;;  %21409 = vst [vmem:[#allocation159_spill] sm:$0xff] %v18388_v38 }
 0x7bc   :  { %v19802_v23 = vmax.f32 %v18373_v4, 0.0 }
 0x7bd   :  { %v5920_v61 = vpop.f32.mrf.mxu0 }
 0x7be   :  { %v18382_v11 = vadd.f32 %v5920_v61, %v18258_v13  ;;  %v6205_v41 = vsel %vm6063_vm11, %v19802_v23, -inf  ;;  %v21411_v13 = vmax.f32 %v18023_v57, 0.0 }
 0x7bf   :  { %v5922_v58 = vpop.f32.mrf.mxu0  ;;  %6206 = vmax.xlane.f32.xlu1 %v6205_v41 }
 0x7c0   :  { %21408 = vst [vmem:[#allocation75_spill] sm:$0xff] %v18382_v11  ;;  %v19803_v51 = vmax.f32 %v18382_v11, 0.0  ;;  %v6278_v61 = vsel %vm6256_vm12, %v21411_v13, -inf }
 0x7c1   :  { %v5925_v12 = vpop.f32.mrf.mxu0 }
 0x7c2   :  { %v18391_v36 = vadd.f32 %v5925_v12, %v18242_v50  ;;  %v6208_v17 = vsel %vm6063_vm11, %v19803_v51, -inf  ;;  %v21413_v12 = vmax.f32 %v18010_v9, 0.0  ;;  %v21414_v9 = vmax.f32 %v17995_v3, 0.0 }
 0x7c3   :  { %v5927_v20 = vpop.f32.mrf.mxu0  ;;  %6209 = vmax.xlane.f32.xlu0 %v6208_v17  ;;  %6279 = vmax.xlane.f32.xlu1 %v6278_v61  ;;  %v21416_v3 = vmax.f32 %v17980_v24, 0.0 }
 0x7c4   :  { %21410 = vst [vmem:[#allocation113_spill] sm:$0xff] %v18391_v36  ;;  %v19804_v41 = vmax.f32 %v18391_v36, 0.0  ;;  %v6275_v51 = vsel %vm6256_vm12, %v21413_v12, -inf  ;;  %v18409_v20 = vpop.xlane.xlu1 %6095  ;;  %v6272_v12 = vsel %vm6256_vm12, %v21414_v9, -inf }
 0x7c5   :  { %v5930_v58 = vpop.f32.mrf.mxu0  ;;  %v6269_v9 = vsel %vm6256_vm12, %v21416_v3, -inf }
 0x7c6   :  { %v18401_v23 = vadd.f32 %v5930_v58, %v18232_v5  ;;  %v6211_v50 = vsel %vm6063_vm11, %v19804_v41, -inf }
 0x7c7   :  { %v5932_v57 = vpop.f32.mrf.mxu0  ;;  %6212 = vmax.xlane.f32.xlu0 %v6211_v50  ;;  %6276 = vmax.xlane.f32.xlu1 %v6275_v51 }
 0x7c8   :  { %21412 = vst [vmem:[#allocation72_spill] sm:$0xff] %v18401_v23  ;;  %v19805_v17 = vmax.f32 %v18401_v23, 0.0  ;;  %v18412_v13 = vpop.xlane.xlu0 %6110  ;;  %v18426_v38 = vpop.xlane.xlu1 %6288 }
 0x7c9   :  { %v5935_v61 = vpop.f32.mrf.mxu0  ;;  %21415 = vst [vmem:[#allocation207_spill] sm:$0xff] %v18426_v38 }
 0x7ca   :  { %v18415_v5 = vadd.f32 %v5935_v61, %v18224_v59  ;;  %v6214_v58 = vsel %vm6063_vm11, %v19805_v17, -inf }
 0x7cb   :  { %v5937_v50 = vpop.f32.mrf.mxu0  ;;  %6215 = vmax.xlane.f32.xlu0 %v6214_v58  ;;  %6273 = vmax.xlane.f32.xlu1 %v6272_v12 }
 0x7cc   :  { %v19806_v51 = vmax.f32 %v18415_v5, 0.0  ;;  %v18424_v57 = vpop.xlane.xlu0 %6113 }
 0x7cd   :  { %v5940_v41 = vpop.f32.mrf.mxu0 }
 0x7ce   :  { %v18429_v59 = vadd.f32 %v5940_v41, %v18220_v26  ;;  %v6217_v61 = vsel %vm6063_vm11, %v19806_v51, -inf  ;;  %v21417_v41 = vmax.f32 %v17967_v60, 0.0  ;;  %v21418_v60 = vmax.f32 %v17953_v46, 0.0 }
 0x7cf   :  { %v5942_v58 = vpop.f32.mrf.mxu0  ;;  %6218 = vmax.xlane.f32.xlu0 %v6217_v61  ;;  %6270 = vmax.xlane.f32.xlu1 %v6269_v9  ;;  %v18449_v61 = vpop.xlane.xlu1 %6098  ;;  %v21420_v46 = vmax.f32 %v17939_v6, 0.0 }
 0x7d0   :  { %v19807_v12 = vmax.f32 %v18429_v59, 0.0  ;;  %v18438_v50 = vpop.xlane.xlu0 %6116  ;;  %v6266_v24 = vsel %vm6256_vm12, %v21417_v41, -inf  ;;  %v6263_v41 = vsel %vm6256_vm12, %v21418_v60, -inf }
 0x7d1   :  { %v5945_v17 = vpop.f32.mrf.mxu0  ;;  %v6260_v60 = vsel %vm6256_vm12, %v21420_v46, -inf }
 0x7d2   :  { %v18441_v38 = vadd.f32 %v5945_v17, %v18215_v34  ;;  %v6220_v26 = vsel %vm6063_vm11, %v19807_v12, -inf }
 0x7d3   :  { %v5947_v3 = vpop.f32.mrf.mxu0  ;;  %6221 = vmax.xlane.f32.xlu0 %v6220_v26  ;;  %6267 = vmax.xlane.f32.xlu1 %v6266_v24  ;;  %v18466_v11 = vpop.xlane.xlu1 %6291 }
 0x7d4   :  { %v19809_v9 = vmax.f32 %v18441_v38, 0.0  ;;  %v18452_v58 = vpop.xlane.xlu0 %6119  ;;  %21419 = vst [vmem:[#allocation143_spill] sm:$0xff] %v18466_v11 }
 0x7d5   :  { %v5950_v51 = vpop.f32.mrf.mxu0 }
 0x7d6   :  { %v18455_v34 = vadd.f32 %v5950_v51, %v18210_v22  ;;  %v6223_v17 = vsel %vm6063_vm11, %v19809_v9, -inf }
 0x7d7   :  { %v5952_v26 = vpop.f32.mrf.mxu0  ;;  %6224 = vmax.xlane.f32.xlu0 %v6223_v17  ;;  %6264 = vmax.xlane.f32.xlu1 %v6263_v41 }
 0x7d8   :  { %v19810_v24 = vmax.f32 %v18455_v34, 0.0  ;;  %v18464_v3 = vpop.xlane.xlu0 %6122 }
 0x7d9   :  { %v5955_v12 = vpop.f32.mrf.mxu0 }
 0x7da   :  { %v18469_v22 = vadd.f32 %v5955_v12, %v18200_v8  ;;  %v6226_v51 = vsel %vm6063_vm11, %v19810_v24, -inf  ;;  %v21421_v12 = vmax.f32 %v17930_v30, 0.0  ;;  %v21422_v30 = vmax.f32 %v18373_v4, 0.0 }
 0x7db   :  { %v5957_v17 = vpop.f32.mrf.mxu0  ;;  %6227 = vmax.xlane.f32.xlu0 %v6226_v51  ;;  %6261 = vmax.xlane.f32.xlu1 %v6260_v60  ;;  %v18489_v51 = vpop.xlane.xlu1 %6101  ;;  %v21424_v4 = vmax.f32 %v18366_v31, 0.0 }
 0x7dc   :  { %v19811_v41 = vmax.f32 %v18469_v22, 0.0  ;;  %v18478_v26 = vpop.xlane.xlu0 %6125  ;;  %v6257_v6 = vsel %vm6256_vm12, %v21421_v12, -inf  ;;  %v6398_v12 = vsel %vm6256_vm12, %v21422_v30, -inf }
 0x7dd   :  { %v5960_v9 = vpop.f32.mrf.mxu0  ;;  %v6395_v30 = vsel %vm6256_vm12, %v21424_v4, -inf }
 0x7de   :  { %v18481_v11 = vadd.f32 %v5960_v9, %v18185_v44  ;;  %v6229_v8 = vsel %vm6063_vm11, %v19811_v41, -inf }
 0x7df   :  { %v5962_v46 = vpop.f32.mrf.mxu0  ;;  %6230 = vmax.xlane.f32.xlu0 %v6229_v8  ;;  %6258 = vmax.xlane.f32.xlu1 %v6257_v6  ;;  %v18506_v36 = vpop.xlane.xlu1 %6294 }
 0x7e0   :  { %v19813_v60 = vmax.f32 %v18481_v11, 0.0  ;;  %v18492_v17 = vpop.xlane.xlu0 %6128  ;;  %21423 = vst [vmem:[#allocation152_spill] sm:$0xff] %v18506_v36 }
 0x7e1   :  { %v5965_v24 = vpop.f32.mrf.mxu0 }
 0x7e2   :  { %v18495_v44 = vadd.f32 %v5965_v24, %v18166_v2  ;;  %v6232_v9 = vsel %vm6063_vm11, %v19813_v60, -inf }
 0x7e3   :  { %v5967_v8 = vpop.f32.mrf.mxu0  ;;  %6233 = vmax.xlane.f32.xlu0 %v6232_v9  ;;  %6399 = vmax.xlane.f32.xlu1 %v6398_v12 }
 0x7e4   :  { %v19814_v6 = vmax.f32 %v18495_v44, 0.0  ;;  %v18504_v46 = vpop.xlane.xlu0 %6131 }
 0x7e5   :  { %v5970_v41 = vpop.f32.mrf.mxu0 }
 0x7e6   :  { %v18509_v2 = vadd.f32 %v5970_v41, %v18153_v25  ;;  %v6235_v24 = vsel %vm6063_vm11, %v19814_v6, -inf  ;;  %v21425_v41 = vmax.f32 %v18357_v45, 0.0  ;;  %v21426_v45 = vmax.f32 %v18348_v42, 0.0 }
 0x7e7   :  { %v5972_v9 = vpop.f32.mrf.mxu0  ;;  %6236 = vmax.xlane.f32.xlu0 %v6235_v24  ;;  %6396 = vmax.xlane.f32.xlu1 %v6395_v30  ;;  %v18529_v24 = vpop.xlane.xlu1 %6104  ;;  %v21428_v42 = vmax.f32 %v18341_v37, 0.0 }
 0x7e8   :  { %v19815_v12 = vmax.f32 %v18509_v2, 0.0  ;;  %v18518_v8 = vpop.xlane.xlu0 %6134  ;;  %v6392_v31 = vsel %vm6256_vm12, %v21425_v41, -inf  ;;  %v6389_v41 = vsel %vm6256_vm12, %v21426_v45, -inf }
 0x7e9   :  { %v5975_v60 = vpop.f32.mrf.mxu0  ;;  %v6386_v45 = vsel %vm6256_vm12, %v21428_v42, -inf }
 0x7ea   :  { %v18521_v36 = vadd.f32 %v5975_v60, %v18133_v55  ;;  %v6238_v25 = vsel %vm6063_vm11, %v19815_v12, -inf }
 0x7eb   :  { %v5977_v4 = vpop.f32.mrf.mxu0  ;;  %6239 = vmax.xlane.f32.xlu0 %v6238_v25  ;;  %6393 = vmax.xlane.f32.xlu1 %v6392_v31  ;;  %v18546_v23 = vpop.xlane.xlu1 %6297 }
 0x7ec   :  { %v19817_v30 = vmax.f32 %v18521_v36, 0.0  ;;  %v18532_v9 = vpop.xlane.xlu0 %6137 }
 0x7ed   :  { %v5980_v6 = vpop.f32.mrf.mxu0 }
 0x7ee   :  { %v18535_v55 = vadd.f32 %v5980_v6, %v18119_v49  ;;  %v6241_v60 = vsel %vm6063_vm11, %v19817_v30, -inf }
 0x7ef   :  { %v5982_v25 = vpop.f32.mrf.mxu0  ;;  %6242 = vmax.xlane.f32.xlu0 %v6241_v60  ;;  %6390 = vmax.xlane.f32.xlu1 %v6389_v41 }
 0x7f0   :  { %v19818_v31 = vmax.f32 %v18535_v55, 0.0  ;;  %v18544_v4 = vpop.xlane.xlu0 %6330 }
 0x7f1   :  { %21427 = vst [vmem:[#allocation206_spill] sm:$0xff] %v18544_v4  ;;  %v5985_v12 = vpop.f32.mrf.mxu0 }
 0x7f2   :  { %v18549_v49 = vadd.f32 %v5985_v12, %v18103_v19  ;;  %v6244_v6 = vsel %vm6063_vm11, %v19818_v31, -inf  ;;  %v21429_v12 = vmax.f32 %v18332_v54, 0.0  ;;  %v21431_v54 = vmax.f32 %v18323_v56, 0.0 }
 0x7f3   :  { %v5987_v60 = vpop.f32.mrf.mxu0  ;;  %6245 = vmax.xlane.f32.xlu0 %v6244_v6  ;;  %6387 = vmax.xlane.f32.xlu1 %v6386_v45  ;;  %v18569_v6 = vpop.xlane.xlu1 %6107 }
 0x7f4   :  { %v19819_v41 = vmax.f32 %v18549_v49, 0.0  ;;  %v18558_v25 = vpop.xlane.xlu0 %6140  ;;  %v6383_v37 = vsel %vm6256_vm12, %v21429_v12, -inf  ;;  %v6380_v12 = vsel %vm6256_vm12, %v21431_v54, -inf }
 0x7f5   :  { %v5990_v30 = vpop.f32.mrf.mxu0 }
 0x7f6   :  { %v18561_v4 = vadd.f32 %v5990_v30, %v18095_v14  ;;  %v6247_v19 = vsel %vm6063_vm11, %v19819_v41, -inf }
 0x7f7   :  { %v5992_v42 = vpop.f32.mrf.mxu0  ;;  %6248 = vmax.xlane.f32.xlu0 %v6247_v19  ;;  %6384 = vmax.xlane.f32.xlu1 %v6383_v37  ;;  %v18586_v41 = vpop.xlane.xlu1 %6300 }
 0x7f8   :  { %v19820_v45 = vmax.f32 %v18561_v4, 0.0  ;;  %v18572_v60 = vpop.xlane.xlu0 %6333 }
 0x7f9   :  { %21430 = vst [vmem:[#allocation70_spill] sm:$0xff] %v18572_v60  ;;  %v5995_v31 = vpop.f32.mrf.mxu0 }
 0x7fa   :  { %v18575_v14 = vadd.f32 %v5995_v31, %v18076_v48  ;;  %v6250_v30 = vsel %vm6063_vm11, %v19820_v45, -inf  ;;  %v21432_v31 = vmax.f32 %v18314_v0, 0.0  ;;  %v6450_v0 = vld [vmem:[%s19166_s8 + $0x8] sm:$0xff] }
 0x7fb   :  { %6251 = vmax.xlane.f32.xlu0 %v6250_v30  ;;  %6381 = vmax.xlane.f32.xlu1 %v6380_v12  ;;  %v5997_v19 = vpop.f32.mrf.mxu0  ;;  %v21433_v30 = vmax.f32 %v18191_v47, 0.0  ;;  %v21434_v12 = vmax.f32 %v18302_v16, 0.0  ;;  %v18602_v60 = vpop.xlane.xlu1 %6303  ;;  %v21436_v47 = vmax.f32 %v18292_v33, 0.0 }
 0x7fc   :  { %v19821_v37 = vmax.f32 %v18575_v14, 0.0  ;;  %v18584_v42 = vpop.xlane.xlu0 %6143  ;;  %v6377_v45 = vsel %vm6256_vm12, %v21432_v31, -inf  ;;  %6585 = vmatprep.mubr.f32.mxu1 %v6450_v0 }
 0x7fd   :  { %v6326_v54 = vsel %vm6256_vm12, %v21433_v30, -inf  ;;  %v6374_v19 = vsel %vm6256_vm12, %v21434_v12, -inf  ;;  %v6371_v31 = vsel %vm6256_vm12, %v21436_v47, -inf  ;;  %v21440_v47 = vmax.f32 %v18272_v53, 0.0 }
 0x7fe   :  { %v6253_v48 = vsel %vm6063_vm11, %v19821_v37, -inf }
 0x7ff   :  { %6254 = vmax.xlane.f32.xlu0 %v6253_v48  ;;  %6378 = vmax.xlane.f32.xlu1 %v6377_v45  ;;  %v21435_v45 = vmax.f32 %v18179_v29, 0.0  ;;  %v21438_v29 = vmax.f32 %v18282_v40, 0.0 }
 0x800   :  { %v18594_v56 = vpop.xlane.xlu0 %6336 }
 0x801   :  { %v6323_v48 = vsel %vm6256_vm12, %v21435_v45, -inf  ;;  %v21439_v45 = vmax.f32 %v18159_v43, 0.0 }
 0x803   :  { %6327 = vmax.xlane.f32.xlu0 %v6326_v54  ;;  %6375 = vmax.xlane.f32.xlu1 %v6374_v19  ;;  %v21437_v54 = vmax.f32 %v18169_v18, 0.0  ;;  %v6368_v19 = vsel %vm6256_vm12, %v21438_v29, -inf  ;;  %v21443_v29 = vmax.f32 %v18136_v7, 0.0 }
 0x804   :  { %v6147_v37 = vpop.xlane.xlu0 %6146 }
 0x805   :  { %v6320_v12 = vsel %vm6256_vm12, %v21437_v54, -inf  ;;  %v21442_v54 = vmax.f32 %v18262_v1, 0.0 }
 0x807   :  { %6324 = vmax.xlane.f32.xlu0 %v6323_v48  ;;  %6372 = vmax.xlane.f32.xlu1 %v6371_v31  ;;  %v6317_v48 = vsel %vm6256_vm12, %v21439_v45, -inf  ;;  %v21441_v31 = vmax.f32 %v18147_v52, 0.0  ;;  %v6362_v43 = vsel %vm6256_vm12, %v21442_v54, -inf  ;;  %v21444_v45 = vmax.f32 %v18252_v62, 0.0  ;;  %v21447_v54 = vld [vmem:[#allocation42_spill] sm:$0xff] }
 0x808   :  { %v18613_v16 = vpop.xlane.xlu0 %6339  ;;  %v6159_v30 = vpop.xlane.xlu1 %6158 }
 0x809   :  { %7222 = vmatprep.subr.mxu1 %v6159_v30  ;;  %v6314_v30 = vsel %vm6256_vm12, %v21441_v31, -inf  ;;  %v21446_v31 = vmax.f32 %v18245_v39, 0.0 }
 0x80a   :  { %7223 = vmatpush3.msra.mxu1 %v18412_v13  ;;  %v6365_v13 = vsel %vm6256_vm12, %v21440_v47, -inf  ;;  %v21445_v47 = vmax.f32 %v18126_v32, 0.0  ;;  %v21449_v32 = vmax.f32 %v18235_v35, 0.0  ;;  %v21451_v35 = vmax.f32 %v18549_v49, 0.0  ;;  %v6465_v49 = vld [vmem:[%s19166_s8 + $0x80] sm:$0xff] }
 0x80b   :  { %6321 = vmax.xlane.f32.xlu0 %v6320_v12  ;;  %6369 = vmax.xlane.f32.xlu1 %v6368_v19  ;;  %v6311_v19 = vsel %vm6256_vm12, %v21443_v29, -inf  ;;  %v6356_v7 = vsel %vm6256_vm12, %v21446_v31, -inf }
 0x80c   :  { %v6150_v33 = vpop.xlane.xlu0 %6149  ;;  %v18622_v0 = vpop.xlane.xlu1 %6161 }
 0x80f   :  { %6318 = vmax.xlane.f32.xlu0 %v6317_v48  ;;  %6366 = vmax.xlane.f32.xlu1 %v6365_v13  ;;  %v6359_v48 = vsel %vm6256_vm12, %v21444_v45, -inf  ;;  %v6308_v13 = vsel %vm6256_vm12, %v21445_v47, -inf  ;;  %v21450_v45 = vmax.f32 %v18561_v4, 0.0  ;;  %v21463_v47 = vmax.f32 %v18455_v34, 0.0 }
 0x810   :  { %v18630_v18 = vpop.xlane.xlu0 %6342  ;;  %v18632_v40 = vpop.xlane.xlu1 %6164 }
 0x813   :  { %6315 = vmax.xlane.f32.xlu0 %v6314_v30  ;;  %6363 = vmax.xlane.f32.xlu1 %v6362_v43  ;;  %v21448_v43 = vmax.f32 %v21447_v54, 0.0  ;;  %v21464_v54 = vmax.f32 %v18441_v38, 0.0 }
 0x814   :  { %v6153_v12 = vpop.xlane.xlu0 %6152  ;;  %v18640_v53 = vpop.xlane.xlu1 %6167 }
 0x815   :  { %v6305_v29 = vsel %vm6256_vm12, %v21448_v43, -inf  ;;  %v6416_v34 = vsel %vm6256_vm12, %v21464_v54, -inf  ;;  %v6490_v43 = vld [vmem:[%s19166_s8 + $0x148] sm:$0xff] }
 0x817   :  { %6312 = vmax.xlane.f32.xlu0 %v6311_v19  ;;  %6360 = vmax.xlane.f32.xlu1 %v6359_v48  ;;  %v6353_v19 = vsel %vm6256_vm12, %v21449_v32, -inf }
 0x818   :  { %v18648_v52 = vpop.xlane.xlu0 %6345  ;;  %v18650_v1 = vpop.xlane.xlu1 %6170 }
 0x81b   :  { %6309 = vmax.xlane.f32.xlu0 %v6308_v13  ;;  %6357 = vmax.xlane.f32.xlu1 %v6356_v7  ;;  %v6419_v13 = vsel %vm6256_vm12, %v21463_v47, -inf }
 0x81c   :  { %v6156_v30 = vpop.xlane.xlu0 %6155  ;;  %v18658_v62 = vpop.xlane.xlu1 %6173 }
 0x81d   :  { %7224 = vmatprep.subr.mxu1 %v6156_v30  ;;  %v6481_v30 = vld [vmem:[%s19166_s8 + $0x100] sm:$0xff] }
 0x81e   :  { %7225 = vmatpush3.msra.mxu1 %v18569_v6  ;;  %v6443_v6 = vsel %vm6256_vm12, %v21450_v45, -inf  ;;  %v21465_v45 = vmax.f32 %v18429_v59, 0.0  ;;  %v6506_v59 = vld [vmem:[%s19166_s8 + $0x1c8] sm:$0xff] }
 0x81f   :  { %6306 = vmax.xlane.f32.xlu0 %v6305_v29  ;;  %6354 = vmax.xlane.f32.xlu1 %v6353_v19  ;;  %v6489_v19 = vld [vmem:[%s19166_s8 + $0x140] sm:$0xff] }
 0x820   :  { %7226 = vmatprep.subr.mxu1 %v6153_v12  ;;  %v18667_v39 = vpop.xlane.xlu1 %6176  ;;  %v6440_v12 = vsel %vm6256_vm12, %v21451_v35, -inf  ;;  %v6413_v38 = vsel %vm6256_vm12, %v21465_v45, -inf }
 0x821   :  { %7227 = vmatpush3.msra.mxu1 %v18529_v24  ;;  %v21452_v24 = vmax.f32 %v18535_v55, 0.0 }
 0x822   :  { %7228 = vmatprep.subr.mxu1 %v6150_v33  ;;  %v6473_v33 = vld [vmem:[%s19166_s8 + $0xc0] sm:$0xff] }
 0x823   :  { %7229 = vmatpush3.msra.mxu1 %v18489_v51  ;;  %6444 = vmax.xlane.f32.xlu0 %v6443_v6  ;;  %v6498_v6 = vld [vmem:[%s19166_s8 + $0x188] sm:$0xff] }
 0x824   :  { %7230 = vmatprep.subr.mxu1 %v6147_v37  ;;  %v18674_v48 = vpop.xlane.xlu1 %6179  ;;  %v21462_v37 = vmax.f32 %v18469_v22, 0.0  ;;  %v6482_v22 = vld [vmem:[%s19166_s8 + $0x108] sm:$0xff] }
 0x825   :  { %7231 = vmatpush3.msra.mxu1 %v18449_v61  ;;  %v6437_v61 = vsel %vm6256_vm12, %v21452_v24, -inf  ;;  %v21466_v24 = vmax.f32 %v18415_v5, 0.0 }
 0x826   :  { %7232 = vmatprep.subr.mxu1 %v18584_v42  ;;  %v6474_v42 = vld [vmem:[%s19166_s8 + $0xc8] sm:$0xff] }
 0x827   :  { %7233 = vmatpush3.msra.mxu1 %v18409_v20  ;;  %6441 = vmax.xlane.f32.xlu0 %v6440_v12  ;;  %v21453_v20 = vmax.f32 %v18521_v36, 0.0  ;;  %v6497_v12 = vld [vmem:[%s19166_s8 + $0x180] sm:$0xff] }
 0x828   :  { %7234 = vmatprep.subr.mxu1 %v18558_v25  ;;  %v18684_v51 = vpop.xlane.xlu1 %6182  ;;  %v18745_v25 = vpop.xlane.xlu0 %6348 }
 0x829   :  { %7235 = vmatpush3.msra.mxu1 %v18378_v21  ;;  %v6434_v21 = vsel %vm6256_vm12, %v21453_v20, -inf }
 0x82a   :  { %7236 = vmatprep.subr.mxu1 %v18532_v9  ;;  %v6466_v9 = vld [vmem:[%s19166_s8 + $0x88] sm:$0xff] }
 0x82b   :  { %7237 = vmatpush3.msra.mxu1 %v18353_v10  ;;  %6438 = vmax.xlane.f32.xlu0 %v6437_v61  ;;  %v21454_v10 = vmax.f32 %v18509_v2, 0.0  ;;  %v6410_v61 = vsel %vm6256_vm12, %v21466_v24, -inf }
 0x82c   :  { %7238 = vmatprep.subr.mxu1 %v18518_v8  ;;  %v18697_v4 = vpop.xlane.xlu1 %6185  ;;  %v21460_v8 = vld [vmem:[#allocation56_spill] sm:$0xff]  ;;  %v18764_v7 = vpop.xlane.xlu0 %6351 }
 0x82d   :  { %7239 = vmatpush3.msra.mxu1 %v18338_v63  ;;  %v6431_v63 = vsel %vm6256_vm12, %v21454_v10, -inf  ;;  %v6505_v10 = vld [vmem:[%s19166_s8 + $0x1c0] sm:$0xff] }
 0x82e   :  { %7240 = vmatprep.subr.mxu1 %v18504_v46  ;;  %v21455_v46 = vld [vmem:[#allocation45_spill] sm:$0xff] }
 0x82f   :  { %7241 = vmatpush3.msra.mxu1 %v18329_v28  ;;  %6435 = vmax.xlane.f32.xlu0 %v6434_v21  ;;  %v21456_v28 = vmax.f32 %v18495_v44, 0.0  ;;  %v6458_v44 = vld [vmem:[%s19166_s8 + $0x48] sm:$0xff] }
 0x830   :  { %7242 = vmatprep.subr.mxu1 %v18492_v17  ;;  %v18708_v36 = vpop.xlane.xlu1 %6188  ;;  %v21458_v17 = vld [vmem:[#allocation43_spill] sm:$0xff] }
 0x831   :  { %7243 = vmatpush3.msra.mxu1 %v18320_v15  ;;  %v6428_v15 = vsel %vm6256_vm12, %v21456_v28, -inf  ;;  %v6452_v28 = vld [vmem:[%s19166_s8 + $0x18] sm:$0xff] }
 0x832   :  { %7244 = vmatprep.subr.mxu1 %v18478_v26  ;;  %v21457_v26 = vld [vmem:[#allocation38_spill] sm:$0xff] }
 0x833   :  { %7245 = vmatpush3.msra.mxu1 %v18311_v27  ;;  %6432 = vmax.xlane.f32.xlu0 %v6431_v63  ;;  %v6449_v27 = vld [vmem:[%s19166_s8] sm:$0xff]  ;;  %v21467_v63 = vld [vmem:[#allocation72_spill] sm:$0xff] }
 0x834   :  { %7246 = vmatprep.subr.mxu1 %v18464_v3  ;;  %v21459_v3 = vmax.f32 %v18481_v11, 0.0  ;;  %v18728_v2 = vpop.xlane.xlu1 %6191 }
 0x835   :  { %7247 = vmatpush3.msra.mxu1 %v21455_v46  ;;  %v21468_v46 = vmax.f32 %v21467_v63, 0.0  ;;  %v6483_v63 = vld [vmem:[%s19166_s8 + $0x110] sm:$0xff] }
 0x836   :  { %7248 = vmatprep.subr.mxu1 %v18452_v58  ;;  %v6425_v58 = vsel %vm6256_vm12, %v21459_v3, -inf }
 0x837   :  { %7249 = vmatpush3.msra.mxu1 %v21457_v26  ;;  %6429 = vmax.xlane.f32.xlu0 %v6428_v15  ;;  %v6407_v5 = vsel %vm6256_vm12, %v21468_v46, -inf  ;;  %v21478_v46 = vld [vmem:[#allocation206_spill] sm:$0xff] }
 0x838   :  { %7250 = vmatprep.subr.mxu1 %v18438_v50  ;;  %v6457_v50 = vld [vmem:[%s19166_s8 + $0x40] sm:$0xff]  ;;  %v18740_v55 = vpop.xlane.xlu1 %6194 }
 0x839   :  { %7251 = vmatpush3.msra.mxu1 %v21458_v17  ;;  %v21469_v17 = vld [vmem:[#allocation113_spill] sm:$0xff] }
 0x83a   :  { %7252 = vmatprep.subr.mxu1 %v18424_v57  ;;  %v21461_v57 = vmax.f32 %v18575_v14, 0.0  ;;  %v6422_v14 = vsel %vm6256_vm12, %v21462_v37, -inf }
 0x83b   :  { %7253 = vmatpush3.msra.mxu1 %v21460_v8  ;;  %6426 = vmax.xlane.f32.xlu0 %v6425_v58 }
 0x83c   :  { %6586 = vmatmul.mubr.f32.vlgmr.msra.gmra.mxu1 %v6449_v27  ;;  %v6446_v11 = vsel %vm6256_vm12, %v21461_v57, -inf  ;;  %v18762_v31 = vpop.xlane.xlu1 %6197  ;;  %v21470_v27 = vmax.f32 %v21469_v17, 0.0  ;;  %v6500_v17 = vld [vmem:[%s19166_s8 + $0x198] sm:$0xff] }
 0x83d   :  { %6590 = vmatprep.mubr.f32.mxu1 %v6458_v44  ;;  %v21471_v44 = vld [vmem:[#allocation75_spill] sm:$0xff] }
 0x83e   :  { %v6404_v3 = vsel %vm6256_vm12, %v21470_v27, -inf  ;;  %v21472_v8 = vmax.f32 %v21471_v44, 0.0  ;;  %v6508_v44 = vld [vmem:[%s19166_s8 + $0x1d8] sm:$0xff] }
 0x83f   :  { %6447 = vmax.xlane.f32.xlu0 %v6446_v11 }
 0x840   :  { %6591 = vmatmul.mubr.f32.gmra.mxu1 %v6457_v50  ;;  %v6201_v32 = vpop.xlane.xlu1 %6200  ;;  %v6401_v50 = vsel %vm6256_vm12, %v21472_v8, -inf }
 0x841   :  { %6595 = vmatprep.mubr.f32.mxu1 %v6466_v9 }
 0x843   :  { %6423 = vmax.xlane.f32.xlu0 %v6422_v14 }
 0x844   :  { %6596 = vmatmul.mubr.f32.gmra.mxu1 %v6465_v49  ;;  %v6204_v20 = vpop.xlane.xlu1 %6203 }
 0x845   :  { %6600 = vmatprep.mubr.f32.mxu1 %v6474_v42 }
 0x847   :  { %6420 = vmax.xlane.f32.xlu0 %v6419_v13 }
 0x848   :  { %6601 = vmatmul.mubr.f32.gmra.mxu1 %v6473_v33  ;;  %v6207_v26 = vpop.xlane.xlu1 %6206 }
 0x849   :  { %6605 = vmatprep.mubr.f32.mxu1 %v6482_v22 }
 0x84b   :  { %6417 = vmax.xlane.f32.xlu0 %v6416_v34 }
 0x84c   :  { %v18775_v29 = vpop.xlane.xlu0 %6209  ;;  %6606 = vmatmul.mubr.f32.gmra.mxu1 %v6481_v30  ;;  %v18814_v57 = vpop.xlane.xlu1 %6279 }
 0x84d   :  { %6610 = vmatprep.mubr.f32.mxu1 %v6490_v43 }
 0x84f   :  { %6414 = vmax.xlane.f32.xlu0 %v6413_v38 }
 0x850   :  { %v18786_v35 = vpop.xlane.xlu0 %6212  ;;  %6611 = vmatmul.mubr.f32.gmra.mxu1 %v6489_v19  ;;  %v18816_v49 = vpop.xlane.xlu1 %6276 }
 0x851   :  { %6615 = vmatprep.mubr.f32.mxu1 %v6498_v6 }
 0x853   :  { %6411 = vmax.xlane.f32.xlu0 %v6410_v61 }
 0x854   :  { %v18797_v21 = vpop.xlane.xlu0 %6215  ;;  %6616 = vmatmul.mubr.f32.gmra.mxu1 %v6497_v12  ;;  %v18818_v14 = vpop.xlane.xlu1 %6273 }
 0x855   :  { %6620 = vmatprep.mubr.f32.mxu1 %v6506_v59 }
 0x857   :  { %6408 = vmax.xlane.f32.xlu0 %v6407_v5 }
 0x858   :  { %v6219_v15 = vpop.xlane.xlu0 %6218  ;;  %6621 = vmatmul.mubr.f32.gmra.mxu1 %v6505_v10  ;;  %v18820_v47 = vpop.xlane.xlu1 %6270 }
 0x859   :  { %6690 = vmatprep.mubr.f32.mxu1 %v6452_v28  ;;  %v21479_v28 = vld [vmem:[#allocation109_spill] sm:$0xff] }
 0x85b   :  { %6405 = vmax.xlane.f32.xlu0 %v6404_v3  ;;  %v6499_v3 = vld [vmem:[%s19166_s8 + $0x190] sm:$0xff] }
 0x85c   :  { %v6222_v58 = vpop.xlane.xlu0 %6221  ;;  %v18822_v22 = vpop.xlane.xlu1 %6267 }
 0x85f   :  { %6402 = vmax.xlane.f32.xlu0 %v6401_v50  ;;  %v6507_v50 = vld [vmem:[%s19166_s8 + $0x1d0] sm:$0xff] }
 0x860   :  { %v6225_v11 = vpop.xlane.xlu0 %6224  ;;  %v18824_v34 = vpop.xlane.xlu1 %6264 }
 0x864   :  { %v6228_v9 = vpop.xlane.xlu0 %6227  ;;  %v18826_v19 = vpop.xlane.xlu1 %6261 }
 0x868   :  { %v6231_v37 = vpop.xlane.xlu0 %6230  ;;  %v18828_v6 = vpop.xlane.xlu1 %6258 }
 0x86c   :  { %v6234_v42 = vpop.xlane.xlu0 %6233  ;;  %v18832_v24 = vpop.xlane.xlu1 %6399 }
 0x870   :  { %v6237_v33 = vpop.xlane.xlu0 %6236  ;;  %v18841_v10 = vpop.xlane.xlu1 %6396 }
 0x874   :  { %v6240_v13 = vpop.xlane.xlu0 %6239 }
 0x878   :  { %v6243_v30 = vpop.xlane.xlu0 %6242 }
 0x87c   :  { %v6246_v54 = vpop.xlane.xlu0 %6245 }
 0x880   :  { %v6249_v43 = vpop.xlane.xlu0 %6248 }
 0x884   :  { %v6252_v45 = vpop.xlane.xlu0 %6251 }
 0x888   :  { %v6255_v38 = vpop.xlane.xlu0 %6254 }
 0x889   :  { %7278 = vmatprep.subr.mxu1 %v6255_v38  ;;  %v6485_v38 = vld [vmem:[%s19166_s8 + $0x120] sm:$0xff] }
 0x88a   :  { %7279 = vmatpush3.msra.mxu1 %v6207_v26  ;;  %v6491_v26 = vld [vmem:[%s19166_s8 + $0x150] sm:$0xff] }
 0x88b   :  { %7280 = vmatprep.subr.mxu1 %v6252_v45 }
 0x88c   :  { %v18830_v12 = vpop.xlane.xlu0 %6327  ;;  %7281 = vmatpush3.msra.mxu1 %v6204_v20  ;;  %v21475_v20 = vld [vmem:[#allocation207_spill] sm:$0xff] }
 0x88d   :  { %7282 = vmatprep.subr.mxu1 %v6249_v43  ;;  %v6477_v43 = vld [vmem:[%s19166_s8 + $0xe0] sm:$0xff] }
 0x88e   :  { %7283 = vmatpush3.msra.mxu1 %v6201_v32 }
 0x88f   :  { %7284 = vmatprep.subr.mxu1 %v6246_v54 }
 0x890   :  { %v18834_v61 = vpop.xlane.xlu0 %6324  ;;  %7285 = vmatpush3.msra.mxu1 %v18762_v31  ;;  %v18848_v31 = vpop.xlane.xlu1 %6393 }
 0x891   :  { %7286 = vmatprep.subr.mxu1 %v6243_v30  ;;  %v6478_v30 = vld [vmem:[%s19166_s8 + $0xe8] sm:$0xff] }
 0x892   :  { %7287 = vmatpush3.msra.mxu1 %v18740_v55 }
 0x893   :  { %7288 = vmatprep.subr.mxu1 %v6240_v13 }
 0x894   :  { %v18838_v59 = vpop.xlane.xlu0 %6321  ;;  %7289 = vmatpush3.msra.mxu1 %v18728_v2  ;;  %v18857_v2 = vpop.xlane.xlu1 %6390 }
 0x895   :  { %7290 = vmatprep.subr.mxu1 %v6237_v33 }
 0x896   :  { %7291 = vmatpush3.msra.mxu1 %v18708_v36 }
 0x897   :  { %7292 = vmatprep.subr.mxu1 %v6234_v42  ;;  %v6461_v42 = vld [vmem:[%s19166_s8 + $0x60] sm:$0xff] }
 0x898   :  { %v18844_v32 = vpop.xlane.xlu0 %6318  ;;  %7293 = vmatpush3.msra.mxu1 %v18697_v4 }
 0x899   :  { %7294 = vmatprep.subr.mxu1 %v6231_v37  ;;  %v6462_v37 = vld [vmem:[%s19166_s8 + $0x68] sm:$0xff] }
 0x89a   :  { %7295 = vmatpush3.msra.mxu1 %v18684_v51 }
 0x89b   :  { %7296 = vmatprep.subr.mxu1 %v6228_v9 }
 0x89c   :  { %v18850_v55 = vpop.xlane.xlu0 %6315  ;;  %7297 = vmatpush3.msra.mxu1 %v18674_v48 }
 0x89d   :  { %7298 = vmatprep.subr.mxu1 %v6225_v11 }
 0x89e   :  { %7299 = vmatpush3.msra.mxu1 %v18667_v39  ;;  %v6451_v39 = vld [vmem:[%s19166_s8 + $0x10] sm:$0xff] }
 0x89f   :  { %7300 = vmatprep.subr.mxu1 %v6222_v58 }
 0x8a0   :  { %v18854_v36 = vpop.xlane.xlu0 %6312  ;;  %7301 = vmatpush3.msra.mxu1 %v18658_v62  ;;  %v18869_v62 = vpop.xlane.xlu1 %6387 }
 0x8a1   :  { %7302 = vmatprep.subr.mxu1 %v6219_v15 }
 0x8a2   :  { %7303 = vmatpush3.msra.mxu1 %v18650_v1  ;;  %v6460_v1 = vld [vmem:[%s19166_s8 + $0x58] sm:$0xff] }
 0x8a3   :  { %7304 = vmatprep.subr.mxu1 %v18797_v21  ;;  %v21477_v21 = vld [vmem:[#allocation159_spill] sm:$0xff] }
 0x8a4   :  { %v18861_v51 = vpop.xlane.xlu0 %6309  ;;  %7305 = vmatpush3.msra.mxu1 %v18640_v53  ;;  %v6468_v53 = vld [vmem:[%s19166_s8 + $0x98] sm:$0xff] }
 0x8a5   :  { %7306 = vmatprep.subr.mxu1 %v18786_v35 }
 0x8a6   :  { %7307 = vmatpush3.msra.mxu1 %v18632_v40  ;;  %v6459_v40 = vld [vmem:[%s19166_s8 + $0x50] sm:$0xff] }
 0x8a7   :  { %7308 = vmatprep.subr.mxu1 %v18775_v29 }
 0x8a8   :  { %v18875_v48 = vpop.xlane.xlu0 %6306  ;;  %7309 = vmatpush3.msra.mxu1 %v18622_v0  ;;  %v18890_v0 = vpop.xlane.xlu1 %6384 }
 0x8a9   :  { %6691 = vmatmul.mubr.f32.vlgmr.msra.gmra.mxu1 %v6451_v39  ;;  %7334 = vmatprep.subr.mxu1 %v18764_v7  ;;  %v6456_v39 = vld [vmem:[%s19166_s8 + $0x38] sm:$0xff] }
 0x8aa   :  { %7335 = vmatpush3.msra.mxu1 %v18602_v60  ;;  %6695 = vmatprep.mubr.f32.mxu1 %v6460_v1  ;;  %v6467_v60 = vld [vmem:[%s19166_s8 + $0x90] sm:$0xff] }
 0x8ab   :  { %7336 = vmatprep.subr.mxu1 %v18745_v25  ;;  %v6476_v25 = vld [vmem:[%s19166_s8 + $0xd8] sm:$0xff] }
 0x8ac   :  { %v18887_v4 = vpop.xlane.xlu0 %6444  ;;  %7337 = vmatpush3.msra.mxu1 %v18586_v41  ;;  %v21473_v41 = vld [vmem:[#allocation152_spill] sm:$0xff]  ;;  %v18909_v29 = vpop.xlane.xlu1 %6381 }
 0x8ad   :  { %6696 = vmatmul.mubr.f32.gmra.mxu1 %v6459_v40  ;;  %7338 = vmatprep.subr.mxu1 %v18648_v52  ;;  %v21474_v52 = vld [vmem:[#allocation143_spill] sm:$0xff] }
 0x8ae   :  { %7339 = vmatpush3.msra.mxu1 %v18546_v23  ;;  %6700 = vmatprep.mubr.f32.mxu1 %v6468_v53  ;;  %v6475_v23 = vld [vmem:[%s19166_s8 + $0xd0] sm:$0xff]  ;;  %v6464_v53 = vld [vmem:[%s19166_s8 + $0x78] sm:$0xff] }
 0x8af   :  { %7340 = vmatprep.subr.mxu1 %v18630_v18  ;;  %v6484_v18 = vld [vmem:[%s19166_s8 + $0x118] sm:$0xff] }
 0x8b0   :  { %v18901_v7 = vpop.xlane.xlu0 %6441  ;;  %7341 = vmatpush3.msra.mxu1 %v21473_v41  ;;  %v18928_v15 = vpop.xlane.xlu1 %6378  ;;  %v6488_v41 = vld [vmem:[%s19166_s8 + $0x138] sm:$0xff] }
 0x8b1   :  { %6701 = vmatmul.mubr.f32.gmra.mxu1 %v6467_v60  ;;  %7342 = vmatprep.subr.mxu1 %v18613_v16  ;;  %v21476_v16 = vld [vmem:[#allocation70_spill] sm:$0xff]  ;;  %v6471_v60 = vld [vmem:[%s19166_s8 + $0xb0] sm:$0xff] }
 0x8b2   :  { %7343 = vmatpush3.msra.mxu1 %v21474_v52  ;;  %6705 = vmatprep.mubr.f32.mxu1 %v6476_v25  ;;  %v6480_v25 = vld [vmem:[%s19166_s8 + $0xf8] sm:$0xff]  ;;  %v6487_v52 = vld [vmem:[%s19166_s8 + $0x130] sm:$0xff] }
 0x8b3   :  { %7344 = vmatprep.subr.mxu1 %v18594_v56  ;;  %v6492_v56 = vld [vmem:[%s19166_s8 + $0x158] sm:$0xff] }
 0x8b4   :  { %v18915_v35 = vpop.xlane.xlu0 %6438  ;;  %7345 = vmatpush3.msra.mxu1 %v21475_v20  ;;  %v18945_v58 = vpop.xlane.xlu1 %6375 }
 0x8b5   :  { %6706 = vmatmul.mubr.f32.gmra.mxu1 %v6475_v23  ;;  %7346 = vmatprep.subr.mxu1 %v21476_v16  ;;  %v6496_v23 = vld [vmem:[%s19166_s8 + $0x178] sm:$0xff] }
 0x8b6   :  { %7347 = vmatpush3.msra.mxu1 %v21477_v21  ;;  %6710 = vmatprep.mubr.f32.mxu1 %v6484_v18  ;;  %v6503_v21 = vld [vmem:[%s19166_s8 + $0x1b0] sm:$0xff] }
 0x8b7   :  { %7348 = vmatprep.subr.mxu1 %v21478_v46  ;;  %v6512_v46 = vld [vmem:[%s19166_s8 + $0x1f8] sm:$0xff] }
 0x8b8   :  { %v6436_v5 = vpop.xlane.xlu0 %6435  ;;  %7349 = vmatpush3.msra.mxu1 %v21479_v28  ;;  %v6373_v9 = vpop.xlane.xlu1 %6372  ;;  %v6511_v28 = vld [vmem:[%s19166_s8 + $0x1f0] sm:$0xff] }
 0x8b9   :  { %6711 = vmatmul.mubr.f32.gmra.mxu1 %v6483_v63  ;;  %7350 = vmatprep.subr.mxu1 %v18830_v12  ;;  %v6494_v12 = vld [vmem:[%s19166_s8 + $0x168] sm:$0xff] }
 0x8ba   :  { %7351 = vmatpush3.msra.mxu1 %v18814_v57  ;;  %6715 = vmatprep.mubr.f32.mxu1 %v6492_v56  ;;  %v6454_v57 = vld [vmem:[%s19166_s8 + $0x28] sm:$0xff] }
 0x8bb   :  { %7352 = vmatprep.subr.mxu1 %v18834_v61  ;;  %v6493_v61 = vld [vmem:[%s19166_s8 + $0x160] sm:$0xff] }
 0x8bc   :  { %v6433_v27 = vpop.xlane.xlu0 %6432  ;;  %7353 = vmatpush3.msra.mxu1 %v18816_v49  ;;  %v6453_v49 = vld [vmem:[%s19166_s8 + $0x20] sm:$0xff]  ;;  %v6370_v33 = vpop.xlane.xlu1 %6369 }
 0x8bd   :  { %6716 = vmatmul.mubr.f32.gmra.mxu1 %v6491_v26  ;;  %7354 = vmatprep.subr.mxu1 %v18838_v59  ;;  %v6502_v59 = vld [vmem:[%s19166_s8 + $0x1a8] sm:$0xff] }
 0x8be   :  { %7355 = vmatpush3.msra.mxu1 %v18818_v14  ;;  %6720 = vmatprep.mubr.f32.mxu1 %v6500_v17 }
 0x8bf   :  { %7356 = vmatprep.subr.mxu1 %v18844_v32 }
 0x8c0   :  { %v6430_v8 = vpop.xlane.xlu0 %6429  ;;  %7357 = vmatpush3.msra.mxu1 %v18820_v47  ;;  %v6470_v47 = vld [vmem:[%s19166_s8 + $0xa8] sm:$0xff] }
 0x8c1   :  { %6721 = vmatmul.mubr.f32.gmra.mxu1 %v6499_v3  ;;  %7358 = vmatprep.subr.mxu1 %v18850_v55  ;;  %v6510_v55 = vld [vmem:[%s19166_s8 + $0x1e8] sm:$0xff] }
 0x8c2   :  { %7359 = vmatpush3.msra.mxu1 %v18822_v22  ;;  %6725 = vmatprep.mubr.f32.mxu1 %v6508_v44  ;;  %v6469_v22 = vld [vmem:[%s19166_s8 + $0xa0] sm:$0xff] }
 0x8c3   :  { %7360 = vmatprep.subr.mxu1 %v18854_v36 }
 0x8c4   :  { %v6427_v11 = vpop.xlane.xlu0 %6426  ;;  %7361 = vmatpush3.msra.mxu1 %v18824_v34  ;;  %v6367_v34 = vpop.xlane.xlu1 %6366 }
 0x8c5   :  { %6726 = vmatmul.mubr.f32.gmra.mxu1 %v6507_v50  ;;  %7362 = vmatprep.subr.mxu1 %v18861_v51 }
 0x8c6   :  { %7363 = vmatpush3.msra.mxu1 %v18826_v19  ;;  %6795 = vmatprep.mubr.f32.mxu1 %v6454_v57  ;;  %v6486_v19 = vld [vmem:[%s19166_s8 + $0x128] sm:$0xff] }
 0x8c7   :  { %7364 = vmatprep.subr.mxu1 %v18875_v48  ;;  %v6455_v48 = vld [vmem:[%s19166_s8 + $0x30] sm:$0xff] }
 0x8c8   :  { %v6448_v14 = vpop.xlane.xlu0 %6447  ;;  %7365 = vmatpush3.msra.mxu1 %v18828_v6  ;;  %v6364_v6 = vpop.xlane.xlu1 %6363 }
 0x8c9   :  { %6796 = vmatmul.mubr.f32.vlgmr.msra.gmra.mxu1 %v6453_v49  ;;  %7390 = vmatprep.subr.mxu1 %v6448_v14 }
 0x8ca   :  { %7391 = vmatpush3.msra.mxu1 %v18832_v24  ;;  %6800 = vmatprep.mubr.f32.mxu1 %v6462_v37 }
 0x8cb   :  { %7392 = vmatprep.subr.mxu1 %v18887_v4  ;;  %v6463_v4 = vld [vmem:[%s19166_s8 + $0x70] sm:$0xff] }
 0x8cc   :  { %v6424_v13 = vpop.xlane.xlu0 %6423  ;;  %7393 = vmatpush3.msra.mxu1 %v18841_v10  ;;  %v6361_v32 = vpop.xlane.xlu1 %6360 }
 0x8cd   :  { %6801 = vmatmul.mubr.f32.gmra.mxu1 %v6461_v42  ;;  %7394 = vmatprep.subr.mxu1 %v18901_v7  ;;  %v6479_v7 = vld [vmem:[%s19166_s8 + $0xf0] sm:$0xff]  ;;  %v6949_v42 = vld [vmem:[%s19167_s10] sm:$0xff] }
 0x8ce   :  { %7395 = vmatpush3.msra.mxu1 %v18848_v31  ;;  %6805 = vmatprep.mubr.f32.mxu1 %v6470_v47  ;;  %v6501_v31 = vld [vmem:[%s19166_s8 + $0x1a0] sm:$0xff] }
 0x8cf   :  { %7396 = vmatprep.subr.mxu1 %v18915_v35  ;;  %v6504_v35 = vld [vmem:[%s19166_s8 + $0x1b8] sm:$0xff] }
 0x8d0   :  { %v6421_v54 = vpop.xlane.xlu0 %6420  ;;  %7397 = vmatpush3.msra.mxu1 %v18857_v2  ;;  %v6509_v2 = vld [vmem:[%s19166_s8 + $0x1e0] sm:$0xff]  ;;  %v6358_v51 = vpop.xlane.xlu1 %6357 }
 0x8d1   :  { %6806 = vmatmul.mubr.f32.gmra.mxu1 %v6469_v22  ;;  %7398 = vmatprep.subr.mxu1 %v6436_v5 }
 0x8d2   :  { %7399 = vmatpush3.msra.mxu1 %v18869_v62  ;;  %6810 = vmatprep.mubr.f32.mxu1 %v6478_v30 }
 0x8d3   :  { %7400 = vmatprep.subr.mxu1 %v6433_v27 }
 0x8d4   :  { %v6418_v45 = vpop.xlane.xlu0 %6417  ;;  %7401 = vmatpush3.msra.mxu1 %v18890_v0  ;;  %v6355_v40 = vpop.xlane.xlu1 %6354  ;;  %v6472_v0 = vld [vmem:[%s19166_s8 + $0xb8] sm:$0xff] }
 0x8d5   :  { %6811 = vmatmul.mubr.f32.gmra.mxu1 %v6477_v43  ;;  %7402 = vmatprep.subr.mxu1 %v6430_v8  ;;  %v6514_v43 = vld [vmem:[%s19168_s9 + $0x8] sm:$0xff] }
 0x8d6   :  { %7403 = vmatpush3.msra.mxu1 %v18909_v29  ;;  %6815 = vmatprep.mubr.f32.mxu1 %v6486_v19  ;;  %v6495_v29 = vld [vmem:[%s19166_s8 + $0x170] sm:$0xff] }
 0x8d7   :  { %7404 = vmatprep.subr.mxu1 %v6427_v11 }
 0x8d8   :  { %v6415_v24 = vpop.xlane.xlu0 %6414  ;;  %7405 = vmatpush3.msra.mxu1 %v18928_v15 }
 0x8d9   :  { %6816 = vmatmul.mubr.f32.gmra.mxu1 %v6485_v38  ;;  %7406 = vmatprep.subr.mxu1 %v6424_v13  ;;  %v6513_v13 = vld [vmem:[%s19168_s9] sm:$0xff] }
 0x8da   :  { %7407 = vmatpush3.msra.mxu1 %v18945_v58  ;;  %6820 = vmatprep.mubr.f32.mxu1 %v6494_v12 }
 0x8db   :  { %7408 = vmatprep.subr.mxu1 %v6421_v54 }
 0x8dc   :  { %v6412_v10 = vpop.xlane.xlu0 %6411  ;;  %7409 = vmatpush3.msra.mxu1 %v6373_v9 }
 0x8dd   :  { %6821 = vmatmul.mubr.f32.gmra.mxu1 %v6493_v61  ;;  %7410 = vmatprep.subr.mxu1 %v6418_v45 }
 0x8de   :  { %7411 = vmatpush3.msra.mxu1 %v6370_v33  ;;  %6825 = vmatprep.mubr.f32.mxu1 %v6502_v59 }
 0x8df   :  { %7412 = vmatprep.subr.mxu1 %v6415_v24  ;;  %v6515_v24 = vld [vmem:[%s19168_s9 + $0x10] sm:$0xff] }
 0x8e0   :  { %v6409_v36 = vpop.xlane.xlu0 %6408  ;;  %7413 = vmatpush3.msra.mxu1 %v6367_v34 }
 0x8e1   :  { %6826 = vmatmul.mubr.f32.gmra.mxu1 %v6501_v31  ;;  %7414 = vmatprep.subr.mxu1 %v6412_v10 }
 0x8e2   :  { %7415 = vmatpush3.msra.mxu1 %v6364_v6  ;;  %6830 = vmatprep.mubr.f32.mxu1 %v6510_v55  ;;  %v6516_v55 = vld [vmem:[%s19168_s9 + $0x18] sm:$0xff] }
 0x8e3   :  { %7416 = vmatprep.subr.mxu1 %v6409_v36 }
 0x8e4   :  { %v6406_v62 = vpop.xlane.xlu0 %6405  ;;  %7417 = vmatpush3.msra.mxu1 %v6361_v32 }
 0x8e5   :  { %6831 = vmatmul.mubr.f32.gmra.mxu1 %v6509_v2  ;;  %7418 = vmatprep.subr.mxu1 %v6406_v62 }
 0x8e6   :  { %7419 = vmatpush3.msra.mxu1 %v6358_v51  ;;  %6900 = vmatprep.mubr.f32.mxu1 %v6456_v39 }
 0x8e8   :  { %v6403_v1 = vpop.xlane.xlu0 %6402 }
 0x8e9   :  { %7420 = vmatprep.subr.mxu1 %v6403_v1  ;;  %v6517_v1 = vld [vmem:[%s19168_s9 + $0x20] sm:$0xff] }
 0x8ea   :  { %7421 = vmatpush3.msra.mxu1 %v6355_v40 }
 0x8eb   :  { %6901 = vmatmul.mubr.f32.vlgmr.msra.gmra.mxu1 %v6455_v48 }
 0x8ec   :  { %6905 = vmatprep.mubr.f32.mxu1 %v6464_v53 }
 0x8ef   :  { %6906 = vmatmul.mubr.f32.gmra.mxu1 %v6463_v4 }
 0x8f0   :  { %6910 = vmatprep.mubr.f32.mxu1 %v6472_v0 }
 0x8f3   :  { %6911 = vmatmul.mubr.f32.gmra.mxu1 %v6471_v60  ;;  %v6518_v60 = vld [vmem:[%s19168_s9 + $0x28] sm:$0xff] }
 0x8f4   :  { %6915 = vmatprep.mubr.f32.mxu1 %v6480_v25 }
 0x8f7   :  { %6916 = vmatmul.mubr.f32.gmra.mxu1 %v6479_v7 }
 0x8f8   :  { %6920 = vmatprep.mubr.f32.mxu1 %v6488_v41 }
 0x8fb   :  { %6921 = vmatmul.mubr.f32.gmra.mxu1 %v6487_v52 }
 0x8fc   :  { %6925 = vmatprep.mubr.f32.mxu1 %v6496_v23  ;;  %v7254_v18 = vpop.f32.mrf.mxu1 }
 0x8fe   :  { %v7255_v20 = vpop.f32.mrf.mxu1 }
 0x8ff   :  { %6926 = vmatmul.mubr.f32.gmra.mxu1 %v6495_v29  ;;  %v7256_v16 = vadd.f32 %v7255_v20, %v7254_v18  ;;  %v6519_v29 = vld [vmem:[%s19168_s9 + $0x30] sm:$0xff] }
 0x900   :  { %6930 = vmatprep.mubr.f32.mxu1 %v6504_v35  ;;  %v7257_v63 = vpop.f32.mrf.mxu1 }
 0x901   :  { %v6588_v54 = vadd.f32 %v7256_v16, %v6513_v13 }
 0x902   :  { %v7258_v56 = vpop.f32.mrf.mxu1 }
 0x903   :  { %6931 = vmatmul.mubr.f32.gmra.mxu1 %v6503_v21  ;;  %v7259_v5 = vadd.f32 %v7258_v56, %v7257_v63 }
 0x904   :  { %6935 = vmatprep.mubr.f32.mxu1 %v6512_v46  ;;  %v7260_v15 = vpop.f32.mrf.mxu1 }
 0x905   :  { %v6593_v6 = vadd.f32 %v7259_v5, %v6514_v43 }
 0x906   :  { %v7261_v26 = vpop.f32.mrf.mxu1 }
 0x907   :  { %6936 = vmatmul.mubr.f32.gmra.mxu1 %v6511_v28  ;;  %v7262_v17 = vadd.f32 %v7261_v26, %v7260_v15 }
 0x908   :  { %v7263_v27 = vpop.f32.mrf.mxu1  ;;  %7479 = vmatprep.mubr.msk.f32.mxu1 %vm6957_vm13, %v6949_v42 }
 0x909   :  { %v6598_v32 = vadd.f32 %v7262_v17, %v6515_v24 }
 0x90a   :  { %v7264_v3 = vpop.f32.mrf.mxu1 }
 0x90b   :  { %v7265_v58 = vadd.f32 %v7264_v3, %v7263_v27 }
 0x90c   :  { %v7266_v44 = vpop.f32.mrf.mxu1 }
 0x90d   :  { %v6603_v39 = vadd.f32 %v7265_v58, %v6516_v55 }
 0x90e   :  { %v7267_v8 = vpop.f32.mrf.mxu1 }
 0x90f   :  { %v7268_v50 = vadd.f32 %v7267_v8, %v7266_v44 }
 0x910   :  { %v7269_v57 = vpop.f32.mrf.mxu1 }
 0x911   :  { %v6608_v4 = vadd.f32 %v7268_v50, %v6517_v1 }
 0x912   :  { %v7270_v11 = vpop.f32.mrf.mxu1 }
 0x913   :  { %v7271_v9 = vadd.f32 %v7270_v11, %v7269_v57 }
 0x914   :  { %v7272_v49 = vpop.f32.mrf.mxu1 }
 0x915   :  { %v6613_v52 = vadd.f32 %v7271_v9, %v6518_v60 }
 0x916   :  { %v7273_v37 = vpop.f32.mrf.mxu1 }
 0x917   :  { %v7274_v14 = vadd.f32 %v7273_v37, %v7272_v49 }
 0x918   :  { %v19074_v33 = vpop.f32.mrf.mxu1 }
 0x919   :  { %v6618_v16 = vadd.f32 %v7274_v14, %v6519_v29 }
 0x91a   :  { %v19077_v47 = vpop.f32.mrf.mxu1 }
 0x969   :  { %v7310_v22 = vpop.f32.mrf.mxu1 }
 0x96b   :  { %v7311_v30 = vpop.f32.mrf.mxu1 }
 0x96c   :  { %v7312_v34 = vadd.f32 %v7311_v30, %v7310_v22 }
 0x96d   :  { %v7313_v19 = vpop.f32.mrf.mxu1 }
 0x96e   :  { %v6693_v45 = vadd.f32 %v7312_v34, %v6588_v54 }
 0x96f   :  { %v7314_v38 = vpop.f32.mrf.mxu1 }
 0x970   :  { %v7315_v12 = vadd.f32 %v7314_v38, %v7313_v19 }
 0x971   :  { %v7316_v61 = vpop.f32.mrf.mxu1 }
 0x972   :  { %v6698_v59 = vadd.f32 %v7315_v12, %v6593_v6 }
 0x973   :  { %v7317_v10 = vpop.f32.mrf.mxu1 }
 0x974   :  { %v7318_v31 = vadd.f32 %v7317_v10, %v7316_v61  ;;  %v7277_v10 = vadd.f32 %v19077_v47, %v19074_v33 }
 0x975   :  { %v7319_v36 = vpop.f32.mrf.mxu1 }
 0x976   :  { %v19091_v2 = vadd.f32 %v7318_v31, %v6598_v32  ;;  %v6520_v32 = vld [vmem:[%s19168_s9 + $0x38] sm:$0xff] }
 0x977   :  { %v7320_v51 = vpop.f32.mrf.mxu1 }
 0x978   :  { %v7321_v62 = vadd.f32 %v7320_v51, %v7319_v36  ;;  %v6623_v51 = vadd.f32 %v7277_v10, %v6520_v32  ;;  %v7059_v32 = vld [vmem:[%s19170_s12] sm:$0x3f] }
 0x979   :  { %v7322_v48 = vpop.f32.mrf.mxu1 }
 0x97a   :  { %v19096_v40 = vadd.f32 %v7321_v62, %v6603_v39 }
 0x97b   :  { %v7323_v53 = vpop.f32.mrf.mxu1 }
 0x97c   :  { %v7324_v0 = vadd.f32 %v7323_v53, %v7322_v48 }
 0x97d   :  { %v7325_v25 = vpop.f32.mrf.mxu1 }
 0x97e   :  { %v19101_v7 = vadd.f32 %v7324_v0, %v6608_v4 }
 0x97f   :  { %v7326_v41 = vpop.f32.mrf.mxu1 }
 0x980   :  { %v7327_v23 = vadd.f32 %v7326_v41, %v7325_v25 }
 0x981   :  { %v7328_v18 = vpop.f32.mrf.mxu1 }
 0x982   :  { %v6718_v35 = vadd.f32 %v7327_v23, %v6613_v52 }
 0x983   :  { %v7329_v20 = vpop.f32.mrf.mxu1 }
 0x984   :  { %v7330_v21 = vadd.f32 %v7329_v20, %v7328_v18 }
 0x985   :  { %v7331_v63 = vpop.f32.mrf.mxu1 }
 0x986   :  { %v6723_v46 = vadd.f32 %v7330_v21, %v6618_v16 }
 0x987   :  { %v7332_v56 = vpop.f32.mrf.mxu1 }
 0x988   :  { %v7333_v55 = vadd.f32 %v7332_v56, %v7331_v63 }
 0x989   :  { %v7366_v5 = vpop.f32.mrf.mxu1 }
 0x98a   :  { %v6728_v48 = vadd.f32 %v7333_v55, %v6623_v51 }
 0x98b   :  { %v7367_v28 = vpop.f32.mrf.mxu1 }
 0x98c   :  { %v7368_v15 = vadd.f32 %v7367_v28, %v7366_v5 }
 0x98d   :  { %v7369_v26 = vpop.f32.mrf.mxu1 }
 0x98e   :  { %v19106_v17 = vadd.f32 %v7368_v15, %v6693_v45 }
 0x98f   :  { %v7370_v27 = vpop.f32.mrf.mxu1 }
 0x990   :  { %v7371_v3 = vadd.f32 %v7370_v27, %v7369_v26 }
 0x991   :  { %v7372_v58 = vpop.f32.mrf.mxu1 }
 0x992   :  { %v19108_v44 = vadd.f32 %v7371_v3, %v6698_v59 }
 0x993   :  { %v7373_v8 = vpop.f32.mrf.mxu1 }
 0x994   :  { %v7374_v16 = vadd.f32 %v7373_v8, %v7372_v58 }
 0x995   :  { %v7375_v50 = vpop.f32.mrf.mxu1 }
 0x997   :  { %v7376_v57 = vpop.f32.mrf.mxu1 }
 0x998   :  { %v7377_v47 = vadd.f32 %v7376_v57, %v7375_v50 }
 0x999   :  { %v7378_v11 = vpop.f32.mrf.mxu1 }
 0x99a   :  { %v6813_v28 = vadd.f32 %v7377_v47, %v19096_v40 }
 0x99b   :  { %v7379_v9 = vpop.f32.mrf.mxu1 }
 0x99c   :  { %v7380_v0 = vadd.f32 %v7379_v9, %v7378_v11 }
 0x99d   :  { %v7381_v49 = vpop.f32.mrf.mxu1 }
 0x99e   :  { %v6818_v21 = vadd.f32 %v7380_v0, %v19101_v7 }
 0x99f   :  { %v7382_v37 = vpop.f32.mrf.mxu1 }
 0x9a0   :  { %v7383_v53 = vadd.f32 %v7382_v37, %v7381_v49  ;;  %v6950_v37 = vld [vmem:[%s19167_s10 + $0x8] sm:$0xff] }
 0x9a1   :  { %v7384_v14 = vpop.f32.mrf.mxu1 }
 0x9a2   :  { %v6823_v23 = vadd.f32 %v7383_v53, %v6718_v35 }
 0x9a3   :  { %v7385_v42 = vpop.f32.mrf.mxu1 }
 0x9a4   :  { %v7386_v39 = vadd.f32 %v7385_v42, %v7384_v14  ;;  %v6952_v14 = vld [vmem:[%s19167_s10 + $0x18] sm:$0xff] }
 0x9a5   :  { %v7387_v13 = vpop.f32.mrf.mxu1 }
 0x9a6   :  { %v6828_v25 = vadd.f32 %v7386_v39, %v6723_v46  ;;  %v6808_v46 = vadd.f32 %v7374_v16, %v19091_v2 }
 0x9a7   :  { %v7388_v22 = vpop.f32.mrf.mxu1 }
 0x9a8   :  { %v7389_v62 = vadd.f32 %v7388_v22, %v7387_v13  ;;  %v6956_v22 = vld [vmem:[%s19169_s11 + $0x18] sm:$0xff] }
 0x9aa   :  { %v6833_v41 = vadd.f32 %v7389_v62, %v6728_v48 }
 0x9ab   :  { %v7422_v30 = vpop.f32.mrf.mxu1 }
 0x9ad   :  { %v7423_v54 = vpop.f32.mrf.mxu1 }
 0x9ae   :  { %v7424_v58 = vadd.f32 %v7423_v54, %v7422_v30  ;;  %v6954_v30 = vld [vmem:[%s19169_s11 + $0x8] sm:$0xff] }
 0x9af   :  { %v7425_v34 = vpop.f32.mrf.mxu1 }
 0x9b0   :  { %v6903_v11 = vadd.f32 %v7424_v58, %v19106_v17  ;;  %v21480_v17 = vmov 0.0  }
 0x9b1   :  { %v7426_v43 = vpop.f32.mrf.mxu1 }
 0x9b2   :  { %v7427_v3 = vadd.f32 %v7426_v43, %v7425_v34  ;;  %v6941_v49 = vmax.f32 %v6903_v11, 0.0  ;;  %v6955_v34 = vld [vmem:[%s19169_s11 + $0x10] sm:$0xff] }
 0x9b3   :  { %v7428_v19 = vpop.f32.mrf.mxu1 }
 0x9b4   :  { %v6908_v57 = vadd.f32 %v7427_v3, %v19108_v44  ;;  %v6951_v44 = vld [vmem:[%s19167_s10 + $0x10] sm:$0xff] }
 0x9b5   :  { %v7429_v45 = vpop.f32.mrf.mxu1 }
 0x9b6   :  { %v7430_v15 = vadd.f32 %v7429_v45, %v7428_v19  ;;  %v6942_v2 = vmax.f32 %v6908_v57, 0.0  ;;  %v6953_v19 = vld [vmem:[%s19169_s11] sm:$0xff] }
 0x9b7   :  { %v7431_v38 = vpop.f32.mrf.mxu1 }
 0x9b8   :  { %v6913_v8 = vadd.f32 %v7430_v15, %v6808_v46 }
 0x9b9   :  { %v7432_v6 = vpop.f32.mrf.mxu1 }
 0x9ba   :  { %v7433_v63 = vadd.f32 %v7432_v6, %v7431_v38  ;;  %v6943_v9 = vmax.f32 %v6913_v8, 0.0 }
 0x9bb   :  { %v7434_v12 = vpop.f32.mrf.mxu1 }
 0x9bc   :  { %v6918_v35 = vadd.f32 %v7433_v63, %v6813_v28 }
 0x9bd   :  { %v7435_v24 = vpop.f32.mrf.mxu1 }
 0x9be   :  { %v7436_v29 = vadd.f32 %v7435_v24, %v7434_v12  ;;  %v6944_v40 = vmax.f32 %v6918_v35, 0.0 }
 0x9bf   :  { %v7437_v61 = vpop.f32.mrf.mxu1 }
 0x9c0   :  { %v6923_v26 = vadd.f32 %v7436_v29, %v6818_v21 }
 0x9c1   :  { %v7438_v59 = vpop.f32.mrf.mxu1 }
 0x9c2   :  { %v7439_v52 = vadd.f32 %v7438_v59, %v7437_v61  ;;  %v6945_v7 = vmax.f32 %v6923_v26, 0.0 }
 0x9c3   :  { %v7440_v31 = vpop.f32.mrf.mxu1 }
 0x9c4   :  { %v6928_v56 = vadd.f32 %v7439_v52, %v6823_v23 }
 0x9c5   :  { %v7441_v36 = vpop.f32.mrf.mxu1 }
 0x9c6   :  { %v7442_v4 = vadd.f32 %v7441_v36, %v7440_v31  ;;  %v6946_v50 = vmax.f32 %v6928_v56, 0.0  ;;  %v7060_v31 = vld [vmem:[%s19171_s13] sm:$0x3f] }
 0x9c7   :  { %v7443_v1 = vpop.f32.mrf.mxu1 }
 0x9c8   :  { %v6933_v18 = vadd.f32 %v7442_v4, %v6828_v25 }
 0x9c9   :  { %v7444_v60 = vpop.f32.mrf.mxu1 }
 0x9ca   :  { %v7445_v33 = vadd.f32 %v7444_v60, %v7443_v1  ;;  %v6947_v27 = vmax.f32 %v6933_v18, 0.0 }
 0x9cc   :  { %v6938_v20 = vadd.f32 %v7445_v33, %v6833_v41 }
 0x9ce   :  { %v6948_v5 = vmax.f32 %v6938_v20, 0.0 }
 0x9d0   :  { %7463 = vmatprep.subr.mxu1 %v6948_v5 }
 0x9d1   :  { %7464 = vmatpush3.msra.mxu1 %v6948_v5 }
 0x9d2   :  { %7465 = vmatprep.subr.mxu1 %v6947_v27 }
 0x9d3   :  { %7466 = vmatpush3.msra.mxu1 %v6947_v27 }
 0x9d4   :  { %7467 = vmatprep.subr.mxu1 %v6946_v50 }
 0x9d5   :  { %7468 = vmatpush3.msra.mxu1 %v6946_v50 }
 0x9d6   :  { %7469 = vmatprep.subr.mxu1 %v6945_v7 }
 0x9d7   :  { %7470 = vmatpush3.msra.mxu1 %v6945_v7 }
 0x9d8   :  { %7471 = vmatprep.subr.mxu1 %v6944_v40 }
 0x9d9   :  { %7472 = vmatpush3.msra.mxu1 %v6944_v40 }
 0x9da   :  { %7473 = vmatprep.subr.mxu1 %v6943_v9 }
 0x9db   :  { %7474 = vmatpush3.msra.mxu1 %v6943_v9 }
 0x9dc   :  { %7475 = vmatprep.subr.mxu1 %v6942_v2 }
 0x9dd   :  { %7476 = vmatpush3.msra.mxu1 %v6942_v2 }
 0x9de   :  { %7477 = vmatprep.subr.mxu1 %v6941_v49 }
 0x9df   :  { %7478 = vmatpush3.msra.mxu1 %v6941_v49 }
 0x9e0   :  { %7480 = vmatmul.mubr.msk.f32.vlgmr.msra.gmra.mxu1 %vm6957_vm13, %v6950_v37  ;;  %7485 = vmatprep.subr.mxu1 %v21480_v17 }
 0x9e1   :  { %7482 = vmatprep.mubr.msk.f32.mxu1 %vm6957_vm13, %v6951_v44 }
 0x9e4   :  { %7483 = vmatmul.mubr.msk.f32.gmra.mxu1 %vm6957_vm13, %v6952_v14 }
 0x9e5   :  { %7493 = vmatprep.mubr.msk.f32.mxu1 %vm9455_vm14, %v21480_v17 }
 0xaa0   :  { %v7481_v42 = vpop.f32.mrf.mxu1 }
 0xaa1   :  { %v7042_v38 = vadd.f32 %v7481_v42, %v6954_v30 }
 0xaa2   :  { %v7036_v13 = vpop.f32.mrf.mxu1 }
 0xaa3   :  { %v7037_v24 = vadd.f32 %v7036_v13, %v6953_v19  ;;  %v7056_v59 = vmax.f32 %v7042_v38, 0.0 }
 0xaa4   :  { %v7484_v54 = vpop.f32.mrf.mxu1 }
 0xaa5   :  { %v7052_v43 = vadd.f32 %v7484_v54, %v6956_v22  ;;  %v7055_v10 = vmax.f32 %v7037_v24, 0.0 }
 0xaa6   :  { %v7046_v45 = vpop.f32.mrf.mxu1 }
 0xaa7   :  { %v7058_v6 = vmax.f32 %v7052_v43, 0.0  ;;  %v7047_v12 = vadd.f32 %v7046_v45, %v6955_v34 }
 0xaa9   :  { %v7057_v61 = vmax.f32 %v7047_v12, 0.0  ;;  %7486 = vmatpush3.msra.mxu1 %v7058_v6 }
 0xaaa   :  { %7487 = vmatprep.subr.mxu1 %v21480_v17 }
 0xaab   :  { %7488 = vmatpush3.msra.mxu1 %v7057_v61 }
 0xaac   :  { %7489 = vmatprep.subr.mxu1 %v21480_v17 }
 0xaad   :  { %7490 = vmatpush3.msra.mxu1 %v7056_v59 }
 0xaae   :  { %7491 = vmatprep.subr.mxu1 %v21480_v17 }
 0xaaf   :  { %7492 = vmatpush3.msra.mxu1 %v7055_v10 }
 0xab0   :  { %7494 = vmatmul.mubr.msk.f32.vlgmr.msra.gmra.mxu1 %vm7061_vm15, %v7059_v32 }
 0xb70   :  { %v7131_v55 = vpop.f32.mrf.mxu1 }
 0xb71   :  { %v7132_v36 = vadd.f32 %v7131_v55, %v7060_v31 }
 0xb72   :  { %v7495_v51 = vpop.f32.mrf.mxu1 }
 0xb73   :  { %7136 = vst.msk [vmem:[%s19172_s14] sm:$0x3f] %vm7135_vm0, %v7132_v36 }

</bundles_post_ra>
